<compile_context>
chip_gen: v6e
topology: v6e:2x2x1
jax: 0.10.0
libtpu: 0.0.40
codegen_flags: <defaults>
</compile_context>

<pallas_src>
from functools import partial

import jax
import jax.numpy as jnp
from jax import lax
from jax.experimental import pallas as pl
from jax.experimental.pallas import tpu as pltpu

_LANE = 128                 # TPU vreg lane width — lane-dense padding target
_MXU_DTYPE = jnp.bfloat16   # MXU operand dtype (f32 accumulation kept)


def _round_up(x, m):
    return ((x + m - 1) // m) * m


def _pad_last2(x, rows, cols, dtype=_MXU_DTYPE):
    """Zero-pad the last two dims of x up to (rows, cols) and cast for MXU feed."""
    pr = rows - x.shape[-2]
    pc = cols - x.shape[-1]
    pads = ((0, 0),) * (x.ndim - 2) + ((0, pr), (0, pc))
    return jnp.pad(x, pads).astype(dtype)


# ----------------------------------------------------------------------------- #
# Fused Pallas kernel: encoder (all timesteps, all layers) + decoder epilogue
# ----------------------------------------------------------------------------- #
def _igae_fused_kernel(*refs, n_layers, t_chunk, seq_len,
                       lambda_link, lambda_weight, link_norm, weight_norm):
    n_seq = 6
    (w_uu_ref, w_uc_ref, w_cu_ref, w_cc_ref, x_u_ref, x_c_ref) = refs[:n_seq]
    th_refs = refs[n_seq:n_seq + 4 * n_layers]             # (Θ_us, Θ_uc, Θ_cs, Θ_cc) per layer
    l_ref, w_ref = refs[n_seq + 4 * n_layers:n_seq + 4 * n_layers + 2]
    acc_u, acc_c = refs[-2:]                               # VMEM scratch accumulators

    c = pl.program_id(0)
    f32 = jnp.float32

    @pl.when(c == 0)
    def _():
        acc_u[...] = jnp.zeros_like(acc_u)
        acc_c[...] = jnp.zeros_like(acc_c)

    sum_u = jnp.zeros(acc_u.shape, f32)
    sum_c = jnp.zeros(acc_c.shape, f32)

    # t_chunk timesteps per grid step (t_chunk == T at demo scale → single grid step;
    # at realistic sizes the VMEM budget drives t_chunk down and the grid pipeline
    # double-buffers the per-timestep adjacency blocks).
    for i in range(t_chunk):                               # static unroll
        w_uu = w_uu_ref[i]          # bf16 [N_Up, N_Up]
        w_uc = w_uc_ref[i]          # bf16 [N_Up, N_Cp]
        w_cu = w_cu_ref[i]          # bf16 [N_Cp, N_Up]  (pre-transposed in wrapper)
        w_cc = w_cc_ref[i]          # bf16 [N_Cp, N_Cp]
        h_u = x_u_ref[i]            # bf16 [N_Up, D0p]
        h_c = x_c_ref[i]            # bf16 [N_Cp, D0p]

        hu_f32 = hc_f32 = None
        for l in range(n_layers):
            th_us = th_refs[4 * l][...]
            th_uc = th_refs[4 * l + 1][...]
            th_cs = th_refs[4 * l + 2][...]
            th_cc = th_refs[4 * l + 3][...]

            # Neighborhood aggregation: bf16 MXU operands, f32 accumulation.
            agg_uu = jnp.dot(w_uu, h_u, preferred_element_type=f32)
            agg_uc = jnp.dot(w_uc, h_c, preferred_element_type=f32)
            agg_cc = jnp.dot(w_cc, h_c, preferred_element_type=f32)
            agg_cu = jnp.dot(w_cu, h_u, preferred_element_type=f32)

            # No lane-axis concat: two matmuls + add per branch (same total K).
            hu_f32 = jnp.maximum(
                jnp.dot(agg_uu.astype(_MXU_DTYPE), th_us, preferred_element_type=f32)
                + jnp.dot(agg_uc.astype(_MXU_DTYPE), th_uc, preferred_element_type=f32),
                0.0)
            hc_f32 = jnp.maximum(
                jnp.dot(agg_cc.astype(_MXU_DTYPE), th_cs, preferred_element_type=f32)
                + jnp.dot(agg_cu.astype(_MXU_DTYPE), th_cc, preferred_element_type=f32),
                0.0)
            h_u = hu_f32.astype(_MXU_DTYPE)
            h_c = hc_f32.astype(_MXU_DTYPE)

        sum_u = sum_u + hu_f32      # temporal accumulation kept in f32
        sum_c = sum_c + hc_f32

    acc_u[...] += sum_u
    acc_c[...] += sum_c

    # Epilogue on the LAST grid step only.  Output index_map is constant and the time
    # axis is "arbitrary" (sequential), so the single writeback is well defined.
    @pl.when(c == pl.num_programs(0) - 1)
    def _():
        inv_t = f32(1.0 / seq_len)
        zu = acc_u[...] * inv_t
        zc = acc_c[...] * inv_t

        # Row-L2 normalization matching torch F.normalize: x / max(||x||, eps).
        eps = 1e-12
        if link_norm or weight_norm:
            zu_n = zu * lax.rsqrt(jnp.maximum(
                jnp.sum(zu * zu, axis=-1, keepdims=True), eps * eps))
            zc_n = zc * lax.rsqrt(jnp.maximum(
                jnp.sum(zc * zc, axis=-1, keepdims=True), eps * eps))
        else:
            zu_n, zc_n = zu, zc

        # zu @ zc^T (contract lane dims) without materializing a zc transpose in JAX.
        dn_inner = (((1,), (1,)), ((), ()))
        a_l = (zu_n if link_norm else zu).astype(_MXU_DTYPE)
        b_l = (zc_n if link_norm else zc).astype(_MXU_DTYPE)
        s_link = lax.dot_general(a_l, b_l, dn_inner, preferred_element_type=f32)
        if link_norm == weight_norm:
            s_wt = s_link                       # identical matmul de-duplicated
        else:
            a_w = (zu_n if weight_norm else zu).astype(_MXU_DTYPE)
            b_w = (zc_n if weight_norm else zc).astype(_MXU_DTYPE)
            s_wt = lax.dot_general(a_w, b_w, dn_inner, preferred_element_type=f32)

        l_ref[...] = jax.nn.sigmoid(f32(lambda_link) * s_link)
        w_ref[...] = jnp.maximum(f32(lambda_weight) * s_wt, 0.0)


# ----------------------------------------------------------------------------- #
# IGAE module (parameter setup = JAX glue; whole forward = ONE pallas_call)
# ----------------------------------------------------------------------------- #
class IGAEPallas:
    def __init__(self, input_dim, hidden_dim, output_dim, seq_len, n_layers, key):
        assert n_layers >= 1
        self.seq_len = seq_len
        self.n_layers = n_layers
        self.dims = [input_dim] + [hidden_dim] * (n_layers - 1) + [output_dim]
        # Lane-dense padded feature dims (multiples of 128).
        self.dims_p = [_round_up(d, _LANE) for d in self.dims]

        # UNSTACKED Θ (self / cross per branch), zero-padded to lane-dense dims and
        # stored as bf16 once (hoisted out of the forward pass entirely).
        self.th_us, self.th_uc, self.th_cs, self.th_cc = [], [], [], []
        for l in range(n_layers):
            d_in, d_out = self.dims[l], self.dims[l + 1]
            dp_in, dp_out = self.dims_p[l], self.dims_p[l + 1]
            key, k1, k2, k3, k4 = jax.random.split(key, 5)
            scale = 1.0 / jnp.sqrt(jnp.float32(d_in))
            mk = lambda k: scale * jax.random.normal(k, (d_in, d_out), jnp.float32)
            self.th_us.append(_pad_last2(mk(k1), dp_in, dp_out))
            self.th_uc.append(_pad_last2(mk(k2), dp_in, dp_out))
            self.th_cs.append(_pad_last2(mk(k3), dp_in, dp_out))
            self.th_cc.append(_pad_last2(mk(k4), dp_in, dp_out))

        # Decoder hyper-params (Decoder(weight_norm=True, link_norm=True, λ_w=1, λ_l=1)).
        self.weight_norm = True
        self.link_norm = True
        self.lambda_weight = 1.0
        self.lambda_link = 1.0

    def __call__(self, W_uu_seq, W_uc_seq, W_cc_seq, X_U_seq, X_C_seq):
        T, n_u, _ = W_uu_seq.shape
        n_c = W_cc_seq.shape[1]
        assert X_U_seq.shape[-1] == self.dims[0]

        n_u_p = _round_up(n_u, _LANE)
        n_c_p = _round_up(n_c, _LANE)
        d0_p = self.dims_p[0]
        d_out_p = self.dims_p[-1]

        # bf16 MXU feed, lane-dense zero padding; W_uc^T computed ONCE wrapper-side so
        # the kernel never pays an in-kernel transpose.
        w_uu = _pad_last2(W_uu_seq, n_u_p, n_u_p)
        w_uc = _pad_last2(W_uc_seq, n_u_p, n_c_p)
        w_cu = _pad_last2(jnp.swapaxes(W_uc_seq, -1, -2), n_c_p, n_u_p)
        w_cc = _pad_last2(W_cc_seq, n_c_p, n_c_p)
        x_u = _pad_last2(X_U_seq, n_u_p, d0_p)
        x_c = _pad_last2(X_C_seq, n_c_p, d0_p)

        # Timesteps per grid step: largest divisor of T whose double-buffered streamed
        # blocks fit a v7x-safe budget (64 MiB VMEM total; ~24 MiB reserved for them).
        per_step_bytes = 2 * (n_u_p * n_u_p + 2 * n_u_p * n_c_p + n_c_p * n_c_p
                              + n_u_p * d0_p + n_c_p * d0_p)
        budget = 24 * 1024 * 1024
        t_chunk = 1
        for cand in range(1, T + 1):
            if T % cand == 0 and 2 * cand * per_step_bytes <= budget:
                t_chunk = cand
        n_chunks = T // t_chunk
        # At demo scale t_chunk == T → grid of one step (no per-step pipeline overhead).

        kernel = partial(_igae_fused_kernel,
                         n_layers=self.n_layers, t_chunk=t_chunk, seq_len=T,
                         lambda_link=float(self.lambda_link),
                         lambda_weight=float(self.lambda_weight),
                         link_norm=self.link_norm, weight_norm=self.weight_norm)

        seq_specs = [
            pl.BlockSpec((t_chunk, n_u_p, n_u_p), lambda c: (c, 0, 0)),
            pl.BlockSpec((t_chunk, n_u_p, n_c_p), lambda c: (c, 0, 0)),
            pl.BlockSpec((t_chunk, n_c_p, n_u_p), lambda c: (c, 0, 0)),
            pl.BlockSpec((t_chunk, n_c_p, n_c_p), lambda c: (c, 0, 0)),
            pl.BlockSpec((t_chunk, n_u_p, d0_p), lambda c: (c, 0, 0)),
            pl.BlockSpec((t_chunk, n_c_p, d0_p), lambda c: (c, 0, 0)),
        ]

        # Grid-invariant blocks (Θ weights, outputs): constant index_map → VMEM-resident.
        # Single-buffer them when the grid actually pipelines (>1 step); with a single
        # grid step buffering is moot, so use the default spec (zero added risk).
        single_buf = pl.Buffered(1) if n_chunks > 1 else None

        def _const_spec(shape):
            if single_buf is None:
                return pl.BlockSpec(shape, lambda c: (0, 0))
            return pl.BlockSpec(shape, lambda c: (0, 0), pipeline_mode=single_buf)

        weights, weight_specs = [], []
        for l in range(self.n_layers):
            for w in (self.th_us[l], self.th_uc[l], self.th_cs[l], self.th_cc[l]):
                weights.append(w)
                weight_specs.append(_const_spec(w.shape))

        out_shape = (jax.ShapeDtypeStruct((n_u_p, n_c_p), jnp.float32),
                     jax.ShapeDtypeStruct((n_u_p, n_c_p), jnp.float32))
        out_specs = (_const_spec((n_u_p, n_c_p)), _const_spec((n_u_p, n_c_p)))

        grid_spec = pltpu.PrefetchScalarGridSpec(
            num_scalar_prefetch=0,
            grid=(n_chunks,),
            in_specs=seq_specs + weight_specs,
            out_specs=out_specs,
            scratch_shapes=[pltpu.VMEM((n_u_p, d_out_p), jnp.float32),
                            pltpu.VMEM((n_c_p, d_out_p), jnp.float32)],
        )

        l_full, w_full = pl.pallas_call(
            kernel,
            grid_spec=grid_spec,
            out_shape=out_shape,
            compiler_params=pltpu.CompilerParams(
                # Temporal reduction + single final writeback → sequential only.
                dimension_semantics=("arbitrary",),
                vmem_limit_bytes=64 * 1024 * 1024,
            ),
        )(w_uu, w_uc, w_cu, w_cc, x_u, x_c, *weights)

        # Strip lane padding (padded rows/cols hold sigmoid(0)=0.5 / relu(0)=0).
        return l_full[:n_u, :n_c], w_full[:n_u, :n_c]


# ----------------------------------------------------------------------------- #
# Demo
# ----------------------------------------------------------------------------- #
if __name__ == "__main__":
    T = 4             # seq_len
    N_U, N_C = 16, 8  # user / content node counts
    INPUT_DIM = 8
    HIDDEN_DIM = 16
    OUTPUT_DIM = 16
    N_LAYERS = 2

    key = jax.random.PRNGKey(0)
    key, kp, k1, k2, k3, k4, k5 = jax.random.split(key, 7)

    model = IGAEPallas(INPUT_DIM, HIDDEN_DIM, OUTPUT_DIM, T, N_LAYERS, kp)

    # Dense non-negative "adjacency" sequences and node feature sequences.
    W_uu_seq = jax.nn.softmax(jax.random.normal(k1, (T, N_U, N_U), jnp.float32), axis=-1)
    W_uc_seq = jax.nn.softmax(jax.random.normal(k2, (T, N_U, N_C), jnp.float32), axis=-1)
    W_cc_seq = jax.nn.softmax(jax.random.normal(k3, (T, N_C, N_C), jnp.float32), axis=-1)
    X_U_seq = jax.random.normal(k4, (T, N_U, INPUT_DIM), jnp.float32)
    X_C_seq = jax.random.normal(k5, (T, N_C, INPUT_DIM), jnp.float32)

    l_pre, w_pre = model(W_uu_seq, W_uc_seq, W_cc_seq, X_U_seq, X_C_seq)
    jax.block_until_ready((l_pre, w_pre))

    assert l_pre.shape == (N_U, N_C) and w_pre.shape == (N_U, N_C)
    assert bool(jnp.all(jnp.isfinite(l_pre))) and bool(jnp.all(jnp.isfinite(w_pre)))
    assert bool(jnp.all(l_pre >= 0.0)) and bool(jnp.all(l_pre <= 1.0))
    assert bool(jnp.all(w_pre >= 0.0))
    print("KERNEL_OK")
</pallas_src>

<mosaic_0001>
module attributes {stable_mosaic.version = 11 : i64} {
  func.func @_igae_fused_kernel(%arg0: i32, %arg1: memref<4x128x128xbf16, #tpu.memory_space<vmem>>, %arg2: memref<4x128x128xbf16, #tpu.memory_space<vmem>>, %arg3: memref<4x128x128xbf16, #tpu.memory_space<vmem>>, %arg4: memref<4x128x128xbf16, #tpu.memory_space<vmem>>, %arg5: memref<4x128x128xbf16, #tpu.memory_space<vmem>>, %arg6: memref<4x128x128xbf16, #tpu.memory_space<vmem>>, %arg7: memref<128x128xbf16, #tpu.memory_space<vmem>>, %arg8: memref<128x128xbf16, #tpu.memory_space<vmem>>, %arg9: memref<128x128xbf16, #tpu.memory_space<vmem>>, %arg10: memref<128x128xbf16, #tpu.memory_space<vmem>>, %arg11: memref<128x128xbf16, #tpu.memory_space<vmem>>, %arg12: memref<128x128xbf16, #tpu.memory_space<vmem>>, %arg13: memref<128x128xbf16, #tpu.memory_space<vmem>>, %arg14: memref<128x128xbf16, #tpu.memory_space<vmem>>, %arg15: memref<128x128xf32, #tpu.memory_space<vmem>>, %arg16: memref<128x128xf32, #tpu.memory_space<vmem>>, %arg17: memref<128x128xf32, #tpu.memory_space<vmem>>, %arg18: memref<128x128xf32, #tpu.memory_space<vmem>>) attributes {dimension_semantics = [#tpu.dimension_semantics<arbitrary>], iteration_bounds = array<i64: 1>, scalar_prefetch = 0 : i64, scratch_operands = 2 : i64, tpu.core_type = #tpu.core_type<tc>, window_params = [{transform_indices = @transform_0, window_bounds = array<i64: 4, 128, 128>}, {transform_indices = @transform_1, window_bounds = array<i64: 4, 128, 128>}, {transform_indices = @transform_2, window_bounds = array<i64: 4, 128, 128>}, {transform_indices = @transform_3, window_bounds = array<i64: 4, 128, 128>}, {transform_indices = @transform_4, window_bounds = array<i64: 4, 128, 128>}, {transform_indices = @transform_5, window_bounds = array<i64: 4, 128, 128>}, {pipeline_mode = #tpu.pipeline_mode<synchronous>, transform_indices = @transform_6, window_bounds = array<i64: 128, 128>}, {pipeline_mode = #tpu.pipeline_mode<synchronous>, transform_indices = @transform_7, window_bounds = array<i64: 128, 128>}, {pipeline_mode = #tpu.pipeline_mode<synchronous>, transform_indices = @transform_8, window_bounds = array<i64: 128, 128>}, {pipeline_mode = #tpu.pipeline_mode<synchronous>, transform_indices = @transform_9, window_bounds = array<i64: 128, 128>}, {pipeline_mode = #tpu.pipeline_mode<synchronous>, transform_indices = @transform_10, window_bounds = array<i64: 128, 128>}, {pipeline_mode = #tpu.pipeline_mode<synchronous>, transform_indices = @transform_11, window_bounds = array<i64: 128, 128>}, {pipeline_mode = #tpu.pipeline_mode<synchronous>, transform_indices = @transform_12, window_bounds = array<i64: 128, 128>}, {pipeline_mode = #tpu.pipeline_mode<synchronous>, transform_indices = @transform_13, window_bounds = array<i64: 128, 128>}, {pipeline_mode = #tpu.pipeline_mode<synchronous>, transform_indices = @transform_14, window_bounds = array<i64: 128, 128>}, {pipeline_mode = #tpu.pipeline_mode<synchronous>, transform_indices = @transform_15, window_bounds = array<i64: 128, 128>}]} {
    %c0_i32 = arith.constant 0 : i32
    %0 = arith.cmpi eq, %arg0, %c0_i32 : i32
    %1 = arith.extui %0 : i1 to i32
    %c0_i32_0 = arith.constant 0 : i32
    %2 = arith.cmpi ne, %1, %c0_i32_0 : i32
    scf.if %2 {
      %cst_224 = arith.constant 0.000000e+00 : f32
      %254 = vector.broadcast %cst_224 : f32 to vector<128x128xf32>
      %c0_225 = arith.constant 0 : index
      %c0_226 = arith.constant 0 : index
      %255 = vector.load %arg17[%c0_225, %c0_226] : memref<128x128xf32, #tpu.memory_space<vmem>>, vector<128x128xf32>
      tpu.vector_store %arg17[%c0_225, %c0_226], %254 {strides = array<i32>} : memref<128x128xf32, #tpu.memory_space<vmem>>, vector<128x128xf32>,
      %cst_227 = arith.constant 0.000000e+00 : f32
      %256 = vector.broadcast %cst_227 : f32 to vector<128x128xf32>
      %c0_228 = arith.constant 0 : index
      %c0_229 = arith.constant 0 : index
      %257 = vector.load %arg18[%c0_228, %c0_229] : memref<128x128xf32, #tpu.memory_space<vmem>>, vector<128x128xf32>
      tpu.vector_store %arg18[%c0_228, %c0_229], %256 {strides = array<i32>} : memref<128x128xf32, #tpu.memory_space<vmem>>, vector<128x128xf32>,
    } else {
    }
    %cst = arith.constant 0.000000e+00 : f32
    %3 = vector.broadcast %cst : f32 to vector<128x128xf32>
    %cst_1 = arith.constant 0.000000e+00 : f32
    %4 = vector.broadcast %cst_1 : f32 to vector<128x128xf32>
    %c0 = arith.constant 0 : index
    %c0_2 = arith.constant 0 : index
    %c0_3 = arith.constant 0 : index
    %5 = vector.load %arg1[%c0, %c0_2, %c0_3] : memref<4x128x128xbf16, #tpu.memory_space<vmem>>, vector<1x128x128xbf16>
    %6 = vector.shape_cast %5 : vector<1x128x128xbf16> to vector<128x128xbf16>
    %c0_4 = arith.constant 0 : index
    %c0_5 = arith.constant 0 : index
    %c0_6 = arith.constant 0 : index
    %7 = vector.load %arg2[%c0_4, %c0_5, %c0_6] : memref<4x128x128xbf16, #tpu.memory_space<vmem>>, vector<1x128x128xbf16>
    %8 = vector.shape_cast %7 : vector<1x128x128xbf16> to vector<128x128xbf16>
    %c0_7 = arith.constant 0 : index
    %c0_8 = arith.constant 0 : index
    %c0_9 = arith.constant 0 : index
    %9 = vector.load %arg3[%c0_7, %c0_8, %c0_9] : memref<4x128x128xbf16, #tpu.memory_space<vmem>>, vector<1x128x128xbf16>
    %10 = vector.shape_cast %9 : vector<1x128x128xbf16> to vector<128x128xbf16>
    %c0_10 = arith.constant 0 : index
    %c0_11 = arith.constant 0 : index
    %c0_12 = arith.constant 0 : index
    %11 = vector.load %arg4[%c0_10, %c0_11, %c0_12] : memref<4x128x128xbf16, #tpu.memory_space<vmem>>, vector<1x128x128xbf16>
    %12 = vector.shape_cast %11 : vector<1x128x128xbf16> to vector<128x128xbf16>
    %c0_13 = arith.constant 0 : index
    %c0_14 = arith.constant 0 : index
    %c0_15 = arith.constant 0 : index
    %13 = vector.load %arg5[%c0_13, %c0_14, %c0_15] : memref<4x128x128xbf16, #tpu.memory_space<vmem>>, vector<1x128x128xbf16>
    %14 = vector.shape_cast %13 : vector<1x128x128xbf16> to vector<128x128xbf16>
    %c0_16 = arith.constant 0 : index
    %c0_17 = arith.constant 0 : index
    %c0_18 = arith.constant 0 : index
    %15 = vector.load %arg6[%c0_16, %c0_17, %c0_18] : memref<4x128x128xbf16, #tpu.memory_space<vmem>>, vector<1x128x128xbf16>
    %16 = vector.shape_cast %15 : vector<1x128x128xbf16> to vector<128x128xbf16>
    %c0_19 = arith.constant 0 : index
    %c0_20 = arith.constant 0 : index
    %17 = vector.load %arg7[%c0_19, %c0_20] : memref<128x128xbf16, #tpu.memory_space<vmem>>, vector<128x128xbf16>
    %c0_21 = arith.constant 0 : index
    %c0_22 = arith.constant 0 : index
    %18 = vector.load %arg8[%c0_21, %c0_22] : memref<128x128xbf16, #tpu.memory_space<vmem>>, vector<128x128xbf16>
    %c0_23 = arith.constant 0 : index
    %c0_24 = arith.constant 0 : index
    %19 = vector.load %arg9[%c0_23, %c0_24] : memref<128x128xbf16, #tpu.memory_space<vmem>>, vector<128x128xbf16>
    %c0_25 = arith.constant 0 : index
    %c0_26 = arith.constant 0 : index
    %20 = vector.load %arg10[%c0_25, %c0_26] : memref<128x128xbf16, #tpu.memory_space<vmem>>, vector<128x128xbf16>
    %cst_27 = arith.constant dense<0.000000e+00> : vector<128x128xf32>
    %21 = tpu.matmul %6, %14, %cst_27 {dimension_numbers = #tpu.dot_dimension_numbers<[1], [0], [0], [1], [0, 0, 1, 1], [], []>} : vector<128x128xbf16>, vector<128x128xbf16>, vector<128x128xf32> -> vector<128x128xf32>
    %cst_28 = arith.constant dense<0.000000e+00> : vector<128x128xf32>
    %22 = tpu.matmul %8, %16, %cst_28 {dimension_numbers = #tpu.dot_dimension_numbers<[1], [0], [0], [1], [0, 0, 1, 1], [], []>} : vector<128x128xbf16>, vector<128x128xbf16>, vector<128x128xf32> -> vector<128x128xf32>
    %cst_29 = arith.constant dense<0.000000e+00> : vector<128x128xf32>
    %23 = tpu.matmul %12, %16, %cst_29 {dimension_numbers = #tpu.dot_dimension_numbers<[1], [0], [0], [1], [0, 0, 1, 1], [], []>} : vector<128x128xbf16>, vector<128x128xbf16>, vector<128x128xf32> -> vector<128x128xf32>
    %cst_30 = arith.constant dense<0.000000e+00> : vector<128x128xf32>
    %24 = tpu.matmul %10, %14, %cst_30 {dimension_numbers = #tpu.dot_dimension_numbers<[1], [0], [0], [1], [0, 0, 1, 1], [], []>} : vector<128x128xbf16>, vector<128x128xbf16>, vector<128x128xf32> -> vector<128x128xf32>
    %25 = arith.truncf %21 : vector<128x128xf32> to vector<128x128xbf16>
    %cst_31 = arith.constant dense<0.000000e+00> : vector<128x128xf32>
    %26 = tpu.matmul %25, %17, %cst_31 {dimension_numbers = #tpu.dot_dimension_numbers<[1], [0], [0], [1], [0, 0, 1, 1], [], []>} : vector<128x128xbf16>, vector<128x128xbf16>, vector<128x128xf32> -> vector<128x128xf32>
    %27 = arith.truncf %22 : vector<128x128xf32> to vector<128x128xbf16>
    %cst_32 = arith.constant dense<0.000000e+00> : vector<128x128xf32>
    %28 = tpu.matmul %27, %18, %cst_32 {dimension_numbers = #tpu.dot_dimension_numbers<[1], [0], [0], [1], [0, 0, 1, 1], [], []>} : vector<128x128xbf16>, vector<128x128xbf16>, vector<128x128xf32> -> vector<128x128xf32>
    %29 = arith.addf %26, %28 : vector<128x128xf32>
    %cst_33 = arith.constant 0.000000e+00 : f32
    %30 = vector.broadcast %cst_33 : f32 to vector<128x128xf32>
    %31 = arith.maximumf %29, %30 : vector<128x128xf32>
    %32 = arith.truncf %23 : vector<128x128xf32> to vector<128x128xbf16>
    %cst_34 = arith.constant dense<0.000000e+00> : vector<128x128xf32>
    %33 = tpu.matmul %32, %19, %cst_34 {dimension_numbers = #tpu.dot_dimension_numbers<[1], [0], [0], [1], [0, 0, 1, 1], [], []>} : vector<128x128xbf16>, vector<128x128xbf16>, vector<128x128xf32> -> vector<128x128xf32>
    %34 = arith.truncf %24 : vector<128x128xf32> to vector<128x128xbf16>
    %cst_35 = arith.constant dense<0.000000e+00> : vector<128x128xf32>
    %35 = tpu.matmul %34, %20, %cst_35 {dimension_numbers = #tpu.dot_dimension_numbers<[1], [0], [0], [1], [0, 0, 1, 1], [], []>} : vector<128x128xbf16>, vector<128x128xbf16>, vector<128x128xf32> -> vector<128x128xf32>
    %36 = arith.addf %33, %35 : vector<128x128xf32>
    %cst_36 = arith.constant 0.000000e+00 : f32
    %37 = vector.broadcast %cst_36 : f32 to vector<128x128xf32>
    %38 = arith.maximumf %36, %37 : vector<128x128xf32>
    %39 = arith.truncf %31 : vector<128x128xf32> to vector<128x128xbf16>
    %40 = arith.truncf %38 : vector<128x128xf32> to vector<128x128xbf16>
    %c0_37 = arith.constant 0 : index
    %c0_38 = arith.constant 0 : index
    %41 = vector.load %arg11[%c0_37, %c0_38] : memref<128x128xbf16, #tpu.memory_space<vmem>>, vector<128x128xbf16>
    %c0_39 = arith.constant 0 : index
    %c0_40 = arith.constant 0 : index
    %42 = vector.load %arg12[%c0_39, %c0_40] : memref<128x128xbf16, #tpu.memory_space<vmem>>, vector<128x128xbf16>
    %c0_41 = arith.constant 0 : index
    %c0_42 = arith.constant 0 : index
    %43 = vector.load %arg13[%c0_41, %c0_42] : memref<128x128xbf16, #tpu.memory_space<vmem>>, vector<128x128xbf16>
    %c0_43 = arith.constant 0 : index
    %c0_44 = arith.constant 0 : index
    %44 = vector.load %arg14[%c0_43, %c0_44] : memref<128x128xbf16, #tpu.memory_space<vmem>>, vector<128x128xbf16>
    %cst_45 = arith.constant dense<0.000000e+00> : vector<128x128xf32>
    %45 = tpu.matmul %6, %39, %cst_45 {dimension_numbers = #tpu.dot_dimension_numbers<[1], [0], [0], [1], [0, 0, 1, 1], [], []>} : vector<128x128xbf16>, vector<128x128xbf16>, vector<128x128xf32> -> vector<128x128xf32>
    %cst_46 = arith.constant dense<0.000000e+00> : vector<128x128xf32>
    %46 = tpu.matmul %8, %40, %cst_46 {dimension_numbers = #tpu.dot_dimension_numbers<[1], [0], [0], [1], [0, 0, 1, 1], [], []>} : vector<128x128xbf16>, vector<128x128xbf16>, vector<128x128xf32> -> vector<128x128xf32>
    %cst_47 = arith.constant dense<0.000000e+00> : vector<128x128xf32>
    %47 = tpu.matmul %12, %40, %cst_47 {dimension_numbers = #tpu.dot_dimension_numbers<[1], [0], [0], [1], [0, 0, 1, 1], [], []>} : vector<128x128xbf16>, vector<128x128xbf16>, vector<128x128xf32> -> vector<128x128xf32>
    %cst_48 = arith.constant dense<0.000000e+00> : vector<128x128xf32>
    %48 = tpu.matmul %10, %39, %cst_48 {dimension_numbers = #tpu.dot_dimension_numbers<[1], [0], [0], [1], [0, 0, 1, 1], [], []>} : vector<128x128xbf16>, vector<128x128xbf16>, vector<128x128xf32> -> vector<128x128xf32>
    %49 = arith.truncf %45 : vector<128x128xf32> to vector<128x128xbf16>
    %cst_49 = arith.constant dense<0.000000e+00> : vector<128x128xf32>
    %50 = tpu.matmul %49, %41, %cst_49 {dimension_numbers = #tpu.dot_dimension_numbers<[1], [0], [0], [1], [0, 0, 1, 1], [], []>} : vector<128x128xbf16>, vector<128x128xbf16>, vector<128x128xf32> -> vector<128x128xf32>
    %51 = arith.truncf %46 : vector<128x128xf32> to vector<128x128xbf16>
    %cst_50 = arith.constant dense<0.000000e+00> : vector<128x128xf32>
    %52 = tpu.matmul %51, %42, %cst_50 {dimension_numbers = #tpu.dot_dimension_numbers<[1], [0], [0], [1], [0, 0, 1, 1], [], []>} : vector<128x128xbf16>, vector<128x128xbf16>, vector<128x128xf32> -> vector<128x128xf32>
    %53 = arith.addf %50, %52 : vector<128x128xf32>
    %cst_51 = arith.constant 0.000000e+00 : f32
    %54 = vector.broadcast %cst_51 : f32 to vector<128x128xf32>
    %55 = arith.maximumf %53, %54 : vector<128x128xf32>
    %56 = arith.truncf %47 : vector<128x128xf32> to vector<128x128xbf16>
    %cst_52 = arith.constant dense<0.000000e+00> : vector<128x128xf32>
    %57 = tpu.matmul %56, %43, %cst_52 {dimension_numbers = #tpu.dot_dimension_numbers<[1], [0], [0], [1], [0, 0, 1, 1], [], []>} : vector<128x128xbf16>, vector<128x128xbf16>, vector<128x128xf32> -> vector<128x128xf32>
    %58 = arith.truncf %48 : vector<128x128xf32> to vector<128x128xbf16>
    %cst_53 = arith.constant dense<0.000000e+00> : vector<128x128xf32>
    %59 = tpu.matmul %58, %44, %cst_53 {dimension_numbers = #tpu.dot_dimension_numbers<[1], [0], [0], [1], [0, 0, 1, 1], [], []>} : vector<128x128xbf16>, vector<128x128xbf16>, vector<128x128xf32> -> vector<128x128xf32>
    %60 = arith.addf %57, %59 : vector<128x128xf32>
    %cst_54 = arith.constant 0.000000e+00 : f32
    %61 = vector.broadcast %cst_54 : f32 to vector<128x128xf32>
    %62 = arith.maximumf %60, %61 : vector<128x128xf32>
    %63 = arith.addf %3, %55 : vector<128x128xf32>
    %64 = arith.addf %4, %62 : vector<128x128xf32>
    %c1 = arith.constant 1 : index
    %c0_55 = arith.constant 0 : index
    %c0_56 = arith.constant 0 : index
    %65 = vector.load %arg1[%c1, %c0_55, %c0_56] : memref<4x128x128xbf16, #tpu.memory_space<vmem>>, vector<1x128x128xbf16>
    %66 = vector.shape_cast %65 : vector<1x128x128xbf16> to vector<128x128xbf16>
    %c1_57 = arith.constant 1 : index
    %c0_58 = arith.constant 0 : index
    %c0_59 = arith.constant 0 : index
    %67 = vector.load %arg2[%c1_57, %c0_58, %c0_59] : memref<4x128x128xbf16, #tpu.memory_space<vmem>>, vector<1x128x128xbf16>
    %68 = vector.shape_cast %67 : vector<1x128x128xbf16> to vector<128x128xbf16>
    %c1_60 = arith.constant 1 : index
    %c0_61 = arith.constant 0 : index
    %c0_62 = arith.constant 0 : index
    %69 = vector.load %arg3[%c1_60, %c0_61, %c0_62] : memref<4x128x128xbf16, #tpu.memory_space<vmem>>, vector<1x128x128xbf16>
    %70 = vector.shape_cast %69 : vector<1x128x128xbf16> to vector<128x128xbf16>
    %c1_63 = arith.constant 1 : index
    %c0_64 = arith.constant 0 : index
    %c0_65 = arith.constant 0 : index
    %71 = vector.load %arg4[%c1_63, %c0_64, %c0_65] : memref<4x128x128xbf16, #tpu.memory_space<vmem>>, vector<1x128x128xbf16>
    %72 = vector.shape_cast %71 : vector<1x128x128xbf16> to vector<128x128xbf16>
    %c1_66 = arith.constant 1 : index
    %c0_67 = arith.constant 0 : index
    %c0_68 = arith.constant 0 : index
    %73 = vector.load %arg5[%c1_66, %c0_67, %c0_68] : memref<4x128x128xbf16, #tpu.memory_space<vmem>>, vector<1x128x128xbf16>
    %74 = vector.shape_cast %73 : vector<1x128x128xbf16> to vector<128x128xbf16>
    %c1_69 = arith.constant 1 : index
    %c0_70 = arith.constant 0 : index
    %c0_71 = arith.constant 0 : index
    %75 = vector.load %arg6[%c1_69, %c0_70, %c0_71] : memref<4x128x128xbf16, #tpu.memory_space<vmem>>, vector<1x128x128xbf16>
    %76 = vector.shape_cast %75 : vector<1x128x128xbf16> to vector<128x128xbf16>
    %c0_72 = arith.constant 0 : index
    %c0_73 = arith.constant 0 : index
    %77 = vector.load %arg7[%c0_72, %c0_73] : memref<128x128xbf16, #tpu.memory_space<vmem>>, vector<128x128xbf16>
    %c0_74 = arith.constant 0 : index
    %c0_75 = arith.constant 0 : index
    %78 = vector.load %arg8[%c0_74, %c0_75] : memref<128x128xbf16, #tpu.memory_space<vmem>>, vector<128x128xbf16>
    %c0_76 = arith.constant 0 : index
    %c0_77 = arith.constant 0 : index
    %79 = vector.load %arg9[%c0_76, %c0_77] : memref<128x128xbf16, #tpu.memory_space<vmem>>, vector<128x128xbf16>
    %c0_78 = arith.constant 0 : index
    %c0_79 = arith.constant 0 : index
    %80 = vector.load %arg10[%c0_78, %c0_79] : memref<128x128xbf16, #tpu.memory_space<vmem>>, vector<128x128xbf16>
    %cst_80 = arith.constant dense<0.000000e+00> : vector<128x128xf32>
    %81 = tpu.matmul %66, %74, %cst_80 {dimension_numbers = #tpu.dot_dimension_numbers<[1], [0], [0], [1], [0, 0, 1, 1], [], []>} : vector<128x128xbf16>, vector<128x128xbf16>, vector<128x128xf32> -> vector<128x128xf32>
    %cst_81 = arith.constant dense<0.000000e+00> : vector<128x128xf32>
    %82 = tpu.matmul %68, %76, %cst_81 {dimension_numbers = #tpu.dot_dimension_numbers<[1], [0], [0], [1], [0, 0, 1, 1], [], []>} : vector<128x128xbf16>, vector<128x128xbf16>, vector<128x128xf32> -> vector<128x128xf32>
    %cst_82 = arith.constant dense<0.000000e+00> : vector<128x128xf32>
    %83 = tpu.matmul %72, %76, %cst_82 {dimension_numbers = #tpu.dot_dimension_numbers<[1], [0], [0], [1], [0, 0, 1, 1], [], []>} : vector<128x128xbf16>, vector<128x128xbf16>, vector<128x128xf32> -> vector<128x128xf32>
    %cst_83 = arith.constant dense<0.000000e+00> : vector<128x128xf32>
    %84 = tpu.matmul %70, %74, %cst_83 {dimension_numbers = #tpu.dot_dimension_numbers<[1], [0], [0], [1], [0, 0, 1, 1], [], []>} : vector<128x128xbf16>, vector<128x128xbf16>, vector<128x128xf32> -> vector<128x128xf32>
    %85 = arith.truncf %81 : vector<128x128xf32> to vector<128x128xbf16>
    %cst_84 = arith.constant dense<0.000000e+00> : vector<128x128xf32>
    %86 = tpu.matmul %85, %77, %cst_84 {dimension_numbers = #tpu.dot_dimension_numbers<[1], [0], [0], [1], [0, 0, 1, 1], [], []>} : vector<128x128xbf16>, vector<128x128xbf16>, vector<128x128xf32> -> vector<128x128xf32>
    %87 = arith.truncf %82 : vector<128x128xf32> to vector<128x128xbf16>
    %cst_85 = arith.constant dense<0.000000e+00> : vector<128x128xf32>
    %88 = tpu.matmul %87, %78, %cst_85 {dimension_numbers = #tpu.dot_dimension_numbers<[1], [0], [0], [1], [0, 0, 1, 1], [], []>} : vector<128x128xbf16>, vector<128x128xbf16>, vector<128x128xf32> -> vector<128x128xf32>
    %89 = arith.addf %86, %88 : vector<128x128xf32>
    %cst_86 = arith.constant 0.000000e+00 : f32
    %90 = vector.broadcast %cst_86 : f32 to vector<128x128xf32>
    %91 = arith.maximumf %89, %90 : vector<128x128xf32>
    %92 = arith.truncf %83 : vector<128x128xf32> to vector<128x128xbf16>
    %cst_87 = arith.constant dense<0.000000e+00> : vector<128x128xf32>
    %93 = tpu.matmul %92, %79, %cst_87 {dimension_numbers = #tpu.dot_dimension_numbers<[1], [0], [0], [1], [0, 0, 1, 1], [], []>} : vector<128x128xbf16>, vector<128x128xbf16>, vector<128x128xf32> -> vector<128x128xf32>
    %94 = arith.truncf %84 : vector<128x128xf32> to vector<128x128xbf16>
    %cst_88 = arith.constant dense<0.000000e+00> : vector<128x128xf32>
    %95 = tpu.matmul %94, %80, %cst_88 {dimension_numbers = #tpu.dot_dimension_numbers<[1], [0], [0], [1], [0, 0, 1, 1], [], []>} : vector<128x128xbf16>, vector<128x128xbf16>, vector<128x128xf32> -> vector<128x128xf32>
    %96 = arith.addf %93, %95 : vector<128x128xf32>
    %cst_89 = arith.constant 0.000000e+00 : f32
    %97 = vector.broadcast %cst_89 : f32 to vector<128x128xf32>
    %98 = arith.maximumf %96, %97 : vector<128x128xf32>
    %99 = arith.truncf %91 : vector<128x128xf32> to vector<128x128xbf16>
    %100 = arith.truncf %98 : vector<128x128xf32> to vector<128x128xbf16>
    %c0_90 = arith.constant 0 : index
    %c0_91 = arith.constant 0 : index
    %101 = vector.load %arg11[%c0_90, %c0_91] : memref<128x128xbf16, #tpu.memory_space<vmem>>, vector<128x128xbf16>
    %c0_92 = arith.constant 0 : index
    %c0_93 = arith.constant 0 : index
    %102 = vector.load %arg12[%c0_92, %c0_93] : memref<128x128xbf16, #tpu.memory_space<vmem>>, vector<128x128xbf16>
    %c0_94 = arith.constant 0 : index
    %c0_95 = arith.constant 0 : index
    %103 = vector.load %arg13[%c0_94, %c0_95] : memref<128x128xbf16, #tpu.memory_space<vmem>>, vector<128x128xbf16>
    %c0_96 = arith.constant 0 : index
    %c0_97 = arith.constant 0 : index
    %104 = vector.load %arg14[%c0_96, %c0_97] : memref<128x128xbf16, #tpu.memory_space<vmem>>, vector<128x128xbf16>
    %cst_98 = arith.constant dense<0.000000e+00> : vector<128x128xf32>
    %105 = tpu.matmul %66, %99, %cst_98 {dimension_numbers = #tpu.dot_dimension_numbers<[1], [0], [0], [1], [0, 0, 1, 1], [], []>} : vector<128x128xbf16>, vector<128x128xbf16>, vector<128x128xf32> -> vector<128x128xf32>
    %cst_99 = arith.constant dense<0.000000e+00> : vector<128x128xf32>
    %106 = tpu.matmul %68, %100, %cst_99 {dimension_numbers = #tpu.dot_dimension_numbers<[1], [0], [0], [1], [0, 0, 1, 1], [], []>} : vector<128x128xbf16>, vector<128x128xbf16>, vector<128x128xf32> -> vector<128x128xf32>
    %cst_100 = arith.constant dense<0.000000e+00> : vector<128x128xf32>
    %107 = tpu.matmul %72, %100, %cst_100 {dimension_numbers = #tpu.dot_dimension_numbers<[1], [0], [0], [1], [0, 0, 1, 1], [], []>} : vector<128x128xbf16>, vector<128x128xbf16>, vector<128x128xf32> -> vector<128x128xf32>
    %cst_101 = arith.constant dense<0.000000e+00> : vector<128x128xf32>
    %108 = tpu.matmul %70, %99, %cst_101 {dimension_numbers = #tpu.dot_dimension_numbers<[1], [0], [0], [1], [0, 0, 1, 1], [], []>} : vector<128x128xbf16>, vector<128x128xbf16>, vector<128x128xf32> -> vector<128x128xf32>
    %109 = arith.truncf %105 : vector<128x128xf32> to vector<128x128xbf16>
    %cst_102 = arith.constant dense<0.000000e+00> : vector<128x128xf32>
    %110 = tpu.matmul %109, %101, %cst_102 {dimension_numbers = #tpu.dot_dimension_numbers<[1], [0], [0], [1], [0, 0, 1, 1], [], []>} : vector<128x128xbf16>, vector<128x128xbf16>, vector<128x128xf32> -> vector<128x128xf32>
    %111 = arith.truncf %106 : vector<128x128xf32> to vector<128x128xbf16>
    %cst_103 = arith.constant dense<0.000000e+00> : vector<128x128xf32>
    %112 = tpu.matmul %111, %102, %cst_103 {dimension_numbers = #tpu.dot_dimension_numbers<[1], [0], [0], [1], [0, 0, 1, 1], [], []>} : vector<128x128xbf16>, vector<128x128xbf16>, vector<128x128xf32> -> vector<128x128xf32>
    %113 = arith.addf %110, %112 : vector<128x128xf32>
    %cst_104 = arith.constant 0.000000e+00 : f32
    %114 = vector.broadcast %cst_104 : f32 to vector<128x128xf32>
    %115 = arith.maximumf %113, %114 : vector<128x128xf32>
    %116 = arith.truncf %107 : vector<128x128xf32> to vector<128x128xbf16>
    %cst_105 = arith.constant dense<0.000000e+00> : vector<128x128xf32>
    %117 = tpu.matmul %116, %103, %cst_105 {dimension_numbers = #tpu.dot_dimension_numbers<[1], [0], [0], [1], [0, 0, 1, 1], [], []>} : vector<128x128xbf16>, vector<128x128xbf16>, vector<128x128xf32> -> vector<128x128xf32>
    %118 = arith.truncf %108 : vector<128x128xf32> to vector<128x128xbf16>
    %cst_106 = arith.constant dense<0.000000e+00> : vector<128x128xf32>
    %119 = tpu.matmul %118, %104, %cst_106 {dimension_numbers = #tpu.dot_dimension_numbers<[1], [0], [0], [1], [0, 0, 1, 1], [], []>} : vector<128x128xbf16>, vector<128x128xbf16>, vector<128x128xf32> -> vector<128x128xf32>
    %120 = arith.addf %117, %119 : vector<128x128xf32>
    %cst_107 = arith.constant 0.000000e+00 : f32
    %121 = vector.broadcast %cst_107 : f32 to vector<128x128xf32>
    %122 = arith.maximumf %120, %121 : vector<128x128xf32>
    %123 = arith.addf %63, %115 : vector<128x128xf32>
    %124 = arith.addf %64, %122 : vector<128x128xf32>
    %c2 = arith.constant 2 : index
    %c0_108 = arith.constant 0 : index
    %c0_109 = arith.constant 0 : index
    %125 = vector.load %arg1[%c2, %c0_108, %c0_109] : memref<4x128x128xbf16, #tpu.memory_space<vmem>>, vector<1x128x128xbf16>
    %126 = vector.shape_cast %125 : vector<1x128x128xbf16> to vector<128x128xbf16>
    %c2_110 = arith.constant 2 : index
    %c0_111 = arith.constant 0 : index
    %c0_112 = arith.constant 0 : index
    %127 = vector.load %arg2[%c2_110, %c0_111, %c0_112] : memref<4x128x128xbf16, #tpu.memory_space<vmem>>, vector<1x128x128xbf16>
    %128 = vector.shape_cast %127 : vector<1x128x128xbf16> to vector<128x128xbf16>
    %c2_113 = arith.constant 2 : index
    %c0_114 = arith.constant 0 : index
    %c0_115 = arith.constant 0 : index
    %129 = vector.load %arg3[%c2_113, %c0_114, %c0_115] : memref<4x128x128xbf16, #tpu.memory_space<vmem>>, vector<1x128x128xbf16>
    %130 = vector.shape_cast %129 : vector<1x128x128xbf16> to vector<128x128xbf16>
    %c2_116 = arith.constant 2 : index
    %c0_117 = arith.constant 0 : index
    %c0_118 = arith.constant 0 : index
    %131 = vector.load %arg4[%c2_116, %c0_117, %c0_118] : memref<4x128x128xbf16, #tpu.memory_space<vmem>>, vector<1x128x128xbf16>
    %132 = vector.shape_cast %131 : vector<1x128x128xbf16> to vector<128x128xbf16>
    %c2_119 = arith.constant 2 : index
    %c0_120 = arith.constant 0 : index
    %c0_121 = arith.constant 0 : index
    %133 = vector.load %arg5[%c2_119, %c0_120, %c0_121] : memref<4x128x128xbf16, #tpu.memory_space<vmem>>, vector<1x128x128xbf16>
    %134 = vector.shape_cast %133 : vector<1x128x128xbf16> to vector<128x128xbf16>
    %c2_122 = arith.constant 2 : index
    %c0_123 = arith.constant 0 : index
    %c0_124 = arith.constant 0 : index
    %135 = vector.load %arg6[%c2_122, %c0_123, %c0_124] : memref<4x128x128xbf16, #tpu.memory_space<vmem>>, vector<1x128x128xbf16>
    %136 = vector.shape_cast %135 : vector<1x128x128xbf16> to vector<128x128xbf16>
    %c0_125 = arith.constant 0 : index
    %c0_126 = arith.constant 0 : index
    %137 = vector.load %arg7[%c0_125, %c0_126] : memref<128x128xbf16, #tpu.memory_space<vmem>>, vector<128x128xbf16>
    %c0_127 = arith.constant 0 : index
    %c0_128 = arith.constant 0 : index
    %138 = vector.load %arg8[%c0_127, %c0_128] : memref<128x128xbf16, #tpu.memory_space<vmem>>, vector<128x128xbf16>
    %c0_129 = arith.constant 0 : index
    %c0_130 = arith.constant 0 : index
    %139 = vector.load %arg9[%c0_129, %c0_130] : memref<128x128xbf16, #tpu.memory_space<vmem>>, vector<128x128xbf16>
    %c0_131 = arith.constant 0 : index
    %c0_132 = arith.constant 0 : index
    %140 = vector.load %arg10[%c0_131, %c0_132] : memref<128x128xbf16, #tpu.memory_space<vmem>>, vector<128x128xbf16>
    %cst_133 = arith.constant dense<0.000000e+00> : vector<128x128xf32>
    %141 = tpu.matmul %126, %134, %cst_133 {dimension_numbers = #tpu.dot_dimension_numbers<[1], [0], [0], [1], [0, 0, 1, 1], [], []>} : vector<128x128xbf16>, vector<128x128xbf16>, vector<128x128xf32> -> vector<128x128xf32>
    %cst_134 = arith.constant dense<0.000000e+00> : vector<128x128xf32>
    %142 = tpu.matmul %128, %136, %cst_134 {dimension_numbers = #tpu.dot_dimension_numbers<[1], [0], [0], [1], [0, 0, 1, 1], [], []>} : vector<128x128xbf16>, vector<128x128xbf16>, vector<128x128xf32> -> vector<128x128xf32>
    %cst_135 = arith.constant dense<0.000000e+00> : vector<128x128xf32>
    %143 = tpu.matmul %132, %136, %cst_135 {dimension_numbers = #tpu.dot_dimension_numbers<[1], [0], [0], [1], [0, 0, 1, 1], [], []>} : vector<128x128xbf16>, vector<128x128xbf16>, vector<128x128xf32> -> vector<128x128xf32>
    %cst_136 = arith.constant dense<0.000000e+00> : vector<128x128xf32>
    %144 = tpu.matmul %130, %134, %cst_136 {dimension_numbers = #tpu.dot_dimension_numbers<[1], [0], [0], [1], [0, 0, 1, 1], [], []>} : vector<128x128xbf16>, vector<128x128xbf16>, vector<128x128xf32> -> vector<128x128xf32>
    %145 = arith.truncf %141 : vector<128x128xf32> to vector<128x128xbf16>
    %cst_137 = arith.constant dense<0.000000e+00> : vector<128x128xf32>
    %146 = tpu.matmul %145, %137, %cst_137 {dimension_numbers = #tpu.dot_dimension_numbers<[1], [0], [0], [1], [0, 0, 1, 1], [], []>} : vector<128x128xbf16>, vector<128x128xbf16>, vector<128x128xf32> -> vector<128x128xf32>
    %147 = arith.truncf %142 : vector<128x128xf32> to vector<128x128xbf16>
    %cst_138 = arith.constant dense<0.000000e+00> : vector<128x128xf32>
    %148 = tpu.matmul %147, %138, %cst_138 {dimension_numbers = #tpu.dot_dimension_numbers<[1], [0], [0], [1], [0, 0, 1, 1], [], []>} : vector<128x128xbf16>, vector<128x128xbf16>, vector<128x128xf32> -> vector<128x128xf32>
    %149 = arith.addf %146, %148 : vector<128x128xf32>
    %cst_139 = arith.constant 0.000000e+00 : f32
    %150 = vector.broadcast %cst_139 : f32 to vector<128x128xf32>
    %151 = arith.maximumf %149, %150 : vector<128x128xf32>
    %152 = arith.truncf %143 : vector<128x128xf32> to vector<128x128xbf16>
    %cst_140 = arith.constant dense<0.000000e+00> : vector<128x128xf32>
    %153 = tpu.matmul %152, %139, %cst_140 {dimension_numbers = #tpu.dot_dimension_numbers<[1], [0], [0], [1], [0, 0, 1, 1], [], []>} : vector<128x128xbf16>, vector<128x128xbf16>, vector<128x128xf32> -> vector<128x128xf32>
    %154 = arith.truncf %144 : vector<128x128xf32> to vector<128x128xbf16>
    %cst_141 = arith.constant dense<0.000000e+00> : vector<128x128xf32>
    %155 = tpu.matmul %154, %140, %cst_141 {dimension_numbers = #tpu.dot_dimension_numbers<[1], [0], [0], [1], [0, 0, 1, 1], [], []>} : vector<128x128xbf16>, vector<128x128xbf16>, vector<128x128xf32> -> vector<128x128xf32>
    %156 = arith.addf %153, %155 : vector<128x128xf32>
    %cst_142 = arith.constant 0.000000e+00 : f32
    %157 = vector.broadcast %cst_142 : f32 to vector<128x128xf32>
    %158 = arith.maximumf %156, %157 : vector<128x128xf32>
    %159 = arith.truncf %151 : vector<128x128xf32> to vector<128x128xbf16>
    %160 = arith.truncf %158 : vector<128x128xf32> to vector<128x128xbf16>
    %c0_143 = arith.constant 0 : index
    %c0_144 = arith.constant 0 : index
    %161 = vector.load %arg11[%c0_143, %c0_144] : memref<128x128xbf16, #tpu.memory_space<vmem>>, vector<128x128xbf16>
    %c0_145 = arith.constant 0 : index
    %c0_146 = arith.constant 0 : index
    %162 = vector.load %arg12[%c0_145, %c0_146] : memref<128x128xbf16, #tpu.memory_space<vmem>>, vector<128x128xbf16>
    %c0_147 = arith.constant 0 : index
    %c0_148 = arith.constant 0 : index
    %163 = vector.load %arg13[%c0_147, %c0_148] : memref<128x128xbf16, #tpu.memory_space<vmem>>, vector<128x128xbf16>
    %c0_149 = arith.constant 0 : index
    %c0_150 = arith.constant 0 : index
    %164 = vector.load %arg14[%c0_149, %c0_150] : memref<128x128xbf16, #tpu.memory_space<vmem>>, vector<128x128xbf16>
    %cst_151 = arith.constant dense<0.000000e+00> : vector<128x128xf32>
    %165 = tpu.matmul %126, %159, %cst_151 {dimension_numbers = #tpu.dot_dimension_numbers<[1], [0], [0], [1], [0, 0, 1, 1], [], []>} : vector<128x128xbf16>, vector<128x128xbf16>, vector<128x128xf32> -> vector<128x128xf32>
    %cst_152 = arith.constant dense<0.000000e+00> : vector<128x128xf32>
    %166 = tpu.matmul %128, %160, %cst_152 {dimension_numbers = #tpu.dot_dimension_numbers<[1], [0], [0], [1], [0, 0, 1, 1], [], []>} : vector<128x128xbf16>, vector<128x128xbf16>, vector<128x128xf32> -> vector<128x128xf32>
    %cst_153 = arith.constant dense<0.000000e+00> : vector<128x128xf32>
    %167 = tpu.matmul %132, %160, %cst_153 {dimension_numbers = #tpu.dot_dimension_numbers<[1], [0], [0], [1], [0, 0, 1, 1], [], []>} : vector<128x128xbf16>, vector<128x128xbf16>, vector<128x128xf32> -> vector<128x128xf32>
    %cst_154 = arith.constant dense<0.000000e+00> : vector<128x128xf32>
    %168 = tpu.matmul %130, %159, %cst_154 {dimension_numbers = #tpu.dot_dimension_numbers<[1], [0], [0], [1], [0, 0, 1, 1], [], []>} : vector<128x128xbf16>, vector<128x128xbf16>, vector<128x128xf32> -> vector<128x128xf32>
    %169 = arith.truncf %165 : vector<128x128xf32> to vector<128x128xbf16>
    %cst_155 = arith.constant dense<0.000000e+00> : vector<128x128xf32>
    %170 = tpu.matmul %169, %161, %cst_155 {dimension_numbers = #tpu.dot_dimension_numbers<[1], [0], [0], [1], [0, 0, 1, 1], [], []>} : vector<128x128xbf16>, vector<128x128xbf16>, vector<128x128xf32> -> vector<128x128xf32>
    %171 = arith.truncf %166 : vector<128x128xf32> to vector<128x128xbf16>
    %cst_156 = arith.constant dense<0.000000e+00> : vector<128x128xf32>
    %172 = tpu.matmul %171, %162, %cst_156 {dimension_numbers = #tpu.dot_dimension_numbers<[1], [0], [0], [1], [0, 0, 1, 1], [], []>} : vector<128x128xbf16>, vector<128x128xbf16>, vector<128x128xf32> -> vector<128x128xf32>
    %173 = arith.addf %170, %172 : vector<128x128xf32>
    %cst_157 = arith.constant 0.000000e+00 : f32
    %174 = vector.broadcast %cst_157 : f32 to vector<128x128xf32>
    %175 = arith.maximumf %173, %174 : vector<128x128xf32>
    %176 = arith.truncf %167 : vector<128x128xf32> to vector<128x128xbf16>
    %cst_158 = arith.constant dense<0.000000e+00> : vector<128x128xf32>
    %177 = tpu.matmul %176, %163, %cst_158 {dimension_numbers = #tpu.dot_dimension_numbers<[1], [0], [0], [1], [0, 0, 1, 1], [], []>} : vector<128x128xbf16>, vector<128x128xbf16>, vector<128x128xf32> -> vector<128x128xf32>
    %178 = arith.truncf %168 : vector<128x128xf32> to vector<128x128xbf16>
    %cst_159 = arith.constant dense<0.000000e+00> : vector<128x128xf32>
    %179 = tpu.matmul %178, %164, %cst_159 {dimension_numbers = #tpu.dot_dimension_numbers<[1], [0], [0], [1], [0, 0, 1, 1], [], []>} : vector<128x128xbf16>, vector<128x128xbf16>, vector<128x128xf32> -> vector<128x128xf32>
    %180 = arith.addf %177, %179 : vector<128x128xf32>
    %cst_160 = arith.constant 0.000000e+00 : f32
    %181 = vector.broadcast %cst_160 : f32 to vector<128x128xf32>
    %182 = arith.maximumf %180, %181 : vector<128x128xf32>
    %183 = arith.addf %123, %175 : vector<128x128xf32>
    %184 = arith.addf %124, %182 : vector<128x128xf32>
    %c3 = arith.constant 3 : index
    %c0_161 = arith.constant 0 : index
    %c0_162 = arith.constant 0 : index
    %185 = vector.load %arg1[%c3, %c0_161, %c0_162] : memref<4x128x128xbf16, #tpu.memory_space<vmem>>, vector<1x128x128xbf16>
    %186 = vector.shape_cast %185 : vector<1x128x128xbf16> to vector<128x128xbf16>
    %c3_163 = arith.constant 3 : index
    %c0_164 = arith.constant 0 : index
    %c0_165 = arith.constant 0 : index
    %187 = vector.load %arg2[%c3_163, %c0_164, %c0_165] : memref<4x128x128xbf16, #tpu.memory_space<vmem>>, vector<1x128x128xbf16>
    %188 = vector.shape_cast %187 : vector<1x128x128xbf16> to vector<128x128xbf16>
    %c3_166 = arith.constant 3 : index
    %c0_167 = arith.constant 0 : index
    %c0_168 = arith.constant 0 : index
    %189 = vector.load %arg3[%c3_166, %c0_167, %c0_168] : memref<4x128x128xbf16, #tpu.memory_space<vmem>>, vector<1x128x128xbf16>
    %190 = vector.shape_cast %189 : vector<1x128x128xbf16> to vector<128x128xbf16>
    %c3_169 = arith.constant 3 : index
    %c0_170 = arith.constant 0 : index
    %c0_171 = arith.constant 0 : index
    %191 = vector.load %arg4[%c3_169, %c0_170, %c0_171] : memref<4x128x128xbf16, #tpu.memory_space<vmem>>, vector<1x128x128xbf16>
    %192 = vector.shape_cast %191 : vector<1x128x128xbf16> to vector<128x128xbf16>
    %c3_172 = arith.constant 3 : index
    %c0_173 = arith.constant 0 : index
    %c0_174 = arith.constant 0 : index
    %193 = vector.load %arg5[%c3_172, %c0_173, %c0_174] : memref<4x128x128xbf16, #tpu.memory_space<vmem>>, vector<1x128x128xbf16>
    %194 = vector.shape_cast %193 : vector<1x128x128xbf16> to vector<128x128xbf16>
    %c3_175 = arith.constant 3 : index
    %c0_176 = arith.constant 0 : index
    %c0_177 = arith.constant 0 : index
    %195 = vector.load %arg6[%c3_175, %c0_176, %c0_177] : memref<4x128x128xbf16, #tpu.memory_space<vmem>>, vector<1x128x128xbf16>
    %196 = vector.shape_cast %195 : vector<1x128x128xbf16> to vector<128x128xbf16>
    %c0_178 = arith.constant 0 : index
    %c0_179 = arith.constant 0 : index
    %197 = vector.load %arg7[%c0_178, %c0_179] : memref<128x128xbf16, #tpu.memory_space<vmem>>, vector<128x128xbf16>
    %c0_180 = arith.constant 0 : index
    %c0_181 = arith.constant 0 : index
    %198 = vector.load %arg8[%c0_180, %c0_181] : memref<128x128xbf16, #tpu.memory_space<vmem>>, vector<128x128xbf16>
    %c0_182 = arith.constant 0 : index
    %c0_183 = arith.constant 0 : index
    %199 = vector.load %arg9[%c0_182, %c0_183] : memref<128x128xbf16, #tpu.memory_space<vmem>>, vector<128x128xbf16>
    %c0_184 = arith.constant 0 : index
    %c0_185 = arith.constant 0 : index
    %200 = vector.load %arg10[%c0_184, %c0_185] : memref<128x128xbf16, #tpu.memory_space<vmem>>, vector<128x128xbf16>
    %cst_186 = arith.constant dense<0.000000e+00> : vector<128x128xf32>
    %201 = tpu.matmul %186, %194, %cst_186 {dimension_numbers = #tpu.dot_dimension_numbers<[1], [0], [0], [1], [0, 0, 1, 1], [], []>} : vector<128x128xbf16>, vector<128x128xbf16>, vector<128x128xf32> -> vector<128x128xf32>
    %cst_187 = arith.constant dense<0.000000e+00> : vector<128x128xf32>
    %202 = tpu.matmul %188, %196, %cst_187 {dimension_numbers = #tpu.dot_dimension_numbers<[1], [0], [0], [1], [0, 0, 1, 1], [], []>} : vector<128x128xbf16>, vector<128x128xbf16>, vector<128x128xf32> -> vector<128x128xf32>
    %cst_188 = arith.constant dense<0.000000e+00> : vector<128x128xf32>
    %203 = tpu.matmul %192, %196, %cst_188 {dimension_numbers = #tpu.dot_dimension_numbers<[1], [0], [0], [1], [0, 0, 1, 1], [], []>} : vector<128x128xbf16>, vector<128x128xbf16>, vector<128x128xf32> -> vector<128x128xf32>
    %cst_189 = arith.constant dense<0.000000e+00> : vector<128x128xf32>
    %204 = tpu.matmul %190, %194, %cst_189 {dimension_numbers = #tpu.dot_dimension_numbers<[1], [0], [0], [1], [0, 0, 1, 1], [], []>} : vector<128x128xbf16>, vector<128x128xbf16>, vector<128x128xf32> -> vector<128x128xf32>
    %205 = arith.truncf %201 : vector<128x128xf32> to vector<128x128xbf16>
    %cst_190 = arith.constant dense<0.000000e+00> : vector<128x128xf32>
    %206 = tpu.matmul %205, %197, %cst_190 {dimension_numbers = #tpu.dot_dimension_numbers<[1], [0], [0], [1], [0, 0, 1, 1], [], []>} : vector<128x128xbf16>, vector<128x128xbf16>, vector<128x128xf32> -> vector<128x128xf32>
    %207 = arith.truncf %202 : vector<128x128xf32> to vector<128x128xbf16>
    %cst_191 = arith.constant dense<0.000000e+00> : vector<128x128xf32>
    %208 = tpu.matmul %207, %198, %cst_191 {dimension_numbers = #tpu.dot_dimension_numbers<[1], [0], [0], [1], [0, 0, 1, 1], [], []>} : vector<128x128xbf16>, vector<128x128xbf16>, vector<128x128xf32> -> vector<128x128xf32>
    %209 = arith.addf %206, %208 : vector<128x128xf32>
    %cst_192 = arith.constant 0.000000e+00 : f32
    %210 = vector.broadcast %cst_192 : f32 to vector<128x128xf32>
    %211 = arith.maximumf %209, %210 : vector<128x128xf32>
    %212 = arith.truncf %203 : vector<128x128xf32> to vector<128x128xbf16>
    %cst_193 = arith.constant dense<0.000000e+00> : vector<128x128xf32>
    %213 = tpu.matmul %212, %199, %cst_193 {dimension_numbers = #tpu.dot_dimension_numbers<[1], [0], [0], [1], [0, 0, 1, 1], [], []>} : vector<128x128xbf16>, vector<128x128xbf16>, vector<128x128xf32> -> vector<128x128xf32>
    %214 = arith.truncf %204 : vector<128x128xf32> to vector<128x128xbf16>
    %cst_194 = arith.constant dense<0.000000e+00> : vector<128x128xf32>
    %215 = tpu.matmul %214, %200, %cst_194 {dimension_numbers = #tpu.dot_dimension_numbers<[1], [0], [0], [1], [0, 0, 1, 1], [], []>} : vector<128x128xbf16>, vector<128x128xbf16>, vector<128x128xf32> -> vector<128x128xf32>
    %216 = arith.addf %213, %215 : vector<128x128xf32>
    %cst_195 = arith.constant 0.000000e+00 : f32
    %217 = vector.broadcast %cst_195 : f32 to vector<128x128xf32>
    %218 = arith.maximumf %216, %217 : vector<128x128xf32>
    %219 = arith.truncf %211 : vector<128x128xf32> to vector<128x128xbf16>
    %220 = arith.truncf %218 : vector<128x128xf32> to vector<128x128xbf16>
    %c0_196 = arith.constant 0 : index
    %c0_197 = arith.constant 0 : index
    %221 = vector.load %arg11[%c0_196, %c0_197] : memref<128x128xbf16, #tpu.memory_space<vmem>>, vector<128x128xbf16>
    %c0_198 = arith.constant 0 : index
    %c0_199 = arith.constant 0 : index
    %222 = vector.load %arg12[%c0_198, %c0_199] : memref<128x128xbf16, #tpu.memory_space<vmem>>, vector<128x128xbf16>
    %c0_200 = arith.constant 0 : index
    %c0_201 = arith.constant 0 : index
    %223 = vector.load %arg13[%c0_200, %c0_201] : memref<128x128xbf16, #tpu.memory_space<vmem>>, vector<128x128xbf16>
    %c0_202 = arith.constant 0 : index
    %c0_203 = arith.constant 0 : index
    %224 = vector.load %arg14[%c0_202, %c0_203] : memref<128x128xbf16, #tpu.memory_space<vmem>>, vector<128x128xbf16>
    %cst_204 = arith.constant dense<0.000000e+00> : vector<128x128xf32>
    %225 = tpu.matmul %186, %219, %cst_204 {dimension_numbers = #tpu.dot_dimension_numbers<[1], [0], [0], [1], [0, 0, 1, 1], [], []>} : vector<128x128xbf16>, vector<128x128xbf16>, vector<128x128xf32> -> vector<128x128xf32>
    %cst_205 = arith.constant dense<0.000000e+00> : vector<128x128xf32>
    %226 = tpu.matmul %188, %220, %cst_205 {dimension_numbers = #tpu.dot_dimension_numbers<[1], [0], [0], [1], [0, 0, 1, 1], [], []>} : vector<128x128xbf16>, vector<128x128xbf16>, vector<128x128xf32> -> vector<128x128xf32>
    %cst_206 = arith.constant dense<0.000000e+00> : vector<128x128xf32>
    %227 = tpu.matmul %192, %220, %cst_206 {dimension_numbers = #tpu.dot_dimension_numbers<[1], [0], [0], [1], [0, 0, 1, 1], [], []>} : vector<128x128xbf16>, vector<128x128xbf16>, vector<128x128xf32> -> vector<128x128xf32>
    %cst_207 = arith.constant dense<0.000000e+00> : vector<128x128xf32>
    %228 = tpu.matmul %190, %219, %cst_207 {dimension_numbers = #tpu.dot_dimension_numbers<[1], [0], [0], [1], [0, 0, 1, 1], [], []>} : vector<128x128xbf16>, vector<128x128xbf16>, vector<128x128xf32> -> vector<128x128xf32>
    %229 = arith.truncf %225 : vector<128x128xf32> to vector<128x128xbf16>
    %cst_208 = arith.constant dense<0.000000e+00> : vector<128x128xf32>
    %230 = tpu.matmul %229, %221, %cst_208 {dimension_numbers = #tpu.dot_dimension_numbers<[1], [0], [0], [1], [0, 0, 1, 1], [], []>} : vector<128x128xbf16>, vector<128x128xbf16>, vector<128x128xf32> -> vector<128x128xf32>
    %231 = arith.truncf %226 : vector<128x128xf32> to vector<128x128xbf16>
    %cst_209 = arith.constant dense<0.000000e+00> : vector<128x128xf32>
    %232 = tpu.matmul %231, %222, %cst_209 {dimension_numbers = #tpu.dot_dimension_numbers<[1], [0], [0], [1], [0, 0, 1, 1], [], []>} : vector<128x128xbf16>, vector<128x128xbf16>, vector<128x128xf32> -> vector<128x128xf32>
    %233 = arith.addf %230, %232 : vector<128x128xf32>
    %cst_210 = arith.constant 0.000000e+00 : f32
    %234 = vector.broadcast %cst_210 : f32 to vector<128x128xf32>
    %235 = arith.maximumf %233, %234 : vector<128x128xf32>
    %236 = arith.truncf %227 : vector<128x128xf32> to vector<128x128xbf16>
    %cst_211 = arith.constant dense<0.000000e+00> : vector<128x128xf32>
    %237 = tpu.matmul %236, %223, %cst_211 {dimension_numbers = #tpu.dot_dimension_numbers<[1], [0], [0], [1], [0, 0, 1, 1], [], []>} : vector<128x128xbf16>, vector<128x128xbf16>, vector<128x128xf32> -> vector<128x128xf32>
    %238 = arith.truncf %228 : vector<128x128xf32> to vector<128x128xbf16>
    %cst_212 = arith.constant dense<0.000000e+00> : vector<128x128xf32>
    %239 = tpu.matmul %238, %224, %cst_212 {dimension_numbers = #tpu.dot_dimension_numbers<[1], [0], [0], [1], [0, 0, 1, 1], [], []>} : vector<128x128xbf16>, vector<128x128xbf16>, vector<128x128xf32> -> vector<128x128xf32>
    %240 = arith.addf %237, %239 : vector<128x128xf32>
    %cst_213 = arith.constant 0.000000e+00 : f32
    %241 = vector.broadcast %cst_213 : f32 to vector<128x128xf32>
    %242 = arith.maximumf %240, %241 : vector<128x128xf32>
    %243 = arith.addf %183, %235 : vector<128x128xf32>
    %244 = arith.addf %184, %242 : vector<128x128xf32>
    %c0_214 = arith.constant 0 : index
    %c0_215 = arith.constant 0 : index
    %245 = vector.load %arg17[%c0_214, %c0_215] : memref<128x128xf32, #tpu.memory_space<vmem>>, vector<128x128xf32>
    %246 = arith.addf %245, %243 : vector<128x128xf32>
    %c0_216 = arith.constant 0 : index
    %c0_217 = arith.constant 0 : index
    %247 = vector.load %arg17[%c0_216, %c0_217] : memref<128x128xf32, #tpu.memory_space<vmem>>, vector<128x128xf32>
    tpu.vector_store %arg17[%c0_216, %c0_217], %246 {strides = array<i32>} : memref<128x128xf32, #tpu.memory_space<vmem>>, vector<128x128xf32>,
    %c0_218 = arith.constant 0 : index
    %c0_219 = arith.constant 0 : index
    %248 = vector.load %arg18[%c0_218, %c0_219] : memref<128x128xf32, #tpu.memory_space<vmem>>, vector<128x128xf32>
    %249 = arith.addf %248, %244 : vector<128x128xf32>
    %c0_220 = arith.constant 0 : index
    %c0_221 = arith.constant 0 : index
    %250 = vector.load %arg18[%c0_220, %c0_221] : memref<128x128xf32, #tpu.memory_space<vmem>>, vector<128x128xf32>
    tpu.vector_store %arg18[%c0_220, %c0_221], %249 {strides = array<i32>} : memref<128x128xf32, #tpu.memory_space<vmem>>, vector<128x128xf32>,
    %c0_i32_222 = arith.constant 0 : i32
    %251 = arith.cmpi eq, %arg0, %c0_i32_222 : i32
    %252 = arith.extui %251 : i1 to i32
    %c0_i32_223 = arith.constant 0 : i32
    %253 = arith.cmpi ne, %252, %c0_i32_223 : i32
    scf.if %253 {
      %c0_224 = arith.constant 0 : index
      %c0_225 = arith.constant 0 : index
      %254 = vector.load %arg17[%c0_224, %c0_225] : memref<128x128xf32, #tpu.memory_space<vmem>>, vector<128x128xf32>
      %cst_226 = arith.constant 2.500000e-01 : f32
      %255 = vector.broadcast %cst_226 : f32 to vector<128x128xf32>
      %256 = arith.mulf %254, %255 : vector<128x128xf32>
      %c0_227 = arith.constant 0 : index
      %c0_228 = arith.constant 0 : index
      %257 = vector.load %arg18[%c0_227, %c0_228] : memref<128x128xf32, #tpu.memory_space<vmem>>, vector<128x128xf32>
      %cst_229 = arith.constant 2.500000e-01 : f32
      %258 = vector.broadcast %cst_229 : f32 to vector<128x128xf32>
      %259 = arith.mulf %257, %258 : vector<128x128xf32>
      %260 = arith.mulf %256, %256 : vector<128x128xf32>
      %cst_230 = arith.constant dense<0.000000e+00> : vector<128xf32>
      %261 = vector.multi_reduction <add>, %260, %cst_230 [1] : vector<128x128xf32> to vector<128xf32>
      %262 = vector.shape_cast %261 : vector<128xf32> to vector<128x1xf32>
      %cst_231 = arith.constant 1.000000e-24 : f32
      %263 = vector.broadcast %cst_231 : f32 to vector<128x1xf32>
      %264 = arith.maximumf %262, %263 : vector<128x1xf32>
      %265 = math.rsqrt %264 : vector<128x1xf32>
      %266 = vector.broadcast %265 : vector<128x1xf32> to vector<128x128xf32>
      %267 = arith.mulf %256, %266 : vector<128x128xf32>
      %268 = arith.mulf %259, %259 : vector<128x128xf32>
      %cst_232 = arith.constant dense<0.000000e+00> : vector<128xf32>
      %269 = vector.multi_reduction <add>, %268, %cst_232 [1] : vector<128x128xf32> to vector<128xf32>
      %270 = vector.shape_cast %269 : vector<128xf32> to vector<128x1xf32>
      %cst_233 = arith.constant 1.000000e-24 : f32
      %271 = vector.broadcast %cst_233 : f32 to vector<128x1xf32>
      %272 = arith.maximumf %270, %271 : vector<128x1xf32>
      %273 = math.rsqrt %272 : vector<128x1xf32>
      %274 = vector.broadcast %273 : vector<128x1xf32> to vector<128x128xf32>
      %275 = arith.mulf %259, %274 : vector<128x128xf32>
      %276 = arith.truncf %267 : vector<128x128xf32> to vector<128x128xbf16>
      %277 = arith.truncf %275 : vector<128x128xf32> to vector<128x128xbf16>
      %cst_234 = arith.constant dense<0.000000e+00> : vector<128x128xf32>
      %278 = tpu.matmul %276, %277, %cst_234 {dimension_numbers = #tpu.dot_dimension_numbers<[1], [1], [0], [0], [0, 0, 1, 0], [], []>} : vector<128x128xbf16>, vector<128x128xbf16>, vector<128x128xf32> -> vector<128x128xf32>
      %cst_235 = arith.constant 1.000000e+00 : f32
      %279 = vector.broadcast %cst_235 : f32 to vector<128x128xf32>
      %280 = arith.mulf %279, %278 : vector<128x128xf32>
      %281 = arith.negf %280 : vector<128x128xf32>
      %282 = math.exp %281 : vector<128x128xf32>
      %cst_236 = arith.constant 1.000000e+00 : f32
      %283 = vector.broadcast %cst_236 : f32 to vector<128x128xf32>
      %284 = arith.addf %283, %282 : vector<128x128xf32>
      %285 = arith.divf %283, %284 : vector<128x128xf32>
      %c0_237 = arith.constant 0 : index
      %c0_238 = arith.constant 0 : index
      %286 = vector.load %arg15[%c0_237, %c0_238] : memref<128x128xf32, #tpu.memory_space<vmem>>, vector<128x128xf32>
      tpu.vector_store %arg15[%c0_237, %c0_238], %285 {strides = array<i32>} : memref<128x128xf32, #tpu.memory_space<vmem>>, vector<128x128xf32>,
      %cst_239 = arith.constant 1.000000e+00 : f32
      %287 = vector.broadcast %cst_239 : f32 to vector<128x128xf32>
      %288 = arith.mulf %287, %278 : vector<128x128xf32>
      %cst_240 = arith.constant 0.000000e+00 : f32
      %289 = vector.broadcast %cst_240 : f32 to vector<128x128xf32>
      %290 = arith.maximumf %288, %289 : vector<128x128xf32>
      %c0_241 = arith.constant 0 : index
      %c0_242 = arith.constant 0 : index
      %291 = vector.load %arg16[%c0_241, %c0_242] : memref<128x128xf32, #tpu.memory_space<vmem>>, vector<128x128xf32>
      tpu.vector_store %arg16[%c0_241, %c0_242], %290 {strides = array<i32>} : memref<128x128xf32, #tpu.memory_space<vmem>>, vector<128x128xf32>,
    } else {
    }
    return
  }
  func.func @transform_0(%arg0: i32) -> (i32, i32, i32) {
    %c0_i32 = arith.constant 0 : i32
    %c0_i32_0 = arith.constant 0 : i32
    %c0_i32_1 = arith.constant 0 : i32
    return %arg0, %c0_i32, %c0_i32_0 : i32, i32, i32
  }
  func.func @transform_1(%arg0: i32) -> (i32, i32, i32) {
    %c0_i32 = arith.constant 0 : i32
    %c0_i32_0 = arith.constant 0 : i32
    %c0_i32_1 = arith.constant 0 : i32
    return %arg0, %c0_i32, %c0_i32_0 : i32, i32, i32
  }
  func.func @transform_2(%arg0: i32) -> (i32, i32, i32) {
    %c0_i32 = arith.constant 0 : i32
    %c0_i32_0 = arith.constant 0 : i32
    %c0_i32_1 = arith.constant 0 : i32
    return %arg0, %c0_i32, %c0_i32_0 : i32, i32, i32
  }
  func.func @transform_3(%arg0: i32) -> (i32, i32, i32) {
    %c0_i32 = arith.constant 0 : i32
    %c0_i32_0 = arith.constant 0 : i32
    %c0_i32_1 = arith.constant 0 : i32
    return %arg0, %c0_i32, %c0_i32_0 : i32, i32, i32
  }
  func.func @transform_4(%arg0: i32) -> (i32, i32, i32) {
    %c0_i32 = arith.constant 0 : i32
    %c0_i32_0 = arith.constant 0 : i32
    %c0_i32_1 = arith.constant 0 : i32
    return %arg0, %c0_i32, %c0_i32_0 : i32, i32, i32
  }
  func.func @transform_5(%arg0: i32) -> (i32, i32, i32) {
    %c0_i32 = arith.constant 0 : i32
    %c0_i32_0 = arith.constant 0 : i32
    %c0_i32_1 = arith.constant 0 : i32
    return %arg0, %c0_i32, %c0_i32_0 : i32, i32, i32
  }
  func.func @transform_6(%arg0: i32) -> (i32, i32) {
    %c0_i32 = arith.constant 0 : i32
    %c0_i32_0 = arith.constant 0 : i32
    %c0_i32_1 = arith.constant 0 : i32
    return %c0_i32, %c0_i32_0 : i32, i32
  }
  func.func @transform_7(%arg0: i32) -> (i32, i32) {
    %c0_i32 = arith.constant 0 : i32
    %c0_i32_0 = arith.constant 0 : i32
    %c0_i32_1 = arith.constant 0 : i32
    return %c0_i32, %c0_i32_0 : i32, i32
  }
  func.func @transform_8(%arg0: i32) -> (i32, i32) {
    %c0_i32 = arith.constant 0 : i32
    %c0_i32_0 = arith.constant 0 : i32
    %c0_i32_1 = arith.constant 0 : i32
    return %c0_i32, %c0_i32_0 : i32, i32
  }
  func.func @transform_9(%arg0: i32) -> (i32, i32) {
    %c0_i32 = arith.constant 0 : i32
    %c0_i32_0 = arith.constant 0 : i32
    %c0_i32_1 = arith.constant 0 : i32
    return %c0_i32, %c0_i32_0 : i32, i32
  }
  func.func @transform_10(%arg0: i32) -> (i32, i32) {
    %c0_i32 = arith.constant 0 : i32
    %c0_i32_0 = arith.constant 0 : i32
    %c0_i32_1 = arith.constant 0 : i32
    return %c0_i32, %c0_i32_0 : i32, i32
  }
  func.func @transform_11(%arg0: i32) -> (i32, i32) {
    %c0_i32 = arith.constant 0 : i32
    %c0_i32_0 = arith.constant 0 : i32
    %c0_i32_1 = arith.constant 0 : i32
    return %c0_i32, %c0_i32_0 : i32, i32
  }
  func.func @transform_12(%arg0: i32) -> (i32, i32) {
    %c0_i32 = arith.constant 0 : i32
    %c0_i32_0 = arith.constant 0 : i32
    %c0_i32_1 = arith.constant 0 : i32
    return %c0_i32, %c0_i32_0 : i32, i32
  }
  func.func @transform_13(%arg0: i32) -> (i32, i32) {
    %c0_i32 = arith.constant 0 : i32
    %c0_i32_0 = arith.constant 0 : i32
    %c0_i32_1 = arith.constant 0 : i32
    return %c0_i32, %c0_i32_0 : i32, i32
  }
  func.func @transform_14(%arg0: i32) -> (i32, i32) {
    %c0_i32 = arith.constant 0 : i32
    %c0_i32_0 = arith.constant 0 : i32
    %c0_i32_1 = arith.constant 0 : i32
    return %c0_i32, %c0_i32_0 : i32, i32
  }
  func.func @transform_15(%arg0: i32) -> (i32, i32) {
    %c0_i32 = arith.constant 0 : i32
    %c0_i32_0 = arith.constant 0 : i32
    %c0_i32_1 = arith.constant 0 : i32
    return %c0_i32, %c0_i32_0 : i32, i32
  }
}

</mosaic_0001>

<bundles_post_ra>
// kernel: tpu_custom_call.1
= control target key start
LH: loop header
LB: loop body
LE: loop exit
PB: predicated region body
PF: predicated region fallthrough
CT: control target
= control target key end

     0   :  { %21 = vsyncpa [#allocation5], 0  ;;  %s16117_s0 = inlined_call_operand.hbm [shape: bf16[4,128,128], index: 0, kind: input, shape index: {}]   ;;  %s16118_s1 = inlined_call_operand.hbm [shape: bf16[4,128,128], index: 1, kind: input, shape index: {}]   ;;  %s16119_s2 = inlined_call_operand.hbm [shape: bf16[4,128,128], index: 2, kind: input, shape index: {}]   ;;  %s16120_s3 = inlined_call_operand.hbm [shape: bf16[4,128,128], index: 3, kind: input, shape index: {}]   ;;  %s16121_s4 = inlined_call_operand.hbm [shape: bf16[4,128,128], index: 4, kind: input, shape index: {}]   ;;  %s16122_s5 = inlined_call_operand.hbm [shape: bf16[4,128,128], index: 5, kind: input, shape index: {}]   ;;  %s16123_s6 = inlined_call_operand.hbm [shape: bf16[128,128], index: 6, kind: input, shape index: {}]   ;;  %s16124_s7 = inlined_call_operand.hbm [shape: bf16[128,128], index: 7, kind: input, shape index: {}]   ;;  %s16125_s8 = inlined_call_operand.hbm [shape: bf16[128,128], index: 8, kind: input, shape index: {}]   ;;  %s16126_s9 = inlined_call_operand.hbm [shape: bf16[128,128], index: 9, kind: input, shape index: {}]   ;;  %s16127_s10 = inlined_call_operand.hbm [shape: bf16[128,128], index: 10, kind: input, shape index: {}]   ;;  %s16128_s11 = inlined_call_operand.hbm [shape: bf16[128,128], index: 11, kind: input, shape index: {}]   ;;  %s16129_s12 = inlined_call_operand.hbm [shape: bf16[128,128], index: 12, kind: input, shape index: {}]   ;;  %s16130_s13 = inlined_call_operand.hbm [shape: bf16[128,128], index: 13, kind: input, shape index: {}]   ;;  %s16131_s14 = inlined_call_operand.hbm [shape: f32[128,128], index: 14, kind: output, shape index: {0}]   ;;  %s16132_s15 = inlined_call_operand.hbm [shape: f32[128,128], index: 15, kind: output, shape index: {1}]  }
   0x1   :  { %22 = vsyncpa [#allocation8], 0 }
   0x2   :  { %23 = vsyncpa [#allocation11], 0 }
   0x3   :  { %24 = vsyncpa [#allocation14], 0 }
   0x4   :  { %25 = vsyncpa [#allocation17], 0 }
   0x5   :  { %26 = vsyncpa [#allocation20], 0 }
   0x6   :  { %27 = vsyncpa [#allocation23], 0 }
   0x7   :  { %28 = vsyncpa [#allocation26], 0 }
   0x8   :  { %29 = vsyncpa [#allocation6], 0 }
   0x9   :  { %30 = vsyncpa [#allocation29], 0  ;;  %s14344_s18 = smov [#allocation7]   ;;  %s14345_s20 = smov [#allocation10]  }
   0xa   :  { %s48_s19 = sshll.u32 %s14344_s18, 4  ;;  %s72_s21 = sshll.u32 %s14345_s20, 4  ;;  %s49_s19 = int_to_ptr.vmem [resolvable:$true] %s48_s19  ;;  %s73_s21 = int_to_ptr.vmem [resolvable:$true] %s72_s21 }
   0xb   :  { %s14012_s22 = scalar_lea.vmem %s49_s19, 4096  ;;  %p14017_p1 = scmp.lt.s32.totalorder %s49_s19, %s49_s19 }
   0xc   :  { %p14013_p0 = scmp.ne.s32.totalorder %s49_s19, %s14012_s22  ;;  %p14018_p2 = scmp.lt.s32.totalorder %s14012_s22, %s14012_s22 }
   0xe   :  { %p14019_p3 = por %p14018_p2, %p14017_p1 }
  0x10   :  { %p14020_p4 = pnand %p14019_p3, %p14013_p0 }
  0x12   :  { %14023 = shalt.err (!%p14020_p4)
}
  0x13   :  { %s14346_s23 = smov 64   ;;  %s14347_s24 = smov 4  }
  0x14   :  { %54 = dma.hbm_to_vmem [thread:$0]  %s16118_s1, 4096, %s49_s19, [#allocation8], %s14346_s23, %s14346_s23, %s14347_s24  }
  0x15   :  { %s14032_s27 = scalar_lea.vmem %s73_s21, 4096  ;;  %p14037_p6 = scmp.lt.s32.totalorder %s73_s21, %s73_s21 }
  0x16   :  { %p14033_p5 = scmp.ne.s32.totalorder %s73_s21, %s14032_s27  ;;  %p14038_p7 = scmp.lt.s32.totalorder %s14032_s27, %s14032_s27 }
  0x18   :  { %p14039_p8 = por %p14038_p7, %p14037_p6 }
  0x1a   :  { %p14040_p9 = pnand %p14039_p8, %p14033_p5 }
  0x1c   :  { %14043 = shalt.err (!%p14040_p9)
}
  0x1d   :  { %78 = dma.hbm_to_vmem [thread:$0]  %s16120_s3, 4096, %s73_s21, [#allocation11], %s14346_s23, %s14346_s23, %s14347_s24  }
  0x1e   :  { %s14348_s30 = smov [#allocation13]   ;;  %s14349_s17 = smov [#allocation16]  }
  0x1f   :  { %s96_s16 = sshll.u32 %s14348_s30, 4  ;;  %s120_s18 = sshll.u32 %s14349_s17, 4  ;;  %s97_s16 = int_to_ptr.vmem [resolvable:$true] %s96_s16  ;;  %s121_s18 = int_to_ptr.vmem [resolvable:$true] %s120_s18 }
  0x20   :  { %s14052_s1 = scalar_lea.vmem %s97_s16, 4096  ;;  %p14057_p11 = scmp.lt.s32.totalorder %s97_s16, %s97_s16 }
  0x21   :  { %p14053_p10 = scmp.ne.s32.totalorder %s97_s16, %s14052_s1  ;;  %p14058_p12 = scmp.lt.s32.totalorder %s14052_s1, %s14052_s1 }
  0x23   :  { %p14059_p13 = por %p14058_p12, %p14057_p11 }
  0x25   :  { %p14060_p0 = pnand %p14059_p13, %p14053_p10 }
  0x27   :  { %14063 = shalt.err (!%p14060_p0)
}
  0x28   :  { %102 = dma.hbm_to_vmem [thread:$0]  %s16122_s5, 4096, %s97_s16, [#allocation14], %s14346_s23, %s14346_s23, %s14347_s24  }
  0x29   :  { %s14072_s3 = scalar_lea.vmem %s121_s18, 1024  ;;  %p14077_p2 = scmp.lt.s32.totalorder %s121_s18, %s121_s18 }
  0x2a   :  { %p14073_p1 = scmp.ne.s32.totalorder %s121_s18, %s14072_s3  ;;  %p14078_p3 = scmp.lt.s32.totalorder %s14072_s3, %s14072_s3 }
  0x2c   :  { %p14079_p4 = por %p14078_p3, %p14077_p2 }
  0x2e   :  { %p14080_p5 = pnand %p14079_p4, %p14073_p1 }
  0x30   :  { %14083 = shalt.err (!%p14080_p5)
}
  0x31   :  { %126 = dma.hbm_to_vmem [thread:$0]  %s16124_s7, 1024, %s121_s18, [#allocation17], %s14346_s23, %s14346_s23, %s14347_s24  }
  0x32   :  { %s14350_s25 = smov [#allocation19]   ;;  %s14351_s27 = smov [#allocation22]  }
  0x33   :  { %s144_s26 = sshll.u32 %s14350_s25, 4  ;;  %s168_s28 = sshll.u32 %s14351_s27, 4  ;;  %s145_s26 = int_to_ptr.vmem [resolvable:$true] %s144_s26  ;;  %s169_s28 = int_to_ptr.vmem [resolvable:$true] %s168_s28 }
  0x34   :  { %s14092_s5 = scalar_lea.vmem %s145_s26, 1024  ;;  %p14097_p7 = scmp.lt.s32.totalorder %s145_s26, %s145_s26 }
  0x35   :  { %p14093_p6 = scmp.ne.s32.totalorder %s145_s26, %s14092_s5  ;;  %p14098_p8 = scmp.lt.s32.totalorder %s14092_s5, %s14092_s5 }
  0x37   :  { %p14099_p9 = por %p14098_p8, %p14097_p7 }
  0x39   :  { %p14100_p10 = pnand %p14099_p9, %p14093_p6 }
  0x3b   :  { %14103 = shalt.err (!%p14100_p10)
}
  0x3c   :  { %150 = dma.hbm_to_vmem [thread:$0]  %s16126_s9, 1024, %s145_s26, [#allocation20], %s14346_s23, %s14346_s23, %s14347_s24  }
  0x3d   :  { %s14112_s7 = scalar_lea.vmem %s169_s28, 1024  ;;  %p14117_p12 = scmp.lt.s32.totalorder %s169_s28, %s169_s28 }
  0x3e   :  { %p14113_p11 = scmp.ne.s32.totalorder %s169_s28, %s14112_s7  ;;  %p14118_p13 = scmp.lt.s32.totalorder %s14112_s7, %s14112_s7 }
  0x40   :  { %p14119_p0 = por %p14118_p13, %p14117_p12 }
  0x42   :  { %p14120_p1 = pnand %p14119_p0, %p14113_p11 }
  0x44   :  { %14123 = shalt.err (!%p14120_p1)
}
  0x45   :  { %174 = dma.hbm_to_vmem [thread:$0]  %s16128_s11, 1024, %s169_s28, [#allocation23], %s14346_s23, %s14346_s23, %s14347_s24  }
  0x46   :  { %s14352_s18 = smov [#allocation4]   ;;  %s14353_s19 = smov [#allocation9]  }
  0x47   :  { %s36_s1 = sshll.u32 %s14352_s18, 4  ;;  %s60_s20 = sshll.u32 %s14353_s19, 4  ;;  %s37_s1 = int_to_ptr.vmem [resolvable:$true] %s36_s1  ;;  %s61_s20 = int_to_ptr.vmem [resolvable:$true] %s60_s20 }
  0x48   :  { %s14132_s9 = scalar_lea.vmem %s37_s1, 4096  ;;  %p14137_p3 = scmp.lt.s32.totalorder %s37_s1, %s37_s1 }
  0x49   :  { %p14133_p2 = scmp.ne.s32.totalorder %s37_s1, %s14132_s9  ;;  %p14138_p4 = scmp.lt.s32.totalorder %s14132_s9, %s14132_s9 }
  0x4b   :  { %p14139_p5 = por %p14138_p4, %p14137_p3 }
  0x4d   :  { %p14140_p6 = pnand %p14139_p5, %p14133_p2 }
  0x4f   :  { %14143 = shalt.err (!%p14140_p6)
}
  0x50   :  { %42 = dma.hbm_to_vmem [thread:$0]  %s16117_s0, 4096, %s37_s1, [#allocation5], %s14346_s23, %s14346_s23, %s14347_s24  }
  0x51   :  { %s14152_s11 = scalar_lea.vmem %s61_s20, 4096  ;;  %p14157_p8 = scmp.lt.s32.totalorder %s61_s20, %s61_s20 }
  0x52   :  { %p14153_p7 = scmp.ne.s32.totalorder %s61_s20, %s14152_s11  ;;  %p14158_p9 = scmp.lt.s32.totalorder %s14152_s11, %s14152_s11 }
  0x54   :  { %p14159_p10 = por %p14158_p9, %p14157_p8 }
  0x56   :  { %p14160_p11 = pnand %p14159_p10, %p14153_p7 }
  0x58   :  { %14163 = shalt.err (!%p14160_p11)
}
  0x59   :  { %66 = dma.hbm_to_vmem [thread:$0]  %s16119_s2, 4096, %s61_s20, [#allocation8], %s14346_s23, %s14346_s23, %s14347_s24  }
  0x5a   :  { %s14354_s26 = smov [#allocation12]   ;;  %s14355_s28 = smov [#allocation15]  }
  0x5b   :  { %s84_s27 = sshll.u32 %s14354_s26, 4  ;;  %s108_s5 = sshll.u32 %s14355_s28, 4  ;;  %s85_s27 = int_to_ptr.vmem [resolvable:$true] %s84_s27  ;;  %s109_s5 = int_to_ptr.vmem [resolvable:$true] %s108_s5 }
  0x5c   :  { %s14172_s0 = scalar_lea.vmem %s85_s27, 4096  ;;  %p14177_p13 = scmp.lt.s32.totalorder %s85_s27, %s85_s27 }
  0x5d   :  { %p14173_p12 = scmp.ne.s32.totalorder %s85_s27, %s14172_s0  ;;  %p14178_p0 = scmp.lt.s32.totalorder %s14172_s0, %s14172_s0 }
  0x5f   :  { %p14179_p1 = por %p14178_p0, %p14177_p13 }
  0x61   :  { %p14180_p2 = pnand %p14179_p1, %p14173_p12 }
  0x63   :  { %14183 = shalt.err (!%p14180_p2)
}
  0x64   :  { %90 = dma.hbm_to_vmem [thread:$0]  %s16121_s4, 4096, %s85_s27, [#allocation11], %s14346_s23, %s14346_s23, %s14347_s24  }
  0x65   :  { %s14192_s2 = scalar_lea.vmem %s109_s5, 1024  ;;  %p14197_p4 = scmp.lt.s32.totalorder %s109_s5, %s109_s5 }
  0x66   :  { %p14193_p3 = scmp.ne.s32.totalorder %s109_s5, %s14192_s2  ;;  %p14198_p5 = scmp.lt.s32.totalorder %s14192_s2, %s14192_s2 }
  0x68   :  { %p14199_p6 = por %p14198_p5, %p14197_p4 }
  0x6a   :  { %p14200_p7 = pnand %p14199_p6, %p14193_p3 }
  0x6c   :  { %14203 = shalt.err (!%p14200_p7)
}
  0x6d   :  { %114 = dma.hbm_to_vmem [thread:$0]  %s16123_s6, 1024, %s109_s5, [#allocation14], %s14346_s23, %s14346_s23, %s14347_s24  }
  0x6e   :  { %s14356_s17 = smov [#allocation18]   ;;  %s14357_s1 = smov [#allocation21]  }
  0x6f   :  { %s132_s18 = sshll.u32 %s14356_s17, 4  ;;  %s156_s19 = sshll.u32 %s14357_s1, 4  ;;  %s133_s18 = int_to_ptr.vmem [resolvable:$true] %s132_s18  ;;  %s157_s19 = int_to_ptr.vmem [resolvable:$true] %s156_s19 }
  0x70   :  { %s14212_s4 = scalar_lea.vmem %s133_s18, 1024  ;;  %p14217_p9 = scmp.lt.s32.totalorder %s133_s18, %s133_s18 }
  0x71   :  { %p14213_p8 = scmp.ne.s32.totalorder %s133_s18, %s14212_s4  ;;  %p14218_p10 = scmp.lt.s32.totalorder %s14212_s4, %s14212_s4 }
  0x73   :  { %p14219_p11 = por %p14218_p10, %p14217_p9 }
  0x75   :  { %p14220_p12 = pnand %p14219_p11, %p14213_p8 }
  0x77   :  { %14223 = shalt.err (!%p14220_p12)
}
  0x78   :  { %138 = dma.hbm_to_vmem [thread:$0]  %s16125_s8, 1024, %s133_s18, [#allocation17], %s14346_s23, %s14346_s23, %s14347_s24  }
  0x79   :  { %s14232_s6 = scalar_lea.vmem %s157_s19, 1024  ;;  %p14237_p0 = scmp.lt.s32.totalorder %s157_s19, %s157_s19 }
  0x7a   :  { %p14233_p13 = scmp.ne.s32.totalorder %s157_s19, %s14232_s6  ;;  %p14238_p1 = scmp.lt.s32.totalorder %s14232_s6, %s14232_s6 }
  0x7c   :  { %p14239_p2 = por %p14238_p1, %p14237_p0 }
  0x7e   :  { %p14240_p3 = pnand %p14239_p2, %p14233_p13 }
  0x80   :  { %14243 = shalt.err (!%p14240_p3)
}
  0x81   :  { %162 = dma.hbm_to_vmem [thread:$0]  %s16127_s10, 1024, %s157_s19, [#allocation20], %s14346_s23, %s14346_s23, %s14347_s24  }
  0x82   :  { %s14358_s11 = smov [#allocation24]   ;;  %s14359_s25 = smov [#allocation25]  }
  0x83   :  { %s180_s22 = sshll.u32 %s14358_s11, 4  ;;  %s192_s26 = sshll.u32 %s14359_s25, 4  ;;  %s181_s22 = int_to_ptr.vmem [resolvable:$true] %s180_s22  ;;  %s193_s26 = int_to_ptr.vmem [resolvable:$true] %s192_s26 }
  0x84   :  { %s14252_s8 = scalar_lea.vmem %s181_s22, 1024  ;;  %p14257_p5 = scmp.lt.s32.totalorder %s181_s22, %s181_s22 }
  0x85   :  { %p14253_p4 = scmp.ne.s32.totalorder %s181_s22, %s14252_s8  ;;  %p14258_p6 = scmp.lt.s32.totalorder %s14252_s8, %s14252_s8 }
  0x87   :  { %p14259_p7 = por %p14258_p6, %p14257_p5 }
  0x89   :  { %p14260_p8 = pnand %p14259_p7, %p14253_p4 }
  0x8b   :  { %14263 = shalt.err (!%p14260_p8)
}
  0x8c   :  { %186 = dma.hbm_to_vmem [thread:$0]  %s16129_s12, 1024, %s181_s22, [#allocation23], %s14346_s23, %s14346_s23, %s14347_s24  }
  0x8d   :  { %s14272_s10 = scalar_lea.vmem %s193_s26, 1024  ;;  %p14277_p10 = scmp.lt.s32.totalorder %s193_s26, %s193_s26 }
  0x8e   :  { %p14273_p9 = scmp.ne.s32.totalorder %s193_s26, %s14272_s10  ;;  %p14278_p11 = scmp.lt.s32.totalorder %s14272_s10, %s14272_s10 }
  0x90   :  { %p14279_p12 = por %p14278_p11, %p14277_p10 }
  0x92   :  { %p14280_p13 = pnand %p14279_p12, %p14273_p9 }
  0x94   :  { %14283 = shalt.err (!%p14280_p13)
}
  0x95   :  { %198 = dma.hbm_to_vmem [thread:$0]  %s16130_s13, 1024, %s193_s26, [#allocation26], %s14346_s23, %s14346_s23, %s14347_s24  }
  0x96   :  { %14324 = dma.done.wait [#allocation5], 4096  }
  0x97   :  { %14325 = vsyncadd [#allocation5], 4294963200 }
  0x98   :  { %14326 = dma.done.wait [#allocation8], 8192  }
  0x99   :  { %14327 = vsyncadd [#allocation8], 4294959104 }
  0x9a   :  { %14328 = dma.done.wait [#allocation11], 8192  }
  0x9b   :  { %14329 = vsyncadd [#allocation11], 4294959104 }
  0x9c   :  { %14330 = dma.done.wait [#allocation14], 5120  }
  0x9d   :  { %14331 = vsyncadd [#allocation14], 4294962176 }
  0x9e   :  { %14332 = dma.done.wait [#allocation17], 2048  }
  0x9f   :  { %14333 = vsyncadd [#allocation17], 4294965248 }
  0xa0   :  { %14334 = dma.done.wait [#allocation20], 2048  }
  0xa1   :  { %14335 = vsyncadd [#allocation20], 4294965248 }
  0xa2   :  { %14336 = dma.done.wait [#allocation23], 2048  }
  0xa3   :  { %14337 = vsyncadd [#allocation23], 4294965248 }
  0xa4   :  { %14338 = dma.done.wait [#allocation26], 1024  }
  0xa5   :  { %14339 = vsyncadd [#allocation26], 4294966272  ;;  %v14528_v0 = vld [vmem:[#allocation12 + $0x38] sm:$0xff]   ;;  %v14530_v1 = vld [vmem:[#allocation12 + $0x30] sm:$0xff]   ;;  %s14360_s12 = smov [#allocation28]  }
  0xa6   :  { %11220 = vmatprep.subr.bf16.mxu1 %v14528_v0  ;;  %v14535_v2 = vld [vmem:[#allocation12 + $0x28] sm:$0xff]   ;;  %v14538_v3 = vld [vmem:[#allocation12 + $0x20] sm:$0xff]   ;;  %v13330_v5 = vld [vmem:[#allocation13 + $0x38] sm:$0xff]   ;;  %s9885_s13 = sshll.u32 %s14360_s12, 4  ;;  %s9886_s13 = int_to_ptr.vmem [resolvable:$true] %s9885_s13 }
  0xa7   :  { %11221 = vmatpush3.bf16.msra.mxu1 %v14528_v0  ;;  %v13328_v4 = vld [vmem:[#allocation4] sm:$0xff]   ;;  %v14542_v6 = vld [vmem:[#allocation12 + $0x18] sm:$0xff]   ;;  %v13331_v7 = vld [vmem:[#allocation13 + $0x30] sm:$0xff]   ;;  %11284 = vmatprep.subr.bf16.mxu0 %v13330_v5  ;;  %s14284_s23 = scalar_lea.vmem %s9886_s13, 2048  ;;  %p14289_p1 = scmp.lt.s32.totalorder %s9886_s13, %s9886_s13 }
  0xa8   :  { %11222 = vmatprep.subr.bf16.mxu1 %v14530_v1  ;;  %11236 = vmatprep.mubr.bf16.mxu1 %v13328_v4  ;;  %v14546_v8 = vld [vmem:[#allocation12 + $0x10] sm:$0xff]   ;;  %v13334_v9 = vld [vmem:[#allocation13 + $0x28] sm:$0xff]   ;;  %v13335_v11 = vld [vmem:[#allocation13 + $0x20] sm:$0xff]   ;;  %p14285_p0 = scmp.ne.s32.totalorder %s9886_s13, %s14284_s23  ;;  %p14290_p2 = scmp.lt.s32.totalorder %s14284_s23, %s14284_s23 }
  0xa9   :  { %11285 = vmatpush3.bf16.msra.mxu0 %v13330_v5  ;;  %v14550_v10 = vld [vmem:[#allocation12 + $0x8] sm:$0xff]   ;;  %v14554_v12 = vld [vmem:[#allocation12] sm:$0xff]   ;;  %v13338_v13 = vld [vmem:[#allocation13 + $0x18] sm:$0xff]  }
  0xaa   :  { %11286 = vmatprep.subr.bf16.mxu0 %v13331_v7  ;;  %v13339_v14 = vld [vmem:[#allocation13 + $0x10] sm:$0xff]   ;;  %v13329_v15 = vld [vmem:[#allocation4 + $0x8] sm:$0xff]   ;;  %v13350_v16 = vld [vmem:[#allocation10] sm:$0xff]   ;;  %p14291_p3 = por %p14290_p2, %p14289_p1 }
  0xab   :  { %11223 = vmatpush3.bf16.msra.mxu1 %v14530_v1  ;;  %v13332_v17 = vld [vmem:[#allocation4 + $0x10] sm:$0xff]   ;;  %v13342_v18 = vld [vmem:[#allocation13 + $0x8] sm:$0xff]   ;;  %11300 = vmatprep.mubr.bf16.mxu0 %v13350_v16  ;;  %v13343_v19 = vld [vmem:[#allocation13] sm:$0xff]  }
  0xac   :  { %11224 = vmatprep.subr.bf16.mxu1 %v14535_v2  ;;  %v13333_v20 = vld [vmem:[#allocation4 + $0x18] sm:$0xff]   ;;  %v13336_v21 = vld [vmem:[#allocation4 + $0x20] sm:$0xff]   ;;  %v13351_v22 = vld [vmem:[#allocation10 + $0x8] sm:$0xff]   ;;  %p14292_p4 = pnand %p14291_p3, %p14285_p0 }
  0xad   :  { %11287 = vmatpush3.bf16.msra.mxu0 %v13331_v7  ;;  %v13354_v23 = vld [vmem:[#allocation10 + $0x10] sm:$0xff]   ;;  %v13337_v24 = vld [vmem:[#allocation4 + $0x28] sm:$0xff]   ;;  %v13355_v26 = vld [vmem:[#allocation10 + $0x18] sm:$0xff]  }
  0xae   :  { %11288 = vmatprep.subr.bf16.mxu0 %v13334_v9  ;;  %v13340_v25 = vld [vmem:[#allocation4 + $0x30] sm:$0xff]   ;;  %v13358_v27 = vld [vmem:[#allocation10 + $0x20] sm:$0xff]   ;;  %v13341_v28 = vld [vmem:[#allocation4 + $0x38] sm:$0xff]  }
  0xaf   :  { %11225 = vmatpush3.bf16.msra.mxu1 %v14535_v2  ;;  %v13344_v29 = vld [vmem:[#allocation7] sm:$0xff]   ;;  %v13359_v30 = vld [vmem:[#allocation10 + $0x28] sm:$0xff]   ;;  %v13362_v31 = vld [vmem:[#allocation10 + $0x30] sm:$0xff]  }
  0xb0   :  { %11226 = vmatprep.subr.bf16.mxu1 %v14538_v3  ;;  %v13345_v32 = vld [vmem:[#allocation7 + $0x8] sm:$0xff]   ;;  %v13346_v33 = vld [vmem:[#allocation7 + $0x10] sm:$0xff]   ;;  %v13363_v34 = vld [vmem:[#allocation10 + $0x38] sm:$0xff]  }
  0xb1   :  { %11289 = vmatpush3.bf16.msra.mxu0 %v13334_v9  ;;  %v13347_v35 = vld [vmem:[#allocation7 + $0x18] sm:$0xff]   ;;  %v13348_v36 = vld [vmem:[#allocation7 + $0x20] sm:$0xff]   ;;  %v13349_v37 = vld [vmem:[#allocation7 + $0x28] sm:$0xff]  }
  0xb2   :  { %11290 = vmatprep.subr.bf16.mxu0 %v13335_v11  ;;  %v13352_v38 = vld [vmem:[#allocation7 + $0x30] sm:$0xff]   ;;  %v13353_v39 = vld [vmem:[#allocation7 + $0x38] sm:$0xff]   ;;  %v13356_v40 = vld [vmem:[#allocation9] sm:$0xff]  }
  0xb3   :  { %11227 = vmatpush3.bf16.msra.mxu1 %v14538_v3  ;;  %v13368_v41 = vld [vmem:[#allocation15 + $0x38] sm:$0xff]   ;;  %v13357_v42 = vld [vmem:[#allocation9 + $0x8] sm:$0xff]   ;;  %v13360_v43 = vld [vmem:[#allocation9 + $0x10] sm:$0xff]  }
  0xb4   :  { %11228 = vmatprep.subr.bf16.mxu1 %v14542_v6  ;;  %v13369_v44 = vld [vmem:[#allocation15 + $0x30] sm:$0xff]   ;;  %v13370_v45 = vld [vmem:[#allocation15 + $0x28] sm:$0xff]   ;;  %v13361_v46 = vld [vmem:[#allocation9 + $0x18] sm:$0xff]  }
  0xb5   :  { %11291 = vmatpush3.bf16.msra.mxu0 %v13335_v11  ;;  %v13364_v47 = vld [vmem:[#allocation9 + $0x20] sm:$0xff]   ;;  %v13372_v49 = vld [vmem:[#allocation15 + $0x18] sm:$0xff]   ;;  %v13365_v51 = vld [vmem:[#allocation9 + $0x28] sm:$0xff]  }
  0xb6   :  { %11292 = vmatprep.subr.bf16.mxu0 %v13338_v13  ;;  %v13371_v48 = vld [vmem:[#allocation15 + $0x20] sm:$0xff]   ;;  %v13376_v50 = vld [vmem:[#allocation16 + $0x38] sm:$0xff]   ;;  %v13366_v52 = vld [vmem:[#allocation9 + $0x30] sm:$0xff]  }
  0xb7   :  { %11229 = vmatpush3.bf16.msra.mxu1 %v14542_v6  ;;  %v13373_v53 = vld [vmem:[#allocation15 + $0x10] sm:$0xff]   ;;  %v13374_v55 = vld [vmem:[#allocation15 + $0x8] sm:$0xff]   ;;  %v13367_v57 = vld [vmem:[#allocation9 + $0x38] sm:$0xff]  }
  0xb8   :  { %11230 = vmatprep.subr.bf16.mxu1 %v14546_v8  ;;  %v13377_v54 = vld [vmem:[#allocation16 + $0x30] sm:$0xff]   ;;  %v13378_v56 = vld [vmem:[#allocation16 + $0x28] sm:$0xff]   ;;  %v13375_v58 = vld [vmem:[#allocation15] sm:$0xff]  }
  0xb9   :  { %11293 = vmatpush3.bf16.msra.mxu0 %v13338_v13  ;;  %v13379_v59 = vld [vmem:[#allocation16 + $0x20] sm:$0xff]   ;;  %v13380_v60 = vld [vmem:[#allocation16 + $0x18] sm:$0xff]   ;;  %v13382_v62 = vld [vmem:[#allocation16 + $0x10] sm:$0xff]  }
  0xba   :  { %11294 = vmatprep.subr.bf16.mxu0 %v13339_v14  ;;  %v13381_v61 = vld [vmem:[#allocation18 + $0x38] sm:$0xff]   ;;  %v13384_v63 = vld [vmem:[#allocation16 + $0x8] sm:$0xff]  }
  0xbb   :  { %11231 = vmatpush3.bf16.msra.mxu1 %v14546_v8 }
  0xbc   :  { %11232 = vmatprep.subr.bf16.mxu1 %v14550_v10 }
  0xbd   :  { %11295 = vmatpush3.bf16.msra.mxu0 %v13339_v14 }
  0xbe   :  { %11296 = vmatprep.subr.bf16.mxu0 %v13342_v18 }
  0xbf   :  { %11233 = vmatpush3.bf16.msra.mxu1 %v14550_v10 }
  0xc0   :  { %11234 = vmatprep.subr.bf16.mxu1 %v14554_v12 }
  0xc1   :  { %11297 = vmatpush3.bf16.msra.mxu0 %v13342_v18 }
  0xc2   :  { %11298 = vmatprep.subr.bf16.mxu0 %v13343_v19 }
  0xc3   :  { %11235 = vmatpush3.bf16.msra.mxu1 %v14554_v12 }
  0xc4   :  { %11252 = vmatprep.subr.bf16.mxu1 %v13330_v5 }
  0xc5   :  { %11299 = vmatpush3.bf16.msra.mxu0 %v13343_v19 }
  0xc6   :  { %11237 = vmatmul.mubr.bf16.vlgmr.msra.gmra.mxu1 %v13329_v15  ;;  %11348 = vmatprep.subr.bf16.mxu0 %v13376_v50 }
  0xc7   :  { %11253 = vmatpush3.bf16.msra.mxu1 %v13330_v5  ;;  %11240 = vmatprep.mubr.bf16.mxu1 %v13332_v17 }
  0xc8   :  { %11254 = vmatprep.subr.bf16.mxu1 %v13331_v7  ;;  %11301 = vmatmul.mubr.bf16.vlgmr.msra.gmra.mxu0 %v13351_v22 }
  0xc9   :  { %11304 = vmatprep.mubr.bf16.mxu0 %v13354_v23  ;;  %11349 = vmatpush3.bf16.msra.mxu0 %v13376_v50 }
  0xca   :  { %11350 = vmatprep.subr.bf16.mxu0 %v13377_v54 }
  0xcb   :  { %11255 = vmatpush3.bf16.msra.mxu1 %v13331_v7 }
  0xcc   :  { %11256 = vmatprep.subr.bf16.mxu1 %v13334_v9 }
  0xcd   :  { %11351 = vmatpush3.bf16.msra.mxu0 %v13377_v54 }
  0xce   :  { %11241 = vmatmul.mubr.bf16.gmra.mxu1 %v13333_v20  ;;  %11352 = vmatprep.subr.bf16.mxu0 %v13378_v56  ;;  %v13387_v20 = vld [vmem:[#allocation18 + $0x20] sm:$0xff]  }
  0xcf   :  { %11257 = vmatpush3.bf16.msra.mxu1 %v13334_v9  ;;  %11244 = vmatprep.mubr.bf16.mxu1 %v13336_v21  ;;  %v13383_v9 = vld [vmem:[#allocation18 + $0x30] sm:$0xff]  }
  0xd0   :  { %11258 = vmatprep.subr.bf16.mxu1 %v13335_v11  ;;  %11305 = vmatmul.mubr.bf16.gmra.mxu0 %v13355_v26 }
  0xd1   :  { %11308 = vmatprep.mubr.bf16.mxu0 %v13358_v27  ;;  %11353 = vmatpush3.bf16.msra.mxu0 %v13378_v56 }
  0xd2   :  { %11354 = vmatprep.subr.bf16.mxu0 %v13379_v59 }
  0xd3   :  { %11259 = vmatpush3.bf16.msra.mxu1 %v13335_v11 }
  0xd4   :  { %11260 = vmatprep.subr.bf16.mxu1 %v13338_v13 }
  0xd5   :  { %11355 = vmatpush3.bf16.msra.mxu0 %v13379_v59  ;;  %v13392_v59 = vld [vmem:[#allocation19 + $0x28] sm:$0xff]  }
  0xd6   :  { %11245 = vmatmul.mubr.bf16.gmra.mxu1 %v13337_v24  ;;  %11356 = vmatprep.subr.bf16.mxu0 %v13380_v60 }
  0xd7   :  { %11261 = vmatpush3.bf16.msra.mxu1 %v13338_v13  ;;  %11248 = vmatprep.mubr.bf16.mxu1 %v13340_v25  ;;  %v13385_v13 = vld [vmem:[#allocation18 + $0x28] sm:$0xff]   ;;  %v13389_v25 = vld [vmem:[#allocation18 + $0x18] sm:$0xff]  }
  0xd8   :  { %11262 = vmatprep.subr.bf16.mxu1 %v13339_v14  ;;  %11309 = vmatmul.mubr.bf16.gmra.mxu0 %v13359_v30 }
  0xd9   :  { %11312 = vmatprep.mubr.bf16.mxu0 %v13362_v31  ;;  %11357 = vmatpush3.bf16.msra.mxu0 %v13380_v60 }
  0xda   :  { %11358 = vmatprep.subr.bf16.mxu0 %v13382_v62 }
  0xdb   :  { %11263 = vmatpush3.bf16.msra.mxu1 %v13339_v14 }
  0xdc   :  { %11264 = vmatprep.subr.bf16.mxu1 %v13342_v18 }
  0xdd   :  { %11359 = vmatpush3.bf16.msra.mxu0 %v13382_v62 }
  0xde   :  { %11249 = vmatmul.mubr.bf16.gmra.mxu1 %v13341_v28  ;;  %11360 = vmatprep.subr.bf16.mxu0 %v13384_v63 }
  0xdf   :  { %11265 = vmatpush3.bf16.msra.mxu1 %v13342_v18  ;;  %11268 = vmatprep.mubr.bf16.mxu1 %v13344_v29 }
  0xe0   :  { %11266 = vmatprep.subr.bf16.mxu1 %v13343_v19  ;;  %11313 = vmatmul.mubr.bf16.gmra.mxu0 %v13363_v34 }
  0xe1   :  { %11361 = vmatpush3.bf16.msra.mxu0 %v13384_v63 }
  0xe3   :  { %11267 = vmatpush3.bf16.msra.mxu1 %v13343_v19 }
  0xe4   :  { %11316 = vmatprep.subr.bf16.mxu1 %v14528_v0 }
  0xe6   :  { %11269 = vmatmul.mubr.bf16.vlgmr.msra.gmra.mxu1 %v13345_v32  ;;  %v13391_v32 = vld [vmem:[#allocation18 + $0x10] sm:$0xff]  }
  0xe7   :  { %11317 = vmatpush3.bf16.msra.mxu1 %v14528_v0  ;;  %11272 = vmatprep.mubr.bf16.mxu1 %v13346_v33  ;;  %v13386_v0 = vld [vmem:[#allocation16] sm:$0xff]  }
  0xe8   :  { %11318 = vmatprep.subr.bf16.mxu1 %v14530_v1  ;;  %11362 = vmatprep.subr.bf16.mxu0 %v13386_v0 }
  0xe9   :  { %11363 = vmatpush3.bf16.msra.mxu0 %v13386_v0 }
  0xeb   :  { %11319 = vmatpush3.bf16.msra.mxu1 %v14530_v1  ;;  %v14576_v1 = vld [vmem:[#allocation19 + $0x38] sm:$0xff]  }
  0xec   :  { %11320 = vmatprep.subr.bf16.mxu1 %v14535_v2  ;;  %11412 = vmatprep.subr.bf16.mxu0 %v14576_v1 }
  0xee   :  { %11273 = vmatmul.mubr.bf16.gmra.mxu1 %v13347_v35 }
  0xef   :  { %11321 = vmatpush3.bf16.msra.mxu1 %v14535_v2  ;;  %11276 = vmatprep.mubr.bf16.mxu1 %v13348_v36 }
  0xf0   :  { %11322 = vmatprep.subr.bf16.mxu1 %v14538_v3 }
  0xf3   :  { %11323 = vmatpush3.bf16.msra.mxu1 %v14538_v3 }
  0xf4   :  { %11324 = vmatprep.subr.bf16.mxu1 %v14542_v6 }
  0xf6   :  { %11277 = vmatmul.mubr.bf16.gmra.mxu1 %v13349_v37  ;;  %v13393_v37 = vld [vmem:[#allocation18 + $0x8] sm:$0xff]  }
  0xf7   :  { %11325 = vmatpush3.bf16.msra.mxu1 %v14542_v6  ;;  %11280 = vmatprep.mubr.bf16.mxu1 %v13352_v38 }
  0xf8   :  { %11326 = vmatprep.subr.bf16.mxu1 %v14546_v8 }
  0xfb   :  { %11327 = vmatpush3.bf16.msra.mxu1 %v14546_v8 }
  0xfc   :  { %11328 = vmatprep.subr.bf16.mxu1 %v14550_v10 }
  0xfe   :  { %11281 = vmatmul.mubr.bf16.gmra.mxu1 %v13353_v39 }
  0xff   :  { %11329 = vmatpush3.bf16.msra.mxu1 %v14550_v10  ;;  %11332 = vmatprep.mubr.bf16.mxu1 %v13356_v40 }
 0x100   :  { %11330 = vmatprep.subr.bf16.mxu1 %v14554_v12 }
 0x103   :  { %11331 = vmatpush3.bf16.msra.mxu1 %v14554_v12 }
 0x104   :  { %11380 = vmatprep.subr.bf16.mxu1 %v13368_v41 }
 0x106   :  { %11333 = vmatmul.mubr.bf16.vlgmr.msra.gmra.mxu1 %v13357_v42 }
 0x107   :  { %11336 = vmatprep.mubr.bf16.mxu1 %v13360_v43  ;;  %11381 = vmatpush3.bf16.msra.mxu1 %v13368_v41 }
 0x108   :  { %11382 = vmatprep.subr.bf16.mxu1 %v13369_v44 }
 0x10b   :  { %11383 = vmatpush3.bf16.msra.mxu1 %v13369_v44  ;;  %v13395_v44 = vld [vmem:[#allocation18] sm:$0xff]  }
 0x10c   :  { %11384 = vmatprep.subr.bf16.mxu1 %v13370_v45 }
 0x10e   :  { %11337 = vmatmul.mubr.bf16.gmra.mxu1 %v13361_v46 }
 0x10f   :  { %11340 = vmatprep.mubr.bf16.mxu1 %v13364_v47  ;;  %11385 = vmatpush3.bf16.msra.mxu1 %v13370_v45 }
 0x110   :  { %11386 = vmatprep.subr.bf16.mxu1 %v13371_v48 }
 0x113   :  { %11387 = vmatpush3.bf16.msra.mxu1 %v13371_v48 }
 0x114   :  { %11388 = vmatprep.subr.bf16.mxu1 %v13372_v49 }
 0x116   :  { %11341 = vmatmul.mubr.bf16.gmra.mxu1 %v13365_v51 }
 0x117   :  { %11344 = vmatprep.mubr.bf16.mxu1 %v13366_v52  ;;  %11389 = vmatpush3.bf16.msra.mxu1 %v13372_v49 }
 0x118   :  { %11390 = vmatprep.subr.bf16.mxu1 %v13373_v53 }
 0x11b   :  { %11391 = vmatpush3.bf16.msra.mxu1 %v13373_v53 }
 0x11c   :  { %11392 = vmatprep.subr.bf16.mxu1 %v13374_v55 }
 0x11e   :  { %11345 = vmatmul.mubr.bf16.gmra.mxu1 %v13367_v57 }
 0x11f   :  { %11393 = vmatpush3.bf16.msra.mxu1 %v13374_v55  ;;  %v13390_v55 = vld [vmem:[#allocation19 + $0x30] sm:$0xff]  }
 0x120   :  { %11394 = vmatprep.subr.bf16.mxu1 %v13375_v58 }
 0x123   :  { %11395 = vmatpush3.bf16.msra.mxu1 %v13375_v58 }
 0x124   :  { %11444 = vmatprep.subr.bf16.mxu1 %v13381_v61 }
 0x186   :  { %v11238_v2 = vpop.f32.mrf.mxu1 }
 0x188   :  { %v568_v3 = vpop.f32.mrf.mxu1  ;;  %v14579_v11 = vpop.f32.mrf.mxu0 }
 0x18a   :  { %v11239_v4 = vpop.f32.mrf.mxu1  ;;  %v906_v14 = vpop.f32.mrf.mxu0 }
 0x18b   :  { %v1115_v7 = vpack.c.bf16 %v11239_v4, %v11238_v2  ;;  %v13394_v4 = vld [vmem:[#allocation19 + $0x20] sm:$0xff]  }
 0x18c   :  { %v571_v5 = vpop.f32.mrf.mxu1  ;;  %v14581_v16 = vpop.f32.mrf.mxu0 }
 0x18d   :  { %v1114_v6 = vpack.c.bf16 %v571_v5, %v568_v3  ;;  %v1437_v50 = vpack.c.bf16 %v14581_v16, %v14579_v11 }
 0x18e   :  { %v11242_v8 = vpop.f32.mrf.mxu1  ;;  %v909_v21 = vpop.f32.mrf.mxu0 }
 0x18f   :  { %11396 = vmatprep.mubr.bf16.mxu1 %v1114_v6  ;;  %v1436_v41 = vpack.c.bf16 %v909_v21, %v906_v14 }
 0x190   :  { %v584_v10 = vpop.f32.mrf.mxu1  ;;  %11397 = vmatmul.mubr.bf16.vlgmr.msra.gmra.mxu1 %v1115_v7  ;;  %v14583_v23 = vpop.f32.mrf.mxu0  ;;  %v13396_v7 = vld [vmem:[#allocation19 + $0x18] sm:$0xff]  }
 0x191   :  { %11445 = vmatpush3.bf16.msra.mxu1 %v13381_v61 }
 0x192   :  { %v11243_v12 = vpop.f32.mrf.mxu1  ;;  %11446 = vmatprep.subr.bf16.mxu1 %v13383_v9  ;;  %v922_v26 = vpop.f32.mrf.mxu0 }
 0x193   :  { %v1117_v18 = vpack.c.bf16 %v11243_v12, %v11242_v8 }
 0x194   :  { %v587_v15 = vpop.f32.mrf.mxu1  ;;  %v14585_v28 = vpop.f32.mrf.mxu0 }
 0x195   :  { %v1116_v17 = vpack.c.bf16 %v587_v15, %v584_v10  ;;  %11447 = vmatpush3.bf16.msra.mxu1 %v13383_v9  ;;  %v1439_v62 = vpack.c.bf16 %v14585_v28, %v14583_v23  ;;  %v13397_v15 = vld [vmem:[#allocation19 + $0x10] sm:$0xff]  }
 0x196   :  { %v11246_v19 = vpop.f32.mrf.mxu1  ;;  %11448 = vmatprep.subr.bf16.mxu1 %v13385_v13  ;;  %v925_v33 = vpop.f32.mrf.mxu0 }
 0x197   :  { %11400 = vmatprep.mubr.bf16.mxu1 %v1116_v17  ;;  %v1438_v52 = vpack.c.bf16 %v925_v33, %v922_v26  ;;  %v13704_v26 = vld [vmem:[#allocation7] sm:$0xff]  }
 0x198   :  { %v600_v22 = vpop.f32.mrf.mxu1  ;;  %11401 = vmatmul.mubr.bf16.gmra.mxu1 %v1117_v18  ;;  %v14587_v35 = vpop.f32.mrf.mxu0  ;;  %v13398_v18 = vld [vmem:[#allocation19 + $0x8] sm:$0xff]  }
 0x199   :  { %11449 = vmatpush3.bf16.msra.mxu1 %v13385_v13 }
 0x19a   :  { %v11247_v24 = vpop.f32.mrf.mxu1  ;;  %11450 = vmatprep.subr.bf16.mxu1 %v13387_v20  ;;  %v938_v38 = vpop.f32.mrf.mxu0 }
 0x19b   :  { %v1119_v30 = vpack.c.bf16 %v11247_v24, %v11246_v19  ;;  %v13399_v24 = vld [vmem:[#allocation19] sm:$0xff]  }
 0x19c   :  { %v603_v27 = vpop.f32.mrf.mxu1  ;;  %v11311_v45 = vpop.f32.mrf.mxu0 }
 0x19d   :  { %v1118_v29 = vpack.c.bf16 %v603_v27, %v600_v22  ;;  %11451 = vmatpush3.bf16.msra.mxu1 %v13387_v20  ;;  %v1441_v10 = vpack.c.bf16 %v11311_v45, %v14587_v35 }
 0x19e   :  { %v11250_v31 = vpop.f32.mrf.mxu1  ;;  %11452 = vmatprep.subr.bf16.mxu1 %v13389_v25  ;;  %v941_v48 = vpop.f32.mrf.mxu0 }
 0x19f   :  { %11404 = vmatprep.mubr.bf16.mxu1 %v1118_v29  ;;  %v1440_v0 = vpack.c.bf16 %v941_v48, %v938_v38 }
 0x1a0   :  { %v616_v34 = vpop.f32.mrf.mxu1  ;;  %11405 = vmatmul.mubr.bf16.gmra.mxu1 %v1119_v30  ;;  %v11314_v56 = vpop.f32.mrf.mxu0 }
 0x1a1   :  { %11453 = vmatpush3.bf16.msra.mxu1 %v13389_v25 }
 0x1a2   :  { %v11251_v36 = vpop.f32.mrf.mxu1  ;;  %11454 = vmatprep.subr.bf16.mxu1 %v13391_v32  ;;  %v954_v60 = vpop.f32.mrf.mxu0 }
 0x1a3   :  { %v1121_v42 = vpack.c.bf16 %v11251_v36, %v11250_v31 }
 0x1a4   :  { %v619_v39 = vpop.f32.mrf.mxu1  ;;  %v11315_v5 = vpop.f32.mrf.mxu0 }
 0x1a5   :  { %v1120_v40 = vpack.c.bf16 %v619_v39, %v616_v34  ;;  %11455 = vmatpush3.bf16.msra.mxu1 %v13391_v32  ;;  %v1443_v20 = vpack.c.bf16 %v11315_v5, %v11314_v56 }
 0x1a6   :  { %v11270_v43 = vpop.f32.mrf.mxu1  ;;  %11456 = vmatprep.subr.bf16.mxu1 %v13393_v37  ;;  %v957_v8 = vpop.f32.mrf.mxu0 }
 0x1a7   :  { %11408 = vmatprep.mubr.bf16.mxu1 %v1120_v40  ;;  %v1442_v12 = vpack.c.bf16 %v957_v8, %v954_v60 }
 0x1a8   :  { %v761_v46 = vpop.f32.mrf.mxu1  ;;  %11409 = vmatmul.mubr.bf16.gmra.mxu1 %v1121_v42 }
 0x1a9   :  { %11457 = vmatpush3.bf16.msra.mxu1 %v13393_v37  ;;  %11460 = vmatprep.mubr.bf16.mxu1 %v1436_v41 }
 0x1aa   :  { %v11271_v47 = vpop.f32.mrf.mxu1  ;;  %11458 = vmatprep.subr.bf16.mxu1 %v13395_v44 }
 0x1ab   :  { %v1123_v53 = vpack.c.bf16 %v11271_v47, %v11270_v43 }
 0x1ac   :  { %v764_v49 = vpop.f32.mrf.mxu1 }
 0x1ad   :  { %v1122_v51 = vpack.c.bf16 %v764_v49, %v761_v46  ;;  %11459 = vmatpush3.bf16.msra.mxu1 %v13395_v44  ;;  %v13705_v49 = vld [vmem:[#allocation4] sm:$0xff]  }
 0x1ae   :  { %v11274_v54 = vpop.f32.mrf.mxu1 }
 0x1af   :  { %11364 = vmatprep.mubr.bf16.mxu0 %v1122_v51 }
 0x1b0   :  { %v777_v57 = vpop.f32.mrf.mxu1  ;;  %11365 = vmatmul.mubr.bf16.vlgmr.msra.gmra.mxu0 %v1123_v53  ;;  %11461 = vmatmul.mubr.bf16.vlgmr.msra.gmra.mxu1 %v1437_v50 }
 0x1b1   :  { %11413 = vmatpush3.bf16.msra.mxu0 %v14576_v1  ;;  %11464 = vmatprep.mubr.bf16.mxu1 %v1438_v52 }
 0x1b2   :  { %v11275_v58 = vpop.f32.mrf.mxu1  ;;  %11414 = vmatprep.subr.bf16.mxu0 %v13390_v55 }
 0x1b3   :  { %v1125_v2 = vpack.c.bf16 %v11275_v58, %v11274_v54 }
 0x1b4   :  { %v780_v61 = vpop.f32.mrf.mxu1 }
 0x1b5   :  { %v1124_v63 = vpack.c.bf16 %v780_v61, %v777_v57  ;;  %11415 = vmatpush3.bf16.msra.mxu0 %v13390_v55 }
 0x1b6   :  { %v11278_v3 = vpop.f32.mrf.mxu1  ;;  %11416 = vmatprep.subr.bf16.mxu0 %v13392_v59 }
 0x1b7   :  { %11368 = vmatprep.mubr.bf16.mxu0 %v1124_v63 }
 0x1b8   :  { %v793_v6 = vpop.f32.mrf.mxu1  ;;  %11369 = vmatmul.mubr.bf16.gmra.mxu0 %v1125_v2  ;;  %11465 = vmatmul.mubr.bf16.gmra.mxu1 %v1439_v62 }
 0x1b9   :  { %11417 = vmatpush3.bf16.msra.mxu0 %v13392_v59  ;;  %11468 = vmatprep.mubr.bf16.mxu1 %v1440_v0 }
 0x1ba   :  { %v11279_v1 = vpop.f32.mrf.mxu1  ;;  %11418 = vmatprep.subr.bf16.mxu0 %v13394_v4 }
 0x1bb   :  { %v1127_v13 = vpack.c.bf16 %v11279_v1, %v11278_v3 }
 0x1bc   :  { %v796_v9 = vpop.f32.mrf.mxu1 }
 0x1bd   :  { %v1126_v11 = vpack.c.bf16 %v796_v9, %v793_v6  ;;  %11419 = vmatpush3.bf16.msra.mxu0 %v13394_v4 }
 0x1be   :  { %v11282_v14 = vpop.f32.mrf.mxu1  ;;  %11420 = vmatprep.subr.bf16.mxu0 %v13396_v7 }
 0x1bf   :  { %11372 = vmatprep.mubr.bf16.mxu0 %v1126_v11 }
 0x1c0   :  { %v809_v16 = vpop.f32.mrf.mxu1  ;;  %11373 = vmatmul.mubr.bf16.gmra.mxu0 %v1127_v13  ;;  %11469 = vmatmul.mubr.bf16.gmra.mxu1 %v1441_v10 }
 0x1c1   :  { %11421 = vmatpush3.bf16.msra.mxu0 %v13396_v7  ;;  %11472 = vmatprep.mubr.bf16.mxu1 %v1442_v12 }
 0x1c2   :  { %v11283_v17 = vpop.f32.mrf.mxu1  ;;  %11422 = vmatprep.subr.bf16.mxu0 %v13397_v15 }
 0x1c3   :  { %v1129_v22 = vpack.c.bf16 %v11283_v17, %v11282_v14 }
 0x1c4   :  { %v812_v19 = vpop.f32.mrf.mxu1 }
 0x1c5   :  { %v1128_v21 = vpack.c.bf16 %v812_v19, %v809_v16  ;;  %11423 = vmatpush3.bf16.msra.mxu0 %v13397_v15 }
 0x1c6   :  { %v11334_v23 = vpop.f32.mrf.mxu1  ;;  %11424 = vmatprep.subr.bf16.mxu0 %v13398_v18 }
 0x1c7   :  { %11376 = vmatprep.mubr.bf16.mxu0 %v1128_v21 }
 0x1c8   :  { %v1051_v25 = vpop.f32.mrf.mxu1  ;;  %11377 = vmatmul.mubr.bf16.gmra.mxu0 %v1129_v22  ;;  %11473 = vmatmul.mubr.bf16.gmra.mxu1 %v1443_v20 }
 0x1c9   :  { %11425 = vmatpush3.bf16.msra.mxu0 %v13398_v18  ;;  %11524 = vmatprep.mubr.bf16.mxu1 %v13704_v26 }
 0x1ca   :  { %v11335_v27 = vpop.f32.mrf.mxu1  ;;  %11426 = vmatprep.subr.bf16.mxu0 %v13399_v24 }
 0x1cb   :  { %v1445_v30 = vpack.c.bf16 %v11335_v27, %v11334_v23 }
 0x1cc   :  { %v1054_v28 = vpop.f32.mrf.mxu1 }
 0x1cd   :  { %v1444_v29 = vpack.c.bf16 %v1054_v28, %v1051_v25  ;;  %11427 = vmatpush3.bf16.msra.mxu0 %v13399_v24 }
 0x1ce   :  { %v11338_v31 = vpop.f32.mrf.mxu1 }
 0x1cf   :  { %11428 = vmatprep.mubr.bf16.mxu0 %v1444_v29 }
 0x1d0   :  { %v1067_v32 = vpop.f32.mrf.mxu1  ;;  %11429 = vmatmul.mubr.bf16.vlgmr.msra.gmra.mxu0 %v1445_v30 }
 0x1d2   :  { %v11339_v33 = vpop.f32.mrf.mxu1 }
 0x1d3   :  { %v1447_v36 = vpack.c.bf16 %v11339_v33, %v11338_v31 }
 0x1d4   :  { %v1070_v34 = vpop.f32.mrf.mxu1 }
 0x1d5   :  { %v1446_v35 = vpack.c.bf16 %v1070_v34, %v1067_v32 }
 0x1d6   :  { %v11342_v37 = vpop.f32.mrf.mxu1 }
 0x1d7   :  { %11432 = vmatprep.mubr.bf16.mxu0 %v1446_v35 }
 0x1d8   :  { %v1083_v38 = vpop.f32.mrf.mxu1  ;;  %11433 = vmatmul.mubr.bf16.gmra.mxu0 %v1447_v36 }
 0x1da   :  { %v11343_v39 = vpop.f32.mrf.mxu1 }
 0x1db   :  { %v1449_v42 = vpack.c.bf16 %v11343_v39, %v11342_v37 }
 0x1dc   :  { %v1086_v40 = vpop.f32.mrf.mxu1 }
 0x1dd   :  { %v1448_v41 = vpack.c.bf16 %v1086_v40, %v1083_v38 }
 0x1de   :  { %v11346_v43 = vpop.f32.mrf.mxu1 }
 0x1df   :  { %11436 = vmatprep.mubr.bf16.mxu0 %v1448_v41 }
 0x1e0   :  { %v1099_v44 = vpop.f32.mrf.mxu1  ;;  %11437 = vmatmul.mubr.bf16.gmra.mxu0 %v1449_v42 }
 0x1e2   :  { %v11347_v45 = vpop.f32.mrf.mxu1 }
 0x1e3   :  { %v1451_v48 = vpack.c.bf16 %v11347_v45, %v11346_v43 }
 0x1e4   :  { %v1102_v46 = vpop.f32.mrf.mxu1 }
 0x1e5   :  { %v1450_v47 = vpack.c.bf16 %v1102_v46, %v1099_v44 }
 0x1e7   :  { %11440 = vmatprep.mubr.bf16.mxu0 %v1450_v47 }
 0x1e8   :  { %11441 = vmatmul.mubr.bf16.gmra.mxu0 %v1451_v48 }
 0x1e9   :  { %11492 = vmatprep.mubr.bf16.mxu0 %v13705_v49 }
 0x250   :  { %v14595_v50 = vpop.f32.mrf.mxu1 }
 0x252   :  { %v14597_v51 = vpop.f32.mrf.mxu1 }
 0x254   :  { %v14599_v52 = vpop.f32.mrf.mxu1 }
 0x256   :  { %v14601_v53 = vpop.f32.mrf.mxu1 }
 0x258   :  { %v14603_v54 = vpop.f32.mrf.mxu1 }
 0x25a   :  { %v14605_v55 = vpop.f32.mrf.mxu1 }
 0x25c   :  { %v11403_v56 = vpop.f32.mrf.mxu1 }
 0x25e   :  { %v14607_v57 = vpop.f32.mrf.mxu1 }
 0x260   :  { %v11406_v58 = vpop.f32.mrf.mxu1 }
 0x262   :  { %v1389_v59 = vpop.f32.mrf.mxu1 }
 0x264   :  { %v11407_v60 = vpop.f32.mrf.mxu1 }
 0x266   :  { %v1392_v61 = vpop.f32.mrf.mxu1 }
 0x268   :  { %v11410_v62 = vpop.f32.mrf.mxu1 }
 0x26a   :  { %v1405_v63 = vpop.f32.mrf.mxu1 }
 0x26c   :  { %v11411_v0 = vpop.f32.mrf.mxu1 }
 0x26e   :  { %v1408_v2 = vpop.f32.mrf.mxu1 }
 0x270   :  { %v14609_v3 = vpop.f32.mrf.mxu0  ;;  %v14613_v5 = vpop.f32.mrf.mxu1 }
 0x272   :  { %v14611_v4 = vpop.f32.mrf.mxu0  ;;  %v14619_v7 = vpop.f32.mrf.mxu1 }
 0x274   :  { %v14615_v6 = vpop.f32.mrf.mxu0  ;;  %v14621_v10 = vpop.f32.mrf.mxu1 }
 0x276   :  { %v14617_v1 = vpop.f32.mrf.mxu0  ;;  %v14623_v13 = vpop.f32.mrf.mxu1 }
 0x278   :  { %v11370_v8 = vpop.f32.mrf.mxu0  ;;  %v14625_v16 = vpop.f32.mrf.mxu1 }
 0x27a   :  { %v1228_v9 = vpop.f32.mrf.mxu0  ;;  %v14627_v19 = vpop.f32.mrf.mxu1 }
 0x27c   :  { %v11371_v11 = vpop.f32.mrf.mxu0  ;;  %v14629_v22 = vpop.f32.mrf.mxu1 }
 0x27d   :  { %v1385_v48 = vadd.f32 %v11403_v56, %v11371_v11 }
 0x27e   :  { %v1231_v12 = vpop.f32.mrf.mxu0  ;;  %v14631_v28 = vpop.f32.mrf.mxu1 }
 0x280   :  { %v11374_v14 = vpop.f32.mrf.mxu0  ;;  %v14639_v39 = vpop.f32.mrf.mxu1 }
 0x281   :  { %v1398_v34 = vadd.f32 %v11406_v58, %v11374_v14 }
 0x282   :  { %v1244_v15 = vpop.f32.mrf.mxu0  ;;  %v14648_v46 = vpop.f32.mrf.mxu1 }
 0x283   :  { %v1430_v44 = vmax.f32 %v1398_v34, 0.0  ;;  %v1390_v45 = vadd.f32 %v1389_v59, %v1244_v15  ;;  %v1374_v15 = vadd.f32 %v14605_v55, %v1228_v9 }
 0x284   :  { %v11375_v17 = vpop.f32.mrf.mxu0  ;;  %v11471_v59 = vpop.f32.mrf.mxu1 }
 0x285   :  { %v1401_v29 = vadd.f32 %v11407_v60, %v11375_v17  ;;  %v1369_v17 = vadd.f32 %v14599_v52, %v14615_v6 }
 0x286   :  { %v1247_v18 = vpop.f32.mrf.mxu0 }
 0x287   :  { %v1431_v40 = vmax.f32 %v1401_v29, 0.0  ;;  %v1393_v41 = vadd.f32 %v1392_v61, %v1247_v18  ;;  %v1382_v61 = vadd.f32 %v14603_v54, %v11370_v8  ;;  %v1714_v54 = vpop.f32.mrf.mxu1 }
 0x288   :  { %v11378_v20 = vpop.f32.mrf.mxu0 }
 0x289   :  { %v1414_v23 = vadd.f32 %v11410_v62, %v11378_v20  ;;  %v14652_v49 = vpack.c.bf16 %v1431_v40, %v1430_v44  ;;  %v1429_v58 = vmax.f32 %v1393_v41, 0.0  ;;  %v1428_v62 = vmax.f32 %v1390_v45, 0.0  ;;  %v11474_v55 = vpop.f32.mrf.mxu1 }
 0x28a   :  { %v1260_v21 = vpop.f32.mrf.mxu0  ;;  %v1426_v11 = vmax.f32 %v1382_v61, 0.0  ;;  %v1366_v20 = vadd.f32 %v14595_v50, %v14609_v3 }
 0x28b   :  { %v1406_v25 = vadd.f32 %v1405_v63, %v1260_v21  ;;  %v1434_v30 = vmax.f32 %v1414_v23, 0.0  ;;  %v14662_v14 = vpack.c.bf16 %v1429_v58, %v1428_v62  ;;  %v1424_v21 = vmax.f32 %v1374_v15, 0.0  ;;  %v1727_v50 = vpop.f32.mrf.mxu1 }
 0x28c   :  { %v11379_v24 = vpop.f32.mrf.mxu0  ;;  %v1423_v23 = vmax.f32 %v1369_v17, 0.0  ;;  %v1422_v6 = vmax.f32 %v1366_v20, 0.0  ;;  %v13706_v17 = vld [vmem:[#allocation4 + $0x8] sm:$0xff]   ;;  %v13707_v20 = vld [vmem:[#allocation4 + $0x10] sm:$0xff]  }
 0x28d   :  { %v1417_v26 = vadd.f32 %v11411_v0, %v11379_v24  ;;  %v1432_v35 = vmax.f32 %v1406_v25, 0.0  ;;  %v1427_v0 = vmax.f32 %v1385_v48, 0.0  ;;  %v1361_v24 = vadd.f32 %v14601_v53, %v14617_v1  ;;  %v11475_v1 = vpop.f32.mrf.mxu1 }
 0x28e   :  { %v1263_v27 = vpop.f32.mrf.mxu0 }
 0x28f   :  { %v1435_v31 = vmax.f32 %v1417_v26, 0.0  ;;  %v1409_v32 = vadd.f32 %v1408_v2, %v1263_v27  ;;  %v1377_v2 = vadd.f32 %v14607_v57, %v1231_v12  ;;  %v14673_v18 = vpack.c.bf16 %v1427_v0, %v1426_v11 }
 0x290   :  { %v14633_v33 = vpop.f32.mrf.mxu0  ;;  %v1358_v26 = vadd.f32 %v14597_v51, %v14611_v4  ;;  %v14687_v27 = vpack.c.bf16 %v1423_v23, %v1422_v6  ;;  %v1421_v29 = vmax.f32 %v1361_v24, 0.0  ;;  %v13708_v24 = vld [vmem:[#allocation4 + $0x18] sm:$0xff]  }
 0x291   :  { %v14635_v36 = vpack.c.bf16 %v1435_v31, %v1434_v30  ;;  %v1433_v37 = vmax.f32 %v1409_v32, 0.0  ;;  %v1425_v57 = vmax.f32 %v1377_v2, 0.0 }
 0x292   :  { %v14637_v38 = vpop.f32.mrf.mxu0  ;;  %v1420_v53 = vmax.f32 %v1358_v26, 0.0 }
 0x293   :  { %v14641_v42 = vpack.c.bf16 %v1433_v37, %v1432_v35  ;;  %11476 = vmatprep.subr.bf16.mxu0 %v14635_v36  ;;  %v14681_v25 = vpack.c.bf16 %v1425_v57, %v1424_v21  ;;  %v1730_v37 = vpop.f32.mrf.mxu1 }
 0x294   :  { %v14644_v43 = vpop.f32.mrf.mxu0  ;;  %11477 = vmatpush3.bf16.msra.mxu0 %v14635_v36  ;;  %v14691_v32 = vpack.c.bf16 %v1421_v29, %v1420_v53  ;;  %v13406_v53 = vld [vmem:[#allocation22 + $0x30] sm:$0xff]  }
 0x295   :  { %11478 = vmatprep.subr.bf16.mxu0 %v14641_v42 }
 0x296   :  { %v14650_v47 = vpop.f32.mrf.mxu0 }
 0x298   :  { %v14654_v60 = vpop.f32.mrf.mxu0  ;;  %11479 = vmatpush3.bf16.msra.mxu0 %v14641_v42 }
 0x299   :  { %11480 = vmatprep.subr.bf16.mxu0 %v14652_v49 }
 0x29a   :  { %v14659_v63 = vpop.f32.mrf.mxu0 }
 0x29c   :  { %v14664_v56 = vpop.f32.mrf.mxu0  ;;  %11481 = vmatpush3.bf16.msra.mxu0 %v14652_v49 }
 0x29d   :  { %11482 = vmatprep.subr.bf16.mxu0 %v14662_v14 }
 0x29e   :  { %v14669_v8 = vpop.f32.mrf.mxu0 }
 0x2a0   :  { %v11438_v12 = vpop.f32.mrf.mxu0  ;;  %11483 = vmatpush3.bf16.msra.mxu0 %v14662_v14 }
 0x2a1   :  { %11484 = vmatprep.subr.bf16.mxu0 %v14673_v18  ;;  %v1720_v58 = vadd.f32 %v14639_v39, %v11438_v12  ;;  %v1707_v39 = vadd.f32 %v14629_v22, %v14664_v56  ;;  %v1696_v22 = vadd.f32 %v14627_v19, %v14659_v63  ;;  %v1683_v19 = vadd.f32 %v14623_v13, %v14650_v47  ;;  %v13712_v47 = vld [vmem:[#allocation4 + $0x38] sm:$0xff]  }
 0x2a2   :  { %v1566_v9 = vpop.f32.mrf.mxu0 }
 0x2a3   :  { %v1752_v57 = vmax.f32 %v1720_v58, 0.0  ;;  %v1749_v23 = vmax.f32 %v1707_v39, 0.0  ;;  %v13729_v58 = vld [vmem:[#allocation9 + $0x8] sm:$0xff]   ;;  %v13411_v39 = vld [vmem:[#allocation21] sm:$0xff]  }
 0x2a4   :  { %v11439_v52 = vpop.f32.mrf.mxu0  ;;  %11485 = vmatpush3.bf16.msra.mxu0 %v14673_v18 }
 0x2a5   :  { %11486 = vmatprep.subr.bf16.mxu0 %v14681_v25  ;;  %v1723_v41 = vadd.f32 %v11471_v59, %v11439_v52  ;;  %v1712_v59 = vadd.f32 %v14648_v46, %v1566_v9  ;;  %v1699_v46 = vadd.f32 %v14631_v28, %v14669_v8  ;;  %v1688_v28 = vadd.f32 %v14613_v5, %v14633_v33  ;;  %v13711_v5 = vld [vmem:[#allocation4 + $0x30] sm:$0xff]  }
 0x2a6   :  { %v1569_v3 = vpop.f32.mrf.mxu0  ;;  %v1746_v8 = vmax.f32 %v1696_v22, 0.0 }
 0x2a7   :  { %v1753_v2 = vmax.f32 %v1723_v41, 0.0  ;;  %v1715_v11 = vadd.f32 %v1714_v54, %v1569_v3  ;;  %v1704_v54 = vadd.f32 %v14625_v16, %v14654_v60  ;;  %v13709_v16 = vld [vmem:[#allocation4 + $0x20] sm:$0xff]   ;;  %v1691_v60 = vadd.f32 %v14621_v10, %v14644_v43  ;;  %v13725_v41 = vld [vmem:[#allocation10 + $0x30] sm:$0xff]  }
 0x2a8   :  { %v11442_v30 = vpop.f32.mrf.mxu0  ;;  %11487 = vmatpush3.bf16.msra.mxu0 %v14681_v25  ;;  %v1747_v6 = vmax.f32 %v1699_v46, 0.0  ;;  %v1744_v3 = vmax.f32 %v1688_v28, 0.0  ;;  %v1680_v10 = vadd.f32 %v14619_v7, %v14637_v38  ;;  %v1743_v43 = vmax.f32 %v1683_v19, 0.0  ;;  %v13713_v7 = vld [vmem:[#allocation10] sm:$0xff]   ;;  %v13404_v38 = vld [vmem:[#allocation22 + $0x38] sm:$0xff]  }
 0x2a9   :  { %11488 = vmatprep.subr.bf16.mxu0 %v14687_v27  ;;  %v1736_v34 = vadd.f32 %v11474_v55, %v11442_v30  ;;  %v1771_v12 = vpack.c.bf16 %v1753_v2, %v1752_v57  ;;  %v1751_v21 = vmax.f32 %v1715_v11, 0.0  ;;  %v1750_v55 = vmax.f32 %v1712_v59, 0.0  ;;  %v13714_v30 = vld [vmem:[#allocation7 + $0x8] sm:$0xff]   ;;  %v13412_v2 = vld [vmem:[#allocation22 + $0x18] sm:$0xff]   ;;  %v13732_v11 = vld [vmem:[#allocation9 + $0x20] sm:$0xff]  }
 0x2aa   :  { %v1582_v31 = vpop.f32.mrf.mxu0  ;;  %v1748_v52 = vmax.f32 %v1704_v54, 0.0  ;;  %v1745_v26 = vmax.f32 %v1691_v60, 0.0  ;;  %v1768_v63 = vpack.c.bf16 %v1747_v6, %v1746_v8  ;;  %v1742_v29 = vmax.f32 %v1680_v10, 0.0  ;;  %v13733_v57 = vld [vmem:[#allocation9 + $0x28] sm:$0xff]   ;;  %v13734_v59 = vld [vmem:[#allocation9 + $0x30] sm:$0xff]  }
 0x2ab   :  { %v1728_v51 = vadd.f32 %v1727_v50, %v1582_v31  ;;  %v1756_v44 = vmax.f32 %v1736_v34, 0.0  ;;  %v1770_v9 = vpack.c.bf16 %v1751_v21, %v1750_v55  ;;  %v13710_v50 = vld [vmem:[#allocation4 + $0x28] sm:$0xff]   ;;  %v13717_v34 = vld [vmem:[#allocation10 + $0x10] sm:$0xff]   ;;  %v13413_v21 = vld [vmem:[#allocation24 + $0x38] sm:$0xff]  }
 0x2ac   :  { %v11443_v35 = vpop.f32.mrf.mxu0  ;;  %11489 = vmatpush3.bf16.msra.mxu0 %v14687_v27  ;;  %v1769_v56 = vpack.c.bf16 %v1749_v23, %v1748_v52  ;;  %v1767_v33 = vpack.c.bf16 %v1745_v26, %v1744_v3  ;;  %v1766_v13 = vpack.c.bf16 %v1743_v43, %v1742_v29  ;;  %v13716_v31 = vld [vmem:[#allocation10 + $0x8] sm:$0xff]   ;;  %v13418_v55 = vld [vmem:[#allocation22] sm:$0xff]   ;;  %v14730_v23 = vld [vmem:[#allocation25 + $0x38] sm:$0xff]  }
 0x2ad   :  { %v1739_v4 = vadd.f32 %v11475_v1, %v11443_v35  ;;  %11490 = vmatprep.subr.bf16.mxu0 %v14691_v32  ;;  %v1754_v61 = vmax.f32 %v1728_v51, 0.0  ;;  %v13715_v1 = vld [vmem:[#allocation7 + $0x10] sm:$0xff]   ;;  %v13408_v35 = vld [vmem:[#allocation22 + $0x28] sm:$0xff]   ;;  %v13718_v51 = vld [vmem:[#allocation7 + $0x18] sm:$0xff]  }
 0x2ae   :  { %v1585_v40 = vpop.f32.mrf.mxu0  ;;  %v13416_v54 = vld [vmem:[#allocation22 + $0x8] sm:$0xff]   ;;  %v13419_v3 = vld [vmem:[#allocation24 + $0x20] sm:$0xff]  }
 0x2af   :  { %v1757_v45 = vmax.f32 %v1739_v4, 0.0  ;;  %v1731_v48 = vadd.f32 %v1730_v37, %v1585_v40  ;;  %v13720_v4 = vld [vmem:[#allocation10 + $0x18] sm:$0xff]   ;;  %v13721_v37 = vld [vmem:[#allocation10 + $0x20] sm:$0xff]   ;;  %v13723_v40 = vld [vmem:[#allocation7 + $0x30] sm:$0xff]  }
 0x2b0   :  { %11491 = vmatpush3.bf16.msra.mxu0 %v14691_v32  ;;  %v13417_v8 = vld [vmem:[#allocation24 + $0x28] sm:$0xff]  }
 0x2b1   :  { %v1773_v62 = vpack.c.bf16 %v1757_v45, %v1756_v44  ;;  %v1755_v0 = vmax.f32 %v1731_v48, 0.0  ;;  %v13726_v44 = vld [vmem:[#allocation7 + $0x38] sm:$0xff]   ;;  %v13401_v48 = vld [vmem:[#allocation21 + $0x30] sm:$0xff]  }
 0x2b2   :  { %v13400_v45 = vld [vmem:[#allocation21 + $0x38] sm:$0xff]  }
 0x2b3   :  { %v1772_v15 = vpack.c.bf16 %v1755_v0, %v1754_v61  ;;  %11508 = vmatprep.subr.bf16.mxu1 %v1773_v62  ;;  %11540 = vmatprep.subr.bf16.mxu0 %v1773_v62  ;;  %v13402_v61 = vld [vmem:[#allocation21 + $0x28] sm:$0xff]   ;;  %v13731_v0 = vld [vmem:[#allocation9 + $0x18] sm:$0xff]  }
 0x2b4   :  { %11493 = vmatmul.mubr.bf16.vlgmr.msra.gmra.mxu0 %v13706_v17  ;;  %11509 = vmatpush3.bf16.msra.mxu1 %v1773_v62  ;;  %v13407_v17 = vld [vmem:[#allocation21 + $0x10] sm:$0xff]  }
 0x2b5   :  { %11541 = vmatpush3.bf16.msra.mxu0 %v1773_v62  ;;  %11510 = vmatprep.subr.bf16.mxu1 %v1772_v15  ;;  %v13410_v62 = vld [vmem:[#allocation22 + $0x20] sm:$0xff]  }
 0x2b6   :  { %11542 = vmatprep.subr.bf16.mxu0 %v1772_v15  ;;  %11496 = vmatprep.mubr.bf16.mxu0 %v13707_v20  ;;  %v13409_v20 = vld [vmem:[#allocation21 + $0x8] sm:$0xff]  }
 0x2b8   :  { %11511 = vmatpush3.bf16.msra.mxu1 %v1772_v15 }
 0x2b9   :  { %11543 = vmatpush3.bf16.msra.mxu0 %v1772_v15  ;;  %11512 = vmatprep.subr.bf16.mxu1 %v1771_v12  ;;  %v13414_v15 = vld [vmem:[#allocation22 + $0x10] sm:$0xff]  }
 0x2ba   :  { %11544 = vmatprep.subr.bf16.mxu0 %v1771_v12 }
 0x2bc   :  { %11513 = vmatpush3.bf16.msra.mxu1 %v1771_v12  ;;  %11497 = vmatmul.mubr.bf16.gmra.mxu0 %v13708_v24 }
 0x2bd   :  { %11545 = vmatpush3.bf16.msra.mxu0 %v1771_v12  ;;  %11514 = vmatprep.subr.bf16.mxu1 %v1770_v9  ;;  %v13735_v12 = vld [vmem:[#allocation9 + $0x38] sm:$0xff]  }
 0x2be   :  { %11546 = vmatprep.subr.bf16.mxu0 %v1770_v9  ;;  %11500 = vmatprep.mubr.bf16.mxu0 %v13709_v16 }
 0x2c0   :  { %11515 = vmatpush3.bf16.msra.mxu1 %v1770_v9 }
 0x2c1   :  { %11547 = vmatpush3.bf16.msra.mxu0 %v1770_v9  ;;  %11516 = vmatprep.subr.bf16.mxu1 %v1769_v56 }
 0x2c2   :  { %11548 = vmatprep.subr.bf16.mxu0 %v1769_v56 }
 0x2c4   :  { %11517 = vmatpush3.bf16.msra.mxu1 %v1769_v56  ;;  %11501 = vmatmul.mubr.bf16.gmra.mxu0 %v13710_v50 }
 0x2c5   :  { %11549 = vmatpush3.bf16.msra.mxu0 %v1769_v56  ;;  %11518 = vmatprep.subr.bf16.mxu1 %v1768_v63  ;;  %v13415_v56 = vld [vmem:[#allocation24 + $0x30] sm:$0xff]  }
 0x2c6   :  { %11550 = vmatprep.subr.bf16.mxu0 %v1768_v63  ;;  %11504 = vmatprep.mubr.bf16.mxu0 %v13711_v5 }
 0x2c8   :  { %11519 = vmatpush3.bf16.msra.mxu1 %v1768_v63 }
 0x2c9   :  { %11551 = vmatpush3.bf16.msra.mxu0 %v1768_v63  ;;  %11520 = vmatprep.subr.bf16.mxu1 %v1767_v33 }
 0x2ca   :  { %11552 = vmatprep.subr.bf16.mxu0 %v1767_v33 }
 0x2cc   :  { %11521 = vmatpush3.bf16.msra.mxu1 %v1767_v33  ;;  %11505 = vmatmul.mubr.bf16.gmra.mxu0 %v13712_v47 }
 0x2cd   :  { %11553 = vmatpush3.bf16.msra.mxu0 %v1767_v33  ;;  %11522 = vmatprep.subr.bf16.mxu1 %v1766_v13  ;;  %v13421_v33 = vld [vmem:[#allocation24 + $0x18] sm:$0xff]  }
 0x2ce   :  { %11554 = vmatprep.subr.bf16.mxu0 %v1766_v13  ;;  %11556 = vmatprep.mubr.bf16.mxu0 %v13713_v7  ;;  %v13423_v7 = vld [vmem:[#allocation24 + $0x10] sm:$0xff]  }
 0x2d0   :  { %11523 = vmatpush3.bf16.msra.mxu1 %v1766_v13 }
 0x2d1   :  { %11555 = vmatpush3.bf16.msra.mxu0 %v1766_v13  ;;  %11572 = vmatprep.subr.bf16.mxu1 %v14635_v36 }
 0x2d2   :  { %11604 = vmatprep.subr.bf16.mxu0 %v13404_v38 }
 0x2d3   :  { %11525 = vmatmul.mubr.bf16.vlgmr.msra.gmra.mxu1 %v13714_v30 }
 0x2d4   :  { %11573 = vmatpush3.bf16.msra.mxu1 %v14635_v36  ;;  %11528 = vmatprep.mubr.bf16.mxu1 %v13715_v1  ;;  %v13719_v36 = vld [vmem:[#allocation7 + $0x20] sm:$0xff]  }
 0x2d5   :  { %11574 = vmatprep.subr.bf16.mxu1 %v14641_v42  ;;  %11557 = vmatmul.mubr.bf16.vlgmr.msra.gmra.mxu0 %v13716_v31 }
 0x2d6   :  { %11560 = vmatprep.mubr.bf16.mxu0 %v13717_v34  ;;  %11605 = vmatpush3.bf16.msra.mxu0 %v13404_v38 }
 0x2d7   :  { %11606 = vmatprep.subr.bf16.mxu0 %v13406_v53 }
 0x2d8   :  { %11575 = vmatpush3.bf16.msra.mxu1 %v14641_v42  ;;  %v13722_v42 = vld [vmem:[#allocation7 + $0x28] sm:$0xff]  }
 0x2d9   :  { %11576 = vmatprep.subr.bf16.mxu1 %v14652_v49 }
 0x2da   :  { %11607 = vmatpush3.bf16.msra.mxu0 %v13406_v53  ;;  %v13425_v53 = vld [vmem:[#allocation24 + $0x8] sm:$0xff]  }
 0x2db   :  { %11529 = vmatmul.mubr.bf16.gmra.mxu1 %v13718_v51  ;;  %11608 = vmatprep.subr.bf16.mxu0 %v13408_v35  ;;  %v13427_v51 = vld [vmem:[#allocation24] sm:$0xff]  }
 0x2dc   :  { %11577 = vmatpush3.bf16.msra.mxu1 %v14652_v49  ;;  %11532 = vmatprep.mubr.bf16.mxu1 %v13719_v36  ;;  %v13724_v49 = vld [vmem:[#allocation10 + $0x28] sm:$0xff]  }
 0x2dd   :  { %11578 = vmatprep.subr.bf16.mxu1 %v14662_v14  ;;  %11561 = vmatmul.mubr.bf16.gmra.mxu0 %v13720_v4 }
 0x2de   :  { %11564 = vmatprep.mubr.bf16.mxu0 %v13721_v37  ;;  %11609 = vmatpush3.bf16.msra.mxu0 %v13408_v35 }
 0x2df   :  { %11610 = vmatprep.subr.bf16.mxu0 %v13410_v62 }
 0x2e0   :  { %11579 = vmatpush3.bf16.msra.mxu1 %v14662_v14  ;;  %v13727_v14 = vld [vmem:[#allocation9] sm:$0xff]  }
 0x2e1   :  { %11580 = vmatprep.subr.bf16.mxu1 %v14673_v18 }
 0x2e2   :  { %11611 = vmatpush3.bf16.msra.mxu0 %v13410_v62 }
 0x2e3   :  { %11533 = vmatmul.mubr.bf16.gmra.mxu1 %v13722_v42  ;;  %11612 = vmatprep.subr.bf16.mxu0 %v13412_v2 }
 0x2e4   :  { %11581 = vmatpush3.bf16.msra.mxu1 %v14673_v18  ;;  %11536 = vmatprep.mubr.bf16.mxu1 %v13723_v40  ;;  %v13728_v18 = vld [vmem:[#allocation10 + $0x38] sm:$0xff]  }
 0x2e5   :  { %11582 = vmatprep.subr.bf16.mxu1 %v14681_v25  ;;  %11565 = vmatmul.mubr.bf16.gmra.mxu0 %v13724_v49  ;;  %v14733_v40 = vld [vmem:[#allocation13 + $0x78] sm:$0xff]  }
 0x2e6   :  { %11568 = vmatprep.mubr.bf16.mxu0 %v13725_v41  ;;  %11613 = vmatpush3.bf16.msra.mxu0 %v13412_v2  ;;  %v13424_v2 = vld [vmem:[#allocation25 + $0x28] sm:$0xff]  }
 0x2e7   :  { %11614 = vmatprep.subr.bf16.mxu0 %v13414_v15 }
 0x2e8   :  { %11583 = vmatpush3.bf16.msra.mxu1 %v14681_v25  ;;  %v13730_v25 = vld [vmem:[#allocation9 + $0x10] sm:$0xff]  }
 0x2e9   :  { %11584 = vmatprep.subr.bf16.mxu1 %v14687_v27 }
 0x2ea   :  { %11615 = vmatpush3.bf16.msra.mxu0 %v13414_v15 }
 0x2eb   :  { %11537 = vmatmul.mubr.bf16.gmra.mxu1 %v13726_v44  ;;  %11616 = vmatprep.subr.bf16.mxu0 %v13416_v54 }
 0x2ec   :  { %11585 = vmatpush3.bf16.msra.mxu1 %v14687_v27  ;;  %11588 = vmatprep.mubr.bf16.mxu1 %v13727_v14  ;;  %v13403_v27 = vld [vmem:[#allocation21 + $0x20] sm:$0xff]  }
 0x2ed   :  { %11586 = vmatprep.subr.bf16.mxu1 %v14691_v32  ;;  %11569 = vmatmul.mubr.bf16.gmra.mxu0 %v13728_v18 }
 0x2ee   :  { %11617 = vmatpush3.bf16.msra.mxu0 %v13416_v54 }
 0x2ef   :  { %11618 = vmatprep.subr.bf16.mxu0 %v13418_v55 }
 0x2f0   :  { %11587 = vmatpush3.bf16.msra.mxu1 %v14691_v32  ;;  %v13405_v32 = vld [vmem:[#allocation21 + $0x18] sm:$0xff]  }
 0x2f1   :  { %11636 = vmatprep.subr.bf16.mxu1 %v13400_v45 }
 0x2f2   :  { %11619 = vmatpush3.bf16.msra.mxu0 %v13418_v55 }
 0x2f3   :  { %11589 = vmatmul.mubr.bf16.vlgmr.msra.gmra.mxu1 %v13729_v58  ;;  %11668 = vmatprep.subr.bf16.mxu0 %v14730_v23 }
 0x2f4   :  { %11592 = vmatprep.mubr.bf16.mxu1 %v13730_v25  ;;  %11637 = vmatpush3.bf16.msra.mxu1 %v13400_v45  ;;  %v13422_v45 = vld [vmem:[#allocation25 + $0x30] sm:$0xff]  }
 0x2f5   :  { %11638 = vmatprep.subr.bf16.mxu1 %v13401_v48 }
 0x2f8   :  { %11639 = vmatpush3.bf16.msra.mxu1 %v13401_v48 }
 0x2f9   :  { %11640 = vmatprep.subr.bf16.mxu1 %v13402_v61 }
 0x2fb   :  { %11593 = vmatmul.mubr.bf16.gmra.mxu1 %v13731_v0 }
 0x2fc   :  { %11596 = vmatprep.mubr.bf16.mxu1 %v13732_v11  ;;  %11641 = vmatpush3.bf16.msra.mxu1 %v13402_v61 }
 0x2fd   :  { %11642 = vmatprep.subr.bf16.mxu1 %v13403_v27 }
 0x300   :  { %11643 = vmatpush3.bf16.msra.mxu1 %v13403_v27  ;;  %v14736_v27 = vld [vmem:[#allocation13 + $0x70] sm:$0xff]  }
 0x301   :  { %11644 = vmatprep.subr.bf16.mxu1 %v13405_v32 }
 0x303   :  { %11597 = vmatmul.mubr.bf16.gmra.mxu1 %v13733_v57 }
 0x304   :  { %11600 = vmatprep.mubr.bf16.mxu1 %v13734_v59  ;;  %11645 = vmatpush3.bf16.msra.mxu1 %v13405_v32 }
 0x305   :  { %11646 = vmatprep.subr.bf16.mxu1 %v13407_v17 }
 0x308   :  { %11647 = vmatpush3.bf16.msra.mxu1 %v13407_v17  ;;  %v14741_v17 = vld [vmem:[#allocation13 + $0x68] sm:$0xff]  }
 0x309   :  { %11648 = vmatprep.subr.bf16.mxu1 %v13409_v20 }
 0x30b   :  { %11601 = vmatmul.mubr.bf16.gmra.mxu1 %v13735_v12 }
 0x30c   :  { %11649 = vmatpush3.bf16.msra.mxu1 %v13409_v20 }
 0x30d   :  { %11650 = vmatprep.subr.bf16.mxu1 %v13411_v39 }
 0x310   :  { %11651 = vmatpush3.bf16.msra.mxu1 %v13411_v39  ;;  %v13426_v39 = vld [vmem:[#allocation25 + $0x20] sm:$0xff]  }
 0x311   :  { %11700 = vmatprep.subr.bf16.mxu1 %v13413_v21 }
 0x374   :  { %v11494_v46 = vpop.f32.mrf.mxu0 }
 0x376   :  { %v1872_v9 = vpop.f32.mrf.mxu0 }
 0x378   :  { %v11495_v24 = vpop.f32.mrf.mxu0 }
 0x379   :  { %v2227_v52 = vpack.c.bf16 %v11495_v24, %v11494_v46  ;;  %v14745_v46 = vld [vmem:[#allocation13 + $0x60] sm:$0xff]   ;;  %v13428_v24 = vld [vmem:[#allocation25 + $0x18] sm:$0xff]  }
 0x37a   :  { %v1875_v22 = vpop.f32.mrf.mxu0 }
 0x37b   :  { %v2226_v16 = vpack.c.bf16 %v1875_v22, %v1872_v9 }
 0x37c   :  { %v11498_v60 = vpop.f32.mrf.mxu0 }
 0x37d   :  { %11652 = vmatprep.mubr.bf16.mxu1 %v2226_v16 }
 0x37e   :  { %v1888_v6 = vpop.f32.mrf.mxu0  ;;  %11653 = vmatmul.mubr.bf16.vlgmr.msra.gmra.mxu1 %v2227_v52 }
 0x37f   :  { %11701 = vmatpush3.bf16.msra.mxu1 %v13413_v21 }
 0x380   :  { %v11499_v28 = vpop.f32.mrf.mxu0  ;;  %11702 = vmatprep.subr.bf16.mxu1 %v13415_v56 }
 0x381   :  { %v2229_v26 = vpack.c.bf16 %v11499_v28, %v11498_v60  ;;  %v14749_v60 = vld [vmem:[#allocation13 + $0x58] sm:$0xff]  }
 0x382   :  { %v1891_v19 = vpop.f32.mrf.mxu0 }
 0x383   :  { %v2228_v63 = vpack.c.bf16 %v1891_v19, %v1888_v6  ;;  %11703 = vmatpush3.bf16.msra.mxu1 %v13415_v56 }
 0x384   :  { %v11502_v50 = vpop.f32.mrf.mxu0  ;;  %11704 = vmatprep.subr.bf16.mxu1 %v13417_v8 }
 0x385   :  { %11656 = vmatprep.mubr.bf16.mxu1 %v2228_v63 }
 0x386   :  { %v1904_v10 = vpop.f32.mrf.mxu0  ;;  %11657 = vmatmul.mubr.bf16.gmra.mxu1 %v2229_v26 }
 0x387   :  { %11705 = vmatpush3.bf16.msra.mxu1 %v13417_v8  ;;  %v13430_v8 = vld [vmem:[#allocation25 + $0x10] sm:$0xff]  }
 0x388   :  { %v11503_v5 = vpop.f32.mrf.mxu0  ;;  %11706 = vmatprep.subr.bf16.mxu1 %v13419_v3 }
 0x389   :  { %v2231_v43 = vpack.c.bf16 %v11503_v5, %v11502_v50 }
 0x38a   :  { %v1907_v29 = vpop.f32.mrf.mxu0 }
 0x38b   :  { %v2230_v13 = vpack.c.bf16 %v1907_v29, %v1904_v10  ;;  %11707 = vmatpush3.bf16.msra.mxu1 %v13419_v3  ;;  %v14753_v10 = vld [vmem:[#allocation13 + $0x50] sm:$0xff]  }
 0x38c   :  { %v11506_v47 = vpop.f32.mrf.mxu0  ;;  %11708 = vmatprep.subr.bf16.mxu1 %v13421_v33 }
 0x38d   :  { %11660 = vmatprep.mubr.bf16.mxu1 %v2230_v13 }
 0x38e   :  { %v1920_v38 = vpop.f32.mrf.mxu0  ;;  %11661 = vmatmul.mubr.bf16.gmra.mxu1 %v2231_v43 }
 0x38f   :  { %11709 = vmatpush3.bf16.msra.mxu1 %v13421_v33  ;;  %v13432_v33 = vld [vmem:[#allocation25 + $0x8] sm:$0xff]  }
 0x390   :  { %v11507_v30 = vpop.f32.mrf.mxu0  ;;  %11710 = vmatprep.subr.bf16.mxu1 %v13423_v7 }
 0x391   :  { %v2233_v1 = vpack.c.bf16 %v11507_v30, %v11506_v47  ;;  %v14757_v47 = vld [vmem:[#allocation13 + $0x48] sm:$0xff]  }
 0x392   :  { %v1923_v31 = vpop.f32.mrf.mxu0 }
 0x393   :  { %v11526_v34 = vpop.f32.mrf.mxu1  ;;  %v2232_v35 = vpack.c.bf16 %v1923_v31, %v1920_v38  ;;  %11711 = vmatpush3.bf16.msra.mxu1 %v13423_v7 }
 0x394   :  { %11712 = vmatprep.subr.bf16.mxu1 %v13425_v53 }
 0x395   :  { %v1969_v36 = vpop.f32.mrf.mxu1  ;;  %v11558_v4 = vpop.f32.mrf.mxu0  ;;  %11664 = vmatprep.mubr.bf16.mxu1 %v2232_v35  ;;  %v14760_v35 = vld [vmem:[#allocation7 + $0x40] sm:$0xff]  }
 0x396   :  { %11665 = vmatmul.mubr.bf16.gmra.mxu1 %v2233_v1 }
 0x397   :  { %v11527_v37 = vpop.f32.mrf.mxu1  ;;  %v2066_v42 = vpop.f32.mrf.mxu0  ;;  %11713 = vmatpush3.bf16.msra.mxu1 %v13425_v53  ;;  %v13434_v53 = vld [vmem:[#allocation25] sm:$0xff]  }
 0x398   :  { %11714 = vmatprep.subr.bf16.mxu1 %v13427_v51  ;;  %v2235_v14 = vpack.c.bf16 %v11527_v37, %v11526_v34  ;;  %v13436_v37 = vld [vmem:[#allocation12 + $0x78] sm:$0xff]  }
 0x399   :  { %v1972_v49 = vpop.f32.mrf.mxu1  ;;  %v11559_v41 = vpop.f32.mrf.mxu0 }
 0x39a   :  { %v2234_v44 = vpack.c.bf16 %v1972_v49, %v1969_v36  ;;  %v2549_v48 = vpack.c.bf16 %v11559_v41, %v11558_v4  ;;  %v14763_v36 = vld [vmem:[#allocation13 + $0x40] sm:$0xff]  }
 0x39b   :  { %v11530_v18 = vpop.f32.mrf.mxu1  ;;  %v2069_v58 = vpop.f32.mrf.mxu0  ;;  %11715 = vmatpush3.bf16.msra.mxu1 %v13427_v51 }
 0x39c   :  { %11620 = vmatprep.mubr.bf16.mxu0 %v2234_v44  ;;  %v2548_v25 = vpack.c.bf16 %v2069_v58, %v2066_v42  ;;  %11764 = vmatprep.subr.bf16.mxu1 %v14733_v40 }
 0x39d   :  { %v1985_v61 = vpop.f32.mrf.mxu1  ;;  %11621 = vmatmul.mubr.bf16.vlgmr.msra.gmra.mxu0 %v2235_v14  ;;  %v11562_v62 = vpop.f32.mrf.mxu0  ;;  %v13438_v14 = vld [vmem:[#allocation12 + $0x70] sm:$0xff]  }
 0x39e   :  { %11669 = vmatpush3.bf16.msra.mxu0 %v14730_v23  ;;  %11716 = vmatprep.mubr.bf16.mxu1 %v2548_v25  ;;  %v13440_v25 = vld [vmem:[#allocation12 + $0x68] sm:$0xff]  }
 0x39f   :  { %v11531_v0 = vpop.f32.mrf.mxu1  ;;  %11670 = vmatprep.subr.bf16.mxu0 %v13422_v45  ;;  %v2082_v11 = vpop.f32.mrf.mxu0  ;;  %11717 = vmatmul.mubr.bf16.vlgmr.msra.gmra.mxu1 %v2549_v48 }
 0x3a0   :  { %11765 = vmatpush3.bf16.msra.mxu1 %v14733_v40  ;;  %v2237_v59 = vpack.c.bf16 %v11531_v0, %v11530_v18  ;;  %v13446_v18 = vld [vmem:[#allocation7 + $0x48] sm:$0xff]  }
 0x3a1   :  { %v1988_v32 = vpop.f32.mrf.mxu1  ;;  %v11563_v15 = vpop.f32.mrf.mxu0  ;;  %11766 = vmatprep.subr.bf16.mxu1 %v14736_v27 }
 0x3a2   :  { %v2236_v57 = vpack.c.bf16 %v1988_v32, %v1985_v61  ;;  %11671 = vmatpush3.bf16.msra.mxu0 %v13422_v45  ;;  %v2551_v12 = vpack.c.bf16 %v11563_v15, %v11562_v62  ;;  %v13449_v45 = vld [vmem:[#allocation7 + $0x50] sm:$0xff]   ;;  %v13450_v32 = vld [vmem:[#allocation7 + $0x58] sm:$0xff]   ;;  %v13454_v15 = vld [vmem:[#allocation7 + $0x60] sm:$0xff]  }
 0x3a3   :  { %v11534_v20 = vpop.f32.mrf.mxu1  ;;  %11672 = vmatprep.subr.bf16.mxu0 %v13424_v2  ;;  %v2085_v21 = vpop.f32.mrf.mxu0 }
 0x3a4   :  { %11624 = vmatprep.mubr.bf16.mxu0 %v2236_v57  ;;  %v2550_v54 = vpack.c.bf16 %v2085_v21, %v2082_v11  ;;  %11767 = vmatpush3.bf16.msra.mxu1 %v14736_v27  ;;  %v13442_v11 = vld [vmem:[#allocation12 + $0x60] sm:$0xff]  }
 0x3a5   :  { %v2001_v55 = vpop.f32.mrf.mxu1  ;;  %11625 = vmatmul.mubr.bf16.gmra.mxu0 %v2237_v59  ;;  %v11566_v23 = vpop.f32.mrf.mxu0  ;;  %11768 = vmatprep.subr.bf16.mxu1 %v14741_v17 }
 0x3a6   :  { %11673 = vmatpush3.bf16.msra.mxu0 %v13424_v2  ;;  %11720 = vmatprep.mubr.bf16.mxu1 %v2550_v54 }
 0x3a7   :  { %v11535_v9 = vpop.f32.mrf.mxu1  ;;  %11674 = vmatprep.subr.bf16.mxu0 %v13426_v39  ;;  %v2098_v52 = vpop.f32.mrf.mxu0  ;;  %11721 = vmatmul.mubr.bf16.gmra.mxu1 %v2551_v12 }
 0x3a8   :  { %11769 = vmatpush3.bf16.msra.mxu1 %v14741_v17  ;;  %v2239_v6 = vpack.c.bf16 %v11535_v9, %v11534_v20  ;;  %v13444_v20 = vld [vmem:[#allocation12 + $0x58] sm:$0xff]   ;;  %v13458_v9 = vld [vmem:[#allocation7 + $0x70] sm:$0xff]  }
 0x3a9   :  { %v2004_v22 = vpop.f32.mrf.mxu1  ;;  %v11567_v16 = vpop.f32.mrf.mxu0  ;;  %11770 = vmatprep.subr.bf16.mxu1 %v14745_v46 }
 0x3aa   :  { %v2238_v56 = vpack.c.bf16 %v2004_v22, %v2001_v55  ;;  %11675 = vmatpush3.bf16.msra.mxu0 %v13426_v39  ;;  %v2553_v26 = vpack.c.bf16 %v11567_v16, %v11566_v23  ;;  %v13447_v55 = vld [vmem:[#allocation12 + $0x50] sm:$0xff]   ;;  %v13455_v23 = vld [vmem:[#allocation7 + $0x68] sm:$0xff]  }
 0x3ab   :  { %v11538_v28 = vpop.f32.mrf.mxu1  ;;  %11676 = vmatprep.subr.bf16.mxu0 %v13428_v24  ;;  %v2101_v19 = vpop.f32.mrf.mxu0  ;;  %v13448_v22 = vld [vmem:[#allocation12 + $0x48] sm:$0xff]  }
 0x3ac   :  { %11628 = vmatprep.mubr.bf16.mxu0 %v2238_v56  ;;  %v2552_v63 = vpack.c.bf16 %v2101_v19, %v2098_v52  ;;  %11771 = vmatpush3.bf16.msra.mxu1 %v14745_v46  ;;  %v13462_v19 = vld [vmem:[#allocation9 + $0x40] sm:$0xff]  }
 0x3ad   :  { %v2017_v50 = vpop.f32.mrf.mxu1  ;;  %11629 = vmatmul.mubr.bf16.gmra.mxu0 %v2239_v6  ;;  %v11570_v3 = vpop.f32.mrf.mxu0  ;;  %11772 = vmatprep.subr.bf16.mxu1 %v14749_v60  ;;  %v14769_v6 = vld [vmem:[#allocation4 + $0x40] sm:$0xff]  }
 0x3ae   :  { %11677 = vmatpush3.bf16.msra.mxu0 %v13428_v24  ;;  %11724 = vmatprep.mubr.bf16.mxu1 %v2552_v63  ;;  %v14772_v63 = vld [vmem:[#allocation4 + $0x48] sm:$0xff]  }
 0x3af   :  { %v11539_v5 = vpop.f32.mrf.mxu1  ;;  %11678 = vmatprep.subr.bf16.mxu0 %v13430_v8  ;;  %v2114_v43 = vpop.f32.mrf.mxu0  ;;  %11725 = vmatmul.mubr.bf16.gmra.mxu1 %v2553_v26  ;;  %v13459_v26 = vld [vmem:[#allocation7 + $0x78] sm:$0xff]  }
 0x3b0   :  { %11773 = vmatpush3.bf16.msra.mxu1 %v14749_v60  ;;  %v2241_v38 = vpack.c.bf16 %v11539_v5, %v11538_v28  ;;  %v13466_v5 = vld [vmem:[#allocation9 + $0x50] sm:$0xff]  }
 0x3b1   :  { %v2020_v29 = vpop.f32.mrf.mxu1  ;;  %v11571_v13 = vpop.f32.mrf.mxu0  ;;  %11774 = vmatprep.subr.bf16.mxu1 %v14753_v10 }
 0x3b2   :  { %v2240_v7 = vpack.c.bf16 %v2020_v29, %v2017_v50  ;;  %11679 = vmatpush3.bf16.msra.mxu0 %v13430_v8  ;;  %v2555_v1 = vpack.c.bf16 %v11571_v13, %v11570_v3  ;;  %v13451_v8 = vld [vmem:[#allocation12 + $0x40] sm:$0xff]   ;;  %v14774_v50 = vld [vmem:[#allocation4 + $0x50] sm:$0xff]   ;;  %v13463_v3 = vld [vmem:[#allocation9 + $0x48] sm:$0xff]  }
 0x3b3   :  { %v11590_v30 = vpop.f32.mrf.mxu1  ;;  %11680 = vmatprep.subr.bf16.mxu0 %v13432_v33  ;;  %v2117_v31 = vpop.f32.mrf.mxu0  ;;  %v13737_v29 = vld [vmem:[#allocation15 + $0x30] sm:$0xff]   ;;  %v14784_v13 = vld [vmem:[#allocation4 + $0x60] sm:$0xff]  }
 0x3b4   :  { %11632 = vmatprep.mubr.bf16.mxu0 %v2240_v7  ;;  %v2554_v34 = vpack.c.bf16 %v2117_v31, %v2114_v43  ;;  %11775 = vmatpush3.bf16.msra.mxu1 %v14753_v10  ;;  %v14781_v43 = vld [vmem:[#allocation4 + $0x58] sm:$0xff]   ;;  %v13474_v31 = vld [vmem:[#allocation9 + $0x70] sm:$0xff]  }
 0x3b5   :  { %v2163_v51 = vpop.f32.mrf.mxu1  ;;  %11633 = vmatmul.mubr.bf16.gmra.mxu0 %v2241_v38  ;;  %11776 = vmatprep.subr.bf16.mxu1 %v14757_v47  ;;  %v13467_v7 = vld [vmem:[#allocation9 + $0x58] sm:$0xff]   ;;  %v13470_v38 = vld [vmem:[#allocation9 + $0x60] sm:$0xff]  }
 0x3b6   :  { %11681 = vmatpush3.bf16.msra.mxu0 %v13432_v33  ;;  %11728 = vmatprep.mubr.bf16.mxu1 %v2554_v34  ;;  %v13736_v33 = vld [vmem:[#allocation15 + $0x38] sm:$0xff]   ;;  %v13741_v34 = vld [vmem:[#allocation15 + $0x10] sm:$0xff]  }
 0x3b7   :  { %v11591_v4 = vpop.f32.mrf.mxu1  ;;  %11682 = vmatprep.subr.bf16.mxu0 %v13434_v53  ;;  %11729 = vmatmul.mubr.bf16.gmra.mxu1 %v2555_v1  ;;  %v13471_v1 = vld [vmem:[#allocation9 + $0x68] sm:$0xff]  }
 0x3b8   :  { %11777 = vmatpush3.bf16.msra.mxu1 %v14757_v47  ;;  %11780 = vmatprep.mubr.bf16.mxu1 %v14760_v35  ;;  %v2557_v41 = vpack.c.bf16 %v11591_v4, %v11590_v30  ;;  %v13739_v30 = vld [vmem:[#allocation15 + $0x20] sm:$0xff]   ;;  %v13475_v4 = vld [vmem:[#allocation9 + $0x78] sm:$0xff]  }
 0x3b9   :  { %v2166_v42 = vpop.f32.mrf.mxu1  ;;  %11778 = vmatprep.subr.bf16.mxu1 %v14763_v36 }
 0x3ba   :  { %v2556_v49 = vpack.c.bf16 %v2166_v42, %v2163_v51  ;;  %11683 = vmatpush3.bf16.msra.mxu0 %v13434_v53  ;;  %v14794_v53 = vld [vmem:[#allocation4 + $0x70] sm:$0xff]   ;;  %v14804_v51 = vld [vmem:[#allocation10 + $0x40] sm:$0xff]  }
 0x3bb   :  { %v11594_v44 = vpop.f32.mrf.mxu1  ;;  %11732 = vmatprep.subr.bf16.mxu0 %v13436_v37  ;;  %v14814_v42 = vld [vmem:[#allocation10 + $0x50] sm:$0xff]  }
 0x3bc   :  { %11684 = vmatprep.mubr.bf16.mxu0 %v2556_v49  ;;  %11779 = vmatpush3.bf16.msra.mxu1 %v14763_v36  ;;  %v13744_v49 = vld [vmem:[#allocation16 + $0x38] sm:$0xff]  }
 0x3bd   :  { %v2179_v48 = vpop.f32.mrf.mxu1  ;;  %11685 = vmatmul.mubr.bf16.vlgmr.msra.gmra.mxu0 %v2557_v41  ;;  %11828 = vmatprep.subr.bf16.mxu1 %v13436_v37  ;;  %v13746_v41 = vld [vmem:[#allocation16 + $0x30] sm:$0xff]  }
 0x3be   :  { %11733 = vmatpush3.bf16.msra.mxu0 %v13436_v37 }
 0x3bf   :  { %v11595_v58 = vpop.f32.mrf.mxu1  ;;  %11734 = vmatprep.subr.bf16.mxu0 %v13438_v14  ;;  %11781 = vmatmul.mubr.bf16.vlgmr.msra.gmra.mxu1 %v13446_v18  ;;  %v13748_v18 = vld [vmem:[#allocation16 + $0x20] sm:$0xff]  }
 0x3c0   :  { %11829 = vmatpush3.bf16.msra.mxu1 %v13436_v37  ;;  %11784 = vmatprep.mubr.bf16.mxu1 %v13449_v45  ;;  %v2559_v0 = vpack.c.bf16 %v11595_v58, %v11594_v44  ;;  %v14811_v37 = vld [vmem:[#allocation10 + $0x48] sm:$0xff]   ;;  %v14821_v44 = vld [vmem:[#allocation10 + $0x58] sm:$0xff]  }
 0x3c1   :  { %v2182_v61 = vpop.f32.mrf.mxu1  ;;  %11830 = vmatprep.subr.bf16.mxu1 %v13438_v14  ;;  %v14827_v45 = vld [vmem:[#allocation10 + $0x68] sm:$0xff]   ;;  %v13749_v58 = vld [vmem:[#allocation16 + $0x18] sm:$0xff]  }
 0x3c2   :  { %v2558_v62 = vpack.c.bf16 %v2182_v61, %v2179_v48  ;;  %11735 = vmatpush3.bf16.msra.mxu0 %v13438_v14  ;;  %16138 = vst [vmem:[#allocation41_spill] sm:$0xff] %v14827_v45  ;;  %v14829_v48 = vld [vmem:[#allocation10 + $0x70] sm:$0xff]   ;;  %v14833_v61 = vld [vmem:[#allocation10 + $0x78] sm:$0xff]  }
 0x3c3   :  { %v11598_v2 = vpop.f32.mrf.mxu1  ;;  %11736 = vmatprep.subr.bf16.mxu0 %v13440_v25  ;;  %16139 = vst [vmem:[#allocation42_spill] sm:$0xff] %v14829_v48  ;;  %16140 = vst [vmem:[#allocation43_spill] sm:$0xff] %v14833_v61 }
 0x3c4   :  { %11688 = vmatprep.mubr.bf16.mxu0 %v2558_v62  ;;  %11831 = vmatpush3.bf16.msra.mxu1 %v13438_v14  ;;  %v14823_v14 = vld [vmem:[#allocation10 + $0x60] sm:$0xff]   ;;  %v13751_v62 = vld [vmem:[#allocation16 + $0x8] sm:$0xff]  }
 0x3c5   :  { %v2195_v57 = vpop.f32.mrf.mxu1  ;;  %11689 = vmatmul.mubr.bf16.gmra.mxu0 %v2559_v0  ;;  %11832 = vmatprep.subr.bf16.mxu1 %v13440_v25  ;;  %16137 = vst [vmem:[#allocation40_spill] sm:$0xff] %v14823_v14  ;;  %v13752_v0 = vld [vmem:[#allocation16] sm:$0xff]  }
 0x3c6   :  { %11737 = vmatpush3.bf16.msra.mxu0 %v13440_v25 }
 0x3c7   :  { %v11599_v59 = vpop.f32.mrf.mxu1  ;;  %11738 = vmatprep.subr.bf16.mxu0 %v13442_v11  ;;  %11785 = vmatmul.mubr.bf16.gmra.mxu1 %v13450_v32 }
 0x3c8   :  { %11833 = vmatpush3.bf16.msra.mxu1 %v13440_v25  ;;  %11788 = vmatprep.mubr.bf16.mxu1 %v13454_v15  ;;  %v2561_v21 = vpack.c.bf16 %v11599_v59, %v11598_v2  ;;  %v13750_v25 = vld [vmem:[#allocation16 + $0x10] sm:$0xff]   ;;  %v14836_v2 = vld [vmem:[#allocation19 + $0x38] sm:$0xff]  }
 0x3c9   :  { %v2198_v39 = vpop.f32.mrf.mxu1  ;;  %11834 = vmatprep.subr.bf16.mxu1 %v13442_v11 }
 0x3ca   :  { %v2560_v12 = vpack.c.bf16 %v2198_v39, %v2195_v57  ;;  %11739 = vmatpush3.bf16.msra.mxu0 %v13442_v11 }
 0x3cb   :  { %v11602_v54 = vpop.f32.mrf.mxu1  ;;  %11740 = vmatprep.subr.bf16.mxu0 %v13444_v20 }
 0x3cc   :  { %11692 = vmatprep.mubr.bf16.mxu0 %v2560_v12  ;;  %11835 = vmatpush3.bf16.msra.mxu1 %v13442_v11 }
 0x3cd   :  { %v2211_v24 = vpop.f32.mrf.mxu1  ;;  %11693 = vmatmul.mubr.bf16.gmra.mxu0 %v2561_v21  ;;  %11836 = vmatprep.subr.bf16.mxu1 %v13444_v20 }
 0x3ce   :  { %11741 = vmatpush3.bf16.msra.mxu0 %v13444_v20 }
 0x3cf   :  { %v11603_v52 = vpop.f32.mrf.mxu1  ;;  %11742 = vmatprep.subr.bf16.mxu0 %v13447_v55  ;;  %11789 = vmatmul.mubr.bf16.gmra.mxu1 %v13455_v23 }
 0x3d0   :  { %11837 = vmatpush3.bf16.msra.mxu1 %v13444_v20  ;;  %11792 = vmatprep.mubr.bf16.mxu1 %v13458_v9  ;;  %v2563_v28 = vpack.c.bf16 %v11603_v52, %v11602_v54 }
 0x3d1   :  { %v2214_v16 = vpop.f32.mrf.mxu1  ;;  %11838 = vmatprep.subr.bf16.mxu1 %v13447_v55 }
 0x3d2   :  { %v2562_v56 = vpack.c.bf16 %v2214_v16, %v2211_v24  ;;  %11743 = vmatpush3.bf16.msra.mxu0 %v13447_v55 }
 0x3d3   :  { %11744 = vmatprep.subr.bf16.mxu0 %v13448_v22 }
 0x3d4   :  { %11696 = vmatprep.mubr.bf16.mxu0 %v2562_v56  ;;  %11839 = vmatpush3.bf16.msra.mxu1 %v13447_v55 }
 0x3d5   :  { %11697 = vmatmul.mubr.bf16.gmra.mxu0 %v2563_v28  ;;  %11840 = vmatprep.subr.bf16.mxu1 %v13448_v22 }
 0x3d6   :  { %11745 = vmatpush3.bf16.msra.mxu0 %v13448_v22  ;;  %11748 = vmatprep.mubr.bf16.mxu0 %v14769_v6 }
 0x3d7   :  { %11746 = vmatprep.subr.bf16.mxu0 %v13451_v8  ;;  %11793 = vmatmul.mubr.bf16.gmra.mxu1 %v13459_v26 }
 0x3d8   :  { %11841 = vmatpush3.bf16.msra.mxu1 %v13448_v22  ;;  %11844 = vmatprep.mubr.bf16.mxu1 %v13462_v19 }
 0x3d9   :  { %11842 = vmatprep.subr.bf16.mxu1 %v13451_v8 }
 0x3da   :  { %11747 = vmatpush3.bf16.msra.mxu0 %v13451_v8 }
 0x3db   :  { %11796 = vmatprep.subr.bf16.mxu0 %v14733_v40 }
 0x3dc   :  { %11843 = vmatpush3.bf16.msra.mxu1 %v13451_v8 }
 0x3dd   :  { %11749 = vmatmul.mubr.bf16.vlgmr.msra.gmra.mxu0 %v14772_v63  ;;  %11892 = vmatprep.subr.bf16.mxu1 %v13736_v33 }
 0x3de   :  { %11797 = vmatpush3.bf16.msra.mxu0 %v14733_v40  ;;  %11752 = vmatprep.mubr.bf16.mxu0 %v14774_v50  ;;  %v13738_v40 = vld [vmem:[#allocation15 + $0x28] sm:$0xff]  }
 0x3df   :  { %11798 = vmatprep.subr.bf16.mxu0 %v14736_v27  ;;  %11845 = vmatmul.mubr.bf16.vlgmr.msra.gmra.mxu1 %v13463_v3 }
 0x3e0   :  { %11848 = vmatprep.mubr.bf16.mxu1 %v13466_v5  ;;  %11893 = vmatpush3.bf16.msra.mxu1 %v13736_v33 }
 0x3e1   :  { %11894 = vmatprep.subr.bf16.mxu1 %v13737_v29 }
 0x3e2   :  { %11799 = vmatpush3.bf16.msra.mxu0 %v14736_v27  ;;  %v14791_v27 = vld [vmem:[#allocation4 + $0x68] sm:$0xff]  }
 0x3e3   :  { %11800 = vmatprep.subr.bf16.mxu0 %v14741_v17 }
 0x3e4   :  { %11895 = vmatpush3.bf16.msra.mxu1 %v13737_v29 }
 0x3e5   :  { %11753 = vmatmul.mubr.bf16.gmra.mxu0 %v14781_v43  ;;  %11896 = vmatprep.subr.bf16.mxu1 %v13738_v40 }
 0x3e6   :  { %11801 = vmatpush3.bf16.msra.mxu0 %v14741_v17  ;;  %11756 = vmatprep.mubr.bf16.mxu0 %v14784_v13  ;;  %v13740_v17 = vld [vmem:[#allocation15 + $0x18] sm:$0xff]  }
 0x3e7   :  { %11802 = vmatprep.subr.bf16.mxu0 %v14745_v46  ;;  %11849 = vmatmul.mubr.bf16.gmra.mxu1 %v13467_v7 }
 0x3e8   :  { %11852 = vmatprep.mubr.bf16.mxu1 %v13470_v38  ;;  %11897 = vmatpush3.bf16.msra.mxu1 %v13738_v40 }
 0x3e9   :  { %11898 = vmatprep.subr.bf16.mxu1 %v13739_v30 }
 0x3ea   :  { %11803 = vmatpush3.bf16.msra.mxu0 %v14745_v46  ;;  %v14801_v46 = vld [vmem:[#allocation4 + $0x78] sm:$0xff]  }
 0x3eb   :  { %11804 = vmatprep.subr.bf16.mxu0 %v14749_v60 }
 0x3ec   :  { %11899 = vmatpush3.bf16.msra.mxu1 %v13739_v30 }
 0x3ed   :  { %11757 = vmatmul.mubr.bf16.gmra.mxu0 %v14791_v27  ;;  %11900 = vmatprep.subr.bf16.mxu1 %v13740_v17 }
 0x3ee   :  { %11805 = vmatpush3.bf16.msra.mxu0 %v14749_v60  ;;  %11760 = vmatprep.mubr.bf16.mxu0 %v14794_v53  ;;  %v13742_v60 = vld [vmem:[#allocation15 + $0x8] sm:$0xff]  }
 0x3ef   :  { %11806 = vmatprep.subr.bf16.mxu0 %v14753_v10  ;;  %11853 = vmatmul.mubr.bf16.gmra.mxu1 %v13471_v1 }
 0x3f0   :  { %11856 = vmatprep.mubr.bf16.mxu1 %v13474_v31  ;;  %11901 = vmatpush3.bf16.msra.mxu1 %v13740_v17 }
 0x3f1   :  { %11902 = vmatprep.subr.bf16.mxu1 %v13741_v34 }
 0x3f2   :  { %11807 = vmatpush3.bf16.msra.mxu0 %v14753_v10  ;;  %v13743_v10 = vld [vmem:[#allocation15] sm:$0xff]  }
 0x3f3   :  { %11808 = vmatprep.subr.bf16.mxu0 %v14757_v47 }
 0x3f4   :  { %11903 = vmatpush3.bf16.msra.mxu1 %v13741_v34 }
 0x3f5   :  { %11761 = vmatmul.mubr.bf16.gmra.mxu0 %v14801_v46  ;;  %11904 = vmatprep.subr.bf16.mxu1 %v13742_v60 }
 0x3f6   :  { %11809 = vmatpush3.bf16.msra.mxu0 %v14757_v47  ;;  %11812 = vmatprep.mubr.bf16.mxu0 %v14804_v51  ;;  %v14817_v47 = vld [vmem:[#allocation18 + $0x38] sm:$0xff]  }
 0x3f7   :  { %11810 = vmatprep.subr.bf16.mxu0 %v14763_v36  ;;  %11857 = vmatmul.mubr.bf16.gmra.mxu1 %v13475_v4 }
 0x3f8   :  { %11905 = vmatpush3.bf16.msra.mxu1 %v13742_v60 }
 0x3f9   :  { %11906 = vmatprep.subr.bf16.mxu1 %v13743_v10 }
 0x3fa   :  { %11811 = vmatpush3.bf16.msra.mxu0 %v14763_v36  ;;  %v13747_v36 = vld [vmem:[#allocation16 + $0x28] sm:$0xff]  }
 0x3fb   :  { %11860 = vmatprep.subr.bf16.mxu0 %v13744_v49 }
 0x3fc   :  { %11907 = vmatpush3.bf16.msra.mxu1 %v13743_v10 }
 0x3fd   :  { %11813 = vmatmul.mubr.bf16.vlgmr.msra.gmra.mxu0 %v14811_v37  ;;  %11956 = vmatprep.subr.bf16.mxu1 %v14817_v47 }
 0x3fe   :  { %11816 = vmatprep.mubr.bf16.mxu0 %v14814_v42  ;;  %11861 = vmatpush3.bf16.msra.mxu0 %v13744_v49 }
 0x3ff   :  { %11862 = vmatprep.subr.bf16.mxu0 %v13746_v41 }
 0x402   :  { %11863 = vmatpush3.bf16.msra.mxu0 %v13746_v41 }
 0x403   :  { %11864 = vmatprep.subr.bf16.mxu0 %v13747_v36 }
 0x405   :  { %11817 = vmatmul.mubr.bf16.gmra.mxu0 %v14821_v44 }
 0x406   :  { %11820 = vmatprep.mubr.bf16.mxu0 %v14823_v14  ;;  %11865 = vmatpush3.bf16.msra.mxu0 %v13747_v36 }
 0x407   :  { %11866 = vmatprep.subr.bf16.mxu0 %v13748_v18 }
 0x40a   :  { %11867 = vmatpush3.bf16.msra.mxu0 %v13748_v18 }
 0x40b   :  { %11868 = vmatprep.subr.bf16.mxu0 %v13749_v58 }
 0x40d   :  { %11821 = vmatmul.mubr.bf16.gmra.mxu0 %v14827_v45 }
 0x40e   :  { %11824 = vmatprep.mubr.bf16.mxu0 %v14829_v48  ;;  %11869 = vmatpush3.bf16.msra.mxu0 %v13749_v58 }
 0x40f   :  { %11870 = vmatprep.subr.bf16.mxu0 %v13750_v25 }
 0x412   :  { %11871 = vmatpush3.bf16.msra.mxu0 %v13750_v25 }
 0x413   :  { %11872 = vmatprep.subr.bf16.mxu0 %v13751_v62 }
 0x415   :  { %11825 = vmatmul.mubr.bf16.gmra.mxu0 %v14833_v61 }
 0x416   :  { %11873 = vmatpush3.bf16.msra.mxu0 %v13751_v62 }
 0x417   :  { %11874 = vmatprep.subr.bf16.mxu0 %v13752_v0 }
 0x41a   :  { %11875 = vmatpush3.bf16.msra.mxu0 %v13752_v0 }
 0x41b   :  { %11924 = vmatprep.subr.bf16.mxu0 %v14836_v2 }
 0x43e   :  { %v11654_v11 = vpop.f32.mrf.mxu1 }
 0x440   :  { %v2469_v32 = vpop.f32.mrf.mxu1 }
 0x442   :  { %v11655_v15 = vpop.f32.mrf.mxu1 }
 0x444   :  { %v14839_v57 = vpop.f32.mrf.mxu1 }
 0x445   :  { %16141 = vst [vmem:[#allocation44_spill] sm:$0xff] %v14839_v57 }
 0x446   :  { %v11658_v59 = vpop.f32.mrf.mxu1 }
 0x448   :  { %v2485_v20 = vpop.f32.mrf.mxu1 }
 0x44a   :  { %v11659_v39 = vpop.f32.mrf.mxu1 }
 0x44c   :  { %v14841_v12 = vpop.f32.mrf.mxu1 }
 0x44d   :  { %16142 = vst [vmem:[#allocation45_spill] sm:$0xff] %v14841_v12 }
 0x44e   :  { %v11662_v21 = vpop.f32.mrf.mxu1 }
 0x450   :  { %v2501_v54 = vpop.f32.mrf.mxu1 }
 0x452   :  { %v11663_v55 = vpop.f32.mrf.mxu1 }
 0x454   :  { %v14843_v23 = vpop.f32.mrf.mxu1 }
 0x455   :  { %16143 = vst [vmem:[#allocation46_spill] sm:$0xff] %v14843_v23 }
 0x456   :  { %v11666_v9 = vpop.f32.mrf.mxu1 }
 0x458   :  { %v2517_v24 = vpop.f32.mrf.mxu1 }
 0x45a   :  { %v11667_v52 = vpop.f32.mrf.mxu1 }
 0x45c   :  { %v14845_v22 = vpop.f32.mrf.mxu1 }
 0x45d   :  { %16144 = vst [vmem:[#allocation47_spill] sm:$0xff] %v14845_v22  ;;  %v11622_v16 = vpop.f32.mrf.mxu0 }
 0x45e   :  { %v14847_v56 = vadd.f32 %v11654_v11, %v11622_v16 }
 0x45f   :  { %v2324_v28 = vpop.f32.mrf.mxu0  ;;  %v11718_v8 = vpop.f32.mrf.mxu1 }
 0x460   :  { %16145 = vst [vmem:[#allocation48_spill] sm:$0xff] %v14847_v56  ;;  %v14849_v26 = vadd.f32 %v2469_v32, %v2324_v28 }
 0x461   :  { %v11623_v19 = vpop.f32.mrf.mxu0  ;;  %v2791_v3 = vpop.f32.mrf.mxu1 }
 0x462   :  { %16146 = vst [vmem:[#allocation49_spill] sm:$0xff] %v14849_v26  ;;  %v14851_v5 = vadd.f32 %v11655_v15, %v11623_v19 }
 0x463   :  { %v14853_v33 = vpop.f32.mrf.mxu0  ;;  %v11719_v29 = vpop.f32.mrf.mxu1 }
 0x464   :  { %16147 = vst [vmem:[#allocation50_spill] sm:$0xff] %v14851_v5  ;;  %16148 = vst [vmem:[#allocation51_spill] sm:$0xff] %v14853_v33 }
 0x465   :  { %v11626_v7 = vpop.f32.mrf.mxu0  ;;  %v14855_v38 = vpop.f32.mrf.mxu1 }
 0x466   :  { %16149 = vst [vmem:[#allocation52_spill] sm:$0xff] %v14855_v38  ;;  %v14857_v40 = vadd.f32 %v11658_v59, %v11626_v7 }
 0x467   :  { %v2340_v30 = vpop.f32.mrf.mxu0  ;;  %v11722_v1 = vpop.f32.mrf.mxu1 }
 0x468   :  { %16150 = vst [vmem:[#allocation53_spill] sm:$0xff] %v14857_v40  ;;  %v14859_v31 = vadd.f32 %v2485_v20, %v2340_v30 }
 0x469   :  { %v11627_v17 = vpop.f32.mrf.mxu0  ;;  %v2807_v34 = vpop.f32.mrf.mxu1 }
 0x46a   :  { %16151 = vst [vmem:[#allocation54_spill] sm:$0xff] %v14859_v31  ;;  %v14861_v4 = vadd.f32 %v11659_v39, %v11627_v17 }
 0x46b   :  { %v14863_v60 = vpop.f32.mrf.mxu0  ;;  %v11723_v10 = vpop.f32.mrf.mxu1 }
 0x46c   :  { %16152 = vst [vmem:[#allocation55_spill] sm:$0xff] %v14861_v4  ;;  %16153 = vst [vmem:[#allocation56_spill] sm:$0xff] %v14863_v60 }
 0x46d   :  { %v11630_v49 = vpop.f32.mrf.mxu0  ;;  %v14865_v41 = vpop.f32.mrf.mxu1 }
 0x46e   :  { %16154 = vst [vmem:[#allocation57_spill] sm:$0xff] %v14865_v41  ;;  %v14867_v36 = vadd.f32 %v11662_v21, %v11630_v49 }
 0x46f   :  { %v2356_v18 = vpop.f32.mrf.mxu0  ;;  %v11726_v58 = vpop.f32.mrf.mxu1 }
 0x470   :  { %16155 = vst [vmem:[#allocation58_spill] sm:$0xff] %v14867_v36  ;;  %v14869_v25 = vadd.f32 %v2501_v54, %v2356_v18 }
 0x471   :  { %v11631_v62 = vpop.f32.mrf.mxu0  ;;  %v2823_v0 = vpop.f32.mrf.mxu1 }
 0x472   :  { %16156 = vst [vmem:[#allocation59_spill] sm:$0xff] %v14869_v25  ;;  %v14871_v11 = vadd.f32 %v11663_v55, %v11631_v62 }
 0x473   :  { %v14873_v32 = vpop.f32.mrf.mxu0  ;;  %v11727_v15 = vpop.f32.mrf.mxu1 }
 0x474   :  { %16157 = vst [vmem:[#allocation60_spill] sm:$0xff] %v14871_v11  ;;  %16158 = vst [vmem:[#allocation61_spill] sm:$0xff] %v14873_v32 }
 0x475   :  { %v11634_v59 = vpop.f32.mrf.mxu0  ;;  %v14875_v20 = vpop.f32.mrf.mxu1 }
 0x476   :  { %16159 = vst [vmem:[#allocation62_spill] sm:$0xff] %v14875_v20  ;;  %v14877_v39 = vadd.f32 %v11666_v9, %v11634_v59 }
 0x477   :  { %v2372_v16 = vpop.f32.mrf.mxu0  ;;  %v11730_v28 = vpop.f32.mrf.mxu1 }
 0x478   :  { %16160 = vst [vmem:[#allocation63_spill] sm:$0xff] %v14877_v39  ;;  %v14879_v21 = vadd.f32 %v2517_v24, %v2372_v16 }
 0x479   :  { %v11635_v19 = vpop.f32.mrf.mxu0  ;;  %v14881_v7 = vpop.f32.mrf.mxu1 }
 0x47a   :  { %16161 = vst [vmem:[#allocation64_spill] sm:$0xff] %v14879_v21  ;;  %v14883_v54 = vadd.f32 %v11667_v52, %v11635_v19 }
 0x47b   :  { %v14885_v30 = vpop.f32.mrf.mxu0  ;;  %v14887_v55 = vpop.f32.mrf.mxu1 }
 0x47c   :  { %16162 = vst [vmem:[#allocation65_spill] sm:$0xff] %v14883_v54  ;;  %16163 = vst [vmem:[#allocation66_spill] sm:$0xff] %v14885_v30 }
 0x47d   :  { %v11686_v17 = vpop.f32.mrf.mxu0  ;;  %v14889_v49 = vpop.f32.mrf.mxu1 }
 0x47e   :  { %16164 = vst [vmem:[#allocation67_spill] sm:$0xff] %v14889_v49  ;;  %v14891_v18 = vadd.f32 %v11718_v8, %v11686_v17 }
 0x47f   :  { %v2646_v9 = vpop.f32.mrf.mxu0  ;;  %v11782_v62 = vpop.f32.mrf.mxu1 }
 0x480   :  { %16165 = vst [vmem:[#allocation68_spill] sm:$0xff] %v14891_v18  ;;  %v14893_v59 = vadd.f32 %v2791_v3, %v2646_v9 }
 0x481   :  { %v11687_v24 = vpop.f32.mrf.mxu0  ;;  %v3327_v16 = vpop.f32.mrf.mxu1 }
 0x482   :  { %16166 = vst [vmem:[#allocation69_spill] sm:$0xff] %v14893_v59  ;;  %v14895_v22 = vadd.f32 %v11719_v29, %v11687_v24 }
 0x483   :  { %v14897_v23 = vpop.f32.mrf.mxu0  ;;  %v11783_v52 = vpop.f32.mrf.mxu1 }
 0x484   :  { %16167 = vst [vmem:[#allocation70_spill] sm:$0xff] %v14895_v22  ;;  %16168 = vst [vmem:[#allocation71_spill] sm:$0xff] %v14897_v23  ;;  %v3689_v30 = vpack.c.bf16 %v11783_v52, %v11782_v62  ;;  %v13754_v62 = vld [vmem:[#allocation19 + $0x30] sm:$0xff]  }
 0x485   :  { %v11690_v19 = vpop.f32.mrf.mxu0  ;;  %v3330_v32 = vpop.f32.mrf.mxu1 }
 0x486   :  { %v14899_v12 = vadd.f32 %v11722_v1, %v11690_v19  ;;  %v3688_v60 = vpack.c.bf16 %v3330_v32, %v3327_v16  ;;  %v13755_v19 = vld [vmem:[#allocation19 + $0x28] sm:$0xff]  }
 0x487   :  { %v2662_v57 = vpop.f32.mrf.mxu0  ;;  %v11786_v8 = vpop.f32.mrf.mxu1 }
 0x488   :  { %16169 = vst [vmem:[#allocation72_spill] sm:$0xff] %v14899_v12  ;;  %v14901_v17 = vadd.f32 %v2807_v34, %v2662_v57  ;;  %11876 = vmatprep.mubr.bf16.mxu0 %v3688_v60 }
 0x489   :  { %v11691_v3 = vpop.f32.mrf.mxu0  ;;  %v3343_v9 = vpop.f32.mrf.mxu1  ;;  %11877 = vmatmul.mubr.bf16.vlgmr.msra.gmra.mxu0 %v3689_v30 }
 0x48a   :  { %16170 = vst [vmem:[#allocation73_spill] sm:$0xff] %v14901_v17  ;;  %v14903_v33 = vadd.f32 %v11723_v10, %v11691_v3  ;;  %11925 = vmatpush3.bf16.msra.mxu0 %v14836_v2 }
 0x48b   :  { %v14906_v29 = vpop.f32.mrf.mxu0  ;;  %v11787_v24 = vpop.f32.mrf.mxu1  ;;  %11926 = vmatprep.subr.bf16.mxu0 %v13754_v62 }
 0x48c   :  { %16171 = vst [vmem:[#allocation74_spill] sm:$0xff] %v14903_v33  ;;  %16172 = vst [vmem:[#allocation75_spill] sm:$0xff] %v14906_v29  ;;  %v3691_v52 = vpack.c.bf16 %v11787_v24, %v11786_v8 }
 0x48d   :  { %v11694_v1 = vpop.f32.mrf.mxu0  ;;  %v3346_v32 = vpop.f32.mrf.mxu1 }
 0x48e   :  { %v14908_v16 = vadd.f32 %v11726_v58, %v11694_v1  ;;  %v3690_v57 = vpack.c.bf16 %v3346_v32, %v3343_v9  ;;  %11927 = vmatpush3.bf16.msra.mxu0 %v13754_v62  ;;  %v13756_v58 = vld [vmem:[#allocation19 + $0x20] sm:$0xff]  }
 0x48f   :  { %v2678_v34 = vpop.f32.mrf.mxu0  ;;  %v11790_v60 = vpop.f32.mrf.mxu1  ;;  %11928 = vmatprep.subr.bf16.mxu0 %v13755_v19 }
 0x490   :  { %16173 = vst [vmem:[#allocation76_spill] sm:$0xff] %v14908_v16  ;;  %v14910_v10 = vadd.f32 %v2823_v0, %v2678_v34  ;;  %11880 = vmatprep.mubr.bf16.mxu0 %v3690_v57  ;;  %v13757_v34 = vld [vmem:[#allocation19 + $0x18] sm:$0xff]  }
 0x491   :  { %v11695_v2 = vpop.f32.mrf.mxu0  ;;  %v3359_v30 = vpop.f32.mrf.mxu1  ;;  %11881 = vmatmul.mubr.bf16.gmra.mxu0 %v3691_v52 }
 0x492   :  { %16174 = vst [vmem:[#allocation77_spill] sm:$0xff] %v14910_v10  ;;  %v14912_v3 = vadd.f32 %v11727_v15, %v11695_v2  ;;  %11929 = vmatpush3.bf16.msra.mxu0 %v13755_v19 }
 0x493   :  { %v14914_v38 = vpop.f32.mrf.mxu0  ;;  %v11791_v8 = vpop.f32.mrf.mxu1  ;;  %11930 = vmatprep.subr.bf16.mxu0 %v13756_v58 }
 0x494   :  { %16175 = vst [vmem:[#allocation78_spill] sm:$0xff] %v14912_v3  ;;  %16176 = vst [vmem:[#allocation79_spill] sm:$0xff] %v14914_v38  ;;  %v3693_v24 = vpack.c.bf16 %v11791_v8, %v11790_v60 }
 0x495   :  { %v11698_v9 = vpop.f32.mrf.mxu0  ;;  %v3362_v62 = vpop.f32.mrf.mxu1 }
 0x496   :  { %v14916_v1 = vadd.f32 %v11730_v28, %v11698_v9  ;;  %v3692_v32 = vpack.c.bf16 %v3362_v62, %v3359_v30  ;;  %11931 = vmatpush3.bf16.msra.mxu0 %v13756_v58  ;;  %v13758_v30 = vld [vmem:[#allocation19 + $0x10] sm:$0xff]  }
 0x497   :  { %v2694_v0 = vpop.f32.mrf.mxu0  ;;  %v11794_v57 = vpop.f32.mrf.mxu1  ;;  %11932 = vmatprep.subr.bf16.mxu0 %v13757_v34 }
 0x498   :  { %16177 = vst [vmem:[#allocation80_spill] sm:$0xff] %v14916_v1  ;;  %v14919_v15 = vadd.f32 %v14881_v7, %v2694_v0  ;;  %11884 = vmatprep.mubr.bf16.mxu0 %v3692_v32  ;;  %v13759_v32 = vld [vmem:[#allocation19 + $0x8] sm:$0xff]  }
 0x499   :  { %v11699_v52 = vpop.f32.mrf.mxu0  ;;  %v3375_v19 = vpop.f32.mrf.mxu1  ;;  %11885 = vmatmul.mubr.bf16.gmra.mxu0 %v3693_v24 }
 0x49a   :  { %16178 = vst [vmem:[#allocation81_spill] sm:$0xff] %v14919_v15  ;;  %v14922_v2 = vadd.f32 %v14887_v55, %v11699_v52  ;;  %11933 = vmatpush3.bf16.msra.mxu0 %v13757_v34  ;;  %v13760_v52 = vld [vmem:[#allocation19] sm:$0xff]  }
 0x49b   :  { %v14924_v60 = vpop.f32.mrf.mxu0  ;;  %v11795_v28 = vpop.f32.mrf.mxu1  ;;  %11934 = vmatprep.subr.bf16.mxu0 %v13758_v30 }
 0x49c   :  { %16179 = vst [vmem:[#allocation82_spill] sm:$0xff] %v14922_v2  ;;  %16180 = vst [vmem:[#allocation83_spill] sm:$0xff] %v14924_v60  ;;  %v3695_v58 = vpack.c.bf16 %v11795_v28, %v11794_v57 }
 0x49d   :  { %v11750_v8 = vpop.f32.mrf.mxu0  ;;  %v3378_v9 = vpop.f32.mrf.mxu1 }
 0x49e   :  { %v3694_v62 = vpack.c.bf16 %v3378_v9, %v3375_v19  ;;  %11935 = vmatpush3.bf16.msra.mxu0 %v13758_v30 }
 0x49f   :  { %v3134_v7 = vpop.f32.mrf.mxu0  ;;  %v11846_v0 = vpop.f32.mrf.mxu1  ;;  %11936 = vmatprep.subr.bf16.mxu0 %v13759_v32 }
 0x4a0   :  { %11888 = vmatprep.mubr.bf16.mxu0 %v3694_v62  ;;  %v13761_v62 = vld [vmem:[#allocation18 + $0x30] sm:$0xff]  }
 0x4a1   :  { %v11751_v24 = vpop.f32.mrf.mxu0  ;;  %v3617_v23 = vpop.f32.mrf.mxu1  ;;  %11889 = vmatmul.mubr.bf16.gmra.mxu0 %v3695_v58 }
 0x4a2   :  { %11937 = vmatpush3.bf16.msra.mxu0 %v13759_v32  ;;  %v3681_v29 = vpack.c.bf16 %v11751_v24, %v11750_v8 }
 0x4a3   :  { %v3137_v55 = vpop.f32.mrf.mxu0  ;;  %v11847_v34 = vpop.f32.mrf.mxu1  ;;  %11938 = vmatprep.subr.bf16.mxu0 %v13760_v52 }
 0x4a4   :  { %v3680_v41 = vpack.c.bf16 %v3137_v55, %v3134_v7  ;;  %v3915_v57 = vpack.c.bf16 %v11847_v34, %v11846_v0 }
 0x4a5   :  { %v11754_v49 = vpop.f32.mrf.mxu0  ;;  %v3620_v28 = vpop.f32.mrf.mxu1 }
 0x4a6   :  { %11908 = vmatprep.mubr.bf16.mxu1 %v3680_v41  ;;  %v3914_v19 = vpack.c.bf16 %v3620_v28, %v3617_v23  ;;  %11939 = vmatpush3.bf16.msra.mxu0 %v13760_v52  ;;  %v13762_v41 = vld [vmem:[#allocation18 + $0x28] sm:$0xff]   ;;  %v13763_v28 = vld [vmem:[#allocation18 + $0x20] sm:$0xff]  }
 0x4a7   :  { %v3150_v30 = vpop.f32.mrf.mxu0  ;;  %11909 = vmatmul.mubr.bf16.vlgmr.msra.gmra.mxu1 %v3681_v29  ;;  %v11850_v9 = vpop.f32.mrf.mxu1 }
 0x4a8   :  { %11957 = vmatpush3.bf16.msra.mxu1 %v14817_v47  ;;  %11940 = vmatprep.mubr.bf16.mxu0 %v3914_v19 }
 0x4a9   :  { %v11755_v58 = vpop.f32.mrf.mxu0  ;;  %11958 = vmatprep.subr.bf16.mxu1 %v13761_v62  ;;  %v3633_v32 = vpop.f32.mrf.mxu1  ;;  %11941 = vmatmul.mubr.bf16.vlgmr.msra.gmra.mxu0 %v3915_v57 }
 0x4aa   :  { %v3683_v0 = vpack.c.bf16 %v11755_v58, %v11754_v49 }
 0x4ab   :  { %v3153_v60 = vpop.f32.mrf.mxu0  ;;  %v11851_v7 = vpop.f32.mrf.mxu1 }
 0x4ac   :  { %v3682_v8 = vpack.c.bf16 %v3153_v60, %v3150_v30  ;;  %11959 = vmatpush3.bf16.msra.mxu1 %v13761_v62  ;;  %v3917_v23 = vpack.c.bf16 %v11851_v7, %v11850_v9  ;;  %v13764_v9 = vld [vmem:[#allocation18 + $0x18] sm:$0xff]  }
 0x4ad   :  { %v11758_v24 = vpop.f32.mrf.mxu0  ;;  %11960 = vmatprep.subr.bf16.mxu1 %v13762_v41  ;;  %v3636_v55 = vpop.f32.mrf.mxu1 }
 0x4ae   :  { %11912 = vmatprep.mubr.bf16.mxu1 %v3682_v8  ;;  %v3916_v29 = vpack.c.bf16 %v3636_v55, %v3633_v32  ;;  %v13765_v55 = vld [vmem:[#allocation18 + $0x10] sm:$0xff]  }
 0x4af   :  { %v3166_v34 = vpop.f32.mrf.mxu0  ;;  %11913 = vmatmul.mubr.bf16.gmra.mxu1 %v3683_v0  ;;  %v11854_v47 = vpop.f32.mrf.mxu1 }
 0x4b0   :  { %11961 = vmatpush3.bf16.msra.mxu1 %v13762_v41  ;;  %11944 = vmatprep.mubr.bf16.mxu0 %v3916_v29 }
 0x4b1   :  { %v11759_v52 = vpop.f32.mrf.mxu0  ;;  %11962 = vmatprep.subr.bf16.mxu1 %v13763_v28  ;;  %v3649_v57 = vpop.f32.mrf.mxu1  ;;  %11945 = vmatmul.mubr.bf16.gmra.mxu0 %v3917_v23 }
 0x4b2   :  { %v3685_v30 = vpack.c.bf16 %v11759_v52, %v11758_v24 }
 0x4b3   :  { %v3169_v60 = vpop.f32.mrf.mxu0  ;;  %v11855_v19 = vpop.f32.mrf.mxu1 }
 0x4b4   :  { %v3684_v49 = vpack.c.bf16 %v3169_v60, %v3166_v34  ;;  %11963 = vmatpush3.bf16.msra.mxu1 %v13763_v28  ;;  %v3919_v62 = vpack.c.bf16 %v11855_v19, %v11854_v47  ;;  %v13766_v47 = vld [vmem:[#allocation18 + $0x8] sm:$0xff]  }
 0x4b5   :  { %v11762_v58 = vpop.f32.mrf.mxu0  ;;  %11964 = vmatprep.subr.bf16.mxu1 %v13764_v9  ;;  %v3652_v32 = vpop.f32.mrf.mxu1 }
 0x4b6   :  { %11916 = vmatprep.mubr.bf16.mxu1 %v3684_v49  ;;  %v3918_v7 = vpack.c.bf16 %v3652_v32, %v3649_v57 }
 0x4b7   :  { %v3182_v8 = vpop.f32.mrf.mxu0  ;;  %11917 = vmatmul.mubr.bf16.gmra.mxu1 %v3685_v30  ;;  %v11858_v0 = vpop.f32.mrf.mxu1 }
 0x4b8   :  { %11965 = vmatpush3.bf16.msra.mxu1 %v13764_v9  ;;  %11948 = vmatprep.mubr.bf16.mxu0 %v3918_v7  ;;  %v13767_v9 = vld [vmem:[#allocation18] sm:$0xff]  }
 0x4b9   :  { %v11763_v41 = vpop.f32.mrf.mxu0  ;;  %11966 = vmatprep.subr.bf16.mxu1 %v13765_v55  ;;  %v3665_v23 = vpop.f32.mrf.mxu1  ;;  %11949 = vmatmul.mubr.bf16.gmra.mxu0 %v3919_v62 }
 0x4ba   :  { %v3687_v52 = vpack.c.bf16 %v11763_v41, %v11762_v58 }
 0x4bb   :  { %v3185_v29 = vpop.f32.mrf.mxu0  ;;  %v11859_v34 = vpop.f32.mrf.mxu1 }
 0x4bc   :  { %v3686_v24 = vpack.c.bf16 %v3185_v29, %v3182_v8  ;;  %11967 = vmatpush3.bf16.msra.mxu1 %v13765_v55  ;;  %v3921_v60 = vpack.c.bf16 %v11859_v34, %v11858_v0 }
 0x4bd   :  { %v11814_v28 = vpop.f32.mrf.mxu0  ;;  %11968 = vmatprep.subr.bf16.mxu1 %v13766_v47  ;;  %v3668_v57 = vpop.f32.mrf.mxu1 }
 0x4be   :  { %11920 = vmatprep.mubr.bf16.mxu1 %v3686_v24  ;;  %v3920_v19 = vpack.c.bf16 %v3668_v57, %v3665_v23 }
 0x4bf   :  { %v3472_v49 = vpop.f32.mrf.mxu0  ;;  %11921 = vmatmul.mubr.bf16.gmra.mxu1 %v3687_v52 }
 0x4c0   :  { %11969 = vmatpush3.bf16.msra.mxu1 %v13766_v47  ;;  %11952 = vmatprep.mubr.bf16.mxu0 %v3920_v19 }
 0x4c1   :  { %v11815_v30 = vpop.f32.mrf.mxu0  ;;  %11970 = vmatprep.subr.bf16.mxu1 %v13767_v9  ;;  %11953 = vmatmul.mubr.bf16.gmra.mxu0 %v3921_v60 }
 0x4c2   :  { %12004 = vmatprep.mubr.bf16.mxu0 %v14769_v6  ;;  %v3907_v58 = vpack.c.bf16 %v11815_v30, %v11814_v28 }
 0x4c3   :  { %v3475_v62 = vpop.f32.mrf.mxu0 }
 0x4c4   :  { %v3906_v32 = vpack.c.bf16 %v3475_v62, %v3472_v49  ;;  %11971 = vmatpush3.bf16.msra.mxu1 %v13767_v9 }
 0x4c5   :  { %v11818_v7 = vpop.f32.mrf.mxu0 }
 0x4c6   :  { %11972 = vmatprep.mubr.bf16.mxu1 %v3906_v32 }
 0x4c7   :  { %v3488_v8 = vpop.f32.mrf.mxu0  ;;  %11973 = vmatmul.mubr.bf16.vlgmr.msra.gmra.mxu1 %v3907_v58 }
 0x4c9   :  { %v11819_v0 = vpop.f32.mrf.mxu0 }
 0x4ca   :  { %v3909_v23 = vpack.c.bf16 %v11819_v0, %v11818_v7 }
 0x4cb   :  { %v3491_v41 = vpop.f32.mrf.mxu0 }
 0x4cc   :  { %v3908_v55 = vpack.c.bf16 %v3491_v41, %v3488_v8 }
 0x4cd   :  { %v11822_v29 = vpop.f32.mrf.mxu0 }
 0x4ce   :  { %11976 = vmatprep.mubr.bf16.mxu1 %v3908_v55 }
 0x4cf   :  { %v3504_v34 = vpop.f32.mrf.mxu0  ;;  %11977 = vmatmul.mubr.bf16.gmra.mxu1 %v3909_v23 }
 0x4d1   :  { %v11823_v24 = vpop.f32.mrf.mxu0 }
 0x4d2   :  { %v3911_v6 = vpack.c.bf16 %v11823_v24, %v11822_v29 }
 0x4d3   :  { %v3507_v52 = vpop.f32.mrf.mxu0 }
 0x4d4   :  { %v3910_v47 = vpack.c.bf16 %v3507_v52, %v3504_v34 }
 0x4d5   :  { %v11826_v60 = vpop.f32.mrf.mxu0 }
 0x4d6   :  { %11980 = vmatprep.mubr.bf16.mxu1 %v3910_v47 }
 0x4d7   :  { %v3520_v57 = vpop.f32.mrf.mxu0  ;;  %11981 = vmatmul.mubr.bf16.gmra.mxu1 %v3911_v6 }
 0x4d9   :  { %v11827_v28 = vpop.f32.mrf.mxu0 }
 0x4da   :  { %v3913_v30 = vpack.c.bf16 %v11827_v28, %v11826_v60 }
 0x4db   :  { %v3523_v19 = vpop.f32.mrf.mxu0 }
 0x4dc   :  { %v3912_v49 = vpack.c.bf16 %v3523_v19, %v3520_v57 }
 0x4de   :  { %11984 = vmatprep.mubr.bf16.mxu1 %v3912_v49 }
 0x4df   :  { %11985 = vmatmul.mubr.bf16.gmra.mxu1 %v3913_v30 }
 0x4e0   :  { %12036 = vmatprep.mubr.bf16.mxu1 %v14760_v35 }
 0x549   :  { %v14929_v9 = vpop.f32.mrf.mxu0 }
 0x54b   :  { %v14931_v62 = vpop.f32.mrf.mxu0 }
 0x54d   :  { %v14933_v32 = vpop.f32.mrf.mxu0 }
 0x54f   :  { %v14935_v58 = vpop.f32.mrf.mxu0 }
 0x551   :  { %v14937_v7 = vpop.f32.mrf.mxu0 }
 0x553   :  { %v14939_v8 = vpop.f32.mrf.mxu0 }
 0x555   :  { %v11883_v0 = vpop.f32.mrf.mxu0 }
 0x557   :  { %v14941_v41 = vpop.f32.mrf.mxu0 }
 0x559   :  { %v11886_v55 = vpop.f32.mrf.mxu0 }
 0x55b   :  { %v3762_v23 = vpop.f32.mrf.mxu0 }
 0x55d   :  { %v11887_v29 = vpop.f32.mrf.mxu0 }
 0x55f   :  { %v3765_v34 = vpop.f32.mrf.mxu0 }
 0x561   :  { %v11890_v35 = vpop.f32.mrf.mxu0 }
 0x563   :  { %v3778_v24 = vpop.f32.mrf.mxu0 }
 0x565   :  { %v11891_v52 = vpop.f32.mrf.mxu0 }
 0x567   :  { %v14943_v47 = vpop.f32.mrf.mxu1  ;;  %v3781_v6 = vpop.f32.mrf.mxu0 }
 0x569   :  { %v14945_v60 = vpop.f32.mrf.mxu1  ;;  %v14947_v57 = vpop.f32.mrf.mxu0 }
 0x56b   :  { %v14949_v28 = vpop.f32.mrf.mxu1  ;;  %v14953_v49 = vpop.f32.mrf.mxu0 }
 0x56d   :  { %v14951_v19 = vpop.f32.mrf.mxu1  ;;  %v14955_v38 = vpop.f32.mrf.mxu0 }
 0x56f   :  { %v11914_v30 = vpop.f32.mrf.mxu1  ;;  %v14957_v1 = vpop.f32.mrf.mxu0 }
 0x571   :  { %v3843_v20 = vpop.f32.mrf.mxu1  ;;  %v14959_v16 = vpop.f32.mrf.mxu0 }
 0x573   :  { %v11915_v2 = vpop.f32.mrf.mxu1  ;;  %v14961_v12 = vpop.f32.mrf.mxu0 }
 0x575   :  { %v3846_v15 = vpop.f32.mrf.mxu1  ;;  %v14963_v18 = vpop.f32.mrf.mxu0 }
 0x577   :  { %v11918_v3 = vpop.f32.mrf.mxu1  ;;  %v14965_v36 = vpop.f32.mrf.mxu0 }
 0x578   :  { %v3868_v56 = vadd.f32 %v11918_v3, %v11886_v55  ;;  %v3847_v3 = vadd.f32 %v3846_v15, %v14941_v41 }
 0x579   :  { %v3859_v10 = vpop.f32.mrf.mxu1 }
 0x57a   :  { %v3895_v15 = vmax.f32 %v3847_v3, 0.0 }
 0x57b   :  { %v11919_v33 = vpop.f32.mrf.mxu1 }
 0x57c   :  { %v3871_v4 = vadd.f32 %v11919_v33, %v11887_v29 }
 0x57d   :  { %v3862_v17 = vpop.f32.mrf.mxu1 }
 0x57f   :  { %v11922_v22 = vpop.f32.mrf.mxu1 }
 0x580   :  { %v3884_v54 = vadd.f32 %v11922_v22, %v11890_v35  ;;  %v14973_v22 = vpop.f32.mrf.mxu0 }
 0x581   :  { %v3875_v59 = vpop.f32.mrf.mxu1 }
 0x582   :  { %v3876_v39 = vadd.f32 %v3875_v59, %v3778_v24  ;;  %v3904_v31 = vmax.f32 %v3884_v54, 0.0  ;;  %v3901_v59 = vmax.f32 %v3871_v4, 0.0 }
 0x583   :  { %v11923_v21 = vpop.f32.mrf.mxu1 }
 0x584   :  { %v3887_v11 = vadd.f32 %v11923_v21, %v11891_v52  ;;  %v3902_v61 = vmax.f32 %v3876_v39, 0.0  ;;  %v3863_v21 = vadd.f32 %v3862_v17, %v3765_v34  ;;  %v3839_v34 = vadd.f32 %v14949_v28, %v14933_v32 }
 0x585   :  { %v3878_v25 = vpop.f32.mrf.mxu1  ;;  %v3836_v52 = vadd.f32 %v14943_v47, %v14929_v9 }
 0x586   :  { %v3905_v40 = vmax.f32 %v3887_v11, 0.0  ;;  %v3879_v5 = vadd.f32 %v3878_v25, %v3781_v6  ;;  %v3900_v25 = vmax.f32 %v3868_v56, 0.0  ;;  %v3860_v11 = vadd.f32 %v3859_v10, %v3762_v23 }
 0x587   :  { %v14967_v26 = vpop.f32.mrf.mxu1  ;;  %v3899_v4 = vmax.f32 %v3863_v21, 0.0  ;;  %v3844_v23 = vadd.f32 %v3843_v20, %v14939_v8  ;;  %v3892_v28 = vmax.f32 %v3836_v52, 0.0 }
 0x588   :  { %v14969_v48 = vpack.c.bf16 %v3905_v40, %v3904_v31  ;;  %v3903_v45 = vmax.f32 %v3879_v5, 0.0  ;;  %v14982_v40 = vpop.f32.mrf.mxu0  ;;  %v3855_v31 = vadd.f32 %v11915_v2, %v11883_v0  ;;  %v14986_v39 = vpack.c.bf16 %v3901_v59, %v3900_v25 }
 0x589   :  { %v14971_v14 = vpop.f32.mrf.mxu1  ;;  %v3898_v54 = vmax.f32 %v3860_v11, 0.0  ;;  %v3894_v6 = vmax.f32 %v3844_v23, 0.0  ;;  %v3831_v59 = vadd.f32 %v14951_v19, %v14935_v58  ;;  %v3828_v25 = vadd.f32 %v14945_v60, %v14931_v62 }
 0x58a   :  { %v14975_v35 = vpack.c.bf16 %v3903_v45, %v3902_v61  ;;  %11988 = vmatprep.subr.bf16.mxu0 %v14969_v48  ;;  %v3852_v61 = vadd.f32 %v11914_v30, %v14937_v7  ;;  %v11951_v56 = vpop.f32.mrf.mxu0  ;;  %v3897_v10 = vmax.f32 %v3855_v31, 0.0  ;;  %v3893_v30 = vmax.f32 %v3839_v34, 0.0 }
 0x58b   :  { %v14978_v33 = vpop.f32.mrf.mxu1  ;;  %11989 = vmatpush3.bf16.msra.mxu0 %v14969_v48  ;;  %v14996_v55 = vpack.c.bf16 %v3899_v4, %v3898_v54  ;;  %v15015_v21 = vpack.c.bf16 %v3895_v15, %v3894_v6  ;;  %v3891_v31 = vmax.f32 %v3831_v59, 0.0  ;;  %v3890_v58 = vmax.f32 %v3828_v25, 0.0 }
 0x58c   :  { %11990 = vmatprep.subr.bf16.mxu0 %v14975_v35  ;;  %v3896_v0 = vmax.f32 %v3852_v61, 0.0  ;;  %v3991_v7 = vpop.f32.mrf.mxu0  ;;  %v15021_v11 = vpack.c.bf16 %v3893_v30, %v3892_v28 }
 0x58d   :  { %v14984_v5 = vpop.f32.mrf.mxu1  ;;  %v15025_v54 = vpack.c.bf16 %v3891_v31, %v3890_v58  ;;  %v16183_v58 = vld [vmem:[#allocation42_spill] sm:$0xff] }
 0x58e   :  { %v15007_v24 = vpack.c.bf16 %v3897_v10, %v3896_v0  ;;  %v11954_v20 = vpop.f32.mrf.mxu0 }
 0x58f   :  { %v14988_v45 = vpop.f32.mrf.mxu1  ;;  %11991 = vmatpush3.bf16.msra.mxu0 %v14975_v35 }
 0x590   :  { %11992 = vmatprep.subr.bf16.mxu0 %v14986_v39  ;;  %v4004_v9 = vpop.f32.mrf.mxu0 }
 0x591   :  { %v14993_v17 = vpop.f32.mrf.mxu1 }
 0x592   :  { %v11955_v19 = vpop.f32.mrf.mxu0 }
 0x593   :  { %v14998_v2 = vpop.f32.mrf.mxu1  ;;  %11993 = vmatpush3.bf16.msra.mxu0 %v14986_v39 }
 0x594   :  { %11994 = vmatprep.subr.bf16.mxu0 %v14996_v55  ;;  %v4007_v0 = vpop.f32.mrf.mxu0 }
 0x595   :  { %v15003_v29 = vpop.f32.mrf.mxu1 }
 0x597   :  { %v11982_v41 = vpop.f32.mrf.mxu1  ;;  %11995 = vmatpush3.bf16.msra.mxu0 %v14996_v55 }
 0x598   :  { %11996 = vmatprep.subr.bf16.mxu0 %v15007_v24  ;;  %v4094_v30 = vadd.f32 %v11982_v41, %v14973_v22  ;;  %v4081_v22 = vadd.f32 %v14998_v2, %v14963_v18  ;;  %v4070_v18 = vadd.f32 %v14993_v17, %v14961_v12  ;;  %v4057_v12 = vadd.f32 %v14984_v5, %v14957_v1  ;;  %v13777_v5 = vld [vmem:[#allocation22 + $0x18] sm:$0xff]  }
 0x599   :  { %v4085_v8 = vpop.f32.mrf.mxu1 }
 0x59b   :  { %v11983_v32 = vpop.f32.mrf.mxu1  ;;  %11997 = vmatpush3.bf16.msra.mxu0 %v15007_v24 }
 0x59c   :  { %11998 = vmatprep.subr.bf16.mxu0 %v15015_v21  ;;  %v4097_v34 = vadd.f32 %v11983_v32, %v11951_v56  ;;  %v4086_v56 = vadd.f32 %v4085_v8, %v14982_v40  ;;  %v4073_v40 = vadd.f32 %v15003_v29, %v14965_v36  ;;  %v4062_v36 = vadd.f32 %v14967_v26, %v14947_v57 }
 0x59d   :  { %v4088_v47 = vpop.f32.mrf.mxu1  ;;  %v4120_v29 = vmax.f32 %v4070_v18, 0.0  ;;  %v4117_v57 = vmax.f32 %v4057_v12, 0.0 }
 0x59e   :  { %v4127_v25 = vmax.f32 %v4097_v34, 0.0  ;;  %v4089_v31 = vadd.f32 %v4088_v47, %v3991_v7  ;;  %v4078_v7 = vadd.f32 %v14988_v45, %v14959_v16  ;;  %v4124_v47 = vmax.f32 %v4086_v56, 0.0  ;;  %v13790_v34 = vld [vmem:[#allocation9 + $0x58] sm:$0xff]  }
 0x59f   :  { %v11986_v4 = vpop.f32.mrf.mxu1  ;;  %11999 = vmatpush3.bf16.msra.mxu0 %v15015_v21  ;;  %v4065_v16 = vadd.f32 %v14978_v33, %v14955_v38  ;;  %v4121_v2 = vmax.f32 %v4073_v40, 0.0  ;;  %v4054_v38 = vadd.f32 %v14971_v14, %v14953_v49  ;;  %v13770_v14 = vld [vmem:[#allocation7 + $0x50] sm:$0xff]   ;;  %v13773_v49 = vld [vmem:[#allocation22 + $0x28] sm:$0xff]  }
 0x5a0   :  { %12000 = vmatprep.subr.bf16.mxu0 %v15021_v11  ;;  %v4110_v10 = vadd.f32 %v11986_v4, %v11954_v20  ;;  %v4125_v32 = vmax.f32 %v4089_v31, 0.0  ;;  %v13800_v31 = vld [vmem:[#allocation24 + $0x38] sm:$0xff]   ;;  %v13801_v40 = vld [vmem:[#allocation24 + $0x30] sm:$0xff]  }
 0x5a1   :  { %v4101_v61 = vpop.f32.mrf.mxu1  ;;  %v4142_v17 = vpack.c.bf16 %v4121_v2, %v4120_v29  ;;  %v4116_v33 = vmax.f32 %v4054_v38, 0.0  ;;  %v13803_v29 = vld [vmem:[#allocation24 + $0x20] sm:$0xff]   ;;  %v13804_v38 = vld [vmem:[#allocation24 + $0x18] sm:$0xff]  }
 0x5a2   :  { %v4102_v62 = vadd.f32 %v4101_v61, %v4004_v9  ;;  %v4130_v15 = vmax.f32 %v4110_v10, 0.0  ;;  %v4126_v9 = vmax.f32 %v4094_v30, 0.0  ;;  %v4144_v8 = vpack.c.bf16 %v4125_v32, %v4124_v47  ;;  %v13781_v61 = vld [vmem:[#allocation22 + $0x8] sm:$0xff]   ;;  %v16184_v10 = vld [vmem:[#allocation43_spill] sm:$0xff]  ;;  %v13795_v30 = vld [vmem:[#allocation9 + $0x70] sm:$0xff]  }
 0x5a3   :  { %v11987_v3 = vpop.f32.mrf.mxu1  ;;  %12001 = vmatpush3.bf16.msra.mxu0 %v15021_v11  ;;  %v4140_v1 = vpack.c.bf16 %v4117_v57, %v4116_v33  ;;  %v13805_v33 = vld [vmem:[#allocation24 + $0x10] sm:$0xff]  }
 0x5a4   :  { %v4113_v60 = vadd.f32 %v11987_v3, %v11955_v19  ;;  %12002 = vmatprep.subr.bf16.mxu0 %v15025_v54  ;;  %v4128_v59 = vmax.f32 %v4102_v62, 0.0  ;;  %v4145_v41 = vpack.c.bf16 %v4127_v25, %v4126_v9  ;;  %v13779_v19 = vld [vmem:[#allocation22 + $0x10] sm:$0xff]   ;;  %v13783_v3 = vld [vmem:[#allocation22] sm:$0xff]   ;;  %v13785_v62 = vld [vmem:[#allocation9 + $0x48] sm:$0xff]  }
 0x5a5   :  { %v4104_v23 = vpop.f32.mrf.mxu1  ;;  %v13799_v25 = vld [vmem:[#allocation21] sm:$0xff]  }
 0x5a6   :  { %v4131_v52 = vmax.f32 %v4113_v60, 0.0  ;;  %v4105_v6 = vadd.f32 %v4104_v23, %v4007_v0  ;;  %v15079_v60 = vld [vmem:[#allocation25 + $0x38] sm:$0xff]   ;;  %v13788_v0 = vld [vmem:[#allocation21 + $0x30] sm:$0xff]   ;;  %v13789_v23 = vld [vmem:[#allocation21 + $0x28] sm:$0xff]  }
 0x5a7   :  { %12003 = vmatpush3.bf16.msra.mxu0 %v15025_v54 }
 0x5a8   :  { %v4147_v28 = vpack.c.bf16 %v4131_v52, %v4130_v15  ;;  %v4129_v20 = vmax.f32 %v4105_v6, 0.0  ;;  %v13792_v15 = vld [vmem:[#allocation21 + $0x20] sm:$0xff]   ;;  %v13793_v52 = vld [vmem:[#allocation21 + $0x18] sm:$0xff]   ;;  %v13794_v6 = vld [vmem:[#allocation9 + $0x68] sm:$0xff]  }
 0x5aa   :  { %v4146_v4 = vpack.c.bf16 %v4129_v20, %v4128_v59  ;;  %12020 = vmatprep.subr.bf16.mxu1 %v4147_v28  ;;  %12052 = vmatprep.subr.bf16.mxu0 %v4147_v28  ;;  %v13796_v59 = vld [vmem:[#allocation21 + $0x10] sm:$0xff]   ;;  %v13798_v20 = vld [vmem:[#allocation9 + $0x78] sm:$0xff]  }
 0x5ab   :  { %12005 = vmatmul.mubr.bf16.vlgmr.msra.gmra.mxu0 %v14772_v63  ;;  %12021 = vmatpush3.bf16.msra.mxu1 %v4147_v28  ;;  %v4123_v63 = vmax.f32 %v4081_v22, 0.0 }
 0x5ac   :  { %12053 = vmatpush3.bf16.msra.mxu0 %v4147_v28  ;;  %12022 = vmatprep.subr.bf16.mxu1 %v4146_v4  ;;  %v13797_v28 = vld [vmem:[#allocation21 + $0x8] sm:$0xff]  }
 0x5ad   :  { %12054 = vmatprep.subr.bf16.mxu0 %v4146_v4  ;;  %12008 = vmatprep.mubr.bf16.mxu0 %v14774_v50  ;;  %v4122_v50 = vmax.f32 %v4078_v7, 0.0 }
 0x5af   :  { %12023 = vmatpush3.bf16.msra.mxu1 %v4146_v4  ;;  %v4143_v45 = vpack.c.bf16 %v4123_v63, %v4122_v50 }
 0x5b0   :  { %12055 = vmatpush3.bf16.msra.mxu0 %v4146_v4  ;;  %12024 = vmatprep.subr.bf16.mxu1 %v4145_v41 }
 0x5b1   :  { %12056 = vmatprep.subr.bf16.mxu0 %v4145_v41 }
 0x5b3   :  { %12025 = vmatpush3.bf16.msra.mxu1 %v4145_v41  ;;  %12009 = vmatmul.mubr.bf16.gmra.mxu0 %v14781_v43  ;;  %v4119_v43 = vmax.f32 %v4065_v16, 0.0 }
 0x5b4   :  { %12057 = vmatpush3.bf16.msra.mxu0 %v4145_v41  ;;  %12026 = vmatprep.subr.bf16.mxu1 %v4144_v8 }
 0x5b5   :  { %12058 = vmatprep.subr.bf16.mxu0 %v4144_v8  ;;  %12012 = vmatprep.mubr.bf16.mxu0 %v14784_v13  ;;  %v4118_v13 = vmax.f32 %v4062_v36, 0.0 }
 0x5b7   :  { %12027 = vmatpush3.bf16.msra.mxu1 %v4144_v8  ;;  %v4141_v26 = vpack.c.bf16 %v4119_v43, %v4118_v13 }
 0x5b8   :  { %12059 = vmatpush3.bf16.msra.mxu0 %v4144_v8  ;;  %12028 = vmatprep.subr.bf16.mxu1 %v4143_v45 }
 0x5b9   :  { %12060 = vmatprep.subr.bf16.mxu0 %v4143_v45 }
 0x5bb   :  { %12029 = vmatpush3.bf16.msra.mxu1 %v4143_v45  ;;  %12013 = vmatmul.mubr.bf16.gmra.mxu0 %v14791_v27  ;;  %v13768_v27 = vld [vmem:[#allocation22 + $0x38] sm:$0xff]  }
 0x5bc   :  { %12061 = vmatpush3.bf16.msra.mxu0 %v4143_v45  ;;  %12030 = vmatprep.subr.bf16.mxu1 %v4142_v17  ;;  %v13802_v45 = vld [vmem:[#allocation24 + $0x28] sm:$0xff]  }
 0x5bd   :  { %12062 = vmatprep.subr.bf16.mxu0 %v4142_v17  ;;  %12016 = vmatprep.mubr.bf16.mxu0 %v14794_v53  ;;  %v13769_v53 = vld [vmem:[#allocation7 + $0x48] sm:$0xff]  }
 0x5bf   :  { %12031 = vmatpush3.bf16.msra.mxu1 %v4142_v17 }
 0x5c0   :  { %12063 = vmatpush3.bf16.msra.mxu0 %v4142_v17  ;;  %12032 = vmatprep.subr.bf16.mxu1 %v4141_v26 }
 0x5c1   :  { %12064 = vmatprep.subr.bf16.mxu0 %v4141_v26 }
 0x5c3   :  { %12033 = vmatpush3.bf16.msra.mxu1 %v4141_v26  ;;  %12017 = vmatmul.mubr.bf16.gmra.mxu0 %v14801_v46  ;;  %v13771_v46 = vld [vmem:[#allocation22 + $0x30] sm:$0xff]  }
 0x5c4   :  { %12065 = vmatpush3.bf16.msra.mxu0 %v4141_v26  ;;  %12034 = vmatprep.subr.bf16.mxu1 %v4140_v1 }
 0x5c5   :  { %12066 = vmatprep.subr.bf16.mxu0 %v4140_v1  ;;  %12068 = vmatprep.mubr.bf16.mxu0 %v14804_v51  ;;  %v13772_v51 = vld [vmem:[#allocation7 + $0x58] sm:$0xff]  }
 0x5c7   :  { %12035 = vmatpush3.bf16.msra.mxu1 %v4140_v1 }
 0x5c8   :  { %12067 = vmatpush3.bf16.msra.mxu0 %v4140_v1  ;;  %12084 = vmatprep.subr.bf16.mxu1 %v14969_v48 }
 0x5c9   :  { %12116 = vmatprep.subr.bf16.mxu0 %v13768_v27 }
 0x5ca   :  { %12037 = vmatmul.mubr.bf16.vlgmr.msra.gmra.mxu1 %v13769_v53 }
 0x5cb   :  { %12085 = vmatpush3.bf16.msra.mxu1 %v14969_v48  ;;  %12040 = vmatprep.mubr.bf16.mxu1 %v13770_v14  ;;  %v13774_v48 = vld [vmem:[#allocation7 + $0x60] sm:$0xff]  }
 0x5cc   :  { %12086 = vmatprep.subr.bf16.mxu1 %v14975_v35  ;;  %12069 = vmatmul.mubr.bf16.vlgmr.msra.gmra.mxu0 %v14811_v37  ;;  %v16181_v37 = vld [vmem:[#allocation40_spill] sm:$0xff] }
 0x5cd   :  { %12072 = vmatprep.mubr.bf16.mxu0 %v14814_v42  ;;  %12117 = vmatpush3.bf16.msra.mxu0 %v13768_v27  ;;  %v13775_v42 = vld [vmem:[#allocation22 + $0x20] sm:$0xff]  }
 0x5ce   :  { %12118 = vmatprep.subr.bf16.mxu0 %v13771_v46 }
 0x5cf   :  { %12087 = vmatpush3.bf16.msra.mxu1 %v14975_v35  ;;  %v13776_v35 = vld [vmem:[#allocation7 + $0x68] sm:$0xff]  }
 0x5d0   :  { %12088 = vmatprep.subr.bf16.mxu1 %v14986_v39 }
 0x5d1   :  { %12119 = vmatpush3.bf16.msra.mxu0 %v13771_v46  ;;  %v13806_v46 = vld [vmem:[#allocation24 + $0x8] sm:$0xff]  }
 0x5d2   :  { %12041 = vmatmul.mubr.bf16.gmra.mxu1 %v13772_v51  ;;  %12120 = vmatprep.subr.bf16.mxu0 %v13773_v49 }
 0x5d3   :  { %12089 = vmatpush3.bf16.msra.mxu1 %v14986_v39  ;;  %12044 = vmatprep.mubr.bf16.mxu1 %v13774_v48  ;;  %v13778_v39 = vld [vmem:[#allocation7 + $0x70] sm:$0xff]  }
 0x5d4   :  { %12090 = vmatprep.subr.bf16.mxu1 %v14996_v55  ;;  %12073 = vmatmul.mubr.bf16.gmra.mxu0 %v14821_v44  ;;  %v16182_v44 = vld [vmem:[#allocation41_spill] sm:$0xff] }
 0x5d5   :  { %12076 = vmatprep.mubr.bf16.mxu0 %v16181_v37  ;;  %12121 = vmatpush3.bf16.msra.mxu0 %v13773_v49 }
 0x5d6   :  { %12122 = vmatprep.subr.bf16.mxu0 %v13775_v42 }
 0x5d7   :  { %12091 = vmatpush3.bf16.msra.mxu1 %v14996_v55  ;;  %v13780_v55 = vld [vmem:[#allocation7 + $0x78] sm:$0xff]  }
 0x5d8   :  { %12092 = vmatprep.subr.bf16.mxu1 %v15007_v24 }
 0x5d9   :  { %12123 = vmatpush3.bf16.msra.mxu0 %v13775_v42  ;;  %v13807_v42 = vld [vmem:[#allocation24] sm:$0xff]  }
 0x5da   :  { %12045 = vmatmul.mubr.bf16.gmra.mxu1 %v13776_v35  ;;  %12124 = vmatprep.subr.bf16.mxu0 %v13777_v5  ;;  %v15082_v35 = vld [vmem:[#allocation13 + $0xb8] sm:$0xff]  }
 0x5db   :  { %12093 = vmatpush3.bf16.msra.mxu1 %v15007_v24  ;;  %12048 = vmatprep.mubr.bf16.mxu1 %v13778_v39  ;;  %v13782_v24 = vld [vmem:[#allocation9 + $0x40] sm:$0xff]  }
 0x5dc   :  { %12094 = vmatprep.subr.bf16.mxu1 %v15015_v21  ;;  %12077 = vmatmul.mubr.bf16.gmra.mxu0 %v16182_v44 }
 0x5dd   :  { %12080 = vmatprep.mubr.bf16.mxu0 %v16183_v58  ;;  %12125 = vmatpush3.bf16.msra.mxu0 %v13777_v5 }
 0x5de   :  { %12126 = vmatprep.subr.bf16.mxu0 %v13779_v19 }
 0x5df   :  { %12095 = vmatpush3.bf16.msra.mxu1 %v15015_v21  ;;  %v13784_v21 = vld [vmem:[#allocation21 + $0x38] sm:$0xff]  }
 0x5e0   :  { %12096 = vmatprep.subr.bf16.mxu1 %v15021_v11 }
 0x5e1   :  { %12127 = vmatpush3.bf16.msra.mxu0 %v13779_v19 }
 0x5e2   :  { %12049 = vmatmul.mubr.bf16.gmra.mxu1 %v13780_v55  ;;  %12128 = vmatprep.subr.bf16.mxu0 %v13781_v61 }
 0x5e3   :  { %12097 = vmatpush3.bf16.msra.mxu1 %v15021_v11  ;;  %12100 = vmatprep.mubr.bf16.mxu1 %v13782_v24  ;;  %v13787_v11 = vld [vmem:[#allocation9 + $0x50] sm:$0xff]  }
 0x5e4   :  { %12098 = vmatprep.subr.bf16.mxu1 %v15025_v54  ;;  %12081 = vmatmul.mubr.bf16.gmra.mxu0 %v16184_v10 }
 0x5e5   :  { %12129 = vmatpush3.bf16.msra.mxu0 %v13781_v61 }
 0x5e6   :  { %12130 = vmatprep.subr.bf16.mxu0 %v13783_v3 }
 0x5e7   :  { %12099 = vmatpush3.bf16.msra.mxu1 %v15025_v54  ;;  %v13791_v54 = vld [vmem:[#allocation9 + $0x60] sm:$0xff]  }
 0x5e8   :  { %12148 = vmatprep.subr.bf16.mxu1 %v13784_v21 }
 0x5e9   :  { %12131 = vmatpush3.bf16.msra.mxu0 %v13783_v3 }
 0x5ea   :  { %12101 = vmatmul.mubr.bf16.vlgmr.msra.gmra.mxu1 %v13785_v62  ;;  %12180 = vmatprep.subr.bf16.mxu0 %v15079_v60 }
 0x5eb   :  { %12104 = vmatprep.mubr.bf16.mxu1 %v13787_v11  ;;  %12149 = vmatpush3.bf16.msra.mxu1 %v13784_v21  ;;  %v15085_v21 = vld [vmem:[#allocation13 + $0xb0] sm:$0xff]  }
 0x5ec   :  { %12150 = vmatprep.subr.bf16.mxu1 %v13788_v0  ;;  %v13808_v11 = vld [vmem:[#allocation25 + $0x30] sm:$0xff]  }
 0x5ef   :  { %12151 = vmatpush3.bf16.msra.mxu1 %v13788_v0 }
 0x5f0   :  { %12152 = vmatprep.subr.bf16.mxu1 %v13789_v23 }
 0x5f2   :  { %12105 = vmatmul.mubr.bf16.gmra.mxu1 %v13790_v34 }
 0x5f3   :  { %12108 = vmatprep.mubr.bf16.mxu1 %v13791_v54  ;;  %12153 = vmatpush3.bf16.msra.mxu1 %v13789_v23  ;;  %v15090_v54 = vld [vmem:[#allocation13 + $0xa8] sm:$0xff]  }
 0x5f4   :  { %12154 = vmatprep.subr.bf16.mxu1 %v13792_v15 }
 0x5f7   :  { %12155 = vmatpush3.bf16.msra.mxu1 %v13792_v15 }
 0x5f8   :  { %12156 = vmatprep.subr.bf16.mxu1 %v13793_v52 }
 0x5fa   :  { %12109 = vmatmul.mubr.bf16.gmra.mxu1 %v13794_v6 }
 0x5fb   :  { %12112 = vmatprep.mubr.bf16.mxu1 %v13795_v30  ;;  %12157 = vmatpush3.bf16.msra.mxu1 %v13793_v52  ;;  %v13809_v30 = vld [vmem:[#allocation25 + $0x28] sm:$0xff]  }
 0x5fc   :  { %12158 = vmatprep.subr.bf16.mxu1 %v13796_v59 }
 0x5ff   :  { %12159 = vmatpush3.bf16.msra.mxu1 %v13796_v59 }
 0x600   :  { %12160 = vmatprep.subr.bf16.mxu1 %v13797_v28 }
 0x602   :  { %12113 = vmatmul.mubr.bf16.gmra.mxu1 %v13798_v20 }
 0x603   :  { %12161 = vmatpush3.bf16.msra.mxu1 %v13797_v28 }
 0x604   :  { %12162 = vmatprep.subr.bf16.mxu1 %v13799_v25 }
 0x607   :  { %12163 = vmatpush3.bf16.msra.mxu1 %v13799_v25 }
 0x608   :  { %12212 = vmatprep.subr.bf16.mxu1 %v13800_v31 }
 0x66b   :  { %v12006_v4 = vpop.f32.mrf.mxu0 }
 0x66d   :  { %v4182_v9 = vpop.f32.mrf.mxu0 }
 0x66f   :  { %v12007_v56 = vpop.f32.mrf.mxu0 }
 0x670   :  { %v4537_v22 = vpack.c.bf16 %v12007_v56, %v12006_v4 }
 0x671   :  { %v4185_v41 = vpop.f32.mrf.mxu0 }
 0x672   :  { %v4536_v32 = vpack.c.bf16 %v4185_v41, %v4182_v9  ;;  %v13810_v9 = vld [vmem:[#allocation25 + $0x20] sm:$0xff]  }
 0x673   :  { %v12010_v7 = vpop.f32.mrf.mxu0 }
 0x674   :  { %12164 = vmatprep.mubr.bf16.mxu1 %v4536_v32  ;;  %v15098_v32 = vld [vmem:[#allocation13 + $0x98] sm:$0xff]  }
 0x675   :  { %v4198_v47 = vpop.f32.mrf.mxu0  ;;  %12165 = vmatmul.mubr.bf16.vlgmr.msra.gmra.mxu1 %v4537_v22 }
 0x676   :  { %12213 = vmatpush3.bf16.msra.mxu1 %v13800_v31  ;;  %v15094_v31 = vld [vmem:[#allocation13 + $0xa0] sm:$0xff]  }
 0x677   :  { %v12011_v63 = vpop.f32.mrf.mxu0  ;;  %12214 = vmatprep.subr.bf16.mxu1 %v13801_v40 }
 0x678   :  { %v4539_v8 = vpack.c.bf16 %v12011_v63, %v12010_v7 }
 0x679   :  { %v4201_v50 = vpop.f32.mrf.mxu0 }
 0x67a   :  { %v4538_v18 = vpack.c.bf16 %v4201_v50, %v4198_v47  ;;  %12215 = vmatpush3.bf16.msra.mxu1 %v13801_v40  ;;  %v13811_v40 = vld [vmem:[#allocation25 + $0x18] sm:$0xff]  }
 0x67b   :  { %v12014_v16 = vpop.f32.mrf.mxu0  ;;  %12216 = vmatprep.subr.bf16.mxu1 %v13802_v45 }
 0x67c   :  { %12168 = vmatprep.mubr.bf16.mxu1 %v4538_v18 }
 0x67d   :  { %v4214_v2 = vpop.f32.mrf.mxu0  ;;  %12169 = vmatmul.mubr.bf16.gmra.mxu1 %v4539_v8 }
 0x67e   :  { %12217 = vmatpush3.bf16.msra.mxu1 %v13802_v45 }
 0x67f   :  { %v12015_v36 = vpop.f32.mrf.mxu0  ;;  %12218 = vmatprep.subr.bf16.mxu1 %v13803_v29 }
 0x680   :  { %v4541_v43 = vpack.c.bf16 %v12015_v36, %v12014_v16 }
 0x681   :  { %v4217_v12 = vpop.f32.mrf.mxu0 }
 0x682   :  { %v4540_v17 = vpack.c.bf16 %v4217_v12, %v4214_v2  ;;  %12219 = vmatpush3.bf16.msra.mxu1 %v13803_v29  ;;  %v15102_v2 = vld [vmem:[#allocation13 + $0x90] sm:$0xff]  }
 0x683   :  { %v12018_v13 = vpop.f32.mrf.mxu0  ;;  %12220 = vmatprep.subr.bf16.mxu1 %v13804_v38  ;;  %v13812_v29 = vld [vmem:[#allocation25 + $0x10] sm:$0xff]  }
 0x684   :  { %12172 = vmatprep.mubr.bf16.mxu1 %v4540_v17 }
 0x685   :  { %v4230_v26 = vpop.f32.mrf.mxu0  ;;  %12173 = vmatmul.mubr.bf16.gmra.mxu1 %v4541_v43 }
 0x686   :  { %12221 = vmatpush3.bf16.msra.mxu1 %v13804_v38 }
 0x687   :  { %v12019_v57 = vpop.f32.mrf.mxu0  ;;  %12222 = vmatprep.subr.bf16.mxu1 %v13805_v33 }
 0x688   :  { %v4543_v1 = vpack.c.bf16 %v12019_v57, %v12018_v13  ;;  %v15106_v13 = vld [vmem:[#allocation13 + $0x88] sm:$0xff]  }
 0x689   :  { %v4233_v27 = vpop.f32.mrf.mxu0 }
 0x68a   :  { %v12038_v53 = vpop.f32.mrf.mxu1  ;;  %v4542_v14 = vpack.c.bf16 %v4233_v27, %v4230_v26  ;;  %12223 = vmatpush3.bf16.msra.mxu1 %v13805_v33  ;;  %v13813_v33 = vld [vmem:[#allocation25 + $0x8] sm:$0xff]  }
 0x68b   :  { %12224 = vmatprep.subr.bf16.mxu1 %v13806_v46 }
 0x68c   :  { %v4279_v51 = vpop.f32.mrf.mxu1  ;;  %v12070_v49 = vpop.f32.mrf.mxu0  ;;  %12176 = vmatprep.mubr.bf16.mxu1 %v4542_v14  ;;  %v13493_v14 = vld [vmem:[#allocation7 + $0x80] sm:$0xff]  }
 0x68d   :  { %12177 = vmatmul.mubr.bf16.gmra.mxu1 %v4543_v1 }
 0x68e   :  { %v12039_v48 = vpop.f32.mrf.mxu1  ;;  %v4376_v37 = vpop.f32.mrf.mxu0  ;;  %12225 = vmatpush3.bf16.msra.mxu1 %v13806_v46 }
 0x68f   :  { %12226 = vmatprep.subr.bf16.mxu1 %v13807_v42  ;;  %v4545_v58 = vpack.c.bf16 %v12039_v48, %v12038_v53  ;;  %v13814_v48 = vld [vmem:[#allocation25] sm:$0xff]  }
 0x690   :  { %v4282_v5 = vpop.f32.mrf.mxu1  ;;  %v12071_v39 = vpop.f32.mrf.mxu0 }
 0x691   :  { %v4544_v44 = vpack.c.bf16 %v4282_v5, %v4279_v51  ;;  %v4763_v55 = vpack.c.bf16 %v12071_v39, %v12070_v49  ;;  %v15110_v51 = vld [vmem:[#allocation13 + $0x80] sm:$0xff]  }
 0x692   :  { %v12042_v19 = vpop.f32.mrf.mxu1  ;;  %v4379_v61 = vpop.f32.mrf.mxu0  ;;  %12227 = vmatpush3.bf16.msra.mxu1 %v13807_v42 }
 0x693   :  { %12132 = vmatprep.mubr.bf16.mxu0 %v4544_v44  ;;  %v4762_v24 = vpack.c.bf16 %v4379_v61, %v4376_v37  ;;  %12276 = vmatprep.subr.bf16.mxu1 %v15082_v35  ;;  %v13484_v37 = vld [vmem:[#allocation12 + $0xb8] sm:$0xff]  }
 0x694   :  { %v4295_v10 = vpop.f32.mrf.mxu1  ;;  %12133 = vmatmul.mubr.bf16.vlgmr.msra.gmra.mxu0 %v4545_v58  ;;  %v12074_v3 = vpop.f32.mrf.mxu0  ;;  %v13486_v58 = vld [vmem:[#allocation12 + $0xb0] sm:$0xff]  }
 0x695   :  { %12181 = vmatpush3.bf16.msra.mxu0 %v15079_v60  ;;  %12228 = vmatprep.mubr.bf16.mxu1 %v4762_v24 }
 0x696   :  { %v12043_v62 = vpop.f32.mrf.mxu1  ;;  %12182 = vmatprep.subr.bf16.mxu0 %v13808_v11  ;;  %v4392_v0 = vpop.f32.mrf.mxu0  ;;  %12229 = vmatmul.mubr.bf16.vlgmr.msra.gmra.mxu1 %v4763_v55  ;;  %v13497_v55 = vld [vmem:[#allocation7 + $0x90] sm:$0xff]  }
 0x697   :  { %12277 = vmatpush3.bf16.msra.mxu1 %v15082_v35  ;;  %v4547_v52 = vpack.c.bf16 %v12043_v62, %v12042_v19  ;;  %v13494_v19 = vld [vmem:[#allocation7 + $0x88] sm:$0xff]  }
 0x698   :  { %v4298_v23 = vpop.f32.mrf.mxu1  ;;  %v12075_v34 = vpop.f32.mrf.mxu0  ;;  %12278 = vmatprep.subr.bf16.mxu1 %v15085_v21 }
 0x699   :  { %v4546_v15 = vpack.c.bf16 %v4298_v23, %v4295_v10  ;;  %12183 = vmatpush3.bf16.msra.mxu0 %v13808_v11  ;;  %v4765_v60 = vpack.c.bf16 %v12075_v34, %v12074_v3  ;;  %v13488_v10 = vld [vmem:[#allocation12 + $0xa8] sm:$0xff]   ;;  %v13490_v23 = vld [vmem:[#allocation12 + $0xa0] sm:$0xff]   ;;  %v13498_v34 = vld [vmem:[#allocation7 + $0x98] sm:$0xff]  }
 0x69a   :  { %v12046_v6 = vpop.f32.mrf.mxu1  ;;  %12184 = vmatprep.subr.bf16.mxu0 %v13809_v30  ;;  %v4395_v59 = vpop.f32.mrf.mxu0 }
 0x69b   :  { %12136 = vmatprep.mubr.bf16.mxu0 %v4546_v15  ;;  %v4764_v28 = vpack.c.bf16 %v4395_v59, %v4392_v0  ;;  %12279 = vmatpush3.bf16.msra.mxu1 %v15085_v21  ;;  %v13502_v15 = vld [vmem:[#allocation7 + $0xa0] sm:$0xff]  }
 0x69c   :  { %v4311_v20 = vpop.f32.mrf.mxu1  ;;  %12137 = vmatmul.mubr.bf16.gmra.mxu0 %v4547_v52  ;;  %v12078_v25 = vpop.f32.mrf.mxu0  ;;  %12280 = vmatprep.subr.bf16.mxu1 %v15090_v54 }
 0x69d   :  { %12185 = vmatpush3.bf16.msra.mxu0 %v13809_v30  ;;  %12232 = vmatprep.mubr.bf16.mxu1 %v4764_v28  ;;  %v13492_v30 = vld [vmem:[#allocation12 + $0x98] sm:$0xff]  }
 0x69e   :  { %v12047_v4 = vpop.f32.mrf.mxu1  ;;  %12186 = vmatprep.subr.bf16.mxu0 %v13810_v9  ;;  %v4408_v56 = vpop.f32.mrf.mxu0  ;;  %12233 = vmatmul.mubr.bf16.gmra.mxu1 %v4765_v60 }
 0x69f   :  { %12281 = vmatpush3.bf16.msra.mxu1 %v15090_v54  ;;  %v4549_v47 = vpack.c.bf16 %v12047_v4, %v12046_v6  ;;  %v13503_v4 = vld [vmem:[#allocation7 + $0xa8] sm:$0xff]  }
 0x6a0   :  { %v4314_v22 = vpop.f32.mrf.mxu1  ;;  %v12079_v41 = vpop.f32.mrf.mxu0  ;;  %12282 = vmatprep.subr.bf16.mxu1 %v15094_v31 }
 0x6a1   :  { %v4548_v7 = vpack.c.bf16 %v4314_v22, %v4311_v20  ;;  %12187 = vmatpush3.bf16.msra.mxu0 %v13810_v9  ;;  %v4767_v8 = vpack.c.bf16 %v12079_v41, %v12078_v25  ;;  %v13495_v25 = vld [vmem:[#allocation12 + $0x90] sm:$0xff]   ;;  %v13496_v41 = vld [vmem:[#allocation12 + $0x88] sm:$0xff]  }
 0x6a2   :  { %v12050_v63 = vpop.f32.mrf.mxu1  ;;  %12188 = vmatprep.subr.bf16.mxu0 %v13811_v40  ;;  %v4411_v50 = vpop.f32.mrf.mxu0  ;;  %v13506_v9 = vld [vmem:[#allocation7 + $0xb0] sm:$0xff]  }
 0x6a3   :  { %12140 = vmatprep.mubr.bf16.mxu0 %v4548_v7  ;;  %v4766_v18 = vpack.c.bf16 %v4411_v50, %v4408_v56  ;;  %12283 = vmatpush3.bf16.msra.mxu1 %v15094_v31  ;;  %v13507_v50 = vld [vmem:[#allocation7 + $0xb8] sm:$0xff]  }
 0x6a4   :  { %v4327_v16 = vpop.f32.mrf.mxu1  ;;  %12141 = vmatmul.mubr.bf16.gmra.mxu0 %v4549_v47  ;;  %v12082_v45 = vpop.f32.mrf.mxu0  ;;  %12284 = vmatprep.subr.bf16.mxu1 %v15098_v32 }
 0x6a5   :  { %12189 = vmatpush3.bf16.msra.mxu0 %v13811_v40  ;;  %12236 = vmatprep.mubr.bf16.mxu1 %v4766_v18  ;;  %v13510_v18 = vld [vmem:[#allocation9 + $0x80] sm:$0xff]  }
 0x6a6   :  { %v12051_v36 = vpop.f32.mrf.mxu1  ;;  %12190 = vmatprep.subr.bf16.mxu0 %v13812_v29  ;;  %v4424_v43 = vpop.f32.mrf.mxu0  ;;  %12237 = vmatmul.mubr.bf16.gmra.mxu1 %v4767_v8  ;;  %v13499_v8 = vld [vmem:[#allocation12 + $0x80] sm:$0xff]  }
 0x6a7   :  { %12285 = vmatpush3.bf16.msra.mxu1 %v15098_v32  ;;  %v4551_v26 = vpack.c.bf16 %v12051_v36, %v12050_v63  ;;  %v15115_v63 = vld [vmem:[#allocation4 + $0x80] sm:$0xff]   ;;  %v13511_v36 = vld [vmem:[#allocation9 + $0x88] sm:$0xff]  }
 0x6a8   :  { %v4330_v12 = vpop.f32.mrf.mxu1  ;;  %v12083_v17 = vpop.f32.mrf.mxu0  ;;  %12286 = vmatprep.subr.bf16.mxu1 %v15102_v2 }
 0x6a9   :  { %v4550_v38 = vpack.c.bf16 %v4330_v12, %v4327_v16  ;;  %12191 = vmatpush3.bf16.msra.mxu0 %v13812_v29  ;;  %v4769_v1 = vpack.c.bf16 %v12083_v17, %v12082_v45  ;;  %v13501_v16 = vld [vmem:[#allocation4 + $0x88] sm:$0xff]   ;;  %v13504_v45 = vld [vmem:[#allocation4 + $0x90] sm:$0xff]   ;;  %v13505_v12 = vld [vmem:[#allocation4 + $0x98] sm:$0xff]  }
 0x6aa   :  { %v12102_v57 = vpop.f32.mrf.mxu1  ;;  %12192 = vmatprep.subr.bf16.mxu0 %v13813_v33  ;;  %v4427_v27 = vpop.f32.mrf.mxu0  ;;  %v13514_v29 = vld [vmem:[#allocation9 + $0x90] sm:$0xff]  }
 0x6ab   :  { %12144 = vmatprep.mubr.bf16.mxu0 %v4550_v38  ;;  %v4768_v53 = vpack.c.bf16 %v4427_v27, %v4424_v43  ;;  %12287 = vmatpush3.bf16.msra.mxu1 %v15102_v2  ;;  %v13815_v43 = vld [vmem:[#allocation15 + $0x38] sm:$0xff]   ;;  %v13816_v17 = vld [vmem:[#allocation15 + $0x30] sm:$0xff]   ;;  %v13508_v38 = vld [vmem:[#allocation4 + $0xa0] sm:$0xff]  }
 0x6ac   :  { %v4473_v46 = vpop.f32.mrf.mxu1  ;;  %12145 = vmatmul.mubr.bf16.gmra.mxu0 %v4551_v26  ;;  %12288 = vmatprep.subr.bf16.mxu1 %v15106_v13  ;;  %v13515_v26 = vld [vmem:[#allocation9 + $0x98] sm:$0xff]   ;;  %v13519_v27 = vld [vmem:[#allocation9 + $0xa8] sm:$0xff]  }
 0x6ad   :  { %12193 = vmatpush3.bf16.msra.mxu0 %v13813_v33  ;;  %12240 = vmatprep.mubr.bf16.mxu1 %v4768_v53  ;;  %v13817_v33 = vld [vmem:[#allocation15 + $0x28] sm:$0xff]   ;;  %v13522_v53 = vld [vmem:[#allocation9 + $0xb0] sm:$0xff]  }
 0x6ae   :  { %v12103_v49 = vpop.f32.mrf.mxu1  ;;  %12194 = vmatprep.subr.bf16.mxu0 %v13814_v48  ;;  %12241 = vmatmul.mubr.bf16.gmra.mxu1 %v4769_v1  ;;  %v13818_v1 = vld [vmem:[#allocation15 + $0x20] sm:$0xff]  }
 0x6af   :  { %12289 = vmatpush3.bf16.msra.mxu1 %v15106_v13  ;;  %12292 = vmatprep.mubr.bf16.mxu1 %v13493_v14  ;;  %v4771_v39 = vpack.c.bf16 %v12103_v49, %v12102_v57  ;;  %v13518_v57 = vld [vmem:[#allocation9 + $0xa0] sm:$0xff]   ;;  %v13819_v14 = vld [vmem:[#allocation15 + $0x18] sm:$0xff]  }
 0x6b0   :  { %v4476_v42 = vpop.f32.mrf.mxu1  ;;  %12290 = vmatprep.subr.bf16.mxu1 %v15110_v51  ;;  %v13523_v49 = vld [vmem:[#allocation9 + $0xb8] sm:$0xff]  }
 0x6b1   :  { %v4770_v5 = vpack.c.bf16 %v4476_v42, %v4473_v46  ;;  %12195 = vmatpush3.bf16.msra.mxu0 %v13814_v48  ;;  %v13820_v46 = vld [vmem:[#allocation15 + $0x10] sm:$0xff]   ;;  %v13821_v48 = vld [vmem:[#allocation15 + $0x8] sm:$0xff]   ;;  %v13823_v42 = vld [vmem:[#allocation16 + $0x38] sm:$0xff]  }
 0x6b2   :  { %v12106_v44 = vpop.f32.mrf.mxu1  ;;  %12244 = vmatprep.subr.bf16.mxu0 %v13484_v37 }
 0x6b3   :  { %12196 = vmatprep.mubr.bf16.mxu0 %v4770_v5  ;;  %12291 = vmatpush3.bf16.msra.mxu1 %v15110_v51  ;;  %v15134_v5 = vld [vmem:[#allocation18 + $0x38] sm:$0xff]  }
 0x6b4   :  { %v4489_v61 = vpop.f32.mrf.mxu1  ;;  %12197 = vmatmul.mubr.bf16.vlgmr.msra.gmra.mxu0 %v4771_v39  ;;  %12340 = vmatprep.subr.bf16.mxu1 %v13484_v37  ;;  %v13521_v39 = vld [vmem:[#allocation10 + $0x98] sm:$0xff]  }
 0x6b5   :  { %12245 = vmatpush3.bf16.msra.mxu0 %v13484_v37 }
 0x6b6   :  { %v12107_v24 = vpop.f32.mrf.mxu1  ;;  %12246 = vmatprep.subr.bf16.mxu0 %v13486_v58  ;;  %12293 = vmatmul.mubr.bf16.vlgmr.msra.gmra.mxu1 %v13494_v19  ;;  %v13525_v19 = vld [vmem:[#allocation10 + $0xa8] sm:$0xff]  }
 0x6b7   :  { %12341 = vmatpush3.bf16.msra.mxu1 %v13484_v37  ;;  %12296 = vmatprep.mubr.bf16.mxu1 %v13497_v55  ;;  %v4773_v11 = vpack.c.bf16 %v12107_v24, %v12106_v44  ;;  %v13822_v37 = vld [vmem:[#allocation15] sm:$0xff]   ;;  %v13526_v55 = vld [vmem:[#allocation10 + $0xb0] sm:$0xff]  }
 0x6b8   :  { %v4492_v3 = vpop.f32.mrf.mxu1  ;;  %12342 = vmatprep.subr.bf16.mxu1 %v13486_v58  ;;  %v13524_v44 = vld [vmem:[#allocation10 + $0xa0] sm:$0xff]   ;;  %v13829_v24 = vld [vmem:[#allocation16 + $0x10] sm:$0xff]  }
 0x6b9   :  { %v4772_v62 = vpack.c.bf16 %v4492_v3, %v4489_v61  ;;  %12247 = vmatpush3.bf16.msra.mxu0 %v13486_v58  ;;  %v13828_v61 = vld [vmem:[#allocation16 + $0x18] sm:$0xff]   ;;  %v13830_v3 = vld [vmem:[#allocation16 + $0x8] sm:$0xff]  }
 0x6ba   :  { %v12110_v0 = vpop.f32.mrf.mxu1  ;;  %12248 = vmatprep.subr.bf16.mxu0 %v13488_v10 }
 0x6bb   :  { %12200 = vmatprep.mubr.bf16.mxu0 %v4772_v62  ;;  %12343 = vmatpush3.bf16.msra.mxu1 %v13486_v58  ;;  %v13826_v58 = vld [vmem:[#allocation16 + $0x28] sm:$0xff]   ;;  %v13831_v62 = vld [vmem:[#allocation16] sm:$0xff]  }
 0x6bc   :  { %v4505_v52 = vpop.f32.mrf.mxu1  ;;  %12201 = vmatmul.mubr.bf16.gmra.mxu0 %v4773_v11  ;;  %12344 = vmatprep.subr.bf16.mxu1 %v13488_v10  ;;  %v15137_v11 = vld [vmem:[#allocation19 + $0x38] sm:$0xff]  }
 0x6bd   :  { %12249 = vmatpush3.bf16.msra.mxu0 %v13488_v10 }
 0x6be   :  { %v12111_v6 = vpop.f32.mrf.mxu1  ;;  %12250 = vmatprep.subr.bf16.mxu0 %v13490_v23  ;;  %12297 = vmatmul.mubr.bf16.gmra.mxu1 %v13498_v34 }
 0x6bf   :  { %12345 = vmatpush3.bf16.msra.mxu1 %v13488_v10  ;;  %12300 = vmatprep.mubr.bf16.mxu1 %v13502_v15  ;;  %v4775_v28 = vpack.c.bf16 %v12111_v6, %v12110_v0  ;;  %v13527_v10 = vld [vmem:[#allocation10 + $0xb8] sm:$0xff]  }
 0x6c0   :  { %v4508_v60 = vpop.f32.mrf.mxu1  ;;  %12346 = vmatprep.subr.bf16.mxu1 %v13490_v23 }
 0x6c1   :  { %v4774_v59 = vpack.c.bf16 %v4508_v60, %v4505_v52  ;;  %12251 = vmatpush3.bf16.msra.mxu0 %v13490_v23 }
 0x6c2   :  { %v12114_v20 = vpop.f32.mrf.mxu1  ;;  %12252 = vmatprep.subr.bf16.mxu0 %v13492_v30 }
 0x6c3   :  { %12204 = vmatprep.mubr.bf16.mxu0 %v4774_v59  ;;  %12347 = vmatpush3.bf16.msra.mxu1 %v13490_v23 }
 0x6c4   :  { %v4521_v56 = vpop.f32.mrf.mxu1  ;;  %12205 = vmatmul.mubr.bf16.gmra.mxu0 %v4775_v28  ;;  %12348 = vmatprep.subr.bf16.mxu1 %v13492_v30 }
 0x6c5   :  { %12253 = vmatpush3.bf16.msra.mxu0 %v13492_v30 }
 0x6c6   :  { %v12115_v22 = vpop.f32.mrf.mxu1  ;;  %12254 = vmatprep.subr.bf16.mxu0 %v13495_v25  ;;  %12301 = vmatmul.mubr.bf16.gmra.mxu1 %v13503_v4 }
 0x6c7   :  { %12349 = vmatpush3.bf16.msra.mxu1 %v13492_v30  ;;  %12304 = vmatprep.mubr.bf16.mxu1 %v13506_v9  ;;  %v4777_v40 = vpack.c.bf16 %v12115_v22, %v12114_v20 }
 0x6c8   :  { %v4524_v7 = vpop.f32.mrf.mxu1  ;;  %12350 = vmatprep.subr.bf16.mxu1 %v13495_v25 }
 0x6c9   :  { %v4776_v47 = vpack.c.bf16 %v4524_v7, %v4521_v56  ;;  %12255 = vmatpush3.bf16.msra.mxu0 %v13495_v25 }
 0x6ca   :  { %12256 = vmatprep.subr.bf16.mxu0 %v13496_v41 }
 0x6cb   :  { %12208 = vmatprep.mubr.bf16.mxu0 %v4776_v47  ;;  %12351 = vmatpush3.bf16.msra.mxu1 %v13495_v25 }
 0x6cc   :  { %12209 = vmatmul.mubr.bf16.gmra.mxu0 %v4777_v40  ;;  %12352 = vmatprep.subr.bf16.mxu1 %v13496_v41 }
 0x6cd   :  { %12257 = vmatpush3.bf16.msra.mxu0 %v13496_v41  ;;  %12260 = vmatprep.mubr.bf16.mxu0 %v15115_v63 }
 0x6ce   :  { %12258 = vmatprep.subr.bf16.mxu0 %v13499_v8  ;;  %12305 = vmatmul.mubr.bf16.gmra.mxu1 %v13507_v50 }
 0x6cf   :  { %12353 = vmatpush3.bf16.msra.mxu1 %v13496_v41  ;;  %12356 = vmatprep.mubr.bf16.mxu1 %v13510_v18 }
 0x6d0   :  { %12354 = vmatprep.subr.bf16.mxu1 %v13499_v8 }
 0x6d1   :  { %12259 = vmatpush3.bf16.msra.mxu0 %v13499_v8 }
 0x6d2   :  { %12308 = vmatprep.subr.bf16.mxu0 %v15082_v35 }
 0x6d3   :  { %12355 = vmatpush3.bf16.msra.mxu1 %v13499_v8  ;;  %v16189_v8 = vld [vmem:[#allocation48_spill] sm:$0xff] }
 0x6d4   :  { %12261 = vmatmul.mubr.bf16.vlgmr.msra.gmra.mxu0 %v13501_v16  ;;  %12404 = vmatprep.subr.bf16.mxu1 %v13815_v43  ;;  %v2534_v50 = vmax.f32 %v16189_v8, 0.0 }
 0x6d5   :  { %12309 = vmatpush3.bf16.msra.mxu0 %v15082_v35  ;;  %12264 = vmatprep.mubr.bf16.mxu0 %v13504_v45  ;;  %v13509_v35 = vld [vmem:[#allocation4 + $0xa8] sm:$0xff]  }
 0x6d6   :  { %12310 = vmatprep.subr.bf16.mxu0 %v15085_v21  ;;  %12357 = vmatmul.mubr.bf16.vlgmr.msra.gmra.mxu1 %v13511_v36 }
 0x6d7   :  { %12360 = vmatprep.mubr.bf16.mxu1 %v13514_v29  ;;  %12405 = vmatpush3.bf16.msra.mxu1 %v13815_v43  ;;  %v16190_v29 = vld [vmem:[#allocation49_spill] sm:$0xff] }
 0x6d8   :  { %12406 = vmatprep.subr.bf16.mxu1 %v13816_v17  ;;  %v2532_v43 = vmax.f32 %v16190_v29, 0.0 }
 0x6d9   :  { %12311 = vmatpush3.bf16.msra.mxu0 %v15085_v21  ;;  %v13512_v21 = vld [vmem:[#allocation4 + $0xb0] sm:$0xff]  }
 0x6da   :  { %12312 = vmatprep.subr.bf16.mxu0 %v15090_v54 }
 0x6db   :  { %12407 = vmatpush3.bf16.msra.mxu1 %v13816_v17 }
 0x6dc   :  { %12265 = vmatmul.mubr.bf16.gmra.mxu0 %v13505_v12  ;;  %12408 = vmatprep.subr.bf16.mxu1 %v13817_v33 }
 0x6dd   :  { %12313 = vmatpush3.bf16.msra.mxu0 %v15090_v54  ;;  %12268 = vmatprep.mubr.bf16.mxu0 %v13508_v38  ;;  %v13513_v54 = vld [vmem:[#allocation4 + $0xb8] sm:$0xff]  }
 0x6de   :  { %12314 = vmatprep.subr.bf16.mxu0 %v15094_v31  ;;  %12361 = vmatmul.mubr.bf16.gmra.mxu1 %v13515_v26 }
 0x6df   :  { %12364 = vmatprep.mubr.bf16.mxu1 %v13518_v57  ;;  %12409 = vmatpush3.bf16.msra.mxu1 %v13817_v33  ;;  %v16192_v33 = vld [vmem:[#allocation50_spill] sm:$0xff] }
 0x6e0   :  { %12410 = vmatprep.subr.bf16.mxu1 %v13818_v1 }
 0x6e1   :  { %12315 = vmatpush3.bf16.msra.mxu0 %v15094_v31  ;;  %v13516_v31 = vld [vmem:[#allocation10 + $0x80] sm:$0xff]  }
 0x6e2   :  { %12316 = vmatprep.subr.bf16.mxu0 %v15098_v32 }
 0x6e3   :  { %12411 = vmatpush3.bf16.msra.mxu1 %v13818_v1 }
 0x6e4   :  { %12269 = vmatmul.mubr.bf16.gmra.mxu0 %v13509_v35  ;;  %12412 = vmatprep.subr.bf16.mxu1 %v13819_v14  ;;  %v2535_v35 = vmax.f32 %v16192_v33, 0.0 }
 0x6e5   :  { %12317 = vmatpush3.bf16.msra.mxu0 %v15098_v32  ;;  %12272 = vmatprep.mubr.bf16.mxu0 %v13512_v21  ;;  %v13517_v32 = vld [vmem:[#allocation10 + $0x88] sm:$0xff]  }
 0x6e6   :  { %12318 = vmatprep.subr.bf16.mxu0 %v15102_v2  ;;  %12365 = vmatmul.mubr.bf16.gmra.mxu1 %v13519_v27 }
 0x6e7   :  { %12368 = vmatprep.mubr.bf16.mxu1 %v13522_v53  ;;  %12413 = vmatpush3.bf16.msra.mxu1 %v13819_v14 }
 0x6e8   :  { %12414 = vmatprep.subr.bf16.mxu1 %v13820_v46 }
 0x6e9   :  { %12319 = vmatpush3.bf16.msra.mxu0 %v15102_v2  ;;  %v13520_v2 = vld [vmem:[#allocation10 + $0x90] sm:$0xff]  }
 0x6ea   :  { %12320 = vmatprep.subr.bf16.mxu0 %v15106_v13 }
 0x6eb   :  { %12415 = vmatpush3.bf16.msra.mxu1 %v13820_v46 }
 0x6ec   :  { %12273 = vmatmul.mubr.bf16.gmra.mxu0 %v13513_v54  ;;  %12416 = vmatprep.subr.bf16.mxu1 %v13821_v48 }
 0x6ed   :  { %12321 = vmatpush3.bf16.msra.mxu0 %v15106_v13  ;;  %12324 = vmatprep.mubr.bf16.mxu0 %v13516_v31  ;;  %v13825_v13 = vld [vmem:[#allocation16 + $0x30] sm:$0xff]  }
 0x6ee   :  { %12322 = vmatprep.subr.bf16.mxu0 %v15110_v51  ;;  %12369 = vmatmul.mubr.bf16.gmra.mxu1 %v13523_v49  ;;  %v16194_v49 = vld [vmem:[#allocation53_spill] sm:$0xff] }
 0x6ef   :  { %12417 = vmatpush3.bf16.msra.mxu1 %v13821_v48  ;;  %v2538_v48 = vmax.f32 %v16194_v49, 0.0 }
 0x6f0   :  { %12418 = vmatprep.subr.bf16.mxu1 %v13822_v37 }
 0x6f1   :  { %12323 = vmatpush3.bf16.msra.mxu0 %v15110_v51  ;;  %v13827_v51 = vld [vmem:[#allocation16 + $0x20] sm:$0xff]  }
 0x6f2   :  { %12372 = vmatprep.subr.bf16.mxu0 %v13823_v42 }
 0x6f3   :  { %12419 = vmatpush3.bf16.msra.mxu1 %v13822_v37 }
 0x6f4   :  { %12325 = vmatmul.mubr.bf16.vlgmr.msra.gmra.mxu0 %v13517_v32  ;;  %12468 = vmatprep.subr.bf16.mxu1 %v15134_v5 }
 0x6f5   :  { %12328 = vmatprep.mubr.bf16.mxu0 %v13520_v2  ;;  %12373 = vmatpush3.bf16.msra.mxu0 %v13823_v42 }
 0x6f6   :  { %12374 = vmatprep.subr.bf16.mxu0 %v13825_v13 }
 0x6f9   :  { %12375 = vmatpush3.bf16.msra.mxu0 %v13825_v13  ;;  %v16195_v13 = vld [vmem:[#allocation54_spill] sm:$0xff] }
 0x6fa   :  { %12376 = vmatprep.subr.bf16.mxu0 %v13826_v58 }
 0x6fc   :  { %12329 = vmatmul.mubr.bf16.gmra.mxu0 %v13521_v39  ;;  %v2536_v39 = vmax.f32 %v16195_v13, 0.0 }
 0x6fd   :  { %12332 = vmatprep.mubr.bf16.mxu0 %v13524_v44  ;;  %12377 = vmatpush3.bf16.msra.mxu0 %v13826_v58 }
 0x6fe   :  { %12378 = vmatprep.subr.bf16.mxu0 %v13827_v51 }
 0x701   :  { %12379 = vmatpush3.bf16.msra.mxu0 %v13827_v51 }
 0x702   :  { %12380 = vmatprep.subr.bf16.mxu0 %v13828_v61 }
 0x704   :  { %12333 = vmatmul.mubr.bf16.gmra.mxu0 %v13525_v19 }
 0x705   :  { %12336 = vmatprep.mubr.bf16.mxu0 %v13526_v55  ;;  %12381 = vmatpush3.bf16.msra.mxu0 %v13828_v61  ;;  %v16197_v61 = vld [vmem:[#allocation55_spill] sm:$0xff] }
 0x706   :  { %12382 = vmatprep.subr.bf16.mxu0 %v13829_v24 }
 0x709   :  { %12383 = vmatpush3.bf16.msra.mxu0 %v13829_v24  ;;  %v2539_v24 = vmax.f32 %v16197_v61, 0.0 }
 0x70a   :  { %12384 = vmatprep.subr.bf16.mxu0 %v13830_v3 }
 0x70c   :  { %12337 = vmatmul.mubr.bf16.gmra.mxu0 %v13527_v10 }
 0x70d   :  { %12385 = vmatpush3.bf16.msra.mxu0 %v13830_v3 }
 0x70e   :  { %12386 = vmatprep.subr.bf16.mxu0 %v13831_v62 }
 0x711   :  { %12387 = vmatpush3.bf16.msra.mxu0 %v13831_v62 }
 0x712   :  { %12436 = vmatprep.subr.bf16.mxu0 %v15137_v11 }
 0x735   :  { %v12166_v0 = vpop.f32.mrf.mxu1 }
 0x737   :  { %v4683_v23 = vpop.f32.mrf.mxu1 }
 0x739   :  { %v12167_v34 = vpop.f32.mrf.mxu1 }
 0x73b   :  { %v15140_v15 = vpop.f32.mrf.mxu1 }
 0x73c   :  { %16185 = vst [vmem:[#allocation40_spill] sm:$0xff] %v15140_v15 }
 0x73d   :  { %v12170_v52 = vpop.f32.mrf.mxu1 }
 0x73f   :  { %v4699_v6 = vpop.f32.mrf.mxu1 }
 0x741   :  { %v12171_v30 = vpop.f32.mrf.mxu1 }
 0x743   :  { %v15142_v60 = vpop.f32.mrf.mxu1 }
 0x744   :  { %16186 = vst [vmem:[#allocation41_spill] sm:$0xff] %v15142_v60 }
 0x745   :  { %v12174_v59 = vpop.f32.mrf.mxu1 }
 0x747   :  { %v4715_v28 = vpop.f32.mrf.mxu1 }
 0x749   :  { %v12175_v20 = vpop.f32.mrf.mxu1 }
 0x74b   :  { %v15144_v25 = vpop.f32.mrf.mxu1 }
 0x74c   :  { %16187 = vst [vmem:[#allocation42_spill] sm:$0xff] %v15144_v25 }
 0x74d   :  { %v15146_v4 = vpop.f32.mrf.mxu1 }
 0x74f   :  { %v15148_v9 = vpop.f32.mrf.mxu1 }
 0x751   :  { %v15150_v56 = vpop.f32.mrf.mxu1 }
 0x753   :  { %v15152_v22 = vpop.f32.mrf.mxu1 }
 0x754   :  { %16188 = vst [vmem:[#allocation43_spill] sm:$0xff] %v15152_v22  ;;  %v12134_v41 = vpop.f32.mrf.mxu0 }
 0x755   :  { %v4692_v7 = vadd.f32 %v12166_v0, %v12134_v41  ;;  %v16199_v41 = vld [vmem:[#allocation58_spill] sm:$0xff] }
 0x756   :  { %v4586_v47 = vpop.f32.mrf.mxu0  ;;  %v15154_v40 = vpop.f32.mrf.mxu1 }
 0x757   :  { %v4748_v18 = vmax.f32 %v4692_v7, 0.0  ;;  %v4684_v16 = vadd.f32 %v4683_v23, %v4586_v47 }
 0x758   :  { %v12135_v45 = vpop.f32.mrf.mxu0  ;;  %v15157_v36 = vpop.f32.mrf.mxu1 }
 0x759   :  { %v15160_v12 = vadd.f32 %v4748_v18, %v2534_v50  ;;  %v4746_v17 = vmax.f32 %v4684_v16, 0.0  ;;  %v4695_v38 = vadd.f32 %v12167_v34, %v12135_v45  ;;  %v16200_v18 = vld [vmem:[#allocation59_spill] sm:$0xff] }
 0x75a   :  { %v15162_v26 = vpop.f32.mrf.mxu0  ;;  %v15164_v57 = vpop.f32.mrf.mxu1  ;;  %v2540_v16 = vmax.f32 %v16200_v18, 0.0 }
 0x75b   :  { %16191 = vst [vmem:[#allocation48_spill] sm:$0xff] %v15162_v26  ;;  %v15167_v1 = vadd.f32 %v4746_v17, %v2532_v43  ;;  %v4749_v21 = vmax.f32 %v4695_v38, 0.0 }
 0x75c   :  { %v12138_v27 = vpop.f32.mrf.mxu0  ;;  %v15169_v53 = vpop.f32.mrf.mxu1 }
 0x75d   :  { %16193 = vst [vmem:[#allocation49_spill] sm:$0xff] %v15169_v53  ;;  %v15171_v14 = vadd.f32 %v4749_v21, %v2535_v35  ;;  %v4708_v54 = vadd.f32 %v12170_v52, %v12138_v27 }
 0x75e   :  { %v4602_v46 = vpop.f32.mrf.mxu0  ;;  %v15173_v31 = vpop.f32.mrf.mxu1 }
 0x75f   :  { %v4752_v32 = vmax.f32 %v4708_v54, 0.0  ;;  %v4700_v37 = vadd.f32 %v4699_v6, %v4602_v46 }
 0x760   :  { %v12139_v2 = vpop.f32.mrf.mxu0  ;;  %v15176_v42 = vpop.f32.mrf.mxu1 }
 0x761   :  { %v15179_v44 = vadd.f32 %v4752_v32, %v2538_v48  ;;  %v4750_v58 = vmax.f32 %v4700_v37, 0.0  ;;  %v4711_v51 = vadd.f32 %v12171_v30, %v12139_v2  ;;  %v2542_v30 = vmax.f32 %v16199_v41, 0.0 }
 0x762   :  { %v15181_v19 = vpop.f32.mrf.mxu0  ;;  %v15183_v55 = vpop.f32.mrf.mxu1 }
 0x763   :  { %16196 = vst [vmem:[#allocation50_spill] sm:$0xff] %v15181_v19  ;;  %v15186_v10 = vadd.f32 %v4750_v58, %v2536_v39  ;;  %v4753_v3 = vmax.f32 %v4711_v51, 0.0  ;;  %v16205_v58 = vld [vmem:[#allocation64_spill] sm:$0xff] }
 0x764   :  { %v12142_v62 = vpop.f32.mrf.mxu0  ;;  %v15188_v0 = vpop.f32.mrf.mxu1  ;;  %v2544_v51 = vmax.f32 %v16205_v58, 0.0 }
 0x765   :  { %16198 = vst [vmem:[#allocation53_spill] sm:$0xff] %v15188_v0  ;;  %v15190_v23 = vadd.f32 %v4753_v3, %v2539_v24  ;;  %v4724_v34 = vadd.f32 %v12174_v59, %v12142_v62  ;;  %v16202_v59 = vld [vmem:[#allocation60_spill] sm:$0xff] }
 0x766   :  { %v4618_v52 = vpop.f32.mrf.mxu0  ;;  %v15192_v6 = vpop.f32.mrf.mxu1  ;;  %v2543_v33 = vmax.f32 %v16202_v59, 0.0 }
 0x767   :  { %v4756_v7 = vmax.f32 %v4724_v34, 0.0  ;;  %v4716_v47 = vadd.f32 %v4715_v28, %v4618_v52  ;;  %v16207_v34 = vld [vmem:[#allocation65_spill] sm:$0xff] }
 0x768   :  { %v12143_v8 = vpop.f32.mrf.mxu0  ;;  %v15195_v50 = vpop.f32.mrf.mxu1  ;;  %v2547_v52 = vmax.f32 %v16207_v34, 0.0 }
 0x769   :  { %v15198_v45 = vadd.f32 %v4756_v7, %v2542_v30  ;;  %v4754_v29 = vmax.f32 %v4716_v47, 0.0  ;;  %v4727_v43 = vadd.f32 %v12175_v20, %v12143_v8  ;;  %v16204_v20 = vld [vmem:[#allocation63_spill] sm:$0xff] }
 0x76a   :  { %v15200_v17 = vpop.f32.mrf.mxu0  ;;  %v15202_v38 = vpop.f32.mrf.mxu1  ;;  %v2546_v32 = vmax.f32 %v16204_v20, 0.0 }
 0x76b   :  { %16201 = vst [vmem:[#allocation54_spill] sm:$0xff] %v15200_v17  ;;  %v15205_v35 = vadd.f32 %v4754_v29, %v2540_v16  ;;  %v4757_v21 = vmax.f32 %v4727_v43, 0.0  ;;  %v16210_v29 = vld [vmem:[#allocation68_spill] sm:$0xff] }
 0x76c   :  { %v12146_v27 = vpop.f32.mrf.mxu0  ;;  %v15207_v28 = vpop.f32.mrf.mxu1 }
 0x76d   :  { %16203 = vst [vmem:[#allocation55_spill] sm:$0xff] %v15207_v28  ;;  %v15209_v54 = vadd.f32 %v4757_v21, %v2543_v33  ;;  %v4740_v46 = vadd.f32 %v15146_v4, %v12146_v27  ;;  %v16211_v27 = vld [vmem:[#allocation69_spill] sm:$0xff] }
 0x76e   :  { %v4634_v49 = vpop.f32.mrf.mxu0  ;;  %v15212_v48 = vpop.f32.mrf.mxu1 }
 0x76f   :  { %v4760_v37 = vmax.f32 %v4740_v46, 0.0  ;;  %v4732_v2 = vadd.f32 %v15148_v9, %v4634_v49  ;;  %v2854_v46 = vmax.f32 %v16211_v27, 0.0 }
 0x770   :  { %v12147_v13 = vpop.f32.mrf.mxu0  ;;  %v15216_v39 = vpop.f32.mrf.mxu1 }
 0x771   :  { %v15219_v61 = vadd.f32 %v4760_v37, %v2546_v32  ;;  %v4758_v24 = vmax.f32 %v4732_v2, 0.0  ;;  %v4743_v3 = vadd.f32 %v15150_v56, %v12147_v13  ;;  %v2856_v56 = vmax.f32 %v16210_v29, 0.0 }
 0x772   :  { %v15222_v62 = vpop.f32.mrf.mxu0  ;;  %v15224_v4 = vpop.f32.mrf.mxu1 }
 0x773   :  { %16206 = vst [vmem:[#allocation58_spill] sm:$0xff] %v15222_v62  ;;  %v15227_v41 = vadd.f32 %v4758_v24, %v2544_v51  ;;  %v4761_v30 = vmax.f32 %v4743_v3, 0.0 }
 0x774   :  { %v12198_v9 = vpop.f32.mrf.mxu0  ;;  %v15229_v7 = vpop.f32.mrf.mxu1 }
 0x775   :  { %16208 = vst [vmem:[#allocation59_spill] sm:$0xff] %v15229_v7  ;;  %v15231_v47 = vadd.f32 %v4761_v30, %v2547_v52  ;;  %v4918_v8 = vadd.f32 %v15154_v40, %v12198_v9  ;;  %v16214_v40 = vld [vmem:[#allocation70_spill] sm:$0xff] }
 0x776   :  { %v4812_v18 = vpop.f32.mrf.mxu0  ;;  %v12294_v16 = vpop.f32.mrf.mxu1  ;;  %v2857_v13 = vmax.f32 %v16214_v40, 0.0 }
 0x777   :  { %16209 = vst [vmem:[#allocation60_spill] sm:$0xff] %v15231_v47  ;;  %v4974_v43 = vmax.f32 %v4918_v8, 0.0  ;;  %v4910_v59 = vadd.f32 %v15157_v36, %v4812_v18  ;;  %v16217_v18 = vld [vmem:[#allocation72_spill] sm:$0xff] }
 0x778   :  { %v12199_v33 = vpop.f32.mrf.mxu0  ;;  %v5445_v21 = vpop.f32.mrf.mxu1 }
 0x779   :  { %v15237_v49 = vadd.f32 %v4974_v43, %v2856_v56  ;;  %v4972_v20 = vmax.f32 %v4910_v59, 0.0  ;;  %v4921_v32 = vadd.f32 %v15164_v57, %v12199_v33  ;;  %v2860_v57 = vmax.f32 %v16217_v18, 0.0  ;;  %v16218_v33 = vld [vmem:[#allocation73_spill] sm:$0xff]  ;;  %v16224_v18 = vld [vmem:[#allocation76_spill] sm:$0xff] }
 0x77a   :  { %v15240_v37 = vpop.f32.mrf.mxu0  ;;  %v12295_v2 = vpop.f32.mrf.mxu1  ;;  %v2858_v27 = vmax.f32 %v16218_v33, 0.0 }
 0x77b   :  { %16212 = vst [vmem:[#allocation63_spill] sm:$0xff] %v15237_v49  ;;  %16213 = vst [vmem:[#allocation64_spill] sm:$0xff] %v15240_v37  ;;  %v15243_v58 = vadd.f32 %v4972_v20, %v2854_v46  ;;  %v4975_v51 = vmax.f32 %v4921_v32, 0.0  ;;  %v5807_v3 = vpack.c.bf16 %v12295_v2, %v12294_v16  ;;  %v13833_v32 = vld [vmem:[#allocation19 + $0x30] sm:$0xff]  }
 0x77c   :  { %v12202_v24 = vpop.f32.mrf.mxu0  ;;  %v5448_v36 = vpop.f32.mrf.mxu1  ;;  %v16221_v2 = vld [vmem:[#allocation74_spill] sm:$0xff] }
 0x77d   :  { %16215 = vst [vmem:[#allocation65_spill] sm:$0xff] %v15243_v58  ;;  %v15245_v34 = vadd.f32 %v4975_v51, %v2857_v13  ;;  %v4934_v52 = vadd.f32 %v15173_v31, %v12202_v24  ;;  %v5806_v30 = vpack.c.bf16 %v5448_v36, %v5445_v21 }
 0x77e   :  { %v4828_v9 = vpop.f32.mrf.mxu0  ;;  %v12298_v8 = vpop.f32.mrf.mxu1 }
 0x77f   :  { %16216 = vst [vmem:[#allocation68_spill] sm:$0xff] %v15245_v34  ;;  %v4978_v29 = vmax.f32 %v4934_v52, 0.0  ;;  %v4926_v56 = vadd.f32 %v15176_v42, %v4828_v9  ;;  %12388 = vmatprep.mubr.bf16.mxu0 %v5806_v30  ;;  %v2861_v42 = vmax.f32 %v16221_v2, 0.0  ;;  %v13834_v9 = vld [vmem:[#allocation19 + $0x28] sm:$0xff]   ;;  %v16228_v2 = vld [vmem:[#allocation78_spill] sm:$0xff] }
 0x780   :  { %v12203_v43 = vpop.f32.mrf.mxu0  ;;  %v5461_v59 = vpop.f32.mrf.mxu1  ;;  %12389 = vmatmul.mubr.bf16.vlgmr.msra.gmra.mxu0 %v5807_v3 }
 0x781   :  { %v15251_v16 = vadd.f32 %v4978_v29, %v2860_v57  ;;  %v4976_v46 = vmax.f32 %v4926_v56, 0.0  ;;  %v4937_v20 = vadd.f32 %v15183_v55, %v12203_v43  ;;  %12437 = vmatpush3.bf16.msra.mxu0 %v15137_v11  ;;  %v2864_v57 = vmax.f32 %v16224_v18, 0.0  ;;  %v13836_v18 = vld [vmem:[#allocation19 + $0x18] sm:$0xff]  }
 0x782   :  { %v15255_v31 = vpop.f32.mrf.mxu0  ;;  %v12299_v21 = vpop.f32.mrf.mxu1  ;;  %12438 = vmatprep.subr.bf16.mxu0 %v13833_v32 }
 0x783   :  { %16219 = vst [vmem:[#allocation69_spill] sm:$0xff] %v15251_v16  ;;  %16220 = vst [vmem:[#allocation70_spill] sm:$0xff] %v15255_v31  ;;  %v15258_v40 = vadd.f32 %v4976_v46, %v2858_v27  ;;  %v4979_v13 = vmax.f32 %v4937_v20, 0.0  ;;  %v5809_v24 = vpack.c.bf16 %v12299_v21, %v12298_v8  ;;  %v16225_v8 = vld [vmem:[#allocation77_spill] sm:$0xff] }
 0x784   :  { %v12206_v51 = vpop.f32.mrf.mxu0  ;;  %v5464_v3 = vpop.f32.mrf.mxu1  ;;  %v2862_v27 = vmax.f32 %v16225_v8, 0.0 }
 0x785   :  { %16222 = vst [vmem:[#allocation72_spill] sm:$0xff] %v15258_v40  ;;  %v15260_v36 = vadd.f32 %v4979_v13, %v2861_v42  ;;  %v4950_v52 = vadd.f32 %v15192_v6, %v12206_v51  ;;  %v5808_v55 = vpack.c.bf16 %v5464_v3, %v5461_v59  ;;  %12439 = vmatpush3.bf16.msra.mxu0 %v13833_v32  ;;  %v13835_v32 = vld [vmem:[#allocation19 + $0x20] sm:$0xff]   ;;  %v2865_v42 = vmax.f32 %v16228_v2, 0.0  ;;  %v13837_v2 = vld [vmem:[#allocation19 + $0x10] sm:$0xff]  }
 0x786   :  { %v4844_v11 = vpop.f32.mrf.mxu0  ;;  %v12302_v30 = vpop.f32.mrf.mxu1  ;;  %12440 = vmatprep.subr.bf16.mxu0 %v13834_v9 }
 0x787   :  { %16223 = vst [vmem:[#allocation73_spill] sm:$0xff] %v15260_v36  ;;  %v4982_v29 = vmax.f32 %v4950_v52, 0.0  ;;  %v4942_v56 = vadd.f32 %v15195_v50, %v4844_v11  ;;  %12392 = vmatprep.mubr.bf16.mxu0 %v5808_v55 }
 0x788   :  { %v12207_v43 = vpop.f32.mrf.mxu0  ;;  %v5477_v33 = vpop.f32.mrf.mxu1  ;;  %12393 = vmatmul.mubr.bf16.gmra.mxu0 %v5809_v24 }
 0x789   :  { %v15266_v46 = vadd.f32 %v4982_v29, %v2864_v57  ;;  %v4980_v6 = vmax.f32 %v4942_v56, 0.0  ;;  %v4953_v59 = vadd.f32 %v15202_v38, %v12207_v43  ;;  %12441 = vmatpush3.bf16.msra.mxu0 %v13834_v9  ;;  %v16231_v57 = vld [vmem:[#allocation80_spill] sm:$0xff] }
 0x78a   :  { %v15269_v20 = vpop.f32.mrf.mxu0  ;;  %v12303_v21 = vpop.f32.mrf.mxu1  ;;  %12442 = vmatprep.subr.bf16.mxu0 %v13835_v32  ;;  %v2868_v29 = vmax.f32 %v16231_v57, 0.0 }
 0x78b   :  { %16226 = vst [vmem:[#allocation74_spill] sm:$0xff] %v15266_v46  ;;  %16227 = vst [vmem:[#allocation76_spill] sm:$0xff] %v15269_v20  ;;  %v15272_v50 = vadd.f32 %v4980_v6, %v2862_v27  ;;  %v4983_v13 = vmax.f32 %v4953_v59, 0.0  ;;  %v5811_v24 = vpack.c.bf16 %v12303_v21, %v12302_v30  ;;  %v16232_v30 = vld [vmem:[#allocation81_spill] sm:$0xff] }
 0x78c   :  { %v12210_v51 = vpop.f32.mrf.mxu0  ;;  %v5480_v3 = vpop.f32.mrf.mxu1  ;;  %v2866_v6 = vmax.f32 %v16232_v30, 0.0  ;;  %v13839_v30 = vld [vmem:[#allocation19] sm:$0xff]  }
 0x78d   :  { %16229 = vst [vmem:[#allocation77_spill] sm:$0xff] %v15272_v50  ;;  %v15274_v52 = vadd.f32 %v4983_v13, %v2865_v42  ;;  %v4966_v55 = vadd.f32 %v15212_v48, %v12210_v51  ;;  %v5810_v11 = vpack.c.bf16 %v5480_v3, %v5477_v33  ;;  %12443 = vmatpush3.bf16.msra.mxu0 %v13835_v32  ;;  %v16235_v42 = vld [vmem:[#allocation82_spill] sm:$0xff] }
 0x78e   :  { %v4860_v38 = vpop.f32.mrf.mxu0  ;;  %v12306_v9 = vpop.f32.mrf.mxu1  ;;  %12444 = vmatprep.subr.bf16.mxu0 %v13836_v18  ;;  %v2869_v13 = vmax.f32 %v16235_v42, 0.0 }
 0x78f   :  { %16230 = vst [vmem:[#allocation78_spill] sm:$0xff] %v15274_v52  ;;  %v4986_v56 = vmax.f32 %v4966_v55, 0.0  ;;  %v4958_v43 = vadd.f32 %v15216_v39, %v4860_v38  ;;  %12396 = vmatprep.mubr.bf16.mxu0 %v5810_v11 }
 0x790   :  { %v12211_v8 = vpop.f32.mrf.mxu0  ;;  %v5493_v27 = vpop.f32.mrf.mxu1  ;;  %12397 = vmatmul.mubr.bf16.gmra.mxu0 %v5811_v24 }
 0x791   :  { %v15280_v59 = vadd.f32 %v4986_v56, %v2868_v29  ;;  %v4984_v48 = vmax.f32 %v4958_v43, 0.0  ;;  %v4969_v33 = vadd.f32 %v15224_v4, %v12211_v8  ;;  %12445 = vmatpush3.bf16.msra.mxu0 %v13836_v18  ;;  %v13838_v18 = vld [vmem:[#allocation19 + $0x8] sm:$0xff]  }
 0x792   :  { %v15283_v21 = vpop.f32.mrf.mxu0  ;;  %v12307_v32 = vpop.f32.mrf.mxu1  ;;  %12446 = vmatprep.subr.bf16.mxu0 %v13837_v2 }
 0x793   :  { %16233 = vst [vmem:[#allocation80_spill] sm:$0xff] %v15280_v59  ;;  %16234 = vst [vmem:[#allocation81_spill] sm:$0xff] %v15283_v21  ;;  %v15286_v39 = vadd.f32 %v4984_v48, %v2866_v6  ;;  %v4987_v51 = vmax.f32 %v4969_v33, 0.0  ;;  %v5813_v24 = vpack.c.bf16 %v12307_v32, %v12306_v9 }
 0x794   :  { %v12262_v3 = vpop.f32.mrf.mxu0  ;;  %v5496_v55 = vpop.f32.mrf.mxu1 }
 0x795   :  { %16236 = vst [vmem:[#allocation82_spill] sm:$0xff] %v15286_v39  ;;  %v15288_v11 = vadd.f32 %v4987_v51, %v2869_v13  ;;  %v5812_v38 = vpack.c.bf16 %v5496_v55, %v5493_v27  ;;  %12447 = vmatpush3.bf16.msra.mxu0 %v13837_v2  ;;  %v13840_v51 = vld [vmem:[#allocation18 + $0x30] sm:$0xff]  }
 0x796   :  { %v5252_v57 = vpop.f32.mrf.mxu0  ;;  %v12358_v4 = vpop.f32.mrf.mxu1  ;;  %12448 = vmatprep.subr.bf16.mxu0 %v13838_v18 }
 0x797   :  { %16237 = vst [vmem:[#allocation84_spill] sm:$0xff] %v15288_v11  ;;  %12400 = vmatprep.mubr.bf16.mxu0 %v5812_v38 }
 0x798   :  { %v12263_v29 = vpop.f32.mrf.mxu0  ;;  %v5735_v56 = vpop.f32.mrf.mxu1  ;;  %12401 = vmatmul.mubr.bf16.gmra.mxu0 %v5813_v24 }
 0x799   :  { %12449 = vmatpush3.bf16.msra.mxu0 %v13838_v18  ;;  %v5799_v9 = vpack.c.bf16 %v12263_v29, %v12262_v3  ;;  %v13841_v18 = vld [vmem:[#allocation18 + $0x28] sm:$0xff]  }
 0x79a   :  { %v5255_v43 = vpop.f32.mrf.mxu0  ;;  %v12359_v8 = vpop.f32.mrf.mxu1  ;;  %12450 = vmatprep.subr.bf16.mxu0 %v13839_v30 }
 0x79b   :  { %v5798_v6 = vpack.c.bf16 %v5255_v43, %v5252_v57  ;;  %v6033_v33 = vpack.c.bf16 %v12359_v8, %v12358_v4 }
 0x79c   :  { %v12266_v48 = vpop.f32.mrf.mxu0  ;;  %v5738_v32 = vpop.f32.mrf.mxu1 }
 0x79d   :  { %12420 = vmatprep.mubr.bf16.mxu1 %v5798_v6  ;;  %v6032_v27 = vpack.c.bf16 %v5738_v32, %v5735_v56  ;;  %12451 = vmatpush3.bf16.msra.mxu0 %v13839_v30  ;;  %v13842_v6 = vld [vmem:[#allocation18 + $0x20] sm:$0xff]  }
 0x79e   :  { %v5268_v2 = vpop.f32.mrf.mxu0  ;;  %12421 = vmatmul.mubr.bf16.vlgmr.msra.gmra.mxu1 %v5799_v9  ;;  %v12362_v42 = vpop.f32.mrf.mxu1 }
 0x79f   :  { %12469 = vmatpush3.bf16.msra.mxu1 %v15134_v5  ;;  %12452 = vmatprep.mubr.bf16.mxu0 %v6032_v27 }
 0x7a0   :  { %v12267_v13 = vpop.f32.mrf.mxu0  ;;  %12470 = vmatprep.subr.bf16.mxu1 %v13840_v51  ;;  %v5751_v24 = vpop.f32.mrf.mxu1  ;;  %12453 = vmatmul.mubr.bf16.vlgmr.msra.gmra.mxu0 %v6033_v33 }
 0x7a1   :  { %v5801_v57 = vpack.c.bf16 %v12267_v13, %v12266_v48 }
 0x7a2   :  { %v5271_v55 = vpop.f32.mrf.mxu0  ;;  %v12363_v38 = vpop.f32.mrf.mxu1 }
 0x7a3   :  { %v5800_v3 = vpack.c.bf16 %v5271_v55, %v5268_v2  ;;  %12471 = vmatpush3.bf16.msra.mxu1 %v13840_v51  ;;  %v6035_v29 = vpack.c.bf16 %v12363_v38, %v12362_v42  ;;  %v13843_v42 = vld [vmem:[#allocation18 + $0x18] sm:$0xff]  }
 0x7a4   :  { %v12270_v4 = vpop.f32.mrf.mxu0  ;;  %12472 = vmatprep.subr.bf16.mxu1 %v13841_v18  ;;  %v5754_v56 = vpop.f32.mrf.mxu1 }
 0x7a5   :  { %12424 = vmatprep.mubr.bf16.mxu1 %v5800_v3  ;;  %v6034_v43 = vpack.c.bf16 %v5754_v56, %v5751_v24 }
 0x7a6   :  { %v5284_v8 = vpop.f32.mrf.mxu0  ;;  %12425 = vmatmul.mubr.bf16.gmra.mxu1 %v5801_v57  ;;  %v12366_v5 = vpop.f32.mrf.mxu1  ;;  %v13844_v57 = vld [vmem:[#allocation18 + $0x10] sm:$0xff]  }
 0x7a7   :  { %12473 = vmatpush3.bf16.msra.mxu1 %v13841_v18  ;;  %12456 = vmatprep.mubr.bf16.mxu0 %v6034_v43 }
 0x7a8   :  { %v12271_v30 = vpop.f32.mrf.mxu0  ;;  %12474 = vmatprep.subr.bf16.mxu1 %v13842_v6  ;;  %v5767_v9 = vpop.f32.mrf.mxu1  ;;  %12457 = vmatmul.mubr.bf16.gmra.mxu0 %v6035_v29 }
 0x7a9   :  { %v5803_v27 = vpack.c.bf16 %v12271_v30, %v12270_v4 }
 0x7aa   :  { %v5287_v33 = vpop.f32.mrf.mxu0  ;;  %v12367_v32 = vpop.f32.mrf.mxu1 }
 0x7ab   :  { %v5802_v48 = vpack.c.bf16 %v5287_v33, %v5284_v8  ;;  %12475 = vmatpush3.bf16.msra.mxu1 %v13842_v6  ;;  %v6037_v13 = vpack.c.bf16 %v12367_v32, %v12366_v5  ;;  %v13845_v5 = vld [vmem:[#allocation18 + $0x8] sm:$0xff]  }
 0x7ac   :  { %v12274_v2 = vpop.f32.mrf.mxu0  ;;  %12476 = vmatprep.subr.bf16.mxu1 %v13843_v42  ;;  %v5770_v51 = vpop.f32.mrf.mxu1 }
 0x7ad   :  { %12428 = vmatprep.mubr.bf16.mxu1 %v5802_v48  ;;  %v6036_v24 = vpack.c.bf16 %v5770_v51, %v5767_v9  ;;  %v13846_v48 = vld [vmem:[#allocation18] sm:$0xff]  }
 0x7ae   :  { %v5300_v55 = vpop.f32.mrf.mxu0  ;;  %12429 = vmatmul.mubr.bf16.gmra.mxu1 %v5803_v27  ;;  %v12370_v38 = vpop.f32.mrf.mxu1 }
 0x7af   :  { %12477 = vmatpush3.bf16.msra.mxu1 %v13843_v42  ;;  %12460 = vmatprep.mubr.bf16.mxu0 %v6036_v24 }
 0x7b0   :  { %v12275_v3 = vpop.f32.mrf.mxu0  ;;  %12478 = vmatprep.subr.bf16.mxu1 %v13844_v57  ;;  %v5783_v18 = vpop.f32.mrf.mxu1  ;;  %12461 = vmatmul.mubr.bf16.gmra.mxu0 %v6037_v13 }
 0x7b1   :  { %v5805_v43 = vpack.c.bf16 %v12275_v3, %v12274_v2 }
 0x7b2   :  { %v5303_v29 = vpop.f32.mrf.mxu0  ;;  %v12371_v56 = vpop.f32.mrf.mxu1 }
 0x7b3   :  { %v5804_v4 = vpack.c.bf16 %v5303_v29, %v5300_v55  ;;  %12479 = vmatpush3.bf16.msra.mxu1 %v13844_v57  ;;  %v6039_v30 = vpack.c.bf16 %v12371_v56, %v12370_v38 }
 0x7b4   :  { %v12326_v8 = vpop.f32.mrf.mxu0  ;;  %12480 = vmatprep.subr.bf16.mxu1 %v13845_v5  ;;  %v5786_v6 = vpop.f32.mrf.mxu1 }
 0x7b5   :  { %12432 = vmatprep.mubr.bf16.mxu1 %v5804_v4  ;;  %v6038_v9 = vpack.c.bf16 %v5786_v6, %v5783_v18 }
 0x7b6   :  { %v5590_v33 = vpop.f32.mrf.mxu0  ;;  %12433 = vmatmul.mubr.bf16.gmra.mxu1 %v5805_v43 }
 0x7b7   :  { %12481 = vmatpush3.bf16.msra.mxu1 %v13845_v5  ;;  %12464 = vmatprep.mubr.bf16.mxu0 %v6038_v9 }
 0x7b8   :  { %v12327_v32 = vpop.f32.mrf.mxu0  ;;  %12482 = vmatprep.subr.bf16.mxu1 %v13846_v48  ;;  %12465 = vmatmul.mubr.bf16.gmra.mxu0 %v6039_v30 }
 0x7b9   :  { %12516 = vmatprep.mubr.bf16.mxu0 %v15115_v63  ;;  %v6025_v2 = vpack.c.bf16 %v12327_v32, %v12326_v8 }
 0x7ba   :  { %v5593_v27 = vpop.f32.mrf.mxu0 }
 0x7bb   :  { %v6024_v42 = vpack.c.bf16 %v5593_v27, %v5590_v33  ;;  %12483 = vmatpush3.bf16.msra.mxu1 %v13846_v48  ;;  %v13847_v33 = vld [vmem:[#allocation7 + $0x80] sm:$0xff]  }
 0x7bc   :  { %v12330_v13 = vpop.f32.mrf.mxu0 }
 0x7bd   :  { %12484 = vmatprep.mubr.bf16.mxu1 %v6024_v42 }
 0x7be   :  { %v5606_v51 = vpop.f32.mrf.mxu0  ;;  %12485 = vmatmul.mubr.bf16.vlgmr.msra.gmra.mxu1 %v6025_v2 }
 0x7c0   :  { %v12331_v24 = vpop.f32.mrf.mxu0 }
 0x7c1   :  { %v6027_v3 = vpack.c.bf16 %v12331_v24, %v12330_v13 }
 0x7c2   :  { %v5609_v55 = vpop.f32.mrf.mxu0 }
 0x7c3   :  { %v6026_v38 = vpack.c.bf16 %v5609_v55, %v5606_v51 }
 0x7c4   :  { %v12334_v57 = vpop.f32.mrf.mxu0 }
 0x7c5   :  { %12488 = vmatprep.mubr.bf16.mxu1 %v6026_v38 }
 0x7c6   :  { %v5622_v18 = vpop.f32.mrf.mxu0  ;;  %12489 = vmatmul.mubr.bf16.gmra.mxu1 %v6027_v3 }
 0x7c8   :  { %v12335_v29 = vpop.f32.mrf.mxu0 }
 0x7c9   :  { %v6029_v63 = vpack.c.bf16 %v12335_v29, %v12334_v57 }
 0x7ca   :  { %v5625_v56 = vpop.f32.mrf.mxu0 }
 0x7cb   :  { %v6028_v4 = vpack.c.bf16 %v5625_v56, %v5622_v18 }
 0x7cc   :  { %v12338_v43 = vpop.f32.mrf.mxu0 }
 0x7cd   :  { %12492 = vmatprep.mubr.bf16.mxu1 %v6028_v4 }
 0x7ce   :  { %v5638_v5 = vpop.f32.mrf.mxu0  ;;  %12493 = vmatmul.mubr.bf16.gmra.mxu1 %v6029_v63 }
 0x7d0   :  { %v12339_v8 = vpop.f32.mrf.mxu0 }
 0x7d1   :  { %v6031_v9 = vpack.c.bf16 %v12339_v8, %v12338_v43 }
 0x7d2   :  { %v5641_v30 = vpop.f32.mrf.mxu0 }
 0x7d3   :  { %v6030_v6 = vpack.c.bf16 %v5641_v30, %v5638_v5 }
 0x7d5   :  { %12496 = vmatprep.mubr.bf16.mxu1 %v6030_v6 }
 0x7d6   :  { %12497 = vmatmul.mubr.bf16.gmra.mxu1 %v6031_v9 }
 0x7d7   :  { %12548 = vmatprep.mubr.bf16.mxu1 %v13847_v33 }
 0x840   :  { %v15292_v32 = vpop.f32.mrf.mxu0 }
 0x842   :  { %v15294_v48 = vpop.f32.mrf.mxu0 }
 0x844   :  { %v15296_v27 = vpop.f32.mrf.mxu0 }
 0x846   :  { %v15298_v42 = vpop.f32.mrf.mxu0 }
 0x848   :  { %v15300_v2 = vpop.f32.mrf.mxu0 }
 0x84a   :  { %v15302_v13 = vpop.f32.mrf.mxu0 }
 0x84c   :  { %v12395_v51 = vpop.f32.mrf.mxu0 }
 0x84e   :  { %v15304_v24 = vpop.f32.mrf.mxu0 }
 0x850   :  { %v12398_v55 = vpop.f32.mrf.mxu0 }
 0x852   :  { %v5880_v38 = vpop.f32.mrf.mxu0 }
 0x854   :  { %v12399_v3 = vpop.f32.mrf.mxu0 }
 0x856   :  { %v5883_v57 = vpop.f32.mrf.mxu0 }
 0x858   :  { %v12402_v18 = vpop.f32.mrf.mxu0 }
 0x85a   :  { %v5896_v29 = vpop.f32.mrf.mxu0 }
 0x85c   :  { %v12403_v56 = vpop.f32.mrf.mxu0 }
 0x85e   :  { %v15306_v4 = vpop.f32.mrf.mxu1  ;;  %v5899_v63 = vpop.f32.mrf.mxu0 }
 0x860   :  { %v15308_v43 = vpop.f32.mrf.mxu1  ;;  %v15310_v5 = vpop.f32.mrf.mxu0 }
 0x862   :  { %v15312_v8 = vpop.f32.mrf.mxu1  ;;  %v15316_v6 = vpop.f32.mrf.mxu0 }
 0x864   :  { %v15314_v30 = vpop.f32.mrf.mxu1  ;;  %v15318_v22 = vpop.f32.mrf.mxu0 }
 0x866   :  { %v12426_v9 = vpop.f32.mrf.mxu1  ;;  %v15320_v17 = vpop.f32.mrf.mxu0 }
 0x868   :  { %v5961_v33 = vpop.f32.mrf.mxu1  ;;  %v15322_v15 = vpop.f32.mrf.mxu0 }
 0x86a   :  { %v12427_v62 = vpop.f32.mrf.mxu1  ;;  %v15324_v37 = vpop.f32.mrf.mxu0 }
 0x86c   :  { %v5964_v25 = vpop.f32.mrf.mxu1  ;;  %v15326_v28 = vpop.f32.mrf.mxu0 }
 0x86e   :  { %v12430_v60 = vpop.f32.mrf.mxu1  ;;  %v15328_v59 = vpop.f32.mrf.mxu0 }
 0x86f   :  { %v5986_v16 = vadd.f32 %v12430_v60, %v12398_v55 }
 0x870   :  { %v5977_v19 = vpop.f32.mrf.mxu1 }
 0x871   :  { %v5978_v60 = vadd.f32 %v5977_v19, %v5880_v38  ;;  %v5962_v38 = vadd.f32 %v5961_v33, %v15302_v13 }
 0x872   :  { %v12431_v26 = vpop.f32.mrf.mxu1 }
 0x873   :  { %v5989_v52 = vadd.f32 %v12431_v26, %v12399_v3 }
 0x874   :  { %v5980_v53 = vpop.f32.mrf.mxu1 }
 0x876   :  { %v12434_v0 = vpop.f32.mrf.mxu1 }
 0x877   :  { %v6002_v20 = vadd.f32 %v12434_v0, %v12402_v18  ;;  %v15336_v0 = vpop.f32.mrf.mxu0 }
 0x878   :  { %v5993_v31 = vpop.f32.mrf.mxu1 }
 0x879   :  { %v5994_v21 = vadd.f32 %v5993_v31, %v5896_v29  ;;  %v6022_v50 = vmax.f32 %v6002_v20, 0.0  ;;  %v6019_v31 = vmax.f32 %v5989_v52, 0.0  ;;  %v6018_v20 = vmax.f32 %v5986_v16, 0.0 }
 0x87a   :  { %v12435_v7 = vpop.f32.mrf.mxu1  ;;  %v6016_v52 = vmax.f32 %v5978_v60, 0.0 }
 0x87b   :  { %v6005_v11 = vadd.f32 %v12435_v7, %v12403_v56  ;;  %v6020_v34 = vmax.f32 %v5994_v21, 0.0  ;;  %v5981_v7 = vadd.f32 %v5980_v53, %v5883_v57  ;;  %v15349_v21 = vpack.c.bf16 %v6019_v31, %v6018_v20 }
 0x87c   :  { %v5996_v39 = vpop.f32.mrf.mxu1  ;;  %v5957_v57 = vadd.f32 %v15312_v8, %v15296_v27  ;;  %v5954_v56 = vadd.f32 %v15306_v4, %v15292_v32  ;;  %v5949_v31 = vadd.f32 %v15314_v30, %v15298_v42  ;;  %v5946_v20 = vadd.f32 %v15308_v43, %v15294_v48 }
 0x87d   :  { %v6023_v46 = vmax.f32 %v6005_v11, 0.0  ;;  %v5997_v36 = vadd.f32 %v5996_v39, %v5899_v63  ;;  %v6017_v53 = vmax.f32 %v5981_v7, 0.0  ;;  %v5965_v11 = vadd.f32 %v5964_v25, %v15304_v24 }
 0x87e   :  { %v15330_v40 = vpop.f32.mrf.mxu1  ;;  %v6012_v63 = vmax.f32 %v5962_v38, 0.0  ;;  %v6011_v33 = vmax.f32 %v5957_v57, 0.0  ;;  %v6010_v8 = vmax.f32 %v5954_v56, 0.0  ;;  %v6008_v42 = vmax.f32 %v5946_v20, 0.0 }
 0x87f   :  { %v15332_v58 = vpack.c.bf16 %v6023_v46, %v6022_v50  ;;  %v6021_v49 = vmax.f32 %v5997_v36, 0.0  ;;  %v15345_v46 = vpop.f32.mrf.mxu0  ;;  %v5973_v50 = vadd.f32 %v12427_v62, %v12395_v51  ;;  %v15359_v55 = vpack.c.bf16 %v6017_v53, %v6016_v52 }
 0x880   :  { %v15334_v47 = vpop.f32.mrf.mxu1  ;;  %v6013_v25 = vmax.f32 %v5965_v11, 0.0  ;;  %v15384_v60 = vpack.c.bf16 %v6011_v33, %v6010_v8 }
 0x881   :  { %v15338_v18 = vpack.c.bf16 %v6021_v49, %v6020_v34  ;;  %12500 = vmatprep.subr.bf16.mxu0 %v15332_v58  ;;  %v5970_v34 = vadd.f32 %v12426_v9, %v15300_v2  ;;  %v12463_v19 = vpop.f32.mrf.mxu0  ;;  %v6015_v39 = vmax.f32 %v5973_v50, 0.0  ;;  %v6009_v50 = vmax.f32 %v5949_v31, 0.0 }
 0x882   :  { %v15341_v26 = vpop.f32.mrf.mxu1  ;;  %12501 = vmatpush3.bf16.msra.mxu0 %v15332_v58  ;;  %v15378_v7 = vpack.c.bf16 %v6013_v25, %v6012_v63 }
 0x883   :  { %12502 = vmatprep.subr.bf16.mxu0 %v15338_v18  ;;  %v6014_v51 = vmax.f32 %v5970_v34, 0.0  ;;  %v6109_v2 = vpop.f32.mrf.mxu0  ;;  %v15388_v52 = vpack.c.bf16 %v6009_v50, %v6008_v42 }
 0x884   :  { %v15347_v36 = vpop.f32.mrf.mxu1 }
 0x885   :  { %v15370_v29 = vpack.c.bf16 %v6015_v39, %v6014_v51  ;;  %v12466_v13 = vpop.f32.mrf.mxu0 }
 0x886   :  { %v15351_v49 = vpop.f32.mrf.mxu1  ;;  %12503 = vmatpush3.bf16.msra.mxu0 %v15338_v18 }
 0x887   :  { %12504 = vmatprep.subr.bf16.mxu0 %v15349_v21  ;;  %v6122_v32 = vpop.f32.mrf.mxu0 }
 0x888   :  { %v15356_v16 = vpop.f32.mrf.mxu1 }
 0x889   :  { %v12467_v30 = vpop.f32.mrf.mxu0 }
 0x88a   :  { %v15361_v62 = vpop.f32.mrf.mxu1  ;;  %12505 = vmatpush3.bf16.msra.mxu0 %v15349_v21 }
 0x88b   :  { %12506 = vmatprep.subr.bf16.mxu0 %v15359_v55  ;;  %v6125_v51 = vpop.f32.mrf.mxu0 }
 0x88c   :  { %v15366_v3 = vpop.f32.mrf.mxu1 }
 0x88e   :  { %v12494_v24 = vpop.f32.mrf.mxu1  ;;  %12507 = vmatpush3.bf16.msra.mxu0 %v15359_v55 }
 0x88f   :  { %12508 = vmatprep.subr.bf16.mxu0 %v15370_v29  ;;  %v6212_v33 = vadd.f32 %v12494_v24, %v15336_v0  ;;  %v6199_v0 = vadd.f32 %v15361_v62, %v15326_v28  ;;  %v6188_v28 = vadd.f32 %v15356_v16, %v15324_v37  ;;  %v6175_v37 = vadd.f32 %v15347_v36, %v15320_v17  ;;  %v13854_v36 = vld [vmem:[#allocation4 + $0xb8] sm:$0xff]  }
 0x890   :  { %v6203_v9 = vpop.f32.mrf.mxu1 }
 0x891   :  { %v6244_v42 = vmax.f32 %v6212_v33, 0.0  ;;  %v13860_v33 = vld [vmem:[#allocation10 + $0x90] sm:$0xff]  }
 0x892   :  { %v12495_v27 = vpop.f32.mrf.mxu1  ;;  %12509 = vmatpush3.bf16.msra.mxu0 %v15370_v29 }
 0x893   :  { %12510 = vmatprep.subr.bf16.mxu0 %v15378_v7  ;;  %v6215_v57 = vadd.f32 %v12495_v27, %v12463_v19  ;;  %v6204_v19 = vadd.f32 %v6203_v9, %v15345_v46  ;;  %v13849_v27 = vld [vmem:[#allocation4 + $0x90] sm:$0xff]   ;;  %v6191_v46 = vadd.f32 %v15366_v3, %v15328_v59  ;;  %v6180_v59 = vadd.f32 %v15330_v40, %v15310_v5 }
 0x894   :  { %v6206_v4 = vpop.f32.mrf.mxu1  ;;  %v6238_v3 = vmax.f32 %v6188_v28, 0.0  ;;  %v13853_v40 = vld [vmem:[#allocation4 + $0xb0] sm:$0xff]   ;;  %v13889_v28 = vld [vmem:[#allocation9 + $0xa8] sm:$0xff]  }
 0x895   :  { %v6245_v20 = vmax.f32 %v6215_v57, 0.0  ;;  %v6207_v50 = vadd.f32 %v6206_v4, %v6109_v2  ;;  %v6196_v2 = vadd.f32 %v15351_v49, %v15322_v15  ;;  %v6242_v4 = vmax.f32 %v6204_v19, 0.0  ;;  %v13851_v15 = vld [vmem:[#allocation4 + $0xa0] sm:$0xff]   ;;  %v13872_v19 = vld [vmem:[#allocation10 + $0xb0] sm:$0xff]  }
 0x896   :  { %v12498_v53 = vpop.f32.mrf.mxu1  ;;  %12511 = vmatpush3.bf16.msra.mxu0 %v15378_v7  ;;  %v6183_v49 = vadd.f32 %v15341_v26, %v15318_v22  ;;  %v6172_v22 = vadd.f32 %v15334_v47, %v15316_v6  ;;  %v6235_v26 = vmax.f32 %v6175_v37, 0.0  ;;  %v13855_v47 = vld [vmem:[#allocation10 + $0x80] sm:$0xff]   ;;  %v13856_v6 = vld [vmem:[#allocation22 + $0x38] sm:$0xff]  }
 0x897   :  { %12512 = vmatprep.subr.bf16.mxu0 %v15384_v60  ;;  %v6228_v39 = vadd.f32 %v12498_v53, %v12466_v13  ;;  %v6263_v24 = vpack.c.bf16 %v6245_v20, %v6244_v42  ;;  %v13865_v20 = vld [vmem:[#allocation10 + $0x98] sm:$0xff]   ;;  %v13871_v42 = vld [vmem:[#allocation10 + $0xa8] sm:$0xff]  }
 0x898   :  { %v6219_v34 = vpop.f32.mrf.mxu1  ;;  %v6234_v57 = vmax.f32 %v6172_v22, 0.0 }
 0x899   :  { %v6220_v48 = vadd.f32 %v6219_v34, %v6122_v32  ;;  %v6248_v25 = vmax.f32 %v6228_v39, 0.0  ;;  %v13848_v32 = vld [vmem:[#allocation4 + $0x88] sm:$0xff]   ;;  %v6241_v34 = vmax.f32 %v6199_v0, 0.0  ;;  %v13850_v39 = vld [vmem:[#allocation4 + $0x98] sm:$0xff]  }
 0x89a   :  { %v12499_v11 = vpop.f32.mrf.mxu1  ;;  %12513 = vmatpush3.bf16.msra.mxu0 %v15384_v60  ;;  %v6258_v17 = vpack.c.bf16 %v6235_v26, %v6234_v57  ;;  %v13875_v0 = vld [vmem:[#allocation22 + $0x8] sm:$0xff]   ;;  %v13896_v57 = vld [vmem:[#allocation24 + $0x30] sm:$0xff]  }
 0x89b   :  { %v6231_v43 = vadd.f32 %v12499_v11, %v12467_v30  ;;  %12514 = vmatprep.subr.bf16.mxu0 %v15388_v52  ;;  %v6246_v31 = vmax.f32 %v6220_v48, 0.0  ;;  %v6243_v30 = vmax.f32 %v6207_v50, 0.0  ;;  %v6240_v11 = vmax.f32 %v6196_v2, 0.0  ;;  %v13866_v50 = vld [vmem:[#allocation10 + $0xa0] sm:$0xff]   ;;  %v13880_v2 = vld [vmem:[#allocation9 + $0x88] sm:$0xff]  }
 0x89c   :  { %v6222_v38 = vpop.f32.mrf.mxu1  ;;  %v6239_v48 = vmax.f32 %v6191_v46, 0.0  ;;  %v13884_v46 = vld [vmem:[#allocation21 + $0x28] sm:$0xff]  }
 0x89d   :  { %v6249_v56 = vmax.f32 %v6231_v43, 0.0  ;;  %v6223_v63 = vadd.f32 %v6222_v38, %v6125_v51  ;;  %v6262_v9 = vpack.c.bf16 %v6243_v30, %v6242_v4  ;;  %v6261_v62 = vpack.c.bf16 %v6241_v34, %v6240_v11  ;;  %v13852_v51 = vld [vmem:[#allocation4 + $0xa8] sm:$0xff]   ;;  %v13878_v30 = vld [vmem:[#allocation22] sm:$0xff]   ;;  %v15427_v4 = vld [vmem:[#allocation25 + $0x38] sm:$0xff]  }
 0x89e   :  { %12515 = vmatpush3.bf16.msra.mxu0 %v15388_v52  ;;  %v6237_v43 = vmax.f32 %v6183_v49, 0.0  ;;  %v6260_v16 = vpack.c.bf16 %v6239_v48, %v6238_v3  ;;  %v6236_v38 = vmax.f32 %v6180_v59, 0.0  ;;  %v13883_v34 = vld [vmem:[#allocation21 + $0x30] sm:$0xff]   ;;  %v13888_v11 = vld [vmem:[#allocation21 + $0x18] sm:$0xff]   ;;  %v13894_v59 = vld [vmem:[#allocation21] sm:$0xff]  }
 0x89f   :  { %v6265_v8 = vpack.c.bf16 %v6249_v56, %v6248_v25  ;;  %v6247_v13 = vmax.f32 %v6223_v63, 0.0  ;;  %v13857_v25 = vld [vmem:[#allocation7 + $0x88] sm:$0xff]   ;;  %v13858_v56 = vld [vmem:[#allocation7 + $0x90] sm:$0xff]   ;;  %v13893_v48 = vld [vmem:[#allocation9 + $0xb8] sm:$0xff]  }
 0x8a0   :  { %v6259_v5 = vpack.c.bf16 %v6237_v43, %v6236_v38  ;;  %v13859_v63 = vld [vmem:[#allocation10 + $0x88] sm:$0xff]   ;;  %v13891_v49 = vld [vmem:[#allocation21 + $0x10] sm:$0xff]   ;;  %v13895_v3 = vld [vmem:[#allocation24 + $0x38] sm:$0xff]  }
 0x8a1   :  { %v6264_v53 = vpack.c.bf16 %v6247_v13, %v6246_v31  ;;  %12532 = vmatprep.subr.bf16.mxu1 %v6265_v8  ;;  %12564 = vmatprep.subr.bf16.mxu0 %v6265_v8  ;;  %v13861_v31 = vld [vmem:[#allocation22 + $0x30] sm:$0xff]   ;;  %v13863_v13 = vld [vmem:[#allocation22 + $0x28] sm:$0xff]  }
 0x8a2   :  { %12517 = vmatmul.mubr.bf16.vlgmr.msra.gmra.mxu0 %v13848_v32  ;;  %12533 = vmatpush3.bf16.msra.mxu1 %v6265_v8  ;;  %v13869_v32 = vld [vmem:[#allocation22 + $0x18] sm:$0xff]  }
 0x8a3   :  { %12565 = vmatpush3.bf16.msra.mxu0 %v6265_v8  ;;  %12534 = vmatprep.subr.bf16.mxu1 %v6264_v53  ;;  %v13862_v8 = vld [vmem:[#allocation7 + $0x98] sm:$0xff]  }
 0x8a4   :  { %12566 = vmatprep.subr.bf16.mxu0 %v6264_v53  ;;  %12520 = vmatprep.mubr.bf16.mxu0 %v13849_v27  ;;  %v13873_v27 = vld [vmem:[#allocation22 + $0x10] sm:$0xff]  }
 0x8a6   :  { %12535 = vmatpush3.bf16.msra.mxu1 %v6264_v53 }
 0x8a7   :  { %12567 = vmatpush3.bf16.msra.mxu0 %v6264_v53  ;;  %12536 = vmatprep.subr.bf16.mxu1 %v6263_v24  ;;  %v13867_v53 = vld [vmem:[#allocation22 + $0x20] sm:$0xff]  }
 0x8a8   :  { %12568 = vmatprep.subr.bf16.mxu0 %v6263_v24 }
 0x8aa   :  { %12537 = vmatpush3.bf16.msra.mxu1 %v6263_v24  ;;  %12521 = vmatmul.mubr.bf16.gmra.mxu0 %v13850_v39  ;;  %v13887_v39 = vld [vmem:[#allocation21 + $0x20] sm:$0xff]  }
 0x8ab   :  { %12569 = vmatpush3.bf16.msra.mxu0 %v6263_v24  ;;  %12538 = vmatprep.subr.bf16.mxu1 %v6262_v9  ;;  %v13877_v24 = vld [vmem:[#allocation10 + $0xb8] sm:$0xff]  }
 0x8ac   :  { %12570 = vmatprep.subr.bf16.mxu0 %v6262_v9  ;;  %12524 = vmatprep.mubr.bf16.mxu0 %v13851_v15  ;;  %v13890_v15 = vld [vmem:[#allocation9 + $0xb0] sm:$0xff]  }
 0x8ae   :  { %12539 = vmatpush3.bf16.msra.mxu1 %v6262_v9 }
 0x8af   :  { %12571 = vmatpush3.bf16.msra.mxu0 %v6262_v9  ;;  %12540 = vmatprep.subr.bf16.mxu1 %v6261_v62  ;;  %v13885_v9 = vld [vmem:[#allocation9 + $0x98] sm:$0xff]  }
 0x8b0   :  { %12572 = vmatprep.subr.bf16.mxu0 %v6261_v62 }
 0x8b2   :  { %12541 = vmatpush3.bf16.msra.mxu1 %v6261_v62  ;;  %12525 = vmatmul.mubr.bf16.gmra.mxu0 %v13852_v51 }
 0x8b3   :  { %12573 = vmatpush3.bf16.msra.mxu0 %v6261_v62  ;;  %12542 = vmatprep.subr.bf16.mxu1 %v6260_v16  ;;  %v13892_v62 = vld [vmem:[#allocation21 + $0x8] sm:$0xff]  }
 0x8b4   :  { %12574 = vmatprep.subr.bf16.mxu0 %v6260_v16  ;;  %12528 = vmatprep.mubr.bf16.mxu0 %v13853_v40 }
 0x8b6   :  { %12543 = vmatpush3.bf16.msra.mxu1 %v6260_v16 }
 0x8b7   :  { %12575 = vmatpush3.bf16.msra.mxu0 %v6260_v16  ;;  %12544 = vmatprep.subr.bf16.mxu1 %v6259_v5 }
 0x8b8   :  { %12576 = vmatprep.subr.bf16.mxu0 %v6259_v5 }
 0x8ba   :  { %12545 = vmatpush3.bf16.msra.mxu1 %v6259_v5  ;;  %12529 = vmatmul.mubr.bf16.gmra.mxu0 %v13854_v36 }
 0x8bb   :  { %12577 = vmatpush3.bf16.msra.mxu0 %v6259_v5  ;;  %12546 = vmatprep.subr.bf16.mxu1 %v6258_v17 }
 0x8bc   :  { %12578 = vmatprep.subr.bf16.mxu0 %v6258_v17  ;;  %12580 = vmatprep.mubr.bf16.mxu0 %v13855_v47 }
 0x8be   :  { %12547 = vmatpush3.bf16.msra.mxu1 %v6258_v17 }
 0x8bf   :  { %12579 = vmatpush3.bf16.msra.mxu0 %v6258_v17  ;;  %12596 = vmatprep.subr.bf16.mxu1 %v15332_v58 }
 0x8c0   :  { %12628 = vmatprep.subr.bf16.mxu0 %v13856_v6 }
 0x8c1   :  { %12549 = vmatmul.mubr.bf16.vlgmr.msra.gmra.mxu1 %v13857_v25  ;;  %v13897_v25 = vld [vmem:[#allocation24 + $0x28] sm:$0xff]  }
 0x8c2   :  { %12597 = vmatpush3.bf16.msra.mxu1 %v15332_v58  ;;  %12552 = vmatprep.mubr.bf16.mxu1 %v13858_v56  ;;  %v13864_v58 = vld [vmem:[#allocation7 + $0xa0] sm:$0xff]  }
 0x8c3   :  { %12598 = vmatprep.subr.bf16.mxu1 %v15338_v18  ;;  %12581 = vmatmul.mubr.bf16.vlgmr.msra.gmra.mxu0 %v13859_v63 }
 0x8c4   :  { %12584 = vmatprep.mubr.bf16.mxu0 %v13860_v33  ;;  %12629 = vmatpush3.bf16.msra.mxu0 %v13856_v6  ;;  %v13898_v33 = vld [vmem:[#allocation24 + $0x20] sm:$0xff]  }
 0x8c5   :  { %12630 = vmatprep.subr.bf16.mxu0 %v13861_v31 }
 0x8c6   :  { %12599 = vmatpush3.bf16.msra.mxu1 %v15338_v18  ;;  %v13868_v18 = vld [vmem:[#allocation7 + $0xa8] sm:$0xff]  }
 0x8c7   :  { %12600 = vmatprep.subr.bf16.mxu1 %v15349_v21 }
 0x8c8   :  { %12631 = vmatpush3.bf16.msra.mxu0 %v13861_v31 }
 0x8c9   :  { %12553 = vmatmul.mubr.bf16.gmra.mxu1 %v13862_v8  ;;  %12632 = vmatprep.subr.bf16.mxu0 %v13863_v13 }
 0x8ca   :  { %12601 = vmatpush3.bf16.msra.mxu1 %v15349_v21  ;;  %12556 = vmatprep.mubr.bf16.mxu1 %v13864_v58  ;;  %v13870_v21 = vld [vmem:[#allocation7 + $0xb0] sm:$0xff]  }
 0x8cb   :  { %12602 = vmatprep.subr.bf16.mxu1 %v15359_v55  ;;  %12585 = vmatmul.mubr.bf16.gmra.mxu0 %v13865_v20  ;;  %v13899_v20 = vld [vmem:[#allocation24 + $0x18] sm:$0xff]  }
 0x8cc   :  { %12588 = vmatprep.mubr.bf16.mxu0 %v13866_v50  ;;  %12633 = vmatpush3.bf16.msra.mxu0 %v13863_v13 }
 0x8cd   :  { %12634 = vmatprep.subr.bf16.mxu0 %v13867_v53 }
 0x8ce   :  { %12603 = vmatpush3.bf16.msra.mxu1 %v15359_v55  ;;  %v13874_v55 = vld [vmem:[#allocation7 + $0xb8] sm:$0xff]  }
 0x8cf   :  { %12604 = vmatprep.subr.bf16.mxu1 %v15370_v29 }
 0x8d0   :  { %12635 = vmatpush3.bf16.msra.mxu0 %v13867_v53 }
 0x8d1   :  { %12557 = vmatmul.mubr.bf16.gmra.mxu1 %v13868_v18  ;;  %12636 = vmatprep.subr.bf16.mxu0 %v13869_v32  ;;  %v13900_v18 = vld [vmem:[#allocation24 + $0x10] sm:$0xff]  }
 0x8d2   :  { %12605 = vmatpush3.bf16.msra.mxu1 %v15370_v29  ;;  %12560 = vmatprep.mubr.bf16.mxu1 %v13870_v21  ;;  %v13876_v29 = vld [vmem:[#allocation9 + $0x80] sm:$0xff]  }
 0x8d3   :  { %12606 = vmatprep.subr.bf16.mxu1 %v15378_v7  ;;  %12589 = vmatmul.mubr.bf16.gmra.mxu0 %v13871_v42 }
 0x8d4   :  { %12592 = vmatprep.mubr.bf16.mxu0 %v13872_v19  ;;  %12637 = vmatpush3.bf16.msra.mxu0 %v13869_v32 }
 0x8d5   :  { %12638 = vmatprep.subr.bf16.mxu0 %v13873_v27 }
 0x8d6   :  { %12607 = vmatpush3.bf16.msra.mxu1 %v15378_v7  ;;  %v13879_v7 = vld [vmem:[#allocation21 + $0x38] sm:$0xff]  }
 0x8d7   :  { %12608 = vmatprep.subr.bf16.mxu1 %v15384_v60 }
 0x8d8   :  { %12639 = vmatpush3.bf16.msra.mxu0 %v13873_v27  ;;  %v13901_v27 = vld [vmem:[#allocation24 + $0x8] sm:$0xff]  }
 0x8d9   :  { %12561 = vmatmul.mubr.bf16.gmra.mxu1 %v13874_v55  ;;  %12640 = vmatprep.subr.bf16.mxu0 %v13875_v0 }
 0x8da   :  { %12609 = vmatpush3.bf16.msra.mxu1 %v15384_v60  ;;  %12612 = vmatprep.mubr.bf16.mxu1 %v13876_v29  ;;  %v13882_v60 = vld [vmem:[#allocation9 + $0x90] sm:$0xff]  }
 0x8db   :  { %12610 = vmatprep.subr.bf16.mxu1 %v15388_v52  ;;  %12593 = vmatmul.mubr.bf16.gmra.mxu0 %v13877_v24 }
 0x8dc   :  { %12641 = vmatpush3.bf16.msra.mxu0 %v13875_v0 }
 0x8dd   :  { %12642 = vmatprep.subr.bf16.mxu0 %v13878_v30 }
 0x8de   :  { %12611 = vmatpush3.bf16.msra.mxu1 %v15388_v52  ;;  %v13886_v52 = vld [vmem:[#allocation9 + $0xa0] sm:$0xff]  }
 0x8df   :  { %12660 = vmatprep.subr.bf16.mxu1 %v13879_v7 }
 0x8e0   :  { %12643 = vmatpush3.bf16.msra.mxu0 %v13878_v30  ;;  %v13902_v30 = vld [vmem:[#allocation24] sm:$0xff]  }
 0x8e1   :  { %12613 = vmatmul.mubr.bf16.vlgmr.msra.gmra.mxu1 %v13880_v2  ;;  %12692 = vmatprep.subr.bf16.mxu0 %v15427_v4 }
 0x8e2   :  { %12616 = vmatprep.mubr.bf16.mxu1 %v13882_v60  ;;  %12661 = vmatpush3.bf16.msra.mxu1 %v13879_v7  ;;  %v15430_v7 = vld [vmem:[#allocation13 + $0xf8] sm:$0xff]  }
 0x8e3   :  { %12662 = vmatprep.subr.bf16.mxu1 %v13883_v34 }
 0x8e6   :  { %12663 = vmatpush3.bf16.msra.mxu1 %v13883_v34 }
 0x8e7   :  { %12664 = vmatprep.subr.bf16.mxu1 %v13884_v46 }
 0x8e9   :  { %12617 = vmatmul.mubr.bf16.gmra.mxu1 %v13885_v9 }
 0x8ea   :  { %12620 = vmatprep.mubr.bf16.mxu1 %v13886_v52  ;;  %12665 = vmatpush3.bf16.msra.mxu1 %v13884_v46 }
 0x8eb   :  { %12666 = vmatprep.subr.bf16.mxu1 %v13887_v39 }
 0x8ee   :  { %12667 = vmatpush3.bf16.msra.mxu1 %v13887_v39 }
 0x8ef   :  { %12668 = vmatprep.subr.bf16.mxu1 %v13888_v11 }
 0x8f1   :  { %12621 = vmatmul.mubr.bf16.gmra.mxu1 %v13889_v28 }
 0x8f2   :  { %12624 = vmatprep.mubr.bf16.mxu1 %v13890_v15  ;;  %12669 = vmatpush3.bf16.msra.mxu1 %v13888_v11 }
 0x8f3   :  { %12670 = vmatprep.subr.bf16.mxu1 %v13891_v49 }
 0x8f6   :  { %12671 = vmatpush3.bf16.msra.mxu1 %v13891_v49  ;;  %v15433_v49 = vld [vmem:[#allocation13 + $0xf0] sm:$0xff]  }
 0x8f7   :  { %12672 = vmatprep.subr.bf16.mxu1 %v13892_v62 }
 0x8f9   :  { %12625 = vmatmul.mubr.bf16.gmra.mxu1 %v13893_v48  ;;  %v13903_v48 = vld [vmem:[#allocation25 + $0x30] sm:$0xff]  }
 0x8fa   :  { %12673 = vmatpush3.bf16.msra.mxu1 %v13892_v62 }
 0x8fb   :  { %12674 = vmatprep.subr.bf16.mxu1 %v13894_v59 }
 0x8fe   :  { %12675 = vmatpush3.bf16.msra.mxu1 %v13894_v59 }
 0x8ff   :  { %12724 = vmatprep.subr.bf16.mxu1 %v13895_v3 }
 0x962   :  { %v12518_v43 = vpop.f32.mrf.mxu0 }
 0x964   :  { %v6300_v37 = vpop.f32.mrf.mxu0 }
 0x966   :  { %v12519_v16 = vpop.f32.mrf.mxu0 }
 0x967   :  { %v6655_v51 = vpack.c.bf16 %v12519_v16, %v12518_v43 }
 0x968   :  { %v6303_v38 = vpop.f32.mrf.mxu0 }
 0x969   :  { %v6654_v22 = vpack.c.bf16 %v6303_v38, %v6300_v37  ;;  %v15438_v37 = vld [vmem:[#allocation13 + $0xe8] sm:$0xff]  }
 0x96a   :  { %v12522_v40 = vpop.f32.mrf.mxu0 }
 0x96b   :  { %12676 = vmatprep.mubr.bf16.mxu1 %v6654_v22  ;;  %v13904_v22 = vld [vmem:[#allocation25 + $0x28] sm:$0xff]  }
 0x96c   :  { %v6316_v5 = vpop.f32.mrf.mxu0  ;;  %12677 = vmatmul.mubr.bf16.vlgmr.msra.gmra.mxu1 %v6655_v51 }
 0x96d   :  { %12725 = vmatpush3.bf16.msra.mxu1 %v13895_v3 }
 0x96e   :  { %v12523_v26 = vpop.f32.mrf.mxu0  ;;  %12726 = vmatprep.subr.bf16.mxu1 %v13896_v57 }
 0x96f   :  { %v6657_v17 = vpack.c.bf16 %v12523_v26, %v12522_v40 }
 0x970   :  { %v6319_v36 = vpop.f32.mrf.mxu0 }
 0x971   :  { %v6656_v47 = vpack.c.bf16 %v6319_v36, %v6316_v5  ;;  %12727 = vmatpush3.bf16.msra.mxu1 %v13896_v57 }
 0x972   :  { %v12526_v6 = vpop.f32.mrf.mxu0  ;;  %12728 = vmatprep.subr.bf16.mxu1 %v13897_v25 }
 0x973   :  { %12680 = vmatprep.mubr.bf16.mxu1 %v6656_v47  ;;  %v13905_v47 = vld [vmem:[#allocation25 + $0x20] sm:$0xff]  }
 0x974   :  { %v6332_v56 = vpop.f32.mrf.mxu0  ;;  %12681 = vmatmul.mubr.bf16.gmra.mxu1 %v6657_v17  ;;  %v15442_v17 = vld [vmem:[#allocation13 + $0xe0] sm:$0xff]  }
 0x975   :  { %12729 = vmatpush3.bf16.msra.mxu1 %v13897_v25 }
 0x976   :  { %v12527_v63 = vpop.f32.mrf.mxu0  ;;  %12730 = vmatprep.subr.bf16.mxu1 %v13898_v33 }
 0x977   :  { %v6659_v31 = vpack.c.bf16 %v12527_v63, %v12526_v6  ;;  %v15446_v63 = vld [vmem:[#allocation13 + $0xd8] sm:$0xff]  }
 0x978   :  { %v6335_v8 = vpop.f32.mrf.mxu0 }
 0x979   :  { %v6658_v13 = vpack.c.bf16 %v6335_v8, %v6332_v56  ;;  %12731 = vmatpush3.bf16.msra.mxu1 %v13898_v33 }
 0x97a   :  { %v12530_v58 = vpop.f32.mrf.mxu0  ;;  %12732 = vmatprep.subr.bf16.mxu1 %v13899_v20 }
 0x97b   :  { %12684 = vmatprep.mubr.bf16.mxu1 %v6658_v13  ;;  %v13906_v13 = vld [vmem:[#allocation25 + $0x18] sm:$0xff]  }
 0x97c   :  { %v6348_v50 = vpop.f32.mrf.mxu0  ;;  %12685 = vmatmul.mubr.bf16.gmra.mxu1 %v6659_v31 }
 0x97d   :  { %12733 = vmatpush3.bf16.msra.mxu1 %v13899_v20 }
 0x97e   :  { %v12531_v53 = vpop.f32.mrf.mxu0  ;;  %12734 = vmatprep.subr.bf16.mxu1 %v13900_v18 }
 0x97f   :  { %v6661_v32 = vpack.c.bf16 %v12531_v53, %v12530_v58 }
 0x980   :  { %v6351_v21 = vpop.f32.mrf.mxu0 }
 0x981   :  { %v12550_v42 = vpop.f32.mrf.mxu1  ;;  %v6660_v19 = vpack.c.bf16 %v6351_v21, %v6348_v50  ;;  %12735 = vmatpush3.bf16.msra.mxu1 %v13900_v18 }
 0x982   :  { %12736 = vmatprep.subr.bf16.mxu1 %v13901_v27 }
 0x983   :  { %v6397_v55 = vpop.f32.mrf.mxu1  ;;  %v12582_v0 = vpop.f32.mrf.mxu0  ;;  %12688 = vmatprep.mubr.bf16.mxu1 %v6660_v19 }
 0x984   :  { %12689 = vmatmul.mubr.bf16.gmra.mxu1 %v6661_v32  ;;  %v15450_v32 = vld [vmem:[#allocation13 + $0xd0] sm:$0xff]  }
 0x985   :  { %v12551_v29 = vpop.f32.mrf.mxu1  ;;  %v6494_v24 = vpop.f32.mrf.mxu0  ;;  %12737 = vmatpush3.bf16.msra.mxu1 %v13901_v27 }
 0x986   :  { %12738 = vmatprep.subr.bf16.mxu1 %v13902_v30  ;;  %v6663_v46 = vpack.c.bf16 %v12551_v29, %v12550_v42  ;;  %v13907_v42 = vld [vmem:[#allocation25 + $0x10] sm:$0xff]  }
 0x987   :  { %v6400_v2 = vpop.f32.mrf.mxu1  ;;  %v12583_v60 = vpop.f32.mrf.mxu0 }
 0x988   :  { %v6662_v34 = vpack.c.bf16 %v6400_v2, %v6397_v55  ;;  %v6881_v52 = vpack.c.bf16 %v12583_v60, %v12582_v0  ;;  %v15454_v0 = vld [vmem:[#allocation13 + $0xc8] sm:$0xff]  }
 0x989   :  { %v12554_v9 = vpop.f32.mrf.mxu1  ;;  %v6497_v39 = vpop.f32.mrf.mxu0  ;;  %12739 = vmatpush3.bf16.msra.mxu1 %v13902_v30  ;;  %v13908_v2 = vld [vmem:[#allocation25 + $0x8] sm:$0xff]  }
 0x98a   :  { %12644 = vmatprep.mubr.bf16.mxu0 %v6662_v34  ;;  %v6880_v11 = vpack.c.bf16 %v6497_v39, %v6494_v24  ;;  %12788 = vmatprep.subr.bf16.mxu1 %v15430_v7  ;;  %v15460_v39 = vld [vmem:[#allocation13 + $0xc0] sm:$0xff]  }
 0x98b   :  { %v6413_v28 = vpop.f32.mrf.mxu1  ;;  %12645 = vmatmul.mubr.bf16.vlgmr.msra.gmra.mxu0 %v6663_v46  ;;  %v12586_v15 = vpop.f32.mrf.mxu0 }
 0x98c   :  { %12693 = vmatpush3.bf16.msra.mxu0 %v15427_v4  ;;  %12740 = vmatprep.mubr.bf16.mxu1 %v6880_v11 }
 0x98d   :  { %v12555_v62 = vpop.f32.mrf.mxu1  ;;  %12694 = vmatprep.subr.bf16.mxu0 %v13903_v48  ;;  %v6510_v59 = vpop.f32.mrf.mxu0  ;;  %12741 = vmatmul.mubr.bf16.vlgmr.msra.gmra.mxu1 %v6881_v52 }
 0x98e   :  { %12789 = vmatpush3.bf16.msra.mxu1 %v15430_v7  ;;  %v6665_v51 = vpack.c.bf16 %v12555_v62, %v12554_v9  ;;  %v15457_v9 = vld [vmem:[#allocation7 + $0xc0] sm:$0xff]  }
 0x98f   :  { %v6416_v3 = vpop.f32.mrf.mxu1  ;;  %v12587_v43 = vpop.f32.mrf.mxu0  ;;  %12790 = vmatprep.subr.bf16.mxu1 %v15433_v49 }
 0x990   :  { %v6664_v16 = vpack.c.bf16 %v6416_v3, %v6413_v28  ;;  %12695 = vmatpush3.bf16.msra.mxu0 %v13903_v48  ;;  %v6883_v4 = vpack.c.bf16 %v12587_v43, %v12586_v15  ;;  %v13909_v28 = vld [vmem:[#allocation25] sm:$0xff]   ;;  %v13532_v15 = vld [vmem:[#allocation12 + $0xf8] sm:$0xff]   ;;  %v13534_v43 = vld [vmem:[#allocation12 + $0xf0] sm:$0xff]  }
 0x991   :  { %v12558_v38 = vpop.f32.mrf.mxu1  ;;  %12696 = vmatprep.subr.bf16.mxu0 %v13904_v22  ;;  %v6513_v40 = vpop.f32.mrf.mxu0 }
 0x992   :  { %12648 = vmatprep.mubr.bf16.mxu0 %v6664_v16  ;;  %v6882_v5 = vpack.c.bf16 %v6513_v40, %v6510_v59  ;;  %12791 = vmatpush3.bf16.msra.mxu1 %v15433_v49  ;;  %v13542_v16 = vld [vmem:[#allocation7 + $0xc8] sm:$0xff]  }
 0x993   :  { %v6429_v26 = vpop.f32.mrf.mxu1  ;;  %12649 = vmatmul.mubr.bf16.gmra.mxu0 %v6665_v51  ;;  %v12590_v57 = vpop.f32.mrf.mxu0  ;;  %12792 = vmatprep.subr.bf16.mxu1 %v15438_v37  ;;  %v13545_v51 = vld [vmem:[#allocation7 + $0xd0] sm:$0xff]  }
 0x994   :  { %12697 = vmatpush3.bf16.msra.mxu0 %v13904_v22  ;;  %12744 = vmatprep.mubr.bf16.mxu1 %v6882_v5 }
 0x995   :  { %v12559_v36 = vpop.f32.mrf.mxu1  ;;  %12698 = vmatprep.subr.bf16.mxu0 %v13905_v47  ;;  %v6526_v6 = vpop.f32.mrf.mxu0  ;;  %12745 = vmatmul.mubr.bf16.gmra.mxu1 %v6883_v4  ;;  %v13536_v4 = vld [vmem:[#allocation12 + $0xe8] sm:$0xff]  }
 0x996   :  { %12793 = vmatpush3.bf16.msra.mxu1 %v15438_v37  ;;  %v6667_v31 = vpack.c.bf16 %v12559_v36, %v12558_v38  ;;  %v13538_v36 = vld [vmem:[#allocation12 + $0xe0] sm:$0xff]  }
 0x997   :  { %v6432_v25 = vpop.f32.mrf.mxu1  ;;  %v12591_v56 = vpop.f32.mrf.mxu0  ;;  %12794 = vmatprep.subr.bf16.mxu1 %v15442_v17 }
 0x998   :  { %v6666_v33 = vpack.c.bf16 %v6432_v25, %v6429_v26  ;;  %12699 = vmatpush3.bf16.msra.mxu0 %v13905_v47  ;;  %v6885_v58 = vpack.c.bf16 %v12591_v56, %v12590_v57  ;;  %v13546_v47 = vld [vmem:[#allocation7 + $0xd8] sm:$0xff]  }
 0x999   :  { %v12562_v8 = vpop.f32.mrf.mxu1  ;;  %12700 = vmatprep.subr.bf16.mxu0 %v13906_v13  ;;  %v6529_v20 = vpop.f32.mrf.mxu0 }
 0x99a   :  { %12652 = vmatprep.mubr.bf16.mxu0 %v6666_v33  ;;  %v6884_v50 = vpack.c.bf16 %v6529_v20, %v6526_v6  ;;  %12795 = vmatpush3.bf16.msra.mxu1 %v15442_v17  ;;  %v13550_v6 = vld [vmem:[#allocation7 + $0xe0] sm:$0xff]   ;;  %v13540_v33 = vld [vmem:[#allocation12 + $0xd8] sm:$0xff]   ;;  %v13543_v20 = vld [vmem:[#allocation12 + $0xd0] sm:$0xff]  }
 0x99b   :  { %v6445_v53 = vpop.f32.mrf.mxu1  ;;  %12653 = vmatmul.mubr.bf16.gmra.mxu0 %v6667_v31  ;;  %v12594_v18 = vpop.f32.mrf.mxu0  ;;  %12796 = vmatprep.subr.bf16.mxu1 %v15446_v63 }
 0x99c   :  { %12701 = vmatpush3.bf16.msra.mxu0 %v13906_v13  ;;  %12748 = vmatprep.mubr.bf16.mxu1 %v6884_v50  ;;  %v13551_v50 = vld [vmem:[#allocation7 + $0xe8] sm:$0xff]  }
 0x99d   :  { %v12563_v21 = vpop.f32.mrf.mxu1  ;;  %12702 = vmatprep.subr.bf16.mxu0 %v13907_v42  ;;  %v6542_v19 = vpop.f32.mrf.mxu0  ;;  %12749 = vmatmul.mubr.bf16.gmra.mxu1 %v6885_v58 }
 0x99e   :  { %12797 = vmatpush3.bf16.msra.mxu1 %v15446_v63  ;;  %v6669_v24 = vpack.c.bf16 %v12563_v21, %v12562_v8 }
 0x99f   :  { %v6448_v27 = vpop.f32.mrf.mxu1  ;;  %v12595_v55 = vpop.f32.mrf.mxu0  ;;  %12798 = vmatprep.subr.bf16.mxu1 %v15450_v32 }
 0x9a0   :  { %v6668_v29 = vpack.c.bf16 %v6448_v27, %v6445_v53  ;;  %12703 = vmatpush3.bf16.msra.mxu0 %v13907_v42  ;;  %v6887_v60 = vpack.c.bf16 %v12595_v55, %v12594_v18  ;;  %v13554_v53 = vld [vmem:[#allocation7 + $0xf0] sm:$0xff]   ;;  %v13544_v42 = vld [vmem:[#allocation12 + $0xc8] sm:$0xff]   ;;  %v15466_v55 = vld [vmem:[#allocation4 + $0xc0] sm:$0xff]  }
 0x9a1   :  { %v12614_v30 = vpop.f32.mrf.mxu1  ;;  %12704 = vmatprep.subr.bf16.mxu0 %v13908_v2  ;;  %v6545_v34 = vpop.f32.mrf.mxu0 }
 0x9a2   :  { %12656 = vmatprep.mubr.bf16.mxu0 %v6668_v29  ;;  %v6886_v46 = vpack.c.bf16 %v6545_v34, %v6542_v19  ;;  %12799 = vmatpush3.bf16.msra.mxu1 %v15450_v32  ;;  %v13552_v34 = vld [vmem:[#allocation4 + $0xd0] sm:$0xff]  }
 0x9a3   :  { %v6591_v52 = vpop.f32.mrf.mxu1  ;;  %12657 = vmatmul.mubr.bf16.gmra.mxu0 %v6669_v24  ;;  %12800 = vmatprep.subr.bf16.mxu1 %v15454_v0  ;;  %v13547_v24 = vld [vmem:[#allocation12 + $0xc0] sm:$0xff]  }
 0x9a4   :  { %12705 = vmatpush3.bf16.msra.mxu0 %v13908_v2  ;;  %12752 = vmatprep.mubr.bf16.mxu1 %v6886_v46  ;;  %v13558_v2 = vld [vmem:[#allocation9 + $0xc0] sm:$0xff]   ;;  %v13559_v46 = vld [vmem:[#allocation9 + $0xc8] sm:$0xff]  }
 0x9a5   :  { %v12615_v11 = vpop.f32.mrf.mxu1  ;;  %12706 = vmatprep.subr.bf16.mxu0 %v13909_v28  ;;  %12753 = vmatmul.mubr.bf16.gmra.mxu1 %v6887_v60  ;;  %v13549_v60 = vld [vmem:[#allocation4 + $0xc8] sm:$0xff]  }
 0x9a6   :  { %12801 = vmatpush3.bf16.msra.mxu1 %v15454_v0  ;;  %12804 = vmatprep.mubr.bf16.mxu1 %v15457_v9  ;;  %v6889_v59 = vpack.c.bf16 %v12615_v11, %v12614_v30  ;;  %v13555_v30 = vld [vmem:[#allocation7 + $0xf8] sm:$0xff]  }
 0x9a7   :  { %v6594_v62 = vpop.f32.mrf.mxu1  ;;  %12802 = vmatprep.subr.bf16.mxu1 %v15460_v39  ;;  %v13910_v11 = vld [vmem:[#allocation15 + $0x38] sm:$0xff]  }
 0x9a8   :  { %v6888_v48 = vpack.c.bf16 %v6594_v62, %v6591_v52  ;;  %12707 = vmatpush3.bf16.msra.mxu0 %v13909_v28  ;;  %v13562_v52 = vld [vmem:[#allocation9 + $0xd0] sm:$0xff]   ;;  %v13553_v28 = vld [vmem:[#allocation4 + $0xd8] sm:$0xff]   ;;  %v13556_v62 = vld [vmem:[#allocation4 + $0xe0] sm:$0xff]  }
 0x9a9   :  { %v12618_v3 = vpop.f32.mrf.mxu1  ;;  %12756 = vmatprep.subr.bf16.mxu0 %v13532_v15 }
 0x9aa   :  { %12708 = vmatprep.mubr.bf16.mxu0 %v6888_v48  ;;  %12803 = vmatpush3.bf16.msra.mxu1 %v15460_v39  ;;  %v13563_v48 = vld [vmem:[#allocation9 + $0xd8] sm:$0xff]  }
 0x9ab   :  { %v6607_v38 = vpop.f32.mrf.mxu1  ;;  %12709 = vmatmul.mubr.bf16.vlgmr.msra.gmra.mxu0 %v6889_v59  ;;  %12852 = vmatprep.subr.bf16.mxu1 %v13532_v15  ;;  %v13566_v59 = vld [vmem:[#allocation9 + $0xe0] sm:$0xff]  }
 0x9ac   :  { %12757 = vmatpush3.bf16.msra.mxu0 %v13532_v15 }
 0x9ad   :  { %v12619_v22 = vpop.f32.mrf.mxu1  ;;  %12758 = vmatprep.subr.bf16.mxu0 %v13534_v43  ;;  %12805 = vmatmul.mubr.bf16.vlgmr.msra.gmra.mxu1 %v13542_v16  ;;  %v13567_v16 = vld [vmem:[#allocation9 + $0xe8] sm:$0xff]  }
 0x9ae   :  { %12853 = vmatpush3.bf16.msra.mxu1 %v13532_v15  ;;  %12808 = vmatprep.mubr.bf16.mxu1 %v13545_v51  ;;  %v6891_v26 = vpack.c.bf16 %v12619_v22, %v12618_v3  ;;  %v13911_v15 = vld [vmem:[#allocation15 + $0x30] sm:$0xff]   ;;  %v13912_v3 = vld [vmem:[#allocation15 + $0x28] sm:$0xff]  }
 0x9af   :  { %v6610_v40 = vpop.f32.mrf.mxu1  ;;  %12854 = vmatprep.subr.bf16.mxu1 %v13534_v43  ;;  %v13570_v51 = vld [vmem:[#allocation9 + $0xf0] sm:$0xff]  }
 0x9b0   :  { %v6890_v5 = vpack.c.bf16 %v6610_v40, %v6607_v38  ;;  %12759 = vmatpush3.bf16.msra.mxu0 %v13534_v43  ;;  %v13914_v38 = vld [vmem:[#allocation15 + $0x18] sm:$0xff]   ;;  %v13915_v22 = vld [vmem:[#allocation15 + $0x10] sm:$0xff]   ;;  %v13916_v40 = vld [vmem:[#allocation15 + $0x8] sm:$0xff]  }
 0x9b1   :  { %v12622_v57 = vpop.f32.mrf.mxu1  ;;  %12760 = vmatprep.subr.bf16.mxu0 %v13536_v4 }
 0x9b2   :  { %12712 = vmatprep.mubr.bf16.mxu0 %v6890_v5  ;;  %12855 = vmatpush3.bf16.msra.mxu1 %v13534_v43  ;;  %v13913_v43 = vld [vmem:[#allocation15 + $0x20] sm:$0xff]  }
 0x9b3   :  { %v6623_v25 = vpop.f32.mrf.mxu1  ;;  %12713 = vmatmul.mubr.bf16.gmra.mxu0 %v6891_v26  ;;  %12856 = vmatprep.subr.bf16.mxu1 %v13536_v4  ;;  %v13917_v5 = vld [vmem:[#allocation15] sm:$0xff]   ;;  %v13918_v26 = vld [vmem:[#allocation16 + $0x38] sm:$0xff]  }
 0x9b4   :  { %12761 = vmatpush3.bf16.msra.mxu0 %v13536_v4 }
 0x9b5   :  { %v12623_v56 = vpop.f32.mrf.mxu1  ;;  %12762 = vmatprep.subr.bf16.mxu0 %v13538_v36  ;;  %12809 = vmatmul.mubr.bf16.gmra.mxu1 %v13546_v47  ;;  %v13572_v47 = vld [vmem:[#allocation10 + $0xe0] sm:$0xff]  }
 0x9b6   :  { %12857 = vmatpush3.bf16.msra.mxu1 %v13536_v4  ;;  %12812 = vmatprep.mubr.bf16.mxu1 %v13550_v6  ;;  %v6893_v13 = vpack.c.bf16 %v12623_v56, %v12622_v57  ;;  %v13571_v4 = vld [vmem:[#allocation9 + $0xf8] sm:$0xff]   ;;  %v13921_v6 = vld [vmem:[#allocation16 + $0x28] sm:$0xff]   ;;  %v13574_v56 = vld [vmem:[#allocation10 + $0xf0] sm:$0xff]  }
 0x9b7   :  { %v6626_v31 = vpop.f32.mrf.mxu1  ;;  %12858 = vmatprep.subr.bf16.mxu1 %v13538_v36  ;;  %v15485_v57 = vld [vmem:[#allocation18 + $0x38] sm:$0xff]  }
 0x9b8   :  { %v6892_v8 = vpack.c.bf16 %v6626_v31, %v6623_v25  ;;  %12763 = vmatpush3.bf16.msra.mxu0 %v13538_v36  ;;  %v13573_v25 = vld [vmem:[#allocation10 + $0xe8] sm:$0xff]   ;;  %v13924_v31 = vld [vmem:[#allocation16 + $0x10] sm:$0xff]  }
 0x9b9   :  { %v12626_v58 = vpop.f32.mrf.mxu1  ;;  %12764 = vmatprep.subr.bf16.mxu0 %v13540_v33 }
 0x9ba   :  { %12716 = vmatprep.mubr.bf16.mxu0 %v6892_v8  ;;  %12859 = vmatpush3.bf16.msra.mxu1 %v13538_v36  ;;  %v13569_v36 = vld [vmem:[#allocation10 + $0xd8] sm:$0xff]  }
 0x9bb   :  { %v6639_v18 = vpop.f32.mrf.mxu1  ;;  %12717 = vmatmul.mubr.bf16.gmra.mxu0 %v6893_v13  ;;  %12860 = vmatprep.subr.bf16.mxu1 %v13540_v33  ;;  %v13575_v8 = vld [vmem:[#allocation10 + $0xf8] sm:$0xff]   ;;  %v13925_v13 = vld [vmem:[#allocation16 + $0x8] sm:$0xff]  }
 0x9bc   :  { %12765 = vmatpush3.bf16.msra.mxu0 %v13540_v33 }
 0x9bd   :  { %v12627_v21 = vpop.f32.mrf.mxu1  ;;  %12766 = vmatprep.subr.bf16.mxu0 %v13543_v20  ;;  %12813 = vmatmul.mubr.bf16.gmra.mxu1 %v13551_v50 }
 0x9be   :  { %12861 = vmatpush3.bf16.msra.mxu1 %v13540_v33  ;;  %12816 = vmatprep.mubr.bf16.mxu1 %v13554_v53  ;;  %v6895_v29 = vpack.c.bf16 %v12627_v21, %v12626_v58  ;;  %v13923_v33 = vld [vmem:[#allocation16 + $0x18] sm:$0xff]   ;;  %v13926_v58 = vld [vmem:[#allocation16] sm:$0xff]  }
 0x9bf   :  { %v6642_v19 = vpop.f32.mrf.mxu1  ;;  %12862 = vmatprep.subr.bf16.mxu1 %v13543_v20 }
 0x9c0   :  { %v6894_v27 = vpack.c.bf16 %v6642_v19, %v6639_v18  ;;  %12767 = vmatpush3.bf16.msra.mxu0 %v13543_v20 }
 0x9c1   :  { %12768 = vmatprep.subr.bf16.mxu0 %v13544_v42 }
 0x9c2   :  { %12720 = vmatprep.mubr.bf16.mxu0 %v6894_v27  ;;  %12863 = vmatpush3.bf16.msra.mxu1 %v13543_v20  ;;  %v15488_v20 = vld [vmem:[#allocation19 + $0x38] sm:$0xff]  }
 0x9c3   :  { %12721 = vmatmul.mubr.bf16.gmra.mxu0 %v6895_v29  ;;  %12864 = vmatprep.subr.bf16.mxu1 %v13544_v42 }
 0x9c4   :  { %12769 = vmatpush3.bf16.msra.mxu0 %v13544_v42  ;;  %12772 = vmatprep.mubr.bf16.mxu0 %v15466_v55 }
 0x9c5   :  { %12770 = vmatprep.subr.bf16.mxu0 %v13547_v24  ;;  %12817 = vmatmul.mubr.bf16.gmra.mxu1 %v13555_v30 }
 0x9c6   :  { %12865 = vmatpush3.bf16.msra.mxu1 %v13544_v42  ;;  %12868 = vmatprep.mubr.bf16.mxu1 %v13558_v2 }
 0x9c7   :  { %12866 = vmatprep.subr.bf16.mxu1 %v13547_v24 }
 0x9c8   :  { %12771 = vmatpush3.bf16.msra.mxu0 %v13547_v24 }
 0x9c9   :  { %12820 = vmatprep.subr.bf16.mxu0 %v15430_v7 }
 0x9ca   :  { %12867 = vmatpush3.bf16.msra.mxu1 %v13547_v24 }
 0x9cb   :  { %12773 = vmatmul.mubr.bf16.vlgmr.msra.gmra.mxu0 %v13549_v60  ;;  %12916 = vmatprep.subr.bf16.mxu1 %v13910_v11 }
 0x9cc   :  { %12821 = vmatpush3.bf16.msra.mxu0 %v15430_v7  ;;  %12776 = vmatprep.mubr.bf16.mxu0 %v13552_v34  ;;  %v13557_v7 = vld [vmem:[#allocation4 + $0xe8] sm:$0xff]  }
 0x9cd   :  { %12822 = vmatprep.subr.bf16.mxu0 %v15433_v49  ;;  %12869 = vmatmul.mubr.bf16.vlgmr.msra.gmra.mxu1 %v13559_v46 }
 0x9ce   :  { %12872 = vmatprep.mubr.bf16.mxu1 %v13562_v52  ;;  %12917 = vmatpush3.bf16.msra.mxu1 %v13910_v11 }
 0x9cf   :  { %12918 = vmatprep.subr.bf16.mxu1 %v13911_v15 }
 0x9d0   :  { %12823 = vmatpush3.bf16.msra.mxu0 %v15433_v49  ;;  %v13560_v49 = vld [vmem:[#allocation4 + $0xf0] sm:$0xff]  }
 0x9d1   :  { %12824 = vmatprep.subr.bf16.mxu0 %v15438_v37 }
 0x9d2   :  { %12919 = vmatpush3.bf16.msra.mxu1 %v13911_v15 }
 0x9d3   :  { %12777 = vmatmul.mubr.bf16.gmra.mxu0 %v13553_v28  ;;  %12920 = vmatprep.subr.bf16.mxu1 %v13912_v3 }
 0x9d4   :  { %12825 = vmatpush3.bf16.msra.mxu0 %v15438_v37  ;;  %12780 = vmatprep.mubr.bf16.mxu0 %v13556_v62  ;;  %v13561_v37 = vld [vmem:[#allocation4 + $0xf8] sm:$0xff]  }
 0x9d5   :  { %12826 = vmatprep.subr.bf16.mxu0 %v15442_v17  ;;  %12873 = vmatmul.mubr.bf16.gmra.mxu1 %v13563_v48 }
 0x9d6   :  { %12876 = vmatprep.mubr.bf16.mxu1 %v13566_v59  ;;  %12921 = vmatpush3.bf16.msra.mxu1 %v13912_v3 }
 0x9d7   :  { %12922 = vmatprep.subr.bf16.mxu1 %v13913_v43 }
 0x9d8   :  { %12827 = vmatpush3.bf16.msra.mxu0 %v15442_v17  ;;  %v13564_v17 = vld [vmem:[#allocation10 + $0xc0] sm:$0xff]  }
 0x9d9   :  { %12828 = vmatprep.subr.bf16.mxu0 %v15446_v63 }
 0x9da   :  { %12923 = vmatpush3.bf16.msra.mxu1 %v13913_v43 }
 0x9db   :  { %12781 = vmatmul.mubr.bf16.gmra.mxu0 %v13557_v7  ;;  %12924 = vmatprep.subr.bf16.mxu1 %v13914_v38 }
 0x9dc   :  { %12829 = vmatpush3.bf16.msra.mxu0 %v15446_v63  ;;  %12784 = vmatprep.mubr.bf16.mxu0 %v13560_v49  ;;  %v13565_v63 = vld [vmem:[#allocation10 + $0xc8] sm:$0xff]  }
 0x9dd   :  { %12830 = vmatprep.subr.bf16.mxu0 %v15450_v32  ;;  %12877 = vmatmul.mubr.bf16.gmra.mxu1 %v13567_v16 }
 0x9de   :  { %12880 = vmatprep.mubr.bf16.mxu1 %v13570_v51  ;;  %12925 = vmatpush3.bf16.msra.mxu1 %v13914_v38 }
 0x9df   :  { %12926 = vmatprep.subr.bf16.mxu1 %v13915_v22 }
 0x9e0   :  { %12831 = vmatpush3.bf16.msra.mxu0 %v15450_v32  ;;  %v13568_v32 = vld [vmem:[#allocation10 + $0xd0] sm:$0xff]  }
 0x9e1   :  { %12832 = vmatprep.subr.bf16.mxu0 %v15454_v0 }
 0x9e2   :  { %12927 = vmatpush3.bf16.msra.mxu1 %v13915_v22 }
 0x9e3   :  { %12785 = vmatmul.mubr.bf16.gmra.mxu0 %v13561_v37  ;;  %12928 = vmatprep.subr.bf16.mxu1 %v13916_v40 }
 0x9e4   :  { %12833 = vmatpush3.bf16.msra.mxu0 %v15454_v0  ;;  %12836 = vmatprep.mubr.bf16.mxu0 %v13564_v17  ;;  %v13920_v0 = vld [vmem:[#allocation16 + $0x30] sm:$0xff]  }
 0x9e5   :  { %12834 = vmatprep.subr.bf16.mxu0 %v15460_v39  ;;  %12881 = vmatmul.mubr.bf16.gmra.mxu1 %v13571_v4 }
 0x9e6   :  { %12929 = vmatpush3.bf16.msra.mxu1 %v13916_v40 }
 0x9e7   :  { %12930 = vmatprep.subr.bf16.mxu1 %v13917_v5 }
 0x9e8   :  { %12835 = vmatpush3.bf16.msra.mxu0 %v15460_v39  ;;  %v13922_v39 = vld [vmem:[#allocation16 + $0x20] sm:$0xff]  }
 0x9e9   :  { %12884 = vmatprep.subr.bf16.mxu0 %v13918_v26 }
 0x9ea   :  { %12931 = vmatpush3.bf16.msra.mxu1 %v13917_v5 }
 0x9eb   :  { %12837 = vmatmul.mubr.bf16.vlgmr.msra.gmra.mxu0 %v13565_v63  ;;  %12980 = vmatprep.subr.bf16.mxu1 %v15485_v57 }
 0x9ec   :  { %12840 = vmatprep.mubr.bf16.mxu0 %v13568_v32  ;;  %12885 = vmatpush3.bf16.msra.mxu0 %v13918_v26 }
 0x9ed   :  { %12886 = vmatprep.subr.bf16.mxu0 %v13920_v0 }
 0x9f0   :  { %12887 = vmatpush3.bf16.msra.mxu0 %v13920_v0 }
 0x9f1   :  { %12888 = vmatprep.subr.bf16.mxu0 %v13921_v6 }
 0x9f3   :  { %12841 = vmatmul.mubr.bf16.gmra.mxu0 %v13569_v36 }
 0x9f4   :  { %12844 = vmatprep.mubr.bf16.mxu0 %v13572_v47  ;;  %12889 = vmatpush3.bf16.msra.mxu0 %v13921_v6 }
 0x9f5   :  { %12890 = vmatprep.subr.bf16.mxu0 %v13922_v39 }
 0x9f8   :  { %12891 = vmatpush3.bf16.msra.mxu0 %v13922_v39 }
 0x9f9   :  { %12892 = vmatprep.subr.bf16.mxu0 %v13923_v33 }
 0x9fb   :  { %12845 = vmatmul.mubr.bf16.gmra.mxu0 %v13573_v25 }
 0x9fc   :  { %12848 = vmatprep.mubr.bf16.mxu0 %v13574_v56  ;;  %12893 = vmatpush3.bf16.msra.mxu0 %v13923_v33 }
 0x9fd   :  { %12894 = vmatprep.subr.bf16.mxu0 %v13924_v31 }
 0xa00   :  { %12895 = vmatpush3.bf16.msra.mxu0 %v13924_v31 }
 0xa01   :  { %12896 = vmatprep.subr.bf16.mxu0 %v13925_v13 }
 0xa03   :  { %12849 = vmatmul.mubr.bf16.gmra.mxu0 %v13575_v8 }
 0xa04   :  { %12897 = vmatpush3.bf16.msra.mxu0 %v13925_v13 }
 0xa05   :  { %12898 = vmatprep.subr.bf16.mxu0 %v13926_v58 }
 0xa08   :  { %12899 = vmatpush3.bf16.msra.mxu0 %v13926_v58 }
 0xa09   :  { %12948 = vmatprep.subr.bf16.mxu0 %v15488_v20 }
 0xa2c   :  { %v12678_v50 = vpop.f32.mrf.mxu1 }
 0xa2e   :  { %v6801_v53 = vpop.f32.mrf.mxu1 }
 0xa30   :  { %v12679_v18 = vpop.f32.mrf.mxu1 }
 0xa32   :  { %v15491_v21 = vpop.f32.mrf.mxu1 }
 0xa33   :  { %16238 = vst [vmem:[#allocation85_spill] sm:$0xff] %v15491_v21 }
 0xa34   :  { %v12682_v42 = vpop.f32.mrf.mxu1 }
 0xa36   :  { %v6817_v19 = vpop.f32.mrf.mxu1 }
 0xa38   :  { %v12683_v27 = vpop.f32.mrf.mxu1 }
 0xa3a   :  { %v15493_v29 = vpop.f32.mrf.mxu1 }
 0xa3b   :  { %16239 = vst [vmem:[#allocation86_spill] sm:$0xff] %v15493_v29 }
 0xa3c   :  { %v12686_v24 = vpop.f32.mrf.mxu1 }
 0xa3e   :  { %v6833_v30 = vpop.f32.mrf.mxu1 }
 0xa40   :  { %v12687_v2 = vpop.f32.mrf.mxu1 }
 0xa42   :  { %v15495_v60 = vpop.f32.mrf.mxu1 }
 0xa43   :  { %16240 = vst [vmem:[#allocation87_spill] sm:$0xff] %v15495_v60 }
 0xa44   :  { %v12690_v34 = vpop.f32.mrf.mxu1 }
 0xa46   :  { %v6849_v46 = vpop.f32.mrf.mxu1 }
 0xa48   :  { %v15497_v52 = vpop.f32.mrf.mxu1 }
 0xa4a   :  { %v15499_v11 = vpop.f32.mrf.mxu1 }
 0xa4b   :  { %16241 = vst [vmem:[#allocation88_spill] sm:$0xff] %v15499_v11  ;;  %v12646_v28 = vpop.f32.mrf.mxu0 }
 0xa4c   :  { %v6810_v15 = vadd.f32 %v12678_v50, %v12646_v28 }
 0xa4d   :  { %v6704_v62 = vpop.f32.mrf.mxu0  ;;  %v15501_v48 = vpop.f32.mrf.mxu1 }
 0xa4e   :  { %v6866_v59 = vmax.f32 %v6810_v15, 0.0  ;;  %v6802_v3 = vadd.f32 %v6801_v53, %v6704_v62 }
 0xa4f   :  { %v12647_v7 = vpop.f32.mrf.mxu0  ;;  %v15503_v43 = vpop.f32.mrf.mxu1 }
 0xa50   :  { %v15506_v49 = vadd.f32 %v6866_v59, %v15160_v12  ;;  %v6864_v16 = vmax.f32 %v6802_v3, 0.0  ;;  %v6813_v51 = vadd.f32 %v12679_v18, %v12647_v7 }
 0xa51   :  { %v15508_v38 = vpop.f32.mrf.mxu0  ;;  %v15510_v37 = vpop.f32.mrf.mxu1 }
 0xa52   :  { %16242 = vst [vmem:[#allocation89_spill] sm:$0xff] %v15508_v38  ;;  %v15513_v22 = vadd.f32 %v6864_v16, %v15167_v1  ;;  %v6867_v17 = vmax.f32 %v6813_v51, 0.0 }
 0xa53   :  { %v12650_v4 = vpop.f32.mrf.mxu0  ;;  %v15515_v40 = vpop.f32.mrf.mxu1 }
 0xa54   :  { %16243 = vst [vmem:[#allocation90_spill] sm:$0xff] %v15515_v40  ;;  %v15518_v63 = vadd.f32 %v6867_v17, %v15171_v14  ;;  %v6826_v5 = vadd.f32 %v12682_v42, %v12650_v4 }
 0xa55   :  { %v6720_v32 = vpop.f32.mrf.mxu0  ;;  %v15520_v12 = vpop.f32.mrf.mxu1 }
 0xa56   :  { %v6870_v26 = vmax.f32 %v6826_v5, 0.0  ;;  %v6818_v0 = vadd.f32 %v6817_v19, %v6720_v32 }
 0xa57   :  { %v12651_v36 = vpop.f32.mrf.mxu0  ;;  %v15522_v47 = vpop.f32.mrf.mxu1 }
 0xa58   :  { %v15525_v6 = vadd.f32 %v6870_v26, %v15179_v44  ;;  %v6868_v1 = vmax.f32 %v6818_v0, 0.0  ;;  %v6829_v39 = vadd.f32 %v12683_v27, %v12651_v36 }
 0xa59   :  { %v15527_v25 = vpop.f32.mrf.mxu0  ;;  %v15529_v56 = vpop.f32.mrf.mxu1 }
 0xa5a   :  { %16244 = vst [vmem:[#allocation91_spill] sm:$0xff] %v15527_v25  ;;  %v15532_v14 = vadd.f32 %v6868_v1, %v15186_v10  ;;  %v6871_v33 = vmax.f32 %v6829_v39, 0.0 }
 0xa5b   :  { %v12654_v31 = vpop.f32.mrf.mxu0  ;;  %v15534_v8 = vpop.f32.mrf.mxu1 }
 0xa5c   :  { %16245 = vst [vmem:[#allocation92_spill] sm:$0xff] %v15534_v8  ;;  %v15537_v13 = vadd.f32 %v6871_v33, %v15190_v23  ;;  %v6842_v58 = vadd.f32 %v12686_v24, %v12654_v31 }
 0xa5d   :  { %v6736_v50 = vpop.f32.mrf.mxu0  ;;  %v15539_v44 = vpop.f32.mrf.mxu1 }
 0xa5e   :  { %v6874_v53 = vmax.f32 %v6842_v58, 0.0  ;;  %v6834_v18 = vadd.f32 %v6833_v30, %v6736_v50 }
 0xa5f   :  { %v12655_v42 = vpop.f32.mrf.mxu0  ;;  %v15541_v19 = vpop.f32.mrf.mxu1 }
 0xa60   :  { %v15544_v27 = vadd.f32 %v6874_v53, %v15198_v45  ;;  %v6872_v10 = vmax.f32 %v6834_v18, 0.0  ;;  %v6845_v28 = vadd.f32 %v12687_v2, %v12655_v42  ;;  %v16252_v18 = vld [vmem:[#allocation63_spill] sm:$0xff] }
 0xa61   :  { %v15546_v15 = vpop.f32.mrf.mxu0  ;;  %v15548_v62 = vpop.f32.mrf.mxu1 }
 0xa62   :  { %16246 = vst [vmem:[#allocation93_spill] sm:$0xff] %v15546_v15  ;;  %v15551_v23 = vadd.f32 %v6872_v10, %v15205_v35  ;;  %v6875_v24 = vmax.f32 %v6845_v28, 0.0 }
 0xa63   :  { %v12658_v59 = vpop.f32.mrf.mxu0  ;;  %v15553_v3 = vpop.f32.mrf.mxu1 }
 0xa64   :  { %16247 = vst [vmem:[#allocation94_spill] sm:$0xff] %v15553_v3  ;;  %v15556_v30 = vadd.f32 %v6875_v24, %v15209_v54  ;;  %v6858_v7 = vadd.f32 %v12690_v34, %v12658_v59  ;;  %v16255_v59 = vld [vmem:[#allocation65_spill] sm:$0xff] }
 0xa65   :  { %v6752_v16 = vpop.f32.mrf.mxu0  ;;  %v15558_v45 = vpop.f32.mrf.mxu1 }
 0xa66   :  { %v6878_v51 = vmax.f32 %v6858_v7, 0.0  ;;  %v6850_v2 = vadd.f32 %v6849_v46, %v6752_v16  ;;  %v16250_v46 = vld [vmem:[#allocation60_spill] sm:$0xff] }
 0xa67   :  { %v12659_v17 = vpop.f32.mrf.mxu0  ;;  %v15560_v4 = vpop.f32.mrf.mxu1 }
 0xa68   :  { %v15563_v5 = vadd.f32 %v6878_v51, %v15219_v61  ;;  %v6876_v35 = vmax.f32 %v6850_v2, 0.0  ;;  %v6861_v32 = vadd.f32 %v15497_v52, %v12659_v17  ;;  %v16257_v17 = vld [vmem:[#allocation68_spill] sm:$0xff] }
 0xa69   :  { %v15566_v26 = vpop.f32.mrf.mxu0  ;;  %v15568_v0 = vpop.f32.mrf.mxu1 }
 0xa6a   :  { %16248 = vst [vmem:[#allocation95_spill] sm:$0xff] %v15566_v26  ;;  %v15571_v54 = vadd.f32 %v6876_v35, %v15227_v41  ;;  %v6879_v34 = vmax.f32 %v6861_v32, 0.0 }
 0xa6b   :  { %v12710_v36 = vpop.f32.mrf.mxu0  ;;  %v15573_v1 = vpop.f32.mrf.mxu1 }
 0xa6c   :  { %16249 = vst [vmem:[#allocation96_spill] sm:$0xff] %v15573_v1  ;;  %v15576_v39 = vadd.f32 %v6879_v34, %v16250_v46  ;;  %v7036_v61 = vadd.f32 %v15501_v48, %v12710_v36 }
 0xa6d   :  { %v6930_v33 = vpop.f32.mrf.mxu0  ;;  %v12806_v31 = vpop.f32.mrf.mxu1 }
 0xa6e   :  { %16251 = vst [vmem:[#allocation60_spill] sm:$0xff] %v15576_v39  ;;  %v7092_v58 = vmax.f32 %v7036_v61, 0.0  ;;  %v7028_v52 = vadd.f32 %v15503_v43, %v6930_v33 }
 0xa6f   :  { %v12711_v50 = vpop.f32.mrf.mxu0  ;;  %v7563_v53 = vpop.f32.mrf.mxu1 }
 0xa70   :  { %v15581_v42 = vadd.f32 %v7092_v58, %v16252_v18  ;;  %v7090_v41 = vmax.f32 %v7028_v52, 0.0  ;;  %v7039_v10 = vadd.f32 %v15510_v37, %v12711_v50  ;;  %v16259_v58 = vld [vmem:[#allocation69_spill] sm:$0xff] }
 0xa71   :  { %v15584_v28 = vpop.f32.mrf.mxu0  ;;  %v12807_v24 = vpop.f32.mrf.mxu1 }
 0xa72   :  { %16253 = vst [vmem:[#allocation63_spill] sm:$0xff] %v15581_v42  ;;  %16254 = vst [vmem:[#allocation97_spill] sm:$0xff] %v15584_v28  ;;  %v15587_v7 = vadd.f32 %v7090_v41, %v16255_v59  ;;  %v7093_v48 = vmax.f32 %v7039_v10, 0.0  ;;  %v7925_v51 = vpack.c.bf16 %v12807_v24, %v12806_v31  ;;  %v16262_v41 = vld [vmem:[#allocation72_spill] sm:$0xff] }
 0xa73   :  { %v12714_v16 = vpop.f32.mrf.mxu0  ;;  %v7566_v2 = vpop.f32.mrf.mxu1 }
 0xa74   :  { %16256 = vst [vmem:[#allocation65_spill] sm:$0xff] %v15587_v7  ;;  %v15590_v43 = vadd.f32 %v7093_v48, %v16257_v17  ;;  %v7052_v35 = vadd.f32 %v15520_v12, %v12714_v16  ;;  %v7924_v32 = vpack.c.bf16 %v7566_v2, %v7563_v53  ;;  %v13928_v53 = vld [vmem:[#allocation19 + $0x30] sm:$0xff]   ;;  %v16264_v16 = vld [vmem:[#allocation73_spill] sm:$0xff] }
 0xa75   :  { %v6946_v34 = vpop.f32.mrf.mxu0  ;;  %v12810_v36 = vpop.f32.mrf.mxu1 }
 0xa76   :  { %16258 = vst [vmem:[#allocation68_spill] sm:$0xff] %v15590_v43  ;;  %v7096_v46 = vmax.f32 %v7052_v35, 0.0  ;;  %v7044_v37 = vadd.f32 %v15522_v47, %v6946_v34  ;;  %12900 = vmatprep.mubr.bf16.mxu0 %v7924_v32  ;;  %v13929_v35 = vld [vmem:[#allocation19 + $0x28] sm:$0xff]  }
 0xa77   :  { %v12715_v61 = vpop.f32.mrf.mxu0  ;;  %v7579_v33 = vpop.f32.mrf.mxu1  ;;  %12901 = vmatmul.mubr.bf16.vlgmr.msra.gmra.mxu0 %v7925_v51 }
 0xa78   :  { %v15595_v52 = vadd.f32 %v7096_v46, %v16259_v58  ;;  %v7094_v31 = vmax.f32 %v7044_v37, 0.0  ;;  %v7055_v50 = vadd.f32 %v15529_v56, %v12715_v61  ;;  %12949 = vmatpush3.bf16.msra.mxu0 %v15488_v20 }
 0xa79   :  { %v15599_v18 = vpop.f32.mrf.mxu0  ;;  %v12811_v12 = vpop.f32.mrf.mxu1  ;;  %12950 = vmatprep.subr.bf16.mxu0 %v13928_v53 }
 0xa7a   :  { %16260 = vst [vmem:[#allocation69_spill] sm:$0xff] %v15595_v52  ;;  %16261 = vst [vmem:[#allocation98_spill] sm:$0xff] %v15599_v18  ;;  %v15602_v10 = vadd.f32 %v7094_v31, %v16262_v41  ;;  %v7097_v47 = vmax.f32 %v7055_v50, 0.0  ;;  %v7927_v59 = vpack.c.bf16 %v12811_v12, %v12810_v36  ;;  %v16266_v36 = vld [vmem:[#allocation74_spill] sm:$0xff]  ;;  %v13930_v50 = vld [vmem:[#allocation19 + $0x20] sm:$0xff]  }
 0xa7b   :  { %v12718_v24 = vpop.f32.mrf.mxu0  ;;  %v7582_v48 = vpop.f32.mrf.mxu1  ;;  %v16269_v12 = vld [vmem:[#allocation77_spill] sm:$0xff] }
 0xa7c   :  { %16263 = vst [vmem:[#allocation72_spill] sm:$0xff] %v15602_v10  ;;  %v15605_v51 = vadd.f32 %v7097_v47, %v16264_v16  ;;  %v7068_v2 = vadd.f32 %v15539_v44, %v12718_v24  ;;  %v7926_v56 = vpack.c.bf16 %v7582_v48, %v7579_v33  ;;  %12951 = vmatpush3.bf16.msra.mxu0 %v13928_v53 }
 0xa7d   :  { %v6962_v20 = vpop.f32.mrf.mxu0  ;;  %v12814_v17 = vpop.f32.mrf.mxu1  ;;  %12952 = vmatprep.subr.bf16.mxu0 %v13929_v35 }
 0xa7e   :  { %16265 = vst [vmem:[#allocation73_spill] sm:$0xff] %v15605_v51  ;;  %v7100_v32 = vmax.f32 %v7068_v2, 0.0  ;;  %v7060_v34 = vadd.f32 %v15541_v19, %v6962_v20  ;;  %12904 = vmatprep.mubr.bf16.mxu0 %v7926_v56  ;;  %v13931_v20 = vld [vmem:[#allocation19 + $0x18] sm:$0xff]  }
 0xa7f   :  { %v12719_v46 = vpop.f32.mrf.mxu0  ;;  %v7595_v37 = vpop.f32.mrf.mxu1  ;;  %12905 = vmatmul.mubr.bf16.gmra.mxu0 %v7927_v59  ;;  %v16271_v59 = vld [vmem:[#allocation78_spill] sm:$0xff] }
 0xa80   :  { %v15610_v61 = vadd.f32 %v7100_v32, %v16266_v36  ;;  %v7098_v58 = vmax.f32 %v7060_v34, 0.0  ;;  %v7071_v31 = vadd.f32 %v15548_v62, %v12719_v46  ;;  %12953 = vmatpush3.bf16.msra.mxu0 %v13929_v35 }
 0xa81   :  { %v15613_v44 = vpop.f32.mrf.mxu0  ;;  %v12815_v33 = vpop.f32.mrf.mxu1  ;;  %12954 = vmatprep.subr.bf16.mxu0 %v13930_v50 }
 0xa82   :  { %16267 = vst [vmem:[#allocation74_spill] sm:$0xff] %v15610_v61  ;;  %16268 = vst [vmem:[#allocation99_spill] sm:$0xff] %v15613_v44  ;;  %v15616_v53 = vadd.f32 %v7098_v58, %v16269_v12  ;;  %v7101_v19 = vmax.f32 %v7071_v31, 0.0  ;;  %v7929_v47 = vpack.c.bf16 %v12815_v33, %v12814_v17  ;;  %v16273_v17 = vld [vmem:[#allocation80_spill] sm:$0xff]  ;;  %v13932_v33 = vld [vmem:[#allocation19 + $0x10] sm:$0xff]  }
 0xa83   :  { %v12722_v41 = vpop.f32.mrf.mxu0  ;;  %v7598_v24 = vpop.f32.mrf.mxu1 }
 0xa84   :  { %16270 = vst [vmem:[#allocation77_spill] sm:$0xff] %v15616_v53  ;;  %v15619_v48 = vadd.f32 %v7101_v19, %v16271_v59  ;;  %v7084_v16 = vadd.f32 %v15558_v45, %v12722_v41  ;;  %v7928_v2 = vpack.c.bf16 %v7598_v24, %v7595_v37  ;;  %12955 = vmatpush3.bf16.msra.mxu0 %v13930_v50  ;;  %v16276_v50 = vld [vmem:[#allocation82_spill] sm:$0xff] }
 0xa85   :  { %v6978_v62 = vpop.f32.mrf.mxu0  ;;  %v12818_v56 = vpop.f32.mrf.mxu1  ;;  %12956 = vmatprep.subr.bf16.mxu0 %v13931_v20 }
 0xa86   :  { %16272 = vst [vmem:[#allocation78_spill] sm:$0xff] %v15619_v48  ;;  %v7104_v35 = vmax.f32 %v7084_v16, 0.0  ;;  %v7076_v32 = vadd.f32 %v15560_v4, %v6978_v62  ;;  %12908 = vmatprep.mubr.bf16.mxu0 %v7928_v2  ;;  %v13933_v62 = vld [vmem:[#allocation19 + $0x8] sm:$0xff]  }
 0xa87   :  { %v12723_v34 = vpop.f32.mrf.mxu0  ;;  %v7611_v46 = vpop.f32.mrf.mxu1  ;;  %12909 = vmatmul.mubr.bf16.gmra.mxu0 %v7929_v47  ;;  %v16278_v47 = vld [vmem:[#allocation84_spill] sm:$0xff] }
 0xa88   :  { %v15624_v36 = vadd.f32 %v7104_v35, %v16273_v17  ;;  %v7102_v58 = vmax.f32 %v7076_v32, 0.0  ;;  %v7087_v31 = vadd.f32 %v15568_v0, %v12723_v34  ;;  %12957 = vmatpush3.bf16.msra.mxu0 %v13931_v20  ;;  %v13934_v17 = vld [vmem:[#allocation19] sm:$0xff]  }
 0xa89   :  { %v15627_v45 = vpop.f32.mrf.mxu0  ;;  %v12819_v37 = vpop.f32.mrf.mxu1  ;;  %12958 = vmatprep.subr.bf16.mxu0 %v13932_v33 }
 0xa8a   :  { %16274 = vst [vmem:[#allocation80_spill] sm:$0xff] %v15624_v36  ;;  %16275 = vst [vmem:[#allocation100_spill] sm:$0xff] %v15627_v45  ;;  %v15630_v12 = vadd.f32 %v7102_v58, %v16276_v50  ;;  %v7105_v4 = vmax.f32 %v7087_v31, 0.0  ;;  %v7931_v41 = vpack.c.bf16 %v12819_v37, %v12818_v56 }
 0xa8b   :  { %v12774_v19 = vpop.f32.mrf.mxu0  ;;  %v7614_v24 = vpop.f32.mrf.mxu1 }
 0xa8c   :  { %16277 = vst [vmem:[#allocation82_spill] sm:$0xff] %v15630_v12  ;;  %v15633_v59 = vadd.f32 %v7105_v4, %v16278_v47  ;;  %v7930_v16 = vpack.c.bf16 %v7614_v24, %v7611_v46  ;;  %12959 = vmatpush3.bf16.msra.mxu0 %v13932_v33  ;;  %v13935_v24 = vld [vmem:[#allocation18 + $0x30] sm:$0xff]  }
 0xa8d   :  { %v7370_v2 = vpop.f32.mrf.mxu0  ;;  %v12870_v0 = vpop.f32.mrf.mxu1  ;;  %12960 = vmatprep.subr.bf16.mxu0 %v13933_v62 }
 0xa8e   :  { %16279 = vst [vmem:[#allocation84_spill] sm:$0xff] %v15633_v59  ;;  %12912 = vmatprep.mubr.bf16.mxu0 %v7930_v16 }
 0xa8f   :  { %v12775_v20 = vpop.f32.mrf.mxu0  ;;  %v7853_v35 = vpop.f32.mrf.mxu1  ;;  %12913 = vmatmul.mubr.bf16.gmra.mxu0 %v7931_v41 }
 0xa90   :  { %12961 = vmatpush3.bf16.msra.mxu0 %v13933_v62  ;;  %v7917_v58 = vpack.c.bf16 %v12775_v20, %v12774_v19  ;;  %v13936_v20 = vld [vmem:[#allocation18 + $0x28] sm:$0xff]  }
 0xa91   :  { %v7373_v32 = vpop.f32.mrf.mxu0  ;;  %v12871_v34 = vpop.f32.mrf.mxu1  ;;  %12962 = vmatprep.subr.bf16.mxu0 %v13934_v17 }
 0xa92   :  { %v7916_v56 = vpack.c.bf16 %v7373_v32, %v7370_v2  ;;  %v8151_v37 = vpack.c.bf16 %v12871_v34, %v12870_v0 }
 0xa93   :  { %v12778_v31 = vpop.f32.mrf.mxu0  ;;  %v7856_v50 = vpop.f32.mrf.mxu1 }
 0xa94   :  { %12932 = vmatprep.mubr.bf16.mxu1 %v7916_v56  ;;  %v8150_v46 = vpack.c.bf16 %v7856_v50, %v7853_v35  ;;  %12963 = vmatpush3.bf16.msra.mxu0 %v13934_v17 }
 0xa95   :  { %v7386_v33 = vpop.f32.mrf.mxu0  ;;  %12933 = vmatmul.mubr.bf16.vlgmr.msra.gmra.mxu1 %v7917_v58  ;;  %v12874_v4 = vpop.f32.mrf.mxu1  ;;  %v13937_v58 = vld [vmem:[#allocation18 + $0x20] sm:$0xff]  }
 0xa96   :  { %12981 = vmatpush3.bf16.msra.mxu1 %v15485_v57  ;;  %12964 = vmatprep.mubr.bf16.mxu0 %v8150_v46 }
 0xa97   :  { %v12779_v41 = vpop.f32.mrf.mxu0  ;;  %12982 = vmatprep.subr.bf16.mxu1 %v13935_v24  ;;  %v7869_v47 = vpop.f32.mrf.mxu1  ;;  %12965 = vmatmul.mubr.bf16.vlgmr.msra.gmra.mxu0 %v8151_v37 }
 0xa98   :  { %v7919_v0 = vpack.c.bf16 %v12779_v41, %v12778_v31 }
 0xa99   :  { %v7389_v16 = vpop.f32.mrf.mxu0  ;;  %v12875_v2 = vpop.f32.mrf.mxu1 }
 0xa9a   :  { %v7918_v19 = vpack.c.bf16 %v7389_v16, %v7386_v33  ;;  %12983 = vmatpush3.bf16.msra.mxu1 %v13935_v24  ;;  %v8153_v35 = vpack.c.bf16 %v12875_v2, %v12874_v4  ;;  %v13938_v4 = vld [vmem:[#allocation18 + $0x18] sm:$0xff]  }
 0xa9b   :  { %v12782_v62 = vpop.f32.mrf.mxu0  ;;  %12984 = vmatprep.subr.bf16.mxu1 %v13936_v20  ;;  %v7872_v32 = vpop.f32.mrf.mxu1 }
 0xa9c   :  { %12936 = vmatprep.mubr.bf16.mxu1 %v7918_v19  ;;  %v8152_v34 = vpack.c.bf16 %v7872_v32, %v7869_v47 }
 0xa9d   :  { %v7402_v17 = vpop.f32.mrf.mxu0  ;;  %12937 = vmatmul.mubr.bf16.gmra.mxu1 %v7919_v0  ;;  %v12878_v57 = vpop.f32.mrf.mxu1 }
 0xa9e   :  { %12985 = vmatpush3.bf16.msra.mxu1 %v13936_v20  ;;  %12968 = vmatprep.mubr.bf16.mxu0 %v8152_v34  ;;  %v13939_v20 = vld [vmem:[#allocation18 + $0x10] sm:$0xff]  }
 0xa9f   :  { %v12783_v56 = vpop.f32.mrf.mxu0  ;;  %12986 = vmatprep.subr.bf16.mxu1 %v13937_v58  ;;  %v7885_v37 = vpop.f32.mrf.mxu1  ;;  %12969 = vmatmul.mubr.bf16.gmra.mxu0 %v8153_v35 }
 0xaa0   :  { %v7921_v33 = vpack.c.bf16 %v12783_v56, %v12782_v62 }
 0xaa1   :  { %v7405_v50 = vpop.f32.mrf.mxu0  ;;  %v12879_v46 = vpop.f32.mrf.mxu1 }
 0xaa2   :  { %v7920_v31 = vpack.c.bf16 %v7405_v50, %v7402_v17  ;;  %12987 = vmatpush3.bf16.msra.mxu1 %v13937_v58  ;;  %v8155_v24 = vpack.c.bf16 %v12879_v46, %v12878_v57  ;;  %v13940_v57 = vld [vmem:[#allocation18 + $0x8] sm:$0xff]  }
 0xaa3   :  { %v12786_v41 = vpop.f32.mrf.mxu0  ;;  %12988 = vmatprep.subr.bf16.mxu1 %v13938_v4  ;;  %v7888_v47 = vpop.f32.mrf.mxu1 }
 0xaa4   :  { %12940 = vmatprep.mubr.bf16.mxu1 %v7920_v31  ;;  %v8154_v16 = vpack.c.bf16 %v7888_v47, %v7885_v37 }
 0xaa5   :  { %v7418_v2 = vpop.f32.mrf.mxu0  ;;  %12941 = vmatmul.mubr.bf16.gmra.mxu1 %v7921_v33  ;;  %v12882_v19 = vpop.f32.mrf.mxu1  ;;  %v13941_v33 = vld [vmem:[#allocation18] sm:$0xff]  }
 0xaa6   :  { %12989 = vmatpush3.bf16.msra.mxu1 %v13938_v4  ;;  %12972 = vmatprep.mubr.bf16.mxu0 %v8154_v16 }
 0xaa7   :  { %v12787_v0 = vpop.f32.mrf.mxu0  ;;  %12990 = vmatprep.subr.bf16.mxu1 %v13939_v20  ;;  %v7901_v35 = vpop.f32.mrf.mxu1  ;;  %12973 = vmatmul.mubr.bf16.gmra.mxu0 %v8155_v24 }
 0xaa8   :  { %v7923_v17 = vpack.c.bf16 %v12787_v0, %v12786_v41 }
 0xaa9   :  { %v7421_v32 = vpop.f32.mrf.mxu0  ;;  %v12883_v34 = vpop.f32.mrf.mxu1 }
 0xaaa   :  { %v7922_v62 = vpack.c.bf16 %v7421_v32, %v7418_v2  ;;  %12991 = vmatpush3.bf16.msra.mxu1 %v13939_v20  ;;  %v8157_v58 = vpack.c.bf16 %v12883_v34, %v12882_v19 }
 0xaab   :  { %v12838_v56 = vpop.f32.mrf.mxu0  ;;  %12992 = vmatprep.subr.bf16.mxu1 %v13940_v57  ;;  %v7904_v37 = vpop.f32.mrf.mxu1 }
 0xaac   :  { %12944 = vmatprep.mubr.bf16.mxu1 %v7922_v62  ;;  %v8156_v50 = vpack.c.bf16 %v7904_v37, %v7901_v35 }
 0xaad   :  { %v7708_v46 = vpop.f32.mrf.mxu0  ;;  %12945 = vmatmul.mubr.bf16.gmra.mxu1 %v7923_v17 }
 0xaae   :  { %12993 = vmatpush3.bf16.msra.mxu1 %v13940_v57  ;;  %12976 = vmatprep.mubr.bf16.mxu0 %v8156_v50 }
 0xaaf   :  { %v12839_v31 = vpop.f32.mrf.mxu0  ;;  %12994 = vmatprep.subr.bf16.mxu1 %v13941_v33  ;;  %12977 = vmatmul.mubr.bf16.gmra.mxu0 %v8157_v58 }
 0xab0   :  { %13028 = vmatprep.mubr.bf16.mxu0 %v15466_v55  ;;  %v8143_v41 = vpack.c.bf16 %v12839_v31, %v12838_v56 }
 0xab1   :  { %v7711_v4 = vpop.f32.mrf.mxu0 }
 0xab2   :  { %v8142_v24 = vpack.c.bf16 %v7711_v4, %v7708_v46  ;;  %12995 = vmatpush3.bf16.msra.mxu1 %v13941_v33 }
 0xab3   :  { %v12842_v47 = vpop.f32.mrf.mxu0 }
 0xab4   :  { %12996 = vmatprep.mubr.bf16.mxu1 %v8142_v24 }
 0xab5   :  { %v7724_v16 = vpop.f32.mrf.mxu0  ;;  %12997 = vmatmul.mubr.bf16.vlgmr.msra.gmra.mxu1 %v8143_v41 }
 0xab7   :  { %v12843_v2 = vpop.f32.mrf.mxu0 }
 0xab8   :  { %v8145_v20 = vpack.c.bf16 %v12843_v2, %v12842_v47 }
 0xab9   :  { %v7727_v19 = vpop.f32.mrf.mxu0 }
 0xaba   :  { %v8144_v0 = vpack.c.bf16 %v7727_v19, %v7724_v16 }
 0xabb   :  { %v12846_v35 = vpop.f32.mrf.mxu0 }
 0xabc   :  { %13000 = vmatprep.mubr.bf16.mxu1 %v8144_v0 }
 0xabd   :  { %v7740_v32 = vpop.f32.mrf.mxu0  ;;  %13001 = vmatmul.mubr.bf16.gmra.mxu1 %v8145_v20 }
 0xabf   :  { %v12847_v34 = vpop.f32.mrf.mxu0 }
 0xac0   :  { %v8147_v55 = vpack.c.bf16 %v12847_v34, %v12846_v35 }
 0xac1   :  { %v7743_v62 = vpop.f32.mrf.mxu0 }
 0xac2   :  { %v8146_v17 = vpack.c.bf16 %v7743_v62, %v7740_v32 }
 0xac3   :  { %v12850_v57 = vpop.f32.mrf.mxu0 }
 0xac4   :  { %13004 = vmatprep.mubr.bf16.mxu1 %v8146_v17 }
 0xac5   :  { %v7756_v58 = vpop.f32.mrf.mxu0  ;;  %13005 = vmatmul.mubr.bf16.gmra.mxu1 %v8147_v55 }
 0xac7   :  { %v12851_v56 = vpop.f32.mrf.mxu0 }
 0xac8   :  { %v8149_v46 = vpack.c.bf16 %v12851_v56, %v12850_v57 }
 0xac9   :  { %v7759_v37 = vpop.f32.mrf.mxu0 }
 0xaca   :  { %v8148_v50 = vpack.c.bf16 %v7759_v37, %v7756_v58 }
 0xacc   :  { %13008 = vmatprep.mubr.bf16.mxu1 %v8148_v50 }
 0xacd   :  { %13009 = vmatmul.mubr.bf16.gmra.mxu1 %v8149_v46 }
 0xace   :  { %13060 = vmatprep.mubr.bf16.mxu1 %v15457_v9 }
 0xb37   :  { %v15638_v31 = vpop.f32.mrf.mxu0 }
 0xb39   :  { %v15640_v33 = vpop.f32.mrf.mxu0 }
 0xb3b   :  { %v15642_v4 = vpop.f32.mrf.mxu0 }
 0xb3d   :  { %v15644_v24 = vpop.f32.mrf.mxu0 }
 0xb3f   :  { %v15646_v41 = vpop.f32.mrf.mxu0 }
 0xb41   :  { %v15648_v47 = vpop.f32.mrf.mxu0 }
 0xb43   :  { %v12907_v16 = vpop.f32.mrf.mxu0 }
 0xb45   :  { %v15650_v2 = vpop.f32.mrf.mxu0 }
 0xb47   :  { %v12910_v19 = vpop.f32.mrf.mxu0 }
 0xb49   :  { %v7998_v0 = vpop.f32.mrf.mxu0 }
 0xb4b   :  { %v12911_v20 = vpop.f32.mrf.mxu0 }
 0xb4d   :  { %v8001_v35 = vpop.f32.mrf.mxu0 }
 0xb4f   :  { %v12914_v9 = vpop.f32.mrf.mxu0 }
 0xb51   :  { %v8014_v32 = vpop.f32.mrf.mxu0 }
 0xb53   :  { %v12915_v34 = vpop.f32.mrf.mxu0 }
 0xb55   :  { %v15652_v62 = vpop.f32.mrf.mxu1  ;;  %v8017_v17 = vpop.f32.mrf.mxu0 }
 0xb57   :  { %v15654_v55 = vpop.f32.mrf.mxu1  ;;  %v15656_v57 = vpop.f32.mrf.mxu0 }
 0xb59   :  { %v15658_v58 = vpop.f32.mrf.mxu1  ;;  %v15662_v37 = vpop.f32.mrf.mxu0 }
 0xb5b   :  { %v15660_v56 = vpop.f32.mrf.mxu1  ;;  %v15664_v11 = vpop.f32.mrf.mxu0 }
 0xb5d   :  { %v12938_v50 = vpop.f32.mrf.mxu1  ;;  %v15666_v15 = vpop.f32.mrf.mxu0 }
 0xb5f   :  { %v8079_v46 = vpop.f32.mrf.mxu1  ;;  %v15668_v7 = vpop.f32.mrf.mxu0 }
 0xb61   :  { %v12939_v26 = vpop.f32.mrf.mxu1  ;;  %v15670_v21 = vpop.f32.mrf.mxu0 }
 0xb63   :  { %v8082_v60 = vpop.f32.mrf.mxu1  ;;  %v15672_v40 = vpop.f32.mrf.mxu0 }
 0xb65   :  { %v12942_v29 = vpop.f32.mrf.mxu1  ;;  %v15674_v18 = vpop.f32.mrf.mxu0 }
 0xb66   :  { %v8104_v3 = vadd.f32 %v12942_v29, %v12910_v19 }
 0xb67   :  { %v8095_v25 = vpop.f32.mrf.mxu1 }
 0xb68   :  { %v8096_v29 = vadd.f32 %v8095_v25, %v7998_v0  ;;  %v8080_v0 = vadd.f32 %v8079_v46, %v15648_v47 }
 0xb69   :  { %v12943_v43 = vpop.f32.mrf.mxu1 }
 0xb6a   :  { %v8107_v48 = vadd.f32 %v12943_v43, %v12911_v20 }
 0xb6b   :  { %v8098_v42 = vpop.f32.mrf.mxu1 }
 0xb6d   :  { %v12946_v38 = vpop.f32.mrf.mxu1 }
 0xb6e   :  { %v8120_v28 = vadd.f32 %v12946_v38, %v12914_v9  ;;  %v15682_v38 = vpop.f32.mrf.mxu0 }
 0xb6f   :  { %v8111_v10 = vpop.f32.mrf.mxu1 }
 0xb70   :  { %v8112_v52 = vadd.f32 %v8111_v10, %v8014_v32  ;;  %v8140_v59 = vmax.f32 %v8120_v28, 0.0  ;;  %v8137_v10 = vmax.f32 %v8107_v48, 0.0  ;;  %v15691_v43 = vpop.f32.mrf.mxu0  ;;  %v8088_v48 = vadd.f32 %v12938_v50, %v15646_v41 }
 0xb71   :  { %v12947_v51 = vpop.f32.mrf.mxu1 }
 0xb72   :  { %v8123_v53 = vadd.f32 %v12947_v51, %v12915_v34  ;;  %v8138_v44 = vmax.f32 %v8112_v52, 0.0  ;;  %v8099_v51 = vadd.f32 %v8098_v42, %v8001_v35  ;;  %v12975_v25 = vpop.f32.mrf.mxu0  ;;  %v8075_v35 = vadd.f32 %v15658_v58, %v15642_v4 }
 0xb73   :  { %v8114_v8 = vpop.f32.mrf.mxu1  ;;  %v8072_v34 = vadd.f32 %v15652_v62, %v15638_v31 }
 0xb74   :  { %v8141_v61 = vmax.f32 %v8123_v53, 0.0  ;;  %v8115_v12 = vadd.f32 %v8114_v8, %v8017_v17  ;;  %v8136_v8 = vmax.f32 %v8104_v3, 0.0  ;;  %v8135_v42 = vmax.f32 %v8099_v51, 0.0  ;;  %v8227_v41 = vpop.f32.mrf.mxu0 }
 0xb75   :  { %v15676_v36 = vpop.f32.mrf.mxu1  ;;  %v8130_v17 = vmax.f32 %v8080_v0, 0.0  ;;  %v8129_v46 = vmax.f32 %v8075_v35, 0.0  ;;  %v8128_v58 = vmax.f32 %v8072_v34, 0.0 }
 0xb76   :  { %v15678_v1 = vpack.c.bf16 %v8141_v61, %v8140_v59  ;;  %v8139_v45 = vmax.f32 %v8115_v12, 0.0  ;;  %v8091_v61 = vadd.f32 %v12939_v26, %v12907_v16  ;;  %v15695_v53 = vpack.c.bf16 %v8137_v10, %v8136_v8  ;;  %v12978_v47 = vpop.f32.mrf.mxu0 }
 0xb77   :  { %v15680_v39 = vpop.f32.mrf.mxu1  ;;  %v8083_v59 = vadd.f32 %v8082_v60, %v15650_v2  ;;  %v8132_v16 = vmax.f32 %v8088_v48, 0.0  ;;  %v8067_v10 = vadd.f32 %v15660_v56, %v15644_v24  ;;  %v8064_v8 = vadd.f32 %v15654_v55, %v15640_v33 }
 0xb78   :  { %v15684_v9 = vpack.c.bf16 %v8139_v45, %v8138_v44  ;;  %13012 = vmatprep.subr.bf16.mxu0 %v15678_v1  ;;  %v8134_v45 = vmax.f32 %v8096_v29, 0.0  ;;  %v8133_v12 = vmax.f32 %v8091_v61, 0.0  ;;  %v8240_v31 = vpop.f32.mrf.mxu0  ;;  %v15730_v29 = vpack.c.bf16 %v8129_v46, %v8128_v58 }
 0xb79   :  { %v15687_v28 = vpop.f32.mrf.mxu1  ;;  %13013 = vmatpush3.bf16.msra.mxu0 %v15678_v1  ;;  %v8131_v60 = vmax.f32 %v8083_v59, 0.0  ;;  %v8127_v61 = vmax.f32 %v8067_v10, 0.0  ;;  %v8126_v24 = vmax.f32 %v8064_v8, 0.0 }
 0xb7a   :  { %13014 = vmatprep.subr.bf16.mxu0 %v15684_v9  ;;  %v15705_v19 = vpack.c.bf16 %v8135_v42, %v8134_v45  ;;  %v15716_v32 = vpack.c.bf16 %v8133_v12, %v8132_v16  ;;  %v12979_v56 = vpop.f32.mrf.mxu0 }
 0xb7b   :  { %v15693_v52 = vpop.f32.mrf.mxu1  ;;  %v15724_v51 = vpack.c.bf16 %v8131_v60, %v8130_v17  ;;  %v15734_v45 = vpack.c.bf16 %v8127_v61, %v8126_v24 }
 0xb7c   :  { %v8243_v16 = vpop.f32.mrf.mxu0 }
 0xb7d   :  { %v15697_v44 = vpop.f32.mrf.mxu1  ;;  %13015 = vmatpush3.bf16.msra.mxu0 %v15684_v9 }
 0xb7e   :  { %13016 = vmatprep.subr.bf16.mxu0 %v15695_v53 }
 0xb7f   :  { %v15702_v3 = vpop.f32.mrf.mxu1 }
 0xb81   :  { %v15707_v26 = vpop.f32.mrf.mxu1  ;;  %13017 = vmatpush3.bf16.msra.mxu0 %v15695_v53 }
 0xb82   :  { %13018 = vmatprep.subr.bf16.mxu0 %v15705_v19 }
 0xb83   :  { %v15712_v20 = vpop.f32.mrf.mxu1 }
 0xb85   :  { %v13006_v2 = vpop.f32.mrf.mxu1  ;;  %13019 = vmatpush3.bf16.msra.mxu0 %v15705_v19 }
 0xb86   :  { %13020 = vmatprep.subr.bf16.mxu0 %v15716_v32  ;;  %v8330_v46 = vadd.f32 %v13006_v2, %v15682_v38  ;;  %v8317_v38 = vadd.f32 %v15707_v26, %v15672_v40  ;;  %v8306_v40 = vadd.f32 %v15702_v3, %v15670_v21  ;;  %v8293_v21 = vadd.f32 %v15693_v52, %v15666_v15  ;;  %v13948_v52 = vld [vmem:[#allocation4 + $0xf8] sm:$0xff]  }
 0xb87   :  { %v8321_v50 = vpop.f32.mrf.mxu1 }
 0xb88   :  { %v8362_v24 = vmax.f32 %v8330_v46, 0.0  ;;  %v13954_v46 = vld [vmem:[#allocation10 + $0xd0] sm:$0xff]  }
 0xb89   :  { %v13007_v4 = vpop.f32.mrf.mxu1  ;;  %13021 = vmatpush3.bf16.msra.mxu0 %v15716_v32 }
 0xb8a   :  { %13022 = vmatprep.subr.bf16.mxu0 %v15724_v51  ;;  %v8333_v35 = vadd.f32 %v13007_v4, %v12975_v25  ;;  %v8322_v25 = vadd.f32 %v8321_v50, %v15691_v43  ;;  %v13943_v4 = vld [vmem:[#allocation4 + $0xd0] sm:$0xff]   ;;  %v8309_v43 = vadd.f32 %v15712_v20, %v15674_v18  ;;  %v8298_v18 = vadd.f32 %v15676_v36, %v15656_v57 }
 0xb8b   :  { %v8324_v62 = vpop.f32.mrf.mxu1  ;;  %v8356_v20 = vmax.f32 %v8306_v40, 0.0  ;;  %v13947_v36 = vld [vmem:[#allocation4 + $0xf0] sm:$0xff]   ;;  %v13983_v40 = vld [vmem:[#allocation9 + $0xe8] sm:$0xff]  }
 0xb8c   :  { %v8363_v8 = vmax.f32 %v8333_v35, 0.0  ;;  %v8325_v61 = vadd.f32 %v8324_v62, %v8227_v41  ;;  %v8314_v41 = vadd.f32 %v15697_v44, %v15668_v7  ;;  %v8360_v62 = vmax.f32 %v8322_v25, 0.0  ;;  %v13945_v7 = vld [vmem:[#allocation4 + $0xe0] sm:$0xff]   ;;  %v13966_v25 = vld [vmem:[#allocation10 + $0xf0] sm:$0xff]  }
 0xb8d   :  { %v13010_v42 = vpop.f32.mrf.mxu1  ;;  %13023 = vmatpush3.bf16.msra.mxu0 %v15724_v51  ;;  %v8301_v44 = vadd.f32 %v15687_v28, %v15664_v11  ;;  %v8290_v11 = vadd.f32 %v15680_v39, %v15662_v37  ;;  %v8353_v28 = vmax.f32 %v8293_v21, 0.0  ;;  %v13949_v39 = vld [vmem:[#allocation10 + $0xc0] sm:$0xff]   ;;  %v13950_v37 = vld [vmem:[#allocation22 + $0x38] sm:$0xff]  }
 0xb8e   :  { %13024 = vmatprep.subr.bf16.mxu0 %v15730_v29  ;;  %v8346_v12 = vadd.f32 %v13010_v42, %v12978_v47  ;;  %v8381_v2 = vpack.c.bf16 %v8363_v8, %v8362_v24  ;;  %v13959_v8 = vld [vmem:[#allocation10 + $0xd8] sm:$0xff]   ;;  %v13965_v24 = vld [vmem:[#allocation10 + $0xe8] sm:$0xff]  }
 0xb8f   :  { %v8337_v48 = vpop.f32.mrf.mxu1  ;;  %v8352_v35 = vmax.f32 %v8290_v11, 0.0 }
 0xb90   :  { %v8338_v33 = vadd.f32 %v8337_v48, %v8240_v31  ;;  %v8366_v60 = vmax.f32 %v8346_v12, 0.0  ;;  %v13942_v31 = vld [vmem:[#allocation4 + $0xc8] sm:$0xff]   ;;  %v8359_v48 = vmax.f32 %v8317_v38, 0.0  ;;  %v13944_v12 = vld [vmem:[#allocation4 + $0xd8] sm:$0xff]  }
 0xb91   :  { %v13011_v59 = vpop.f32.mrf.mxu1  ;;  %13025 = vmatpush3.bf16.msra.mxu0 %v15730_v29  ;;  %v8376_v15 = vpack.c.bf16 %v8353_v28, %v8352_v35  ;;  %v13969_v38 = vld [vmem:[#allocation22 + $0x8] sm:$0xff]   ;;  %v13990_v35 = vld [vmem:[#allocation24 + $0x30] sm:$0xff]  }
 0xb92   :  { %v8349_v55 = vadd.f32 %v13011_v59, %v12979_v56  ;;  %13026 = vmatprep.subr.bf16.mxu0 %v15734_v45  ;;  %v8364_v10 = vmax.f32 %v8338_v33, 0.0  ;;  %v8361_v56 = vmax.f32 %v8325_v61, 0.0  ;;  %v8358_v59 = vmax.f32 %v8314_v41, 0.0  ;;  %v13960_v61 = vld [vmem:[#allocation10 + $0xe0] sm:$0xff]   ;;  %v13974_v41 = vld [vmem:[#allocation9 + $0xc8] sm:$0xff]  }
 0xb93   :  { %v8340_v0 = vpop.f32.mrf.mxu1  ;;  %v8357_v33 = vmax.f32 %v8309_v43, 0.0  ;;  %v13978_v43 = vld [vmem:[#allocation21 + $0x28] sm:$0xff]  }
 0xb94   :  { %v8367_v34 = vmax.f32 %v8349_v55, 0.0  ;;  %v8341_v17 = vadd.f32 %v8340_v0, %v8243_v16  ;;  %v8380_v50 = vpack.c.bf16 %v8361_v56, %v8360_v62  ;;  %v8379_v26 = vpack.c.bf16 %v8359_v48, %v8358_v59  ;;  %v13946_v16 = vld [vmem:[#allocation4 + $0xe8] sm:$0xff]   ;;  %v13972_v56 = vld [vmem:[#allocation22] sm:$0xff]   ;;  %v15773_v62 = vld [vmem:[#allocation25 + $0x38] sm:$0xff]  }
 0xb95   :  { %13027 = vmatpush3.bf16.msra.mxu0 %v15734_v45  ;;  %v8355_v55 = vmax.f32 %v8301_v44, 0.0  ;;  %v8378_v3 = vpack.c.bf16 %v8357_v33, %v8356_v20  ;;  %v8354_v0 = vmax.f32 %v8298_v18, 0.0  ;;  %v13977_v48 = vld [vmem:[#allocation21 + $0x30] sm:$0xff]   ;;  %v13982_v59 = vld [vmem:[#allocation21 + $0x18] sm:$0xff]   ;;  %v13988_v18 = vld [vmem:[#allocation21] sm:$0xff]  }
 0xb96   :  { %v8383_v58 = vpack.c.bf16 %v8367_v34, %v8366_v60  ;;  %v8365_v47 = vmax.f32 %v8341_v17, 0.0  ;;  %v13951_v60 = vld [vmem:[#allocation7 + $0xc8] sm:$0xff]   ;;  %v13952_v34 = vld [vmem:[#allocation7 + $0xd0] sm:$0xff]   ;;  %v13987_v33 = vld [vmem:[#allocation9 + $0xf8] sm:$0xff]  }
 0xb97   :  { %v8377_v57 = vpack.c.bf16 %v8355_v55, %v8354_v0  ;;  %v13953_v17 = vld [vmem:[#allocation10 + $0xc8] sm:$0xff]   ;;  %v13985_v44 = vld [vmem:[#allocation21 + $0x10] sm:$0xff]   ;;  %v13989_v20 = vld [vmem:[#allocation24 + $0x38] sm:$0xff]  }
 0xb98   :  { %v8382_v42 = vpack.c.bf16 %v8365_v47, %v8364_v10  ;;  %13044 = vmatprep.subr.bf16.mxu1 %v8383_v58  ;;  %13076 = vmatprep.subr.bf16.mxu0 %v8383_v58  ;;  %v13955_v10 = vld [vmem:[#allocation22 + $0x30] sm:$0xff]   ;;  %v13957_v47 = vld [vmem:[#allocation22 + $0x28] sm:$0xff]  }
 0xb99   :  { %13029 = vmatmul.mubr.bf16.vlgmr.msra.gmra.mxu0 %v13942_v31  ;;  %13045 = vmatpush3.bf16.msra.mxu1 %v8383_v58  ;;  %v13963_v31 = vld [vmem:[#allocation22 + $0x18] sm:$0xff]  }
 0xb9a   :  { %13077 = vmatpush3.bf16.msra.mxu0 %v8383_v58  ;;  %13046 = vmatprep.subr.bf16.mxu1 %v8382_v42  ;;  %v13956_v58 = vld [vmem:[#allocation7 + $0xd8] sm:$0xff]  }
 0xb9b   :  { %13078 = vmatprep.subr.bf16.mxu0 %v8382_v42  ;;  %13032 = vmatprep.mubr.bf16.mxu0 %v13943_v4  ;;  %v13967_v4 = vld [vmem:[#allocation22 + $0x10] sm:$0xff]  }
 0xb9d   :  { %13047 = vmatpush3.bf16.msra.mxu1 %v8382_v42 }
 0xb9e   :  { %13079 = vmatpush3.bf16.msra.mxu0 %v8382_v42  ;;  %13048 = vmatprep.subr.bf16.mxu1 %v8381_v2  ;;  %v13961_v42 = vld [vmem:[#allocation22 + $0x20] sm:$0xff]  }
 0xb9f   :  { %13080 = vmatprep.subr.bf16.mxu0 %v8381_v2 }
 0xba1   :  { %13049 = vmatpush3.bf16.msra.mxu1 %v8381_v2  ;;  %13033 = vmatmul.mubr.bf16.gmra.mxu0 %v13944_v12  ;;  %v13981_v12 = vld [vmem:[#allocation21 + $0x20] sm:$0xff]  }
 0xba2   :  { %13081 = vmatpush3.bf16.msra.mxu0 %v8381_v2  ;;  %13050 = vmatprep.subr.bf16.mxu1 %v8380_v50  ;;  %v13971_v2 = vld [vmem:[#allocation10 + $0xf8] sm:$0xff]  }
 0xba3   :  { %13082 = vmatprep.subr.bf16.mxu0 %v8380_v50  ;;  %13036 = vmatprep.mubr.bf16.mxu0 %v13945_v7  ;;  %v13984_v7 = vld [vmem:[#allocation9 + $0xf0] sm:$0xff]  }
 0xba5   :  { %13051 = vmatpush3.bf16.msra.mxu1 %v8380_v50 }
 0xba6   :  { %13083 = vmatpush3.bf16.msra.mxu0 %v8380_v50  ;;  %13052 = vmatprep.subr.bf16.mxu1 %v8379_v26  ;;  %v13979_v50 = vld [vmem:[#allocation9 + $0xd8] sm:$0xff]  }
 0xba7   :  { %13084 = vmatprep.subr.bf16.mxu0 %v8379_v26 }
 0xba9   :  { %13053 = vmatpush3.bf16.msra.mxu1 %v8379_v26  ;;  %13037 = vmatmul.mubr.bf16.gmra.mxu0 %v13946_v16 }
 0xbaa   :  { %13085 = vmatpush3.bf16.msra.mxu0 %v8379_v26  ;;  %13054 = vmatprep.subr.bf16.mxu1 %v8378_v3  ;;  %v13986_v26 = vld [vmem:[#allocation21 + $0x8] sm:$0xff]  }
 0xbab   :  { %13086 = vmatprep.subr.bf16.mxu0 %v8378_v3  ;;  %13040 = vmatprep.mubr.bf16.mxu0 %v13947_v36 }
 0xbad   :  { %13055 = vmatpush3.bf16.msra.mxu1 %v8378_v3 }
 0xbae   :  { %13087 = vmatpush3.bf16.msra.mxu0 %v8378_v3  ;;  %13056 = vmatprep.subr.bf16.mxu1 %v8377_v57 }
 0xbaf   :  { %13088 = vmatprep.subr.bf16.mxu0 %v8377_v57 }
 0xbb1   :  { %13057 = vmatpush3.bf16.msra.mxu1 %v8377_v57  ;;  %13041 = vmatmul.mubr.bf16.gmra.mxu0 %v13948_v52 }
 0xbb2   :  { %13089 = vmatpush3.bf16.msra.mxu0 %v8377_v57  ;;  %13058 = vmatprep.subr.bf16.mxu1 %v8376_v15 }
 0xbb3   :  { %13090 = vmatprep.subr.bf16.mxu0 %v8376_v15  ;;  %13092 = vmatprep.mubr.bf16.mxu0 %v13949_v39 }
 0xbb5   :  { %13059 = vmatpush3.bf16.msra.mxu1 %v8376_v15 }
 0xbb6   :  { %13091 = vmatpush3.bf16.msra.mxu0 %v8376_v15  ;;  %13108 = vmatprep.subr.bf16.mxu1 %v15678_v1 }
 0xbb7   :  { %13140 = vmatprep.subr.bf16.mxu0 %v13950_v37 }
 0xbb8   :  { %13061 = vmatmul.mubr.bf16.vlgmr.msra.gmra.mxu1 %v13951_v60  ;;  %v13991_v60 = vld [vmem:[#allocation24 + $0x28] sm:$0xff]  }
 0xbb9   :  { %13109 = vmatpush3.bf16.msra.mxu1 %v15678_v1  ;;  %13064 = vmatprep.mubr.bf16.mxu1 %v13952_v34  ;;  %v13958_v1 = vld [vmem:[#allocation7 + $0xe0] sm:$0xff]  }
 0xbba   :  { %13110 = vmatprep.subr.bf16.mxu1 %v15684_v9  ;;  %13093 = vmatmul.mubr.bf16.vlgmr.msra.gmra.mxu0 %v13953_v17 }
 0xbbb   :  { %13096 = vmatprep.mubr.bf16.mxu0 %v13954_v46  ;;  %13141 = vmatpush3.bf16.msra.mxu0 %v13950_v37  ;;  %v13992_v46 = vld [vmem:[#allocation24 + $0x20] sm:$0xff]  }
 0xbbc   :  { %13142 = vmatprep.subr.bf16.mxu0 %v13955_v10 }
 0xbbd   :  { %13111 = vmatpush3.bf16.msra.mxu1 %v15684_v9  ;;  %v13962_v9 = vld [vmem:[#allocation7 + $0xe8] sm:$0xff]  }
 0xbbe   :  { %13112 = vmatprep.subr.bf16.mxu1 %v15695_v53 }
 0xbbf   :  { %13143 = vmatpush3.bf16.msra.mxu0 %v13955_v10 }
 0xbc0   :  { %13065 = vmatmul.mubr.bf16.gmra.mxu1 %v13956_v58  ;;  %13144 = vmatprep.subr.bf16.mxu0 %v13957_v47 }
 0xbc1   :  { %13113 = vmatpush3.bf16.msra.mxu1 %v15695_v53  ;;  %13068 = vmatprep.mubr.bf16.mxu1 %v13958_v1  ;;  %v13964_v53 = vld [vmem:[#allocation7 + $0xf0] sm:$0xff]  }
 0xbc2   :  { %13114 = vmatprep.subr.bf16.mxu1 %v15705_v19  ;;  %13097 = vmatmul.mubr.bf16.gmra.mxu0 %v13959_v8  ;;  %v13993_v8 = vld [vmem:[#allocation24 + $0x18] sm:$0xff]  }
 0xbc3   :  { %13100 = vmatprep.mubr.bf16.mxu0 %v13960_v61  ;;  %13145 = vmatpush3.bf16.msra.mxu0 %v13957_v47 }
 0xbc4   :  { %13146 = vmatprep.subr.bf16.mxu0 %v13961_v42 }
 0xbc5   :  { %13115 = vmatpush3.bf16.msra.mxu1 %v15705_v19  ;;  %v13968_v19 = vld [vmem:[#allocation7 + $0xf8] sm:$0xff]  }
 0xbc6   :  { %13116 = vmatprep.subr.bf16.mxu1 %v15716_v32 }
 0xbc7   :  { %13147 = vmatpush3.bf16.msra.mxu0 %v13961_v42 }
 0xbc8   :  { %13069 = vmatmul.mubr.bf16.gmra.mxu1 %v13962_v9  ;;  %13148 = vmatprep.subr.bf16.mxu0 %v13963_v31  ;;  %v13994_v9 = vld [vmem:[#allocation24 + $0x10] sm:$0xff]  }
 0xbc9   :  { %13117 = vmatpush3.bf16.msra.mxu1 %v15716_v32  ;;  %13072 = vmatprep.mubr.bf16.mxu1 %v13964_v53  ;;  %v13970_v32 = vld [vmem:[#allocation9 + $0xc0] sm:$0xff]  }
 0xbca   :  { %13118 = vmatprep.subr.bf16.mxu1 %v15724_v51  ;;  %13101 = vmatmul.mubr.bf16.gmra.mxu0 %v13965_v24 }
 0xbcb   :  { %13104 = vmatprep.mubr.bf16.mxu0 %v13966_v25  ;;  %13149 = vmatpush3.bf16.msra.mxu0 %v13963_v31 }
 0xbcc   :  { %13150 = vmatprep.subr.bf16.mxu0 %v13967_v4 }
 0xbcd   :  { %13119 = vmatpush3.bf16.msra.mxu1 %v15724_v51  ;;  %v13973_v51 = vld [vmem:[#allocation21 + $0x38] sm:$0xff]  }
 0xbce   :  { %13120 = vmatprep.subr.bf16.mxu1 %v15730_v29 }
 0xbcf   :  { %13151 = vmatpush3.bf16.msra.mxu0 %v13967_v4  ;;  %v13995_v4 = vld [vmem:[#allocation24 + $0x8] sm:$0xff]  }
 0xbd0   :  { %13073 = vmatmul.mubr.bf16.gmra.mxu1 %v13968_v19  ;;  %13152 = vmatprep.subr.bf16.mxu0 %v13969_v38 }
 0xbd1   :  { %13121 = vmatpush3.bf16.msra.mxu1 %v15730_v29  ;;  %13124 = vmatprep.mubr.bf16.mxu1 %v13970_v32  ;;  %v13976_v29 = vld [vmem:[#allocation9 + $0xd0] sm:$0xff]  }
 0xbd2   :  { %13122 = vmatprep.subr.bf16.mxu1 %v15734_v45  ;;  %13105 = vmatmul.mubr.bf16.gmra.mxu0 %v13971_v2 }
 0xbd3   :  { %13153 = vmatpush3.bf16.msra.mxu0 %v13969_v38 }
 0xbd4   :  { %13154 = vmatprep.subr.bf16.mxu0 %v13972_v56 }
 0xbd5   :  { %13123 = vmatpush3.bf16.msra.mxu1 %v15734_v45  ;;  %v13980_v45 = vld [vmem:[#allocation9 + $0xe0] sm:$0xff]  }
 0xbd6   :  { %13172 = vmatprep.subr.bf16.mxu1 %v13973_v51 }
 0xbd7   :  { %13155 = vmatpush3.bf16.msra.mxu0 %v13972_v56  ;;  %v13996_v56 = vld [vmem:[#allocation24] sm:$0xff]  }
 0xbd8   :  { %13125 = vmatmul.mubr.bf16.vlgmr.msra.gmra.mxu1 %v13974_v41  ;;  %13204 = vmatprep.subr.bf16.mxu0 %v15773_v62 }
 0xbd9   :  { %13128 = vmatprep.mubr.bf16.mxu1 %v13976_v29  ;;  %13173 = vmatpush3.bf16.msra.mxu1 %v13973_v51 }
 0xbda   :  { %13174 = vmatprep.subr.bf16.mxu1 %v13977_v48 }
 0xbdd   :  { %13175 = vmatpush3.bf16.msra.mxu1 %v13977_v48 }
 0xbde   :  { %13176 = vmatprep.subr.bf16.mxu1 %v13978_v43 }
 0xbe0   :  { %13129 = vmatmul.mubr.bf16.gmra.mxu1 %v13979_v50 }
 0xbe1   :  { %13132 = vmatprep.mubr.bf16.mxu1 %v13980_v45  ;;  %13177 = vmatpush3.bf16.msra.mxu1 %v13978_v43 }
 0xbe2   :  { %13178 = vmatprep.subr.bf16.mxu1 %v13981_v12 }
 0xbe5   :  { %13179 = vmatpush3.bf16.msra.mxu1 %v13981_v12 }
 0xbe6   :  { %13180 = vmatprep.subr.bf16.mxu1 %v13982_v59 }
 0xbe8   :  { %13133 = vmatmul.mubr.bf16.gmra.mxu1 %v13983_v40 }
 0xbe9   :  { %13136 = vmatprep.mubr.bf16.mxu1 %v13984_v7  ;;  %13181 = vmatpush3.bf16.msra.mxu1 %v13982_v59 }
 0xbea   :  { %13182 = vmatprep.subr.bf16.mxu1 %v13985_v44 }
 0xbed   :  { %13183 = vmatpush3.bf16.msra.mxu1 %v13985_v44  ;;  %v13997_v44 = vld [vmem:[#allocation25 + $0x30] sm:$0xff]  }
 0xbee   :  { %13184 = vmatprep.subr.bf16.mxu1 %v13986_v26 }
 0xbf0   :  { %13137 = vmatmul.mubr.bf16.gmra.mxu1 %v13987_v33 }
 0xbf1   :  { %13185 = vmatpush3.bf16.msra.mxu1 %v13986_v26 }
 0xbf2   :  { %13186 = vmatprep.subr.bf16.mxu1 %v13988_v18 }
 0xbf5   :  { %13187 = vmatpush3.bf16.msra.mxu1 %v13988_v18 }
 0xbf6   :  { %13236 = vmatprep.subr.bf16.mxu1 %v13989_v20 }
 0xc59   :  { %v13030_v55 = vpop.f32.mrf.mxu0 }
 0xc5b   :  { %v8418_v21 = vpop.f32.mrf.mxu0 }
 0xc5d   :  { %v13031_v3 = vpop.f32.mrf.mxu0 }
 0xc5e   :  { %v8773_v16 = vpack.c.bf16 %v13031_v3, %v13030_v55  ;;  %v13998_v3 = vld [vmem:[#allocation25 + $0x28] sm:$0xff]  }
 0xc5f   :  { %v8421_v0 = vpop.f32.mrf.mxu0 }
 0xc60   :  { %v8772_v11 = vpack.c.bf16 %v8421_v0, %v8418_v21 }
 0xc61   :  { %v13034_v36 = vpop.f32.mrf.mxu0 }
 0xc62   :  { %13188 = vmatprep.mubr.bf16.mxu1 %v8772_v11 }
 0xc63   :  { %v8434_v57 = vpop.f32.mrf.mxu0  ;;  %13189 = vmatmul.mubr.bf16.vlgmr.msra.gmra.mxu1 %v8773_v16 }
 0xc64   :  { %13237 = vmatpush3.bf16.msra.mxu1 %v13989_v20 }
 0xc65   :  { %v13035_v28 = vpop.f32.mrf.mxu0  ;;  %13238 = vmatprep.subr.bf16.mxu1 %v13990_v35 }
 0xc66   :  { %v8775_v15 = vpack.c.bf16 %v13035_v28, %v13034_v36  ;;  %v13999_v28 = vld [vmem:[#allocation25 + $0x20] sm:$0xff]  }
 0xc67   :  { %v8437_v52 = vpop.f32.mrf.mxu0 }
 0xc68   :  { %v8774_v39 = vpack.c.bf16 %v8437_v52, %v8434_v57  ;;  %13239 = vmatpush3.bf16.msra.mxu1 %v13990_v35 }
 0xc69   :  { %v13038_v37 = vpop.f32.mrf.mxu0  ;;  %13240 = vmatprep.subr.bf16.mxu1 %v13991_v60 }
 0xc6a   :  { %13192 = vmatprep.mubr.bf16.mxu1 %v8774_v39 }
 0xc6b   :  { %v8450_v34 = vpop.f32.mrf.mxu0  ;;  %13193 = vmatmul.mubr.bf16.gmra.mxu1 %v8775_v15 }
 0xc6c   :  { %13241 = vmatpush3.bf16.msra.mxu1 %v13991_v60 }
 0xc6d   :  { %v13039_v17 = vpop.f32.mrf.mxu0  ;;  %13242 = vmatprep.subr.bf16.mxu1 %v13992_v46 }
 0xc6e   :  { %v8777_v10 = vpack.c.bf16 %v13039_v17, %v13038_v37 }
 0xc6f   :  { %v8453_v58 = vpop.f32.mrf.mxu0 }
 0xc70   :  { %v8776_v47 = vpack.c.bf16 %v8453_v58, %v8450_v34  ;;  %13243 = vmatpush3.bf16.msra.mxu1 %v13992_v46  ;;  %v14000_v34 = vld [vmem:[#allocation25 + $0x18] sm:$0xff]  }
 0xc71   :  { %v13042_v1 = vpop.f32.mrf.mxu0  ;;  %13244 = vmatprep.subr.bf16.mxu1 %v13993_v8 }
 0xc72   :  { %13196 = vmatprep.mubr.bf16.mxu1 %v8776_v47 }
 0xc73   :  { %v8466_v61 = vpop.f32.mrf.mxu0  ;;  %13197 = vmatmul.mubr.bf16.gmra.mxu1 %v8777_v10 }
 0xc74   :  { %13245 = vmatpush3.bf16.msra.mxu1 %v13993_v8  ;;  %v14001_v8 = vld [vmem:[#allocation25 + $0x10] sm:$0xff]  }
 0xc75   :  { %v13043_v42 = vpop.f32.mrf.mxu0  ;;  %13246 = vmatprep.subr.bf16.mxu1 %v13994_v9 }
 0xc76   :  { %v8779_v31 = vpack.c.bf16 %v13043_v42, %v13042_v1 }
 0xc77   :  { %v8469_v53 = vpop.f32.mrf.mxu0 }
 0xc78   :  { %v13062_v24 = vpop.f32.mrf.mxu1  ;;  %v8778_v25 = vpack.c.bf16 %v8469_v53, %v8466_v61  ;;  %13247 = vmatpush3.bf16.msra.mxu1 %v13994_v9 }
 0xc79   :  { %13248 = vmatprep.subr.bf16.mxu1 %v13995_v4 }
 0xc7a   :  { %v8515_v19 = vpop.f32.mrf.mxu1  ;;  %v13094_v38 = vpop.f32.mrf.mxu0  ;;  %13200 = vmatprep.mubr.bf16.mxu1 %v8778_v25  ;;  %v14002_v25 = vld [vmem:[#allocation25 + $0x8] sm:$0xff]  }
 0xc7b   :  { %13201 = vmatmul.mubr.bf16.gmra.mxu1 %v8779_v31 }
 0xc7c   :  { %v13063_v32 = vpop.f32.mrf.mxu1  ;;  %v8612_v2 = vpop.f32.mrf.mxu0  ;;  %13249 = vmatpush3.bf16.msra.mxu1 %v13995_v4 }
 0xc7d   :  { %13250 = vmatprep.subr.bf16.mxu1 %v13996_v56  ;;  %v8781_v48 = vpack.c.bf16 %v13063_v32, %v13062_v24 }
 0xc7e   :  { %v8518_v51 = vpop.f32.mrf.mxu1  ;;  %v13095_v41 = vpop.f32.mrf.mxu0 }
 0xc7f   :  { %v8780_v29 = vpack.c.bf16 %v8518_v51, %v8515_v19  ;;  %v8999_v50 = vpack.c.bf16 %v13095_v41, %v13094_v38 }
 0xc80   :  { %v13066_v43 = vpop.f32.mrf.mxu1  ;;  %v8615_v45 = vpop.f32.mrf.mxu0  ;;  %13251 = vmatpush3.bf16.msra.mxu1 %v13996_v56  ;;  %v14003_v56 = vld [vmem:[#allocation25] sm:$0xff]  }
 0xc81   :  { %13156 = vmatprep.mubr.bf16.mxu0 %v8780_v29  ;;  %v8998_v12 = vpack.c.bf16 %v8615_v45, %v8612_v2 }
 0xc82   :  { %v8531_v59 = vpop.f32.mrf.mxu1  ;;  %13157 = vmatmul.mubr.bf16.vlgmr.msra.gmra.mxu0 %v8781_v48  ;;  %v13098_v40 = vpop.f32.mrf.mxu0 }
 0xc83   :  { %13205 = vmatpush3.bf16.msra.mxu0 %v15773_v62  ;;  %13252 = vmatprep.mubr.bf16.mxu1 %v8998_v12 }
 0xc84   :  { %v13067_v7 = vpop.f32.mrf.mxu1  ;;  %13206 = vmatprep.subr.bf16.mxu0 %v13997_v44  ;;  %v8628_v26 = vpop.f32.mrf.mxu0  ;;  %13253 = vmatmul.mubr.bf16.vlgmr.msra.gmra.mxu1 %v8999_v50 }
 0xc85   :  { %v8783_v55 = vpack.c.bf16 %v13067_v7, %v13066_v43 }
 0xc86   :  { %v8534_v33 = vpop.f32.mrf.mxu1  ;;  %v13099_v18 = vpop.f32.mrf.mxu0 }
 0xc87   :  { %v8782_v20 = vpack.c.bf16 %v8534_v33, %v8531_v59  ;;  %13207 = vmatpush3.bf16.msra.mxu0 %v13997_v44  ;;  %v9001_v16 = vpack.c.bf16 %v13099_v18, %v13098_v40 }
 0xc88   :  { %v13070_v21 = vpop.f32.mrf.mxu1  ;;  %13208 = vmatprep.subr.bf16.mxu0 %v13998_v3  ;;  %v8631_v0 = vpop.f32.mrf.mxu0 }
 0xc89   :  { %13160 = vmatprep.mubr.bf16.mxu0 %v8782_v20  ;;  %v9000_v11 = vpack.c.bf16 %v8631_v0, %v8628_v26 }
 0xc8a   :  { %v8547_v36 = vpop.f32.mrf.mxu1  ;;  %13161 = vmatmul.mubr.bf16.gmra.mxu0 %v8783_v55  ;;  %v13102_v62 = vpop.f32.mrf.mxu0 }
 0xc8b   :  { %13209 = vmatpush3.bf16.msra.mxu0 %v13998_v3  ;;  %13256 = vmatprep.mubr.bf16.mxu1 %v9000_v11 }
 0xc8c   :  { %v13071_v57 = vpop.f32.mrf.mxu1  ;;  %13210 = vmatprep.subr.bf16.mxu0 %v13999_v28  ;;  %v8644_v35 = vpop.f32.mrf.mxu0  ;;  %13257 = vmatmul.mubr.bf16.gmra.mxu1 %v9001_v16 }
 0xc8d   :  { %v8785_v37 = vpack.c.bf16 %v13071_v57, %v13070_v21 }
 0xc8e   :  { %v8550_v15 = vpop.f32.mrf.mxu1  ;;  %v13103_v52 = vpop.f32.mrf.mxu0 }
 0xc8f   :  { %v8784_v39 = vpack.c.bf16 %v8550_v15, %v8547_v36  ;;  %13211 = vmatpush3.bf16.msra.mxu0 %v13999_v28  ;;  %v9003_v17 = vpack.c.bf16 %v13103_v52, %v13102_v62 }
 0xc90   :  { %v13074_v60 = vpop.f32.mrf.mxu1  ;;  %13212 = vmatprep.subr.bf16.mxu0 %v14000_v34  ;;  %v8647_v46 = vpop.f32.mrf.mxu0 }
 0xc91   :  { %13164 = vmatprep.mubr.bf16.mxu0 %v8784_v39  ;;  %v9002_v10 = vpack.c.bf16 %v8647_v46, %v8644_v35 }
 0xc92   :  { %v8563_v58 = vpop.f32.mrf.mxu1  ;;  %13165 = vmatmul.mubr.bf16.gmra.mxu0 %v8785_v37  ;;  %v13106_v47 = vpop.f32.mrf.mxu0 }
 0xc93   :  { %13213 = vmatpush3.bf16.msra.mxu0 %v14000_v34  ;;  %13260 = vmatprep.mubr.bf16.mxu1 %v9002_v10 }
 0xc94   :  { %v13075_v1 = vpop.f32.mrf.mxu1  ;;  %13214 = vmatprep.subr.bf16.mxu0 %v14001_v8  ;;  %v8660_v61 = vpop.f32.mrf.mxu0  ;;  %13261 = vmatmul.mubr.bf16.gmra.mxu1 %v9003_v17 }
 0xc95   :  { %v8787_v53 = vpack.c.bf16 %v13075_v1, %v13074_v60 }
 0xc96   :  { %v8566_v42 = vpop.f32.mrf.mxu1  ;;  %v13107_v9 = vpop.f32.mrf.mxu0 }
 0xc97   :  { %v8786_v31 = vpack.c.bf16 %v8566_v42, %v8563_v58  ;;  %13215 = vmatpush3.bf16.msra.mxu0 %v14001_v8  ;;  %v9005_v4 = vpack.c.bf16 %v13107_v9, %v13106_v47 }
 0xc98   :  { %v13126_v24 = vpop.f32.mrf.mxu1  ;;  %13216 = vmatprep.subr.bf16.mxu0 %v14002_v25  ;;  %v8663_v19 = vpop.f32.mrf.mxu0 }
 0xc99   :  { %13168 = vmatprep.mubr.bf16.mxu0 %v8786_v31  ;;  %v9004_v38 = vpack.c.bf16 %v8663_v19, %v8660_v61 }
 0xc9a   :  { %v8709_v32 = vpop.f32.mrf.mxu1  ;;  %13169 = vmatmul.mubr.bf16.gmra.mxu0 %v8787_v53 }
 0xc9b   :  { %13217 = vmatpush3.bf16.msra.mxu0 %v14002_v25  ;;  %13264 = vmatprep.mubr.bf16.mxu1 %v9004_v38 }
 0xc9c   :  { %v13127_v2 = vpop.f32.mrf.mxu1  ;;  %13218 = vmatprep.subr.bf16.mxu0 %v14003_v56  ;;  %13265 = vmatmul.mubr.bf16.gmra.mxu1 %v9005_v4 }
 0xc9d   :  { %v9007_v29 = vpack.c.bf16 %v13127_v2, %v13126_v24 }
 0xc9e   :  { %v8712_v51 = vpop.f32.mrf.mxu1 }
 0xc9f   :  { %v9006_v41 = vpack.c.bf16 %v8712_v51, %v8709_v32  ;;  %13219 = vmatpush3.bf16.msra.mxu0 %v14003_v56 }
 0xca0   :  { %v13130_v48 = vpop.f32.mrf.mxu1 }
 0xca1   :  { %13220 = vmatprep.mubr.bf16.mxu0 %v9006_v41 }
 0xca2   :  { %v8725_v43 = vpop.f32.mrf.mxu1  ;;  %13221 = vmatmul.mubr.bf16.vlgmr.msra.gmra.mxu0 %v9007_v29 }
 0xca4   :  { %v13131_v50 = vpop.f32.mrf.mxu1 }
 0xca5   :  { %v9009_v59 = vpack.c.bf16 %v13131_v50, %v13130_v48 }
 0xca6   :  { %v8728_v45 = vpop.f32.mrf.mxu1 }
 0xca7   :  { %v9008_v12 = vpack.c.bf16 %v8728_v45, %v8725_v43 }
 0xca8   :  { %v13134_v40 = vpop.f32.mrf.mxu1 }
 0xca9   :  { %13224 = vmatprep.mubr.bf16.mxu0 %v9008_v12 }
 0xcaa   :  { %v8741_v7 = vpop.f32.mrf.mxu1  ;;  %13225 = vmatmul.mubr.bf16.gmra.mxu0 %v9009_v59 }
 0xcac   :  { %v13135_v44 = vpop.f32.mrf.mxu1 }
 0xcad   :  { %v9011_v18 = vpack.c.bf16 %v13135_v44, %v13134_v40 }
 0xcae   :  { %v8744_v26 = vpop.f32.mrf.mxu1 }
 0xcaf   :  { %v9010_v33 = vpack.c.bf16 %v8744_v26, %v8741_v7 }
 0xcb0   :  { %v13138_v20 = vpop.f32.mrf.mxu1 }
 0xcb1   :  { %13228 = vmatprep.mubr.bf16.mxu0 %v9010_v33 }
 0xcb2   :  { %v8757_v55 = vpop.f32.mrf.mxu1  ;;  %13229 = vmatmul.mubr.bf16.gmra.mxu0 %v9011_v18 }
 0xcb4   :  { %v13139_v21 = vpop.f32.mrf.mxu1 }
 0xcb5   :  { %v9013_v0 = vpack.c.bf16 %v13139_v21, %v13138_v20 }
 0xcb6   :  { %v8760_v3 = vpop.f32.mrf.mxu1 }
 0xcb7   :  { %v9012_v16 = vpack.c.bf16 %v8760_v3, %v8757_v55 }
 0xcb9   :  { %13232 = vmatprep.mubr.bf16.mxu0 %v9012_v16 }
 0xcba   :  { %13233 = vmatmul.mubr.bf16.gmra.mxu0 %v9013_v0 }
 0xd23   :  { %v13190_v11 = vpop.f32.mrf.mxu1 }
 0xd25   :  { %v8919_v36 = vpop.f32.mrf.mxu1 }
 0xd27   :  { %v13191_v62 = vpop.f32.mrf.mxu1 }
 0xd29   :  { %v8922_v57 = vpop.f32.mrf.mxu1 }
 0xd2b   :  { %v13194_v28 = vpop.f32.mrf.mxu1 }
 0xd2d   :  { %v8935_v35 = vpop.f32.mrf.mxu1 }
 0xd2f   :  { %v13195_v15 = vpop.f32.mrf.mxu1 }
 0xd31   :  { %v8938_v52 = vpop.f32.mrf.mxu1 }
 0xd33   :  { %v13198_v39 = vpop.f32.mrf.mxu1 }
 0xd35   :  { %v8951_v37 = vpop.f32.mrf.mxu1 }
 0xd37   :  { %v13199_v60 = vpop.f32.mrf.mxu1 }
 0xd39   :  { %v8954_v34 = vpop.f32.mrf.mxu1 }
 0xd3b   :  { %v13202_v17 = vpop.f32.mrf.mxu1 }
 0xd3d   :  { %v8967_v46 = vpop.f32.mrf.mxu1 }
 0xd3f   :  { %v13203_v10 = vpop.f32.mrf.mxu1 }
 0xd41   :  { %v15777_v58 = vpop.f32.mrf.mxu1 }
 0xd42   :  { %v13158_v47 = vpop.f32.mrf.mxu0 }
 0xd43   :  { %v8928_v1 = vadd.f32 %v13190_v11, %v13158_v47 }
 0xd44   :  { %v8822_v8 = vpop.f32.mrf.mxu0  ;;  %v15779_v61 = vpop.f32.mrf.mxu1 }
 0xd45   :  { %v8984_v42 = vmax.f32 %v8928_v1, 0.0  ;;  %v8920_v9 = vadd.f32 %v8919_v36, %v8822_v8 }
 0xd46   :  { %v13159_v31 = vpop.f32.mrf.mxu0  ;;  %v15784_v19 = vpop.f32.mrf.mxu1 }
 0xd47   :  { %v15782_v53 = vadd.f32 %v8984_v42, %v15506_v49  ;;  %v8982_v24 = vmax.f32 %v8920_v9, 0.0  ;;  %v8931_v25 = vadd.f32 %v13191_v62, %v13159_v31  ;;  %v16284_v31 = vld [vmem:[#allocation60_spill] sm:$0xff] }
 0xd48   :  { %v8825_v4 = vpop.f32.mrf.mxu0  ;;  %v15794_v48 = vpop.f32.mrf.mxu1 }
 0xd49   :  { %v15787_v38 = vadd.f32 %v8982_v24, %v15513_v22  ;;  %v8985_v32 = vmax.f32 %v8931_v25, 0.0  ;;  %v15789_v2 = vadd.f32 %v8922_v57, %v8825_v4 }
 0xd4a   :  { %v13162_v56 = vpop.f32.mrf.mxu0  ;;  %v15799_v40 = vpop.f32.mrf.mxu1 }
 0xd4b   :  { %v15792_v51 = vadd.f32 %v8985_v32, %v15518_v63  ;;  %v8944_v41 = vadd.f32 %v13194_v28, %v13162_v56 }
 0xd4c   :  { %v8838_v29 = vpop.f32.mrf.mxu0  ;;  %v15809_v55 = vpop.f32.mrf.mxu1 }
 0xd4d   :  { %v8988_v49 = vmax.f32 %v8944_v41, 0.0  ;;  %v8936_v43 = vadd.f32 %v8935_v35, %v8838_v29 }
 0xd4e   :  { %v13163_v50 = vpop.f32.mrf.mxu0  ;;  %v15814_v36 = vpop.f32.mrf.mxu1 }
 0xd4f   :  { %v15797_v45 = vadd.f32 %v8988_v49, %v15525_v6  ;;  %v8986_v12 = vmax.f32 %v8936_v43, 0.0  ;;  %v8947_v22 = vadd.f32 %v13195_v15, %v13163_v50 }
 0xd50   :  { %v8841_v59 = vpop.f32.mrf.mxu0 }
 0xd51   :  { %v15802_v7 = vadd.f32 %v8986_v12, %v15532_v14  ;;  %v8989_v63 = vmax.f32 %v8947_v22, 0.0  ;;  %v15804_v44 = vadd.f32 %v8938_v52, %v8841_v59  ;;  %v16286_v22 = vld [vmem:[#allocation81_spill] sm:$0xff]  ;;  %v16287_v59 = vld [vmem:[#allocation59_spill] sm:$0xff] }
 0xd52   :  { %v13166_v26 = vpop.f32.mrf.mxu0 }
 0xd53   :  { %v15807_v33 = vadd.f32 %v8989_v63, %v15537_v13  ;;  %v8960_v18 = vadd.f32 %v13198_v39, %v13166_v26  ;;  %v15824_v39 = vpop.f32.mrf.mxu1  ;;  %v4961_v63 = vadd.f32 %v16287_v59, %v16286_v22 }
 0xd54   :  { %v8854_v20 = vpop.f32.mrf.mxu0 }
 0xd55   :  { %v8992_v6 = vmax.f32 %v8960_v18, 0.0  ;;  %v8952_v21 = vadd.f32 %v8951_v37, %v8854_v20  ;;  %v15829_v42 = vpop.f32.mrf.mxu1  ;;  %v16288_v20 = vld [vmem:[#allocation79_spill] sm:$0xff] }
 0xd56   :  { %v13167_v3 = vpop.f32.mrf.mxu0 }
 0xd57   :  { %v15812_v16 = vadd.f32 %v8992_v6, %v15544_v27  ;;  %v8990_v0 = vmax.f32 %v8952_v21, 0.0  ;;  %v8963_v14 = vadd.f32 %v13199_v60, %v13167_v3  ;;  %v16289_v6 = vld [vmem:[#allocation62_spill] sm:$0xff]  ;;  %v16290_v3 = vld [vmem:[#allocation83_spill] sm:$0xff] }
 0xd58   :  { %v8857_v11 = vpop.f32.mrf.mxu0  ;;  %v2827_v21 = vadd.f32 %v16289_v6, %v16288_v20  ;;  %v16298_v20 = vld [vmem:[#allocation75_spill] sm:$0xff]  ;;  %v16299_v6 = vld [vmem:[#allocation57_spill] sm:$0xff] }
 0xd59   :  { %16280 = vst [vmem:[#allocation101_spill] sm:$0xff] %v15812_v16  ;;  %v15817_v62 = vadd.f32 %v8990_v0, %v15551_v23  ;;  %v8993_v13 = vmax.f32 %v8963_v14, 0.0  ;;  %v15819_v57 = vadd.f32 %v8954_v34, %v8857_v11  ;;  %v16291_v0 = vld [vmem:[#allocation67_spill] sm:$0xff]  ;;  %v16292_v11 = vld [vmem:[#allocation100_spill] sm:$0xff] }
 0xd5a   :  { %v13170_v28 = vpop.f32.mrf.mxu0  ;;  %v2843_v14 = vadd.f32 %v16291_v0, %v16290_v3  ;;  %v2863_v3 = vmax.f32 %v2827_v21, 0.0 }
 0xd5b   :  { %v15822_v35 = vadd.f32 %v8993_v13, %v15556_v30  ;;  %v8976_v15 = vadd.f32 %v13202_v17, %v13170_v28  ;;  %v16293_v13 = vld [vmem:[#allocation96_spill] sm:$0xff] }
 0xd5c   :  { %v8870_v52 = vpop.f32.mrf.mxu0  ;;  %v7079_v28 = vadd.f32 %v16293_v13, %v16292_v11 }
 0xd5d   :  { %16281 = vst [vmem:[#allocation102_spill] sm:$0xff] %v15822_v35  ;;  %v8996_v27 = vmax.f32 %v8976_v15, 0.0  ;;  %v8968_v37 = vadd.f32 %v8967_v46, %v8870_v52 }
 0xd5e   :  { %v13171_v60 = vpop.f32.mrf.mxu0 }
 0xd5f   :  { %v15827_v47 = vadd.f32 %v8996_v27, %v15563_v5  ;;  %v8994_v1 = vmax.f32 %v8968_v37, 0.0  ;;  %v8979_v23 = vadd.f32 %v13203_v10, %v13171_v60  ;;  %v13262_v5 = vpop.f32.mrf.mxu1  ;;  %v16294_v27 = vld [vmem:[#allocation76_spill] sm:$0xff]  ;;  %v16295_v37 = vld [vmem:[#allocation55_spill] sm:$0xff] }
 0xd60   :  { %v8873_v8 = vpop.f32.mrf.mxu0  ;;  %v4945_v60 = vadd.f32 %v16295_v37, %v16294_v27  ;;  %v16300_v37 = vld [vmem:[#allocation80_spill] sm:$0xff] }
 0xd61   :  { %16282 = vst [vmem:[#allocation103_spill] sm:$0xff] %v15827_v47  ;;  %v15832_v34 = vadd.f32 %v8994_v1, %v15571_v54  ;;  %v8997_v30 = vmax.f32 %v8979_v23, 0.0  ;;  %v15835_v17 = vadd.f32 %v15777_v58, %v8873_v8  ;;  %v9177_v4 = vpop.f32.mrf.mxu1  ;;  %v4985_v23 = vmax.f32 %v4961_v63, 0.0  ;;  %v16296_v8 = vld [vmem:[#allocation99_spill] sm:$0xff] }
 0xd62   :  { %v15837_v9 = vpop.f32.mrf.mxu0  ;;  %v15866_v47 = vadd.f32 %v16299_v6, %v16298_v20 }
 0xd63   :  { %16283 = vst [vmem:[#allocation104_spill] sm:$0xff] %v15832_v34  ;;  %v15840_v46 = vadd.f32 %v8997_v30, %v16284_v31  ;;  %v13263_v54 = vpop.f32.mrf.mxu1  ;;  %v16297_v30 = vld [vmem:[#allocation94_spill] sm:$0xff] }
 0xd64   :  { %v15842_v24 = vpop.f32.mrf.mxu0  ;;  %v7063_v31 = vadd.f32 %v16297_v30, %v16296_v8 }
 0xd65   :  { %16285 = vst [vmem:[#allocation60_spill] sm:$0xff] %v15840_v46  ;;  %v9180_v58 = vpop.f32.mrf.mxu1 }
 0xd66   :  { %v15844_v25 = vpop.f32.mrf.mxu0 }
 0xd67   :  { %v13266_v43 = vpop.f32.mrf.mxu1 }
 0xd68   :  { %v15846_v10 = vpop.f32.mrf.mxu0 }
 0xd69   :  { %v9193_v26 = vpop.f32.mrf.mxu1 }
 0xd6a   :  { %v13226_v32 = vpop.f32.mrf.mxu0 }
 0xd6b   :  { %v13267_v22 = vpop.f32.mrf.mxu1 }
 0xd6c   :  { %v15848_v56 = vpop.f32.mrf.mxu0 }
 0xd6e   :  { %v13227_v41 = vpop.f32.mrf.mxu0 }
 0xd70   :  { %v15850_v29 = vpop.f32.mrf.mxu0 }
 0xd72   :  { %v13230_v49 = vpop.f32.mrf.mxu0 }
 0xd73   :  { %v9186_v15 = vadd.f32 %v13262_v5, %v13230_v49  ;;  %v2867_v5 = vmax.f32 %v2843_v14, 0.0  ;;  %v7103_v49 = vmax.f32 %v7079_v28, 0.0 }
 0xd74   :  { %v9080_v50 = vpop.f32.mrf.mxu0 }
 0xd75   :  { %v9218_v13 = vmax.f32 %v9186_v15, 0.0  ;;  %v9178_v34 = vadd.f32 %v9177_v4, %v9080_v50  ;;  %v5017_v30 = vadd.f32 %v4985_v23, %v2867_v5  ;;  %v9170_v4 = vadd.f32 %v15809_v55, %v13226_v32  ;;  %v16302_v50 = vld [vmem:[#allocation74_spill] sm:$0xff] }
 0xd76   :  { %v13231_v12 = vpop.f32.mrf.mxu0  ;;  %v9173_v5 = vadd.f32 %v15824_v39, %v13227_v41 }
 0xd77   :  { %v9189_v59 = vadd.f32 %v13263_v54, %v13231_v12  ;;  %v7099_v54 = vmax.f32 %v7063_v31, 0.0  ;;  %v9196_v12 = vpop.f32.mrf.mxu1  ;;  %v7135_v14 = vadd.f32 %v7103_v49, %v5017_v30  ;;  %v9250_v28 = vadd.f32 %v9218_v13, %v16302_v50  ;;  %v16306_v49 = vld [vmem:[#allocation78_spill] sm:$0xff] }
 0xd78   :  { %v9083_v18 = vpop.f32.mrf.mxu0  ;;  %v9216_v15 = vmax.f32 %v9178_v34, 0.0  ;;  %v9214_v30 = vmax.f32 %v9170_v4, 0.0 }
 0xd79   :  { %v9219_v35 = vmax.f32 %v9189_v59, 0.0  ;;  %v9181_v16 = vadd.f32 %v9180_v58, %v9083_v18  ;;  %v16304_v18 = vld [vmem:[#allocation70_spill] sm:$0xff]  ;;  %v16305_v59 = vld [vmem:[#allocation53_spill] sm:$0xff]  ;;  %v15896_v41 = vmul.f32 0.25, %v9250_v28  ;;  %v16311_v28 = vld [vmem:[#allocation64_spill] sm:$0xff] }
 0xd7a   :  { %v13234_v52 = vpop.f32.mrf.mxu0 }
 0xd7b   :  { %v9202_v1 = vadd.f32 %v13266_v43, %v13234_v52  ;;  %v4981_v43 = vmax.f32 %v4945_v60, 0.0  ;;  %v16303_v60 = vld [vmem:[#allocation84_spill] sm:$0xff]  ;;  %v9217_v55 = vmax.f32 %v9181_v16, 0.0 }
 0xd7c   :  { %v9096_v46 = vpop.f32.mrf.mxu0 }
 0xd7d   :  { %v9222_v0 = vmax.f32 %v9202_v1, 0.0  ;;  %v9194_v11 = vadd.f32 %v9193_v26, %v9096_v46  ;;  %v16301_v46 = vld [vmem:[#allocation82_spill] sm:$0xff] }
 0xd7e   :  { %v13235_v27 = vpop.f32.mrf.mxu0 }
 0xd7f   :  { %v9220_v63 = vmax.f32 %v9194_v11, 0.0  ;;  %v9205_v52 = vadd.f32 %v13267_v22, %v13235_v27  ;;  %v9254_v8 = vadd.f32 %v9222_v0, %v16300_v37  ;;  %v4929_v0 = vadd.f32 %v16305_v59, %v16304_v18  ;;  %v16314_v59 = vld [vmem:[#allocation71_spill] sm:$0xff] }
 0xd80   :  { %v9099_v20 = vpop.f32.mrf.mxu0  ;;  %v5013_v11 = vadd.f32 %v4981_v43, %v2863_v3  ;;  %v9251_v27 = vadd.f32 %v9219_v35, %v16306_v49  ;;  %v9162_v3 = vadd.f32 %v15814_v36, %v15848_v56  ;;  %v16309_v43 = vld [vmem:[#allocation77_spill] sm:$0xff]  ;;  %v16317_v49 = vld [vmem:[#allocation90_spill] sm:$0xff] }
 0xd81   :  { %v9223_v6 = vmax.f32 %v9205_v52, 0.0  ;;  %v9197_v21 = vadd.f32 %v9196_v12, %v9099_v20  ;;  %v15869_v1 = vmul.f32 0.25, %v9254_v8  ;;  %v9252_v26 = vadd.f32 %v9220_v63, %v16301_v46  ;;  %v16307_v63 = vld [vmem:[#allocation98_spill] sm:$0xff]  ;;  %v16308_v52 = vld [vmem:[#allocation92_spill] sm:$0xff] }
 0xd82   :  { %v7047_v37 = vadd.f32 %v16308_v52, %v16307_v63  ;;  %v7131_v8 = vadd.f32 %v7099_v54, %v5013_v11  ;;  %v9248_v39 = vadd.f32 %v9216_v15, %v16309_v43  ;;  %v4977_v12 = vmax.f32 %v4929_v0, 0.0  ;;  %v16312_v15 = vld [vmem:[#allocation49_spill] sm:$0xff]  ;;  %v16315_v0 = vld [vmem:[#allocation52_spill] sm:$0xff] }
 0xd83   :  { %v9255_v22 = vadd.f32 %v9223_v6, %v16303_v60  ;;  %v9221_v23 = vmax.f32 %v9197_v21, 0.0  ;;  %v9529_v31 = vmul.f32 %v15869_v1, %v15869_v1  ;;  %v15877_v58 = vmul.f32 0.25, %v9252_v26 }
 0xd84   :  { %v9215_v20 = vmax.f32 %v9173_v5, 0.0  ;;  %v9165_v6 = vadd.f32 %v15829_v42, %v15850_v29  ;;  %v9249_v54 = vadd.f32 %v9217_v55, %v7131_v8  ;;  %v15902_v56 = vmul.f32 0.25, %v9251_v27  ;;  %v16316_v5 = vld [vmem:[#allocation97_spill] sm:$0xff]  ;;  %v16320_v8 = vld [vmem:[#allocation40_spill] sm:$0xff] }
 0xd85   :  { %v9253_v32 = vadd.f32 %v9221_v23, %v7135_v14  ;;  %9559 = vadd.xlane.f32.xlu0 %v9529_v31  ;;  %v9527_v34 = vmul.f32 %v15877_v58, %v15877_v58  ;;  %v15885_v13 = vmul.f32 0.25, %v9255_v22  ;;  %v2859_v21 = vmax.f32 %v15866_v47, 0.0  ;;  %v16310_v14 = vld [vmem:[#allocation69_spill] sm:$0xff] }
 0xd86   :  { %v7095_v46 = vmax.f32 %v7047_v37, 0.0  ;;  %v9154_v26 = vadd.f32 %v15779_v61, %v15837_v9  ;;  %v9246_v4 = vadd.f32 %v9214_v30, %v16310_v14  ;;  %v9212_v50 = vmax.f32 %v9162_v3, 0.0  ;;  %v16313_v23 = vld [vmem:[#allocation73_spill] sm:$0xff]  ;;  %v16319_v37 = vld [vmem:[#allocation48_spill] sm:$0xff]  ;;  %v16325_v14 = vld [vmem:[#allocation63_spill] sm:$0xff] }
 0xd87   :  { %9555 = vadd.xlane.f32.xlu1 %v9527_v34  ;;  %v9530_v16 = vmul.f32 %v15885_v13, %v15885_v13  ;;  %v15894_v35 = vmul.f32 0.25, %v9253_v32  ;;  %v9525_v42 = vmul.f32 %v15896_v41, %v15896_v41  ;;  %v15910_v29 = vmul.f32 0.25, %v9248_v39 }
 0xd88   :  { %v4913_v60 = vadd.f32 %v16312_v15, %v16311_v28  ;;  %v5009_v22 = vadd.f32 %v4977_v12, %v2859_v21  ;;  %v9157_v47 = vadd.f32 %v15794_v48, %v15844_v25  ;;  %v9247_v31 = vadd.f32 %v9215_v20, %v16313_v23  ;;  %v16318_v25 = vld [vmem:[#allocation72_spill] sm:$0xff]  ;;  %v16321_v12 = vld [vmem:[#allocation51_spill] sm:$0xff]  ;;  %v16324_v21 = vld [vmem:[#allocation85_spill] sm:$0xff] }
 0xd89   :  { %9561 = vadd.xlane.f32.xlu0 %v9530_v16  ;;  %v9528_v36 = vmul.f32 %v15894_v35, %v15894_v35  ;;  %v9213_v18 = vmax.f32 %v9165_v6, 0.0  ;;  %v9526_v61 = vmul.f32 %v15902_v56, %v15902_v56  ;;  %v15919_v9 = vmul.f32 0.25, %v9249_v54  ;;  %v16322_v20 = vld [vmem:[#allocation44_spill] sm:$0xff] }
 0xd8a   :  { %v2795_v11 = vadd.f32 %v16315_v0, %v16314_v59  ;;  %v7031_v27 = vadd.f32 %v16317_v49, %v16316_v5  ;;  %v7127_v55 = vadd.f32 %v7095_v46, %v5009_v22  ;;  %v9210_v32 = vmax.f32 %v9154_v26, 0.0  ;;  %v16326_v15 = vld [vmem:[#allocation68_spill] sm:$0xff]  ;;  %v16327_v59 = vld [vmem:[#allocation65_spill] sm:$0xff] }
 0xd8b   :  { %9557 = vadd.xlane.f32.xlu1 %v9528_v36  ;;  %v9146_v48 = vadd.f32 %v15784_v19, %v15842_v24  ;;  %v9244_v34 = vadd.f32 %v9212_v50, %v16318_v25  ;;  %v9523_v63 = vmul.f32 %v15910_v29, %v15910_v29  ;;  %v15930_v52 = vmul.f32 0.25, %v9246_v4  ;;  %v16323_v36 = vld [vmem:[#allocation89_spill] sm:$0xff] }
 0xd8c   :  { %v4687_v30 = vadd.f32 %v16320_v8, %v16319_v37  ;;  %v4973_v3 = vmax.f32 %v4913_v60, 0.0  ;;  %v9211_v43 = vmax.f32 %v9157_v47, 0.0  ;;  %v9149_v39 = vadd.f32 %v15799_v40, %v15846_v10  ;;  %v16330_v37 = vld [vmem:[#allocation56_spill] sm:$0xff]  ;;  %v16331_v8 = vld [vmem:[#allocation45_spill] sm:$0xff] }
 0xd8d   :  { %9551 = vadd.xlane.f32.xlu0 %v9525_v42  ;;  %v9245_v16 = vadd.f32 %v9213_v18, %v7127_v55  ;;  %v9524_v19 = vmul.f32 %v15919_v9, %v15919_v9  ;;  %v15938_v24 = vmul.f32 0.25, %v9247_v31  ;;  %v2473_v6 = vadd.f32 %v16322_v20, %v16321_v12  ;;  %v16329_v55 = vld [vmem:[#allocation41_spill] sm:$0xff] }
 0xd8e   :  { %v2855_v54 = vmax.f32 %v2795_v11, 0.0  ;;  %v6805_v46 = vadd.f32 %v16324_v21, %v16323_v36  ;;  %v7091_v26 = vmax.f32 %v7031_v27, 0.0  ;;  %v9242_v4 = vadd.f32 %v9210_v32, %v16325_v14  ;;  %v16328_v27 = vld [vmem:[#allocation50_spill] sm:$0xff] }
 0xd8f   :  { %9553 = vadd.xlane.f32.xlu1 %v9526_v61  ;;  %v9208_v50 = vmax.f32 %v9146_v48, 0.0  ;;  %v9521_v40 = vmul.f32 %v15930_v52, %v15930_v52  ;;  %v15947_v10 = vmul.f32 0.25, %v9244_v34  ;;  %v4747_v42 = vmax.f32 %v4687_v30, 0.0  ;;  %v16334_v14 = vld [vmem:[#allocation54_spill] sm:$0xff] }
 0xd90   :  { %v5005_v28 = vadd.f32 %v4973_v3, %v2855_v54  ;;  %v9243_v60 = vadd.f32 %v9211_v43, %v16326_v15  ;;  %v9209_v22 = vmax.f32 %v9149_v39, 0.0  ;;  %v9522_v47 = vmul.f32 %v15938_v24, %v15938_v24  ;;  %v16332_v43 = vld [vmem:[#allocation91_spill] sm:$0xff]  ;;  %v16333_v39 = vld [vmem:[#allocation86_spill] sm:$0xff] }
 0xd91   :  { %9547 = vadd.xlane.f32.xlu0 %v9523_v63  ;;  %v15952_v23 = vmul.f32 0.25, %v9245_v16  ;;  %v2533_v31 = vmax.f32 %v2473_v6, 0.0  ;;  %v6865_v18 = vmax.f32 %v6805_v46, 0.0  ;;  %v9240_v0 = vadd.f32 %v9208_v50, %v16327_v59 }
 0xd92   :  { %v7123_v61 = vadd.f32 %v7091_v26, %v5005_v28  ;;  %v9519_v11 = vmul.f32 %v15947_v10, %v15947_v10  ;;  %v15957_v5 = vmul.f32 0.25, %v9242_v4  ;;  %v4703_v32 = vadd.f32 %v16329_v55, %v16328_v27  ;;  %v16335_v4 = vld [vmem:[#allocation42_spill] sm:$0xff] }
 0xd93   :  { %9549 = vadd.xlane.f32.xlu1 %v9524_v19  ;;  %v4989_v49 = vadd.f32 %v4747_v42, %v2533_v31  ;;  %v8983_v48 = vmax.f32 %v15789_v2, 0.0  ;;  %v9520_v34 = vmul.f32 %v15952_v23, %v15952_v23  ;;  %v15964_v63 = vmul.f32 0.25, %v9243_v60  ;;  %v16336_v60 = vld [vmem:[#allocation61_spill] sm:$0xff] }
 0xd94   :  { %v9241_v25 = vadd.f32 %v9209_v22, %v7123_v61  ;;  %v2489_v30 = vadd.f32 %v16331_v8, %v16330_v37  ;;  %v6821_v16 = vadd.f32 %v16333_v39, %v16332_v43  ;;  %v9517_v19 = vmul.f32 %v15957_v5, %v15957_v5  ;;  %v16337_v22 = vld [vmem:[#allocation46_spill] sm:$0xff]  ;;  %v16339_v61 = vld [vmem:[#allocation87_spill] sm:$0xff] }
 0xd95   :  { %9543 = vadd.xlane.f32.xlu0 %v9521_v40  ;;  %v7107_v3 = vadd.f32 %v6865_v18, %v4989_v49  ;;  %v15972_v12 = vmul.f32 0.25, %v9240_v0  ;;  %v4751_v2 = vmax.f32 %v4703_v32, 0.0  ;;  %v9518_v6 = vmul.f32 %v15964_v63, %v15964_v63  ;;  %v16338_v18 = vld [vmem:[#allocation93_spill] sm:$0xff]  ;;  %v16341_v37 = vld [vmem:[#allocation43_spill] sm:$0xff]  ;;  %v16342_v43 = vld [vmem:[#allocation66_spill] sm:$0xff] }
 0xd96   :  { %v15976_v54 = vmul.f32 0.25, %v9241_v25  ;;  %v2537_v36 = vmax.f32 %v2489_v30, 0.0  ;;  %v6869_v21 = vmax.f32 %v6821_v16, 0.0  ;;  %v15981_v26 = vmul.f32 0.25, %v15787_v38  ;;  %v16343_v39 = vld [vmem:[#allocation47_spill] sm:$0xff] }
 0xd97   :  { %9545 = vadd.xlane.f32.xlu1 %v9522_v47  ;;  %v9225_v20 = vadd.f32 %v8983_v48, %v7107_v3  ;;  %v9515_v46 = vmul.f32 %v15972_v12, %v15972_v12  ;;  %v4719_v50 = vadd.f32 %v16335_v4, %v16334_v14  ;;  %v8987_v42 = vmax.f32 %v15804_v44, 0.0 }
 0xd98   :  { %v4993_v40 = vadd.f32 %v4751_v2, %v2537_v36  ;;  %v9516_v28 = vmul.f32 %v15976_v54, %v15976_v54  ;;  %v2505_v47 = vadd.f32 %v16337_v22, %v16336_v60  ;;  %v6837_v38 = vadd.f32 %v16339_v61, %v16338_v18  ;;  %v16344_v2 = vld [vmem:[#allocation95_spill] sm:$0xff] }
 0xd99   :  { %9539 = vadd.xlane.f32.xlu0 %v9519_v11  ;;  %v15988_v15 = vmul.f32 0.25, %v9225_v20  ;;  %v9419_v59 = vmul.f32 %v15981_v26, %v15981_v26  ;;  %v15997_v0 = vmul.f32 0.25, %v15782_v53  ;;  %v4755_v44 = vmax.f32 %v4719_v50, 0.0  ;;  %v16345_v20 = vld [vmem:[#allocation88_spill] sm:$0xff] }
 0xd9a   :  { %v7111_v31 = vadd.f32 %v6869_v21, %v4993_v40  ;;  %v16002_v27 = vmul.f32 0.25, %v15792_v51  ;;  %v2541_v55 = vmax.f32 %v2505_v47, 0.0  ;;  %v6873_v32 = vmax.f32 %v6837_v38, 0.0 }
 0xd9b   :  { %9541 = vadd.xlane.f32.xlu1 %v9520_v34  ;;  %v9420_v49 = vmul.f32 %v15988_v15, %v15988_v15  ;;  %v9421_v48 = vmul.f32 %v15997_v0, %v15997_v0  ;;  %v16007_v25 = vmul.f32 0.25, %v15802_v7  ;;  %v16340_v34 = vld [vmem:[#allocation58_spill] sm:$0xff]  ;;  %v8991_v30 = vmax.f32 %v15819_v57, 0.0 }
 0xd9c   :  { %v9229_v11 = vadd.f32 %v8987_v42, %v7111_v31  ;;  %v4997_v53 = vadd.f32 %v4755_v44, %v2541_v55  ;;  %v4735_v8 = vadd.f32 %v16341_v37, %v16340_v34  ;;  %v9422_v51 = vmul.f32 %v16002_v27, %v16002_v27  ;;  %v16346_v31 = vld [vmem:[#allocation101_spill] sm:$0xff]  ;;  %v16348_v44 = vld [vmem:[#allocation104_spill] sm:$0xff] }
 0xd9d   :  { %9535 = vadd.xlane.f32.xlu0 %v9517_v19  ;;  %v2521_v16 = vadd.f32 %v16343_v39, %v16342_v43  ;;  %v6853_v7 = vadd.f32 %v16345_v20, %v16344_v2  ;;  %v16023_v36 = vmul.f32 0.25, %v15797_v45  ;;  %v16028_v14 = vmul.f32 0.25, %v15807_v33  ;;  %v16350_v37 = vld [vmem:[#allocation60_spill] sm:$0xff] }
 0xd9e   :  { %v16014_v3 = vmul.f32 0.25, %v9229_v11  ;;  %v7115_v19 = vadd.f32 %v6873_v32, %v4997_v53  ;;  %v4759_v57 = vmax.f32 %v4735_v8, 0.0  ;;  %v16033_v42 = vmul.f32 0.25, %v15817_v62 }
 0xd9f   :  { %9537 = vadd.xlane.f32.xlu1 %v9518_v6  ;;  %v9423_v6 = vmul.f32 %v16007_v25, %v16007_v25  ;;  %v2545_v4 = vmax.f32 %v2521_v16, 0.0  ;;  %v6877_v50 = vmax.f32 %v6853_v7, 0.0  ;;  %v9425_v40 = vmul.f32 %v16023_v36, %v16023_v36 }
 0xda0   :  { %v9233_v21 = vadd.f32 %v8991_v30, %v7115_v19  ;;  %v9426_v60 = vmul.f32 %v16028_v14, %v16028_v14  ;;  %v9427_v47 = vmul.f32 %v16033_v42, %v16033_v42  ;;  %v16043_v18 = vmul.f32 0.25, %v16346_v31 }
 0xda1   :  { %9531 = vadd.xlane.f32.xlu0 %v9515_v46  ;;  %v9424_v46 = vmul.f32 %v16014_v3, %v16014_v3  ;;  %v5001_v45 = vadd.f32 %v4759_v57, %v2545_v4  ;;  %v16053_v11 = vmul.f32 0.25, %v16348_v44  ;;  %v16067_v8 = vmul.f32 0.25, %v16350_v37 }
 0xda2   :  { %v16038_v22 = vmul.f32 0.25, %v9233_v21 }
 0xda3   :  { %9533 = vadd.xlane.f32.xlu1 %v9516_v28  ;;  %v8995_v28 = vmax.f32 %v15835_v17, 0.0  ;;  %v7119_v33 = vadd.f32 %v6877_v50, %v5001_v45  ;;  %v16347_v17 = vld [vmem:[#allocation102_spill] sm:$0xff]  ;;  %v9431_v32 = vmul.f32 %v16053_v11, %v16053_v11 }
 0xda4   :  { %v9428_v62 = vmul.f32 %v16038_v22, %v16038_v22  ;;  %v16048_v38 = vmul.f32 0.25, %v16347_v17 }
 0xda5   :  { %9435 = vadd.xlane.f32.xlu0 %v9419_v59  ;;  %v9237_v61 = vadd.f32 %v8995_v28, %v7119_v33  ;;  %v9429_v59 = vmul.f32 %v16043_v18, %v16043_v18 }
 0xda7   :  { %9437 = vadd.xlane.f32.xlu1 %v9420_v49  ;;  %v9430_v49 = vmul.f32 %v16048_v38, %v16048_v38  ;;  %v16057_v55 = vmul.f32 0.25, %v9237_v61 }
 0xda9   :  { %9439 = vadd.xlane.f32.xlu0 %v9421_v48  ;;  %v16349_v48 = vld [vmem:[#allocation103_spill] sm:$0xff]  ;;  %v9432_v34 = vmul.f32 %v16057_v55, %v16057_v55 }
 0xdaa   :  { %v16062_v53 = vmul.f32 0.25, %v16349_v48 }
 0xdab   :  { %9441 = vadd.xlane.f32.xlu1 %v9422_v51  ;;  %v9434_v51 = vmul.f32 %v16067_v8, %v16067_v8 }
 0xdac   :  { %v9433_v30 = vmul.f32 %v16062_v53, %v16062_v53 }
 0xdad   :  { %9443 = vadd.xlane.f32.xlu0 %v9423_v6 }
 0xdaf   :  { %9445 = vadd.xlane.f32.xlu1 %v9424_v46 }
 0xdb1   :  { %9447 = vadd.xlane.f32.xlu0 %v9425_v40 }
 0xdb3   :  { %9449 = vadd.xlane.f32.xlu1 %v9426_v60 }
 0xdb5   :  { %9451 = vadd.xlane.f32.xlu0 %v9427_v47 }
 0xdb7   :  { %9453 = vadd.xlane.f32.xlu1 %v9428_v62 }
 0xdb9   :  { %9455 = vadd.xlane.f32.xlu0 %v9429_v59 }
 0xdbb   :  { %9457 = vadd.xlane.f32.xlu1 %v9430_v49 }
 0xdbd   :  { %9459 = vadd.xlane.f32.xlu0 %v9431_v32 }
 0xdbf   :  { %9461 = vadd.xlane.f32.xlu1 %v9432_v34 }
 0xdc1   :  { %9463 = vadd.xlane.f32.xlu0 %v9433_v30 }
 0xdc3   :  { %9465 = vadd.xlane.f32.xlu1 %v9434_v51 }
 0xe0e   :  { %v9560_v43 = vpop.xlane.xlu0 %9559 }
 0xe0f   :  { %v9577_v39 = vmax.f32 %v9560_v43, 1e-24 }
 0xe10   :  { %v9556_v16 = vpop.xlane.xlu1 %9555 }
 0xe11   :  { %v9575_v19 = vmax.f32 %v9556_v16, 1e-24  ;;  %13576 = vrsqrt.f32 %v9577_v39 }
 0xe12   :  { %v9562_v2 = vpop.xlane.xlu0 %9561 }
 0xe13   :  { %v9578_v20 = vmax.f32 %v9562_v2, 1e-24  ;;  %13578 = vrsqrt.f32 %v9575_v19 }
 0xe14   :  { %v9558_v7 = vpop.xlane.xlu1 %9557 }
 0xe15   :  { %13580 = vrsqrt.f32 %v9578_v20  ;;  %v9576_v6 = vmax.f32 %v9558_v7, 1e-24 }
 0xe16   :  { %v9552_v57 = vpop.xlane.xlu0 %9551 }
 0xe17   :  { %13582 = vrsqrt.f32 %v9576_v6  ;;  %v9573_v46 = vmax.f32 %v9552_v57, 1e-24 }
 0xe18   :  { %v9554_v21 = vpop.xlane.xlu1 %9553 }
 0xe19   :  { %v9574_v4 = vmax.f32 %v9554_v21, 1e-24 }
 0xe1a   :  { %v9548_v50 = vpop.xlane.xlu0 %9547 }
 0xe1b   :  { %13584 = vrsqrt.f32 %v9574_v4  ;;  %v9571_v31 = vmax.f32 %v9548_v50, 1e-24 }
 0xe1c   :  { %v9550_v40 = vpop.xlane.xlu1 %9549  ;;  %13586 = vrsqrt.f32 %v9573_v46 }
 0xe1d   :  { %v9572_v28 = vmax.f32 %v9550_v40, 1e-24 }
 0xe1e   :  { %v9544_v45 = vpop.xlane.xlu0 %9543  ;;  %v13577_v60 = vpop.eup %13576 }
 0xe1f   :  { %13588 = vrsqrt.f32 %v9572_v28  ;;  %v9609_v17 = vmul.f32 %v13577_v60, %v15869_v1  ;;  %v9569_v16 = vmax.f32 %v9544_v45, 1e-24 }
 0xe20   :  { %v9546_v33 = vpop.xlane.xlu1 %9545  ;;  %v13579_v47 = vpop.eup %13578  ;;  %13590 = vrsqrt.f32 %v9571_v31 }
 0xe21   :  { %v9607_v48 = vmul.f32 %v13579_v47, %v15877_v58  ;;  %v9570_v30 = vmax.f32 %v9546_v33, 1e-24 }
 0xe22   :  { %v13581_v61 = vpop.eup %13580  ;;  %v9540_v62 = vpop.xlane.xlu0 %9539 }
 0xe23   :  { %v9610_v59 = vmul.f32 %v13581_v61, %v15885_v13  ;;  %13592 = vrsqrt.f32 %v9570_v30  ;;  %v9567_v46 = vmax.f32 %v9540_v62, 1e-24 }
 0xe24   :  { %v13583_v44 = vpop.eup %13582  ;;  %v9542_v49 = vpop.xlane.xlu1 %9541  ;;  %13594 = vrsqrt.f32 %v9569_v16 }
 0xe25   :  { %v9626_v32 = vpack.c.bf16 %v9610_v59, %v9609_v17  ;;  %v9608_v34 = vmul.f32 %v13583_v44, %v15894_v35  ;;  %v9568_v20 = vmax.f32 %v9542_v49, 1e-24 }
 0xe26   :  { %v9536_v37 = vpop.xlane.xlu0 %9535 }
 0xe27   :  { %13268 = vmatprep.subr.bf16.mxu0 %v9626_v32  ;;  %v9625_v51 = vpack.c.bf16 %v9608_v34, %v9607_v48  ;;  %v9565_v60 = vmax.f32 %v9536_v37, 1e-24 }
 0xe28   :  { %v13585_v43 = vpop.eup %13584  ;;  %13269 = vmatpush3.bf16.xpose.msra.mxu0 %v9626_v32  ;;  %v9538_v39 = vpop.xlane.xlu1 %9537 }
 0xe29   :  { %13270 = vmatprep.subr.bf16.mxu0 %v9625_v51  ;;  %v13587_v1 = vpop.eup %13586  ;;  %v9606_v13 = vmul.f32 %v13585_v43, %v15902_v56 }
 0xe2a   :  { %v9532_v19 = vpop.xlane.xlu0 %9531  ;;  %v9605_v58 = vmul.f32 %v13587_v1, %v15896_v41  ;;  %v9566_v41 = vmax.f32 %v9538_v39, 1e-24 }
 0xe2b   :  { %v9563_v49 = vmax.f32 %v9532_v19, 1e-24 }
 0xe2c   :  { %v9534_v2 = vpop.xlane.xlu1 %9533  ;;  %v9624_v6 = vpack.c.bf16 %v9606_v13, %v9605_v58  ;;  %v13589_v57 = vpop.eup %13588 }
 0xe2d   :  { %v13591_v50 = vpop.eup %13590  ;;  %v9604_v56 = vmul.f32 %v13589_v57, %v15919_v9  ;;  %v9564_v9 = vmax.f32 %v9534_v2, 1e-24 }
 0xe2e   :  { %v9436_v35 = vpop.xlane.xlu0 %9435  ;;  %v9603_v40 = vmul.f32 %v13591_v50, %v15910_v29 }
 0xe2f   :  { %v9467_v7 = vmax.f32 %v9436_v35, 1e-24 }
 0xe30   :  { %13271 = vmatpush3.bf16.xpose.msra.mxu0 %v9625_v51  ;;  %v9438_v21 = vpop.xlane.xlu1 %9437  ;;  %v9623_v45 = vpack.c.bf16 %v9604_v56, %v9603_v40  ;;  %v13593_v28 = vpop.eup %13592 }
 0xe31   :  { %13596 = vrsqrt.f32 %v9467_v7  ;;  %v9468_v4 = vmax.f32 %v9438_v21, 1e-24  ;;  %13272 = vmatprep.subr.bf16.mxu0 %v9624_v6  ;;  %v13595_v33 = vpop.eup %13594  ;;  %v9602_v47 = vmul.f32 %v13593_v28, %v15938_v24 }
 0xe32   :  { %13598 = vrsqrt.f32 %v9568_v20  ;;  %v9601_v61 = vmul.f32 %v13595_v33, %v15930_v52  ;;  %v9440_v59 = vpop.xlane.xlu0 %9439 }
 0xe33   :  { %13600 = vrsqrt.f32 %v9468_v4  ;;  %v9469_v58 = vmax.f32 %v9440_v59, 1e-24 }
 0xe34   :  { %13602 = vrsqrt.f32 %v9567_v46  ;;  %v9442_v31 = vpop.xlane.xlu1 %9441  ;;  %v9622_v44 = vpack.c.bf16 %v9602_v47, %v9601_v61 }
 0xe35   :  { %13604 = vrsqrt.f32 %v9566_v41  ;;  %v9470_v19 = vmax.f32 %v9442_v31, 1e-24 }
 0xe36   :  { %13606 = vrsqrt.f32 %v9565_v60  ;;  %v9444_v52 = vpop.xlane.xlu0 %9443 }
 0xe37   :  { %13608 = vrsqrt.f32 %v9564_v9  ;;  %v9471_v7 = vmax.f32 %v9444_v52, 1e-24 }
 0xe38   :  { %13273 = vmatpush3.bf16.xpose.msra.mxu0 %v9624_v6  ;;  %v9446_v24 = vpop.xlane.xlu1 %9445  ;;  %13610 = vrsqrt.f32 %v9563_v49 }
 0xe39   :  { %13274 = vmatprep.subr.bf16.mxu0 %v9623_v45  ;;  %v9472_v2 = vmax.f32 %v9446_v24, 1e-24  ;;  %13612 = vrsqrt.f32 %v9470_v19 }
 0xe3b   :  { %13614 = vrsqrt.f32 %v9472_v2 }
 0xe3c   :  { %v9450_v16 = vpop.xlane.xlu1 %9449  ;;  %13616 = vrsqrt.f32 %v9469_v58 }
 0xe3d   :  { %13618 = vrsqrt.f32 %v9471_v7 }
 0xe3e   :  { %v13597_v62 = vpop.eup %13596 }
 0xe3f   :  { %v13599_v17 = vpop.eup %13598  ;;  %v9499_v32 = vmul.f32 %v13597_v62, %v15981_v26  ;;  %v9448_v26 = vpop.xlane.xlu0 %9447 }
 0xe40   :  { %v13601_v29 = vpop.eup %13600  ;;  %13275 = vmatpush3.bf16.xpose.msra.mxu0 %v9623_v45  ;;  %v9600_v30 = vmul.f32 %v13599_v17, %v15952_v23  ;;  %v9454_v23 = vpop.xlane.xlu1 %9453  ;;  %v9473_v4 = vmax.f32 %v9448_v26, 1e-24 }
 0xe41   :  { %13276 = vmatprep.subr.bf16.mxu0 %v9622_v44  ;;  %v9500_v48 = vmul.f32 %v13601_v29, %v15988_v15  ;;  %v13603_v34 = vpop.eup %13602  ;;  %v9476_v46 = vmax.f32 %v9454_v23, 1e-24 }
 0xe42   :  { %v9599_v51 = vmul.f32 %v13603_v34, %v15947_v10  ;;  %v13605_v39 = vpop.eup %13604 }
 0xe43   :  { %v9611_v37 = vpack.c.bf16 %v9500_v48, %v9499_v32  ;;  %v13607_v1 = vpop.eup %13606  ;;  %v9598_v15 = vmul.f32 %v13605_v39, %v15964_v63  ;;  %v9452_v10 = vpop.xlane.xlu0 %9451  ;;  %v9474_v63 = vmax.f32 %v9450_v16, 1e-24 }
 0xe44   :  { %v9621_v43 = vpack.c.bf16 %v9600_v30, %v9599_v51  ;;  %v9597_v13 = vmul.f32 %v13607_v1, %v15957_v5  ;;  %v13609_v35 = vpop.eup %13608  ;;  %v9458_v21 = vpop.xlane.xlu1 %9457  ;;  %v9475_v40 = vmax.f32 %v9452_v10, 1e-24 }
 0xe45   :  { %13284 = vmatprep.mubr.bf16.mxu0 %v9611_v37  ;;  %v13611_v6 = vpop.eup %13610  ;;  %v9596_v57 = vmul.f32 %v13609_v35, %v15976_v54  ;;  %13620 = vrsqrt.f32 %v9474_v63  ;;  %v9478_v45 = vmax.f32 %v9458_v21, 1e-24 }
 0xe46   :  { %v9620_v20 = vpack.c.bf16 %v9598_v15, %v9597_v13  ;;  %v9595_v5 = vmul.f32 %v13611_v6, %v15972_v12  ;;  %13622 = vrsqrt.f32 %v9476_v46  ;;  %v13613_v54 = vpop.eup %13612 }
 0xe47   :  { %v9456_v50 = vpop.xlane.xlu0 %9455  ;;  %13624 = vrsqrt.f32 %v9473_v4  ;;  %v9502_v62 = vmul.f32 %v13613_v54, %v16002_v27 }
 0xe48   :  { %13277 = vmatpush3.bf16.xpose.msra.mxu0 %v9622_v44  ;;  %v9619_v56 = vpack.c.bf16 %v9596_v57, %v9595_v5  ;;  %v9462_v41 = vpop.xlane.xlu1 %9461  ;;  %13626 = vrsqrt.f32 %v9475_v40  ;;  %v13615_v33 = vpop.eup %13614  ;;  %v9477_v47 = vmax.f32 %v9456_v50, 1e-24 }
 0xe49   :  { %13278 = vmatprep.subr.bf16.mxu0 %v9621_v43  ;;  %v9480_v60 = vmax.f32 %v9462_v41, 1e-24  ;;  %v13617_v31 = vpop.eup %13616  ;;  %13628 = vrsqrt.f32 %v9478_v45  ;;  %v9504_v9 = vmul.f32 %v13615_v33, %v16014_v3 }
 0xe4a   :  { %v13619_v61 = vpop.eup %13618  ;;  %v9501_v59 = vmul.f32 %v13617_v31, %v15997_v0 }
 0xe4b   :  { %v9460_v28 = vpop.xlane.xlu0 %9459  ;;  %13630 = vrsqrt.f32 %v9480_v60  ;;  %v9503_v29 = vmul.f32 %v13619_v61, %v16007_v25 }
 0xe4c   :  { %v9479_v12 = vmax.f32 %v9460_v28, 1e-24  ;;  %v9466_v17 = vpop.xlane.xlu1 %9465  ;;  %13632 = vrsqrt.f32 %v9477_v47  ;;  %v9612_v49 = vpack.c.bf16 %v9502_v62, %v9501_v59 }
 0xe4d   :  { %v9482_v32 = vmax.f32 %v9466_v17, 1e-24  ;;  %v9613_v34 = vpack.c.bf16 %v9504_v9, %v9503_v29 }
 0xe4e   :  { %13634 = vrsqrt.f32 %v9479_v12 }
 0xe4f   :  { %v9464_v44 = vpop.xlane.xlu0 %9463  ;;  %13636 = vrsqrt.f32 %v9482_v32 }
 0xe50   :  { %13279 = vmatpush3.bf16.xpose.msra.mxu0 %v9621_v43  ;;  %v9481_v37 = vmax.f32 %v9464_v44, 1e-24 }
 0xe51   :  { %13280 = vmatprep.subr.bf16.mxu0 %v9620_v20 }
 0xe52   :  { %v13621_v48 = vpop.eup %13620  ;;  %13638 = vrsqrt.f32 %v9481_v37 }
 0xe53   :  { %v13623_v24 = vpop.eup %13622  ;;  %v9506_v3 = vmul.f32 %v13621_v48, %v16028_v14 }
 0xe54   :  { %v13625_v27 = vpop.eup %13624  ;;  %v9508_v0 = vmul.f32 %v13623_v24, %v16038_v22 }
 0xe55   :  { %v13627_v30 = vpop.eup %13626  ;;  %v9505_v52 = vmul.f32 %v13625_v27, %v16023_v36 }
 0xe56   :  { %v9507_v25 = vmul.f32 %v13627_v30, %v16033_v42  ;;  %v13629_v43 = vpop.eup %13628 }
 0xe57   :  { %v9614_v51 = vpack.c.bf16 %v9506_v3, %v9505_v52  ;;  %v9510_v15 = vmul.f32 %v13629_v43, %v16048_v38 }
 0xe58   :  { %13281 = vmatpush3.bf16.xpose.msra.mxu0 %v9620_v20  ;;  %v9615_v39 = vpack.c.bf16 %v9508_v0, %v9507_v25  ;;  %v13631_v16 = vpop.eup %13630 }
 0xe59   :  { %13282 = vmatprep.subr.bf16.mxu0 %v9619_v56  ;;  %v13633_v1 = vpop.eup %13632  ;;  %v9512_v19 = vmul.f32 %v13631_v16, %v16057_v55 }
 0xe5a   :  { %v9509_v14 = vmul.f32 %v13633_v1, %v16043_v18 }
 0xe5b   :  { %v13635_v26 = vpop.eup %13634 }
 0xe5c   :  { %v9511_v22 = vmul.f32 %v13635_v26, %v16053_v11  ;;  %v9616_v13 = vpack.c.bf16 %v9510_v15, %v9509_v14  ;;  %v13637_v36 = vpop.eup %13636 }
 0xe5d   :  { %v9514_v58 = vmul.f32 %v13637_v36, %v16067_v8 }
 0xe5e   :  { %v9617_v2 = vpack.c.bf16 %v9512_v19, %v9511_v22 }
 0xe5f   :  { %v13639_v42 = vpop.eup %13638 }
 0xe60   :  { %13283 = vmatpush3.bf16.xpose.msra.mxu0 %v9619_v56  ;;  %v9513_v23 = vmul.f32 %v13639_v42, %v16062_v53 }
 0xe62   :  { %v9618_v20 = vpack.c.bf16 %v9514_v58, %v9513_v23 }
 0xe67   :  { %13285 = vmatmul.mubr.bf16.vlgmr.msra.gmra.mxu0 %v9612_v49 }
 0xe68   :  { %13288 = vmatprep.mubr.bf16.mxu0 %v9613_v34 }
 0xe6f   :  { %13289 = vmatmul.mubr.bf16.gmra.mxu0 %v9614_v51 }
 0xe70   :  { %13292 = vmatprep.mubr.bf16.mxu0 %v9615_v39 }
 0xe77   :  { %13293 = vmatmul.mubr.bf16.gmra.mxu0 %v9616_v13 }
 0xe78   :  { %13296 = vmatprep.mubr.bf16.mxu0 %v9617_v2 }
 0xe7f   :  { %13297 = vmatmul.mubr.bf16.gmra.mxu0 %v9618_v20 }
 0xf27   :  { %v13286_v35 = vpop.f32.mrf.mxu0 }
 0xf28   :  { %v10166_v38 = vmul.f32 -1.442695, %v13286_v35  ;;  %v9838_v7 = vmax.f32 %v13286_v35, 0.0 }
 0xf29   :  { %v9661_v55 = vpop.f32.mrf.mxu0 }
 0xf2a   :  { %13640 = vpow2.f32 %v10166_v38  ;;  %9854 = vst [vmem:[#allocation28 + $0x10] sm:$0xff] %v9838_v7  ;;  %v10164_v18 = vmul.f32 -1.442695, %v9661_v55  ;;  %v9836_v11 = vmax.f32 %v9661_v55, 0.0 }
 0xf2b   :  { %v13287_v10 = vpop.f32.mrf.mxu0 }
 0xf2c   :  { %13642 = vpow2.f32 %v10164_v18  ;;  %9852 = vst [vmem:[#allocation28] sm:$0xff] %v9836_v11  ;;  %v10167_v6 = vmul.f32 -1.442695, %v13287_v10  ;;  %v9839_v57 = vmax.f32 %v13287_v10, 0.0 }
 0xf2d   :  { %v9664_v63 = vpop.f32.mrf.mxu0 }
 0xf2e   :  { %13644 = vpow2.f32 %v10167_v6  ;;  %9855 = vst [vmem:[#allocation28 + $0x18] sm:$0xff] %v9839_v57  ;;  %v10165_v8 = vmul.f32 -1.442695, %v9664_v63  ;;  %v9837_v53 = vmax.f32 %v9664_v63, 0.0 }
 0xf2f   :  { %v13290_v21 = vpop.f32.mrf.mxu0 }
 0xf30   :  { %13646 = vpow2.f32 %v10165_v8  ;;  %9853 = vst [vmem:[#allocation28 + $0x8] sm:$0xff] %v9837_v53  ;;  %v10170_v5 = vmul.f32 -1.442695, %v13290_v21  ;;  %v9842_v46 = vmax.f32 %v13290_v21, 0.0 }
 0xf31   :  { %v9677_v4 = vpop.f32.mrf.mxu0 }
 0xf32   :  { %13648 = vpow2.f32 %v10170_v5  ;;  %9858 = vst [vmem:[#allocation28 + $0x30] sm:$0xff] %v9842_v46  ;;  %v10168_v50 = vmul.f32 -1.442695, %v9677_v4  ;;  %v9840_v56 = vmax.f32 %v9677_v4, 0.0 }
 0xf33   :  { %v13291_v40 = vpop.f32.mrf.mxu0 }
 0xf34   :  { %13650 = vpow2.f32 %v10168_v50  ;;  %9856 = vst [vmem:[#allocation28 + $0x20] sm:$0xff] %v9840_v56  ;;  %v10171_v41 = vmul.f32 -1.442695, %v13291_v40  ;;  %v9843_v45 = vmax.f32 %v13291_v40, 0.0 }
 0xf35   :  { %v9680_v28 = vpop.f32.mrf.mxu0 }
 0xf36   :  { %13652 = vpow2.f32 %v10171_v41  ;;  %9859 = vst [vmem:[#allocation28 + $0x38] sm:$0xff] %v9843_v45  ;;  %v10169_v54 = vmul.f32 -1.442695, %v9680_v28  ;;  %v9841_v60 = vmax.f32 %v9680_v28, 0.0 }
 0xf37   :  { %v13641_v33 = vpop.eup %13640  ;;  %v13294_v47 = vpop.f32.mrf.mxu0 }
 0xf38   :  { %v9774_v31 = vadd.f32 1.0, %v13641_v33  ;;  %13654 = vpow2.f32 %v10169_v54  ;;  %9857 = vst [vmem:[#allocation28 + $0x28] sm:$0xff] %v9841_v60  ;;  %v10174_v12 = vmul.f32 -1.442695, %v13294_v47  ;;  %v9846_v61 = vmax.f32 %v13294_v47, 0.0 }
 0xf39   :  { %v13643_v62 = vpop.eup %13642  ;;  %v9693_v17 = vpop.f32.mrf.mxu0 }
 0xf3a   :  { %13656 = vrcp.f32 %v9774_v31  ;;  %v9772_v9 = vadd.f32 1.0, %v13643_v62  ;;  %9862 = vst [vmem:[#allocation28 + $0x50] sm:$0xff] %v9846_v61  ;;  %v10172_v59 = vmul.f32 -1.442695, %v9693_v17  ;;  %v9844_v44 = vmax.f32 %v9693_v17, 0.0 }
 0xf3b   :  { %v13645_v29 = vpop.eup %13644  ;;  %13658 = vpow2.f32 %v10174_v12  ;;  %v13295_v49 = vpop.f32.mrf.mxu0 }
 0xf3c   :  { %13660 = vrcp.f32 %v9772_v9  ;;  %v9775_v32 = vadd.f32 1.0, %v13645_v29  ;;  %9860 = vst [vmem:[#allocation28 + $0x40] sm:$0xff] %v9844_v44  ;;  %v10175_v48 = vmul.f32 -1.442695, %v13295_v49  ;;  %v9847_v34 = vmax.f32 %v13295_v49, 0.0 }
 0xf3d   :  { %v13647_v24 = vpop.eup %13646  ;;  %13662 = vpow2.f32 %v10172_v59  ;;  %v9696_v37 = vpop.f32.mrf.mxu0 }
 0xf3e   :  { %13664 = vrcp.f32 %v9775_v32  ;;  %v9773_v27 = vadd.f32 1.0, %v13647_v24  ;;  %9863 = vst [vmem:[#allocation28 + $0x58] sm:$0xff] %v9847_v34  ;;  %v10173_v30 = vmul.f32 -1.442695, %v9696_v37  ;;  %v9845_v3 = vmax.f32 %v9696_v37, 0.0 }
 0xf3f   :  { %v13649_v0 = vpop.eup %13648  ;;  %13666 = vpow2.f32 %v10175_v48  ;;  %v13298_v52 = vpop.f32.mrf.mxu0 }
 0xf40   :  { %13668 = vrcp.f32 %v9773_v27  ;;  %v9778_v25 = vadd.f32 1.0, %v13649_v0  ;;  %9861 = vst [vmem:[#allocation28 + $0x48] sm:$0xff] %v9845_v3  ;;  %v10178_v51 = vmul.f32 -1.442695, %v13298_v52  ;;  %v9850_v43 = vmax.f32 %v13298_v52, 0.0 }
 0xf41   :  { %v13651_v39 = vpop.eup %13650  ;;  %13670 = vpow2.f32 %v10173_v30  ;;  %v9709_v16 = vpop.f32.mrf.mxu0 }
 0xf42   :  { %13672 = vrcp.f32 %v9778_v25  ;;  %v9776_v1 = vadd.f32 1.0, %v13651_v39  ;;  %9866 = vst [vmem:[#allocation28 + $0x70] sm:$0xff] %v9850_v43  ;;  %v10176_v26 = vmul.f32 -1.442695, %v9709_v16  ;;  %v9848_v15 = vmax.f32 %v9709_v16, 0.0 }
 0xf43   :  { %v13653_v19 = vpop.eup %13652  ;;  %13674 = vpow2.f32 %v10178_v51  ;;  %v13299_v14 = vpop.f32.mrf.mxu0 }
 0xf44   :  { %13676 = vrcp.f32 %v9776_v1  ;;  %v9779_v22 = vadd.f32 1.0, %v13653_v19  ;;  %9864 = vst [vmem:[#allocation28 + $0x60] sm:$0xff] %v9848_v15  ;;  %v10179_v13 = vmul.f32 -1.442695, %v13299_v14  ;;  %v9851_v36 = vmax.f32 %v13299_v14, 0.0 }
 0xf45   :  { %v13655_v2 = vpop.eup %13654  ;;  %13678 = vpow2.f32 %v10176_v26  ;;  %v9712_v42 = vpop.f32.mrf.mxu0 }
 0xf46   :  { %13680 = vrcp.f32 %v9779_v22  ;;  %v9777_v58 = vadd.f32 1.0, %v13655_v2  ;;  %9867 = vst [vmem:[#allocation28 + $0x78] sm:$0xff] %v9851_v36  ;;  %v10177_v23 = vmul.f32 -1.442695, %v9712_v42  ;;  %v9849_v20 = vmax.f32 %v9712_v42, 0.0 }
 0xf47   :  { %v13657_v35 = vpop.eup %13656  ;;  %13682 = vpow2.f32 %v10179_v13 }
 0xf48   :  { %v13659_v38 = vpop.eup %13658  ;;  %9822 = vst [vmem:[#allocation27 + $0x10] sm:$0xff] %v13657_v35  ;;  %13684 = vrcp.f32 %v9777_v58  ;;  %9865 = vst [vmem:[#allocation28 + $0x68] sm:$0xff] %v9849_v20 }
 0xf49   :  { %v13661_v7 = vpop.eup %13660  ;;  %v9782_v55 = vadd.f32 1.0, %v13659_v38  ;;  %13686 = vpow2.f32 %v10177_v23 }
 0xf4a   :  { %14295 = shalt.err (!%p14292_p4)
}
 0xf4b   :  { %s14361_s24 = smov 128   ;;  %s14362_s29 = smov 8   ;;  %v13663_v18 = vpop.eup %13662  ;;  %9820 = vst [vmem:[#allocation27] sm:$0xff] %v13661_v7  ;;  %13688 = vrcp.f32 %v9782_v55 }
 0xf4c   :  { %9891 = dma.vmem_to_hbm [thread:$0]  %s9886_s13, 2048, %s16132_s15, [#allocation29], %s14361_s24, %s14361_s24, %s14362_s29   ;;  %v13665_v11 = vpop.eup %13664  ;;  %v9780_v10 = vadd.f32 1.0, %v13663_v18 }
 0xf4d   :  { %v13667_v6 = vpop.eup %13666  ;;  %9823 = vst [vmem:[#allocation27 + $0x18] sm:$0xff] %v13665_v11  ;;  %s14363_s15 = smov [#allocation27]  }
 0xf4e   :  { %v13669_v57 = vpop.eup %13668  ;;  %13690 = vrcp.f32 %v9780_v10  ;;  %v9783_v63 = vadd.f32 1.0, %v13667_v6  ;;  %s9873_s7 = sshll.u32 %s14363_s15, 4  ;;  %s9874_s7 = int_to_ptr.vmem [resolvable:$true] %s9873_s7 }
 0xf4f   :  { %v13671_v8 = vpop.eup %13670  ;;  %9821 = vst [vmem:[#allocation27 + $0x8] sm:$0xff] %v13669_v57  ;;  %s14304_s16 = scalar_lea.vmem %s9874_s7, 2048  ;;  %p14309_p6 = scmp.lt.s32.totalorder %s9874_s7, %s9874_s7 }
 0xf50   :  { %v13673_v53 = vpop.eup %13672  ;;  %13692 = vrcp.f32 %v9783_v63  ;;  %v9781_v21 = vadd.f32 1.0, %v13671_v8  ;;  %p14305_p5 = scmp.ne.s32.totalorder %s9874_s7, %s14304_s16  ;;  %p14310_p7 = scmp.lt.s32.totalorder %s14304_s16, %s14304_s16 }
 0xf51   :  { %v13675_v5 = vpop.eup %13674  ;;  %9826 = vst [vmem:[#allocation27 + $0x30] sm:$0xff] %v13673_v53 }
 0xf52   :  { %v13677_v46 = vpop.eup %13676  ;;  %13694 = vrcp.f32 %v9781_v21  ;;  %v9786_v4 = vadd.f32 1.0, %v13675_v5  ;;  %p14311_p8 = por %p14310_p7, %p14309_p6 }
 0xf53   :  { %v13679_v50 = vpop.eup %13678  ;;  %9824 = vst [vmem:[#allocation27 + $0x20] sm:$0xff] %v13677_v46 }
 0xf54   :  { %v13681_v56 = vpop.eup %13680  ;;  %13696 = vrcp.f32 %v9786_v4  ;;  %v9784_v40 = vadd.f32 1.0, %v13679_v50  ;;  %p14312_p9 = pnand %p14311_p8, %p14305_p5 }
 0xf55   :  { %v13683_v41 = vpop.eup %13682  ;;  %9827 = vst [vmem:[#allocation27 + $0x38] sm:$0xff] %v13681_v56 }
 0xf56   :  { %v13685_v45 = vpop.eup %13684  ;;  %13698 = vrcp.f32 %v9784_v40  ;;  %v9787_v28 = vadd.f32 1.0, %v13683_v41 }
 0xf57   :  { %v13687_v54 = vpop.eup %13686  ;;  %9825 = vst [vmem:[#allocation27 + $0x28] sm:$0xff] %v13685_v45 }
 0xf58   :  { %13700 = vrcp.f32 %v9787_v28  ;;  %v9785_v60 = vadd.f32 1.0, %v13687_v54  ;;  %v13689_v33 = vpop.eup %13688 }
 0xf59   :  { %9830 = vst [vmem:[#allocation27 + $0x50] sm:$0xff] %v13689_v33 }
 0xf5a   :  { %13702 = vrcp.f32 %v9785_v60 }
 0xf5b   :  { %v13691_v47 = vpop.eup %13690 }
 0xf5c   :  { %9828 = vst [vmem:[#allocation27 + $0x40] sm:$0xff] %v13691_v47 }
 0xf5d   :  { %v13693_v31 = vpop.eup %13692 }
 0xf5e   :  { %9831 = vst [vmem:[#allocation27 + $0x58] sm:$0xff] %v13693_v31 }
 0xf5f   :  { %v13695_v12 = vpop.eup %13694 }
 0xf60   :  { %9829 = vst [vmem:[#allocation27 + $0x48] sm:$0xff] %v13695_v12 }
 0xf61   :  { %v13697_v61 = vpop.eup %13696 }
 0xf62   :  { %9834 = vst [vmem:[#allocation27 + $0x70] sm:$0xff] %v13697_v61 }
 0xf63   :  { %v13699_v62 = vpop.eup %13698 }
 0xf64   :  { %9832 = vst [vmem:[#allocation27 + $0x60] sm:$0xff] %v13699_v62 }
 0xf65   :  { %v13701_v17 = vpop.eup %13700 }
 0xf66   :  { %9835 = vst [vmem:[#allocation27 + $0x78] sm:$0xff] %v13701_v17 }
 0xf67   :  { %v13703_v9 = vpop.eup %13702 }
 0xf68   :  { %9833 = vst [vmem:[#allocation27 + $0x68] sm:$0xff] %v13703_v9 }
 0xf69   :  { %14315 = shalt.err (!%p14312_p9)
}
 0xf6a   :  { %9879 = dma.vmem_to_hbm [thread:$0]  %s9874_s7, 2048, %s16131_s14, [#allocation6], %s14361_s24, %s14361_s24, %s14362_s29  }
 0xf6b   :  { %14340 = dma.done.wait [#allocation6], 2048  }
 0xf6c   :  { %14341 = vsyncadd [#allocation6], 4294965248 }
 0xf6d   :  { %14342 = dma.done.wait [#allocation29], 2048  }
 0xf6e   :  { %14343 = vsyncadd [#allocation29], 4294965248 }
 0xf6f   :  { %9898 = vsyncpa [#allocation5], 1 }
 0xf70   :  { %9899 = vsyncpa [#allocation8], 1 }
 0xf71   :  { %9900 = vsyncpa [#allocation11], 1 }
 0xf72   :  { %9901 = vsyncpa [#allocation14], 1 }
 0xf73   :  { %9902 = vsyncpa [#allocation17], 1 }
 0xf74   :  { %9903 = vsyncpa [#allocation20], 1 }
 0xf75   :  { %9904 = vsyncpa [#allocation23], 1 }
 0xf76   :  { %9905 = vsyncpa [#allocation26], 1 }
 0xf77   :  { %9906 = vsyncpa [#allocation6], 1 }
 0xf78   :  { %9907 = vsyncpa [#allocation29], 1 }

</bundles_post_ra>
